<compile_context>
chip_gen: v7x
topology: tpu7x:2x2x1
jax: 0.10.0
libtpu: 0.0.40
codegen_flags: <defaults>
</compile_context>

<pallas_src>
import jax
import jax.numpy as jnp
from jax import lax
from jax.experimental import pallas as pl
from jax.experimental.pallas import tpu as pltpu

NEG_SLOPE = 0.01
BN_EPS = 1e-5
MAX_TILE_B = 16          # per-branch samples per grid step (multiple of 8)


def _round_up(x, m):
    return ((x + m - 1) // m) * m


# ---------------------------------------------------------------------------
# Fused Pallas kernel: one grid step = both branches of a tile of samples.
#   conv2d -> leaky -> BN -> maxpool(1,2) -> conv1d -> leaky -> BN -> maxpool(4,2)
#   -> fc1 (3 Linear) -> L1 distance -> Linear(1,1) -> Sigmoid
# ---------------------------------------------------------------------------
def _fused_forward_kernel(
    patches_ref,                          # (16, 120*Nt) f32   lane-dense im2col (15 taps + pad)
    w2d_ref, b2d_ref, s2d_ref, t2d_ref,   # (16,256) f32, (1,256) f32 x3
    w1d_ref, b1d_ref, s1d_ref, t1d_ref,   # (2048,128) bf16, (1,128) f32 x3
    wa_ref, ba_ref,                       # (768,512) bf16, (1,512) f32
    wb_ref, bb_ref,                       # (512,256) bf16, (1,256) f32
    wc_ref, bc_ref,                       # (256,128) bf16, (1,128) f32
    wf2_ref, bf2_ref,                     # (1,1) f32, (1,1) f32
    out_ref,                              # (Bt, 1) f32
):
    nt = patches_ref.shape[1] // 120      # combined rows in this tile (= 2 * Bt)
    bt = nt // 2

    def leaky(v):
        return jnp.where(v >= 0.0, v, NEG_SLOPE * v)

    # --- cnn1: Conv2d(1,256,(3,5),stride=(1,3)) as a K=16 contraction on the lhs'
    # leading (tap) dim so the big batch*width axis stays lane-dense.
    h = lax.dot_general(patches_ref[...], w2d_ref[...],
                        dimension_numbers=(((0,), (0,)), ((), ())),
                        preferred_element_type=jnp.float32)        # (120*nt, 256)
    # LeakyReLU then exact eval-mode BatchNorm (scale applied AFTER the activation,
    # so no positivity assumption on gamma / the BN scale is needed).
    h = leaky(h + b2d_ref[...]) * s2d_ref[...] + t2d_ref[...]

    # --- MaxPool2d((1,2), stride (1,2)): 120 width positions -> 60.
    # Whole-(nt,256)-slab leading-dim regroup (nt is a multiple of 8): no relayout.
    h4 = h.reshape(60, 2, nt, 256)
    hm = jnp.maximum(h4[:, 0], h4[:, 1])                           # (60, nt, 256)

    # --- cnn2: Conv1d(256,128,8,stride=4) as 8 accumulated per-tap K=256 matmuls
    # (no in-VMEM im2col / lane concatenation).  Cast once at the matmul boundary.
    hg = hm.astype(jnp.bfloat16).reshape(15, 4, nt, 256)           # spatial row 4a+r -> hg[a,r]
    g1 = None
    for tap in range(8):                                           # window t uses row 4t+tap
        g, r = tap // 4, tap % 4                                   #   = hg[t+g, r]
        lhs = hg[g:g + 14, r].reshape(14 * nt, 256)
        part = jnp.dot(lhs, w1d_ref[pl.ds(256 * tap, 256), :],
                       preferred_element_type=jnp.float32)
        g1 = part if g1 is None else g1 + part
    g1 = leaky(g1 + b1d_ref[...]) * s1d_ref[...] + t1d_ref[...]    # (14*nt, 128)
    g1 = g1.reshape(14, nt, 128)

    # --- MaxPool1d(4, stride 2): 14 -> 6, fc1a accumulated over the 6 positions
    # (channel-major flatten handled by the row-permuted weight; no 768-lane concat).
    y = None
    for l in range(6):
        win = g1[2 * l:2 * l + 4]                                  # (4, nt, 128)
        pooled = jnp.maximum(jnp.maximum(win[0], win[1]),
                             jnp.maximum(win[2], win[3]))          # (nt, 128) f32
        part = jnp.dot(pooled.astype(jnp.bfloat16),
                       wa_ref[pl.ds(128 * l, 128), :],
                       preferred_element_type=jnp.float32)
        y = part if y is None else y + part
    y = leaky(y + ba_ref[...])                                     # (nt, 512)

    # --- fc1b / fc1c (Dropout = identity at inference).
    y = leaky(jnp.dot(y.astype(jnp.bfloat16), wb_ref[...],
                      preferred_element_type=jnp.float32) + bb_ref[...])
    y = jnp.dot(y.astype(jnp.bfloat16), wc_ref[...],
                preferred_element_type=jnp.float32) + bc_ref[...]  # (nt, 128)

    # --- epilogue: L1 distance between the tile's two branches + Linear(1,1) + Sigmoid.
    yr = y.reshape(2, bt, 128)
    d = jnp.sum(jnp.abs(yr[0] - yr[1]), axis=-1, keepdims=True)    # (bt, 1)
    out_ref[...] = jax.nn.sigmoid(d * wf2_ref[...] + bf2_ref[...])


def _fused_call(prep, patches, num_tiles, bt):
    nt = 2 * bt
    weight_args = (
        prep["w2d"], prep["b2d"], prep["s2d"], prep["t2d"],
        prep["w1d"], prep["b1d"], prep["s1d"], prep["t1d"],
        prep["w_fc1a"], prep["b_fc1a"],
        prep["w_fc1b"], prep["b_fc1b"],
        prep["w_fc1c"], prep["b_fc1c"],
        prep["w_fc2"], prep["b_fc2"],
    )

    def resident(a):
        # Full-array block with a constant index_map: fetched once, stays VMEM-resident
        # across the batch grid.
        return pl.BlockSpec(a.shape, lambda *_: (0,) * a.ndim)

    in_specs = [pl.BlockSpec((None, 16, 120 * nt), lambda i: (i, 0, 0))]
    in_specs += [resident(a) for a in weight_args]

    return pl.pallas_call(
        _fused_forward_kernel,
        out_shape=jax.ShapeDtypeStruct((num_tiles * bt, 1), jnp.float32),
        grid=(num_tiles,),
        in_specs=in_specs,
        out_specs=pl.BlockSpec((bt, 1), lambda i: (i, 0)),
        compiler_params=pltpu.CompilerParams(
            dimension_semantics=("parallel",),          # tiles are independent (megacore on v7x)
            vmem_limit_bytes=32 * 1024 * 1024,          # bounded per-step footprint; v7x-safe
        ),
    )(patches, *weight_args)


# ---------------------------------------------------------------------------
# Parameters (deterministic, PyTorch-style uniform(-1/sqrt(fan_in), 1/sqrt(fan_in)))
# ---------------------------------------------------------------------------
def init_params(key):
    ks = jax.random.split(key, 12)

    def u(k, shape, fan_in):
        bound = 1.0 / jnp.sqrt(jnp.float32(fan_in))
        return jax.random.uniform(k, shape, jnp.float32, -bound, bound)

    p = {}
    # cnn1: Conv2d(1, 256, (3,5), stride=(1,3)) + BatchNorm2d(256)
    p["w_c2d"] = u(ks[0], (256, 1, 3, 5), 1 * 3 * 5)
    p["b_c2d"] = u(ks[1], (256,), 1 * 3 * 5)
    p["g_bn2d"] = jnp.ones((256,), jnp.float32)
    p["be_bn2d"] = jnp.zeros((256,), jnp.float32)
    p["rm_bn2d"] = jnp.zeros((256,), jnp.float32)
    p["rv_bn2d"] = jnp.ones((256,), jnp.float32)
    # cnn2: Conv1d(256, 128, 8, stride=4) + BatchNorm1d(128)
    p["w_c1d"] = u(ks[2], (128, 256, 8), 256 * 8)
    p["b_c1d"] = u(ks[3], (128,), 256 * 8)
    p["g_bn1d"] = jnp.ones((128,), jnp.float32)
    p["be_bn1d"] = jnp.zeros((128,), jnp.float32)
    p["rm_bn1d"] = jnp.zeros((128,), jnp.float32)
    p["rv_bn1d"] = jnp.ones((128,), jnp.float32)
    # fc1: 768 -> 512 -> 256 -> 128
    p["w_fc1a"] = u(ks[4], (512, 768), 768)
    p["b_fc1a"] = u(ks[5], (512,), 768)
    p["w_fc1b"] = u(ks[6], (256, 512), 512)
    p["b_fc1b"] = u(ks[7], (256,), 512)
    p["w_fc1c"] = u(ks[8], (128, 256), 256)
    p["b_fc1c"] = u(ks[9], (128,), 256)
    # fc2: Linear(1, 1)
    p["w_fc2"] = u(ks[10], (1, 1), 1)
    p["b_fc2"] = u(ks[11], (1,), 1)
    return p


def prepare_params(p):
    """One-time layout prep (outside the jit hot path).

    Large weights are pre-transposed / row-permuted to the in-kernel feature ordering
    and cast to bf16 (matmul operands).  Conv biases and BatchNorm scale+shift stay f32
    and are applied exactly in-kernel AFTER the activation, so no positivity assumption
    on the BN scale is needed (valid for arbitrary trained gamma/var)."""
    s2 = p["g_bn2d"] / jnp.sqrt(p["rv_bn2d"] + BN_EPS)
    t2 = p["be_bn2d"] - s2 * p["rm_bn2d"]
    s1 = p["g_bn1d"] / jnp.sqrt(p["rv_bn1d"] + BN_EPS)
    t1 = p["be_bn1d"] - s1 * p["rm_bn1d"]

    bf = jnp.bfloat16
    prep = {}
    # Conv2d (256,1,3,5) -> (15,256), taps ordered kh*5+kw, zero-padded to K=16.
    # Kept f32 (tiny; matches the f32 lane-dense patches operand).
    prep["w2d"] = jnp.pad(p["w_c2d"].reshape(256, 15).T, ((0, 1), (0, 0)))
    prep["b2d"] = p["b_c2d"].reshape(1, 256)
    prep["s2d"] = s2.reshape(1, 256)
    prep["t2d"] = t2.reshape(1, 256)
    # Conv1d (128,256,8) -> (2048,128) with K ordered tap*256 + ic (bf16 matmul operand).
    prep["w1d"] = jnp.transpose(p["w_c1d"], (2, 1, 0)).reshape(2048, 128).astype(bf)
    prep["b1d"] = p["b_c1d"].reshape(1, 128)
    prep["s1d"] = s1.reshape(1, 128)
    prep["t1d"] = t1.reshape(1, 128)
    # fc1a: rows permuted from PyTorch flatten order (oc*6 + l) to in-kernel (l*128 + oc).
    prep["w_fc1a"] = jnp.transpose(p["w_fc1a"].T.reshape(128, 6, 512),
                                   (1, 0, 2)).reshape(768, 512).astype(bf)
    prep["b_fc1a"] = p["b_fc1a"].reshape(1, 512)
    prep["w_fc1b"] = p["w_fc1b"].T.astype(bf)
    prep["b_fc1b"] = p["b_fc1b"].reshape(1, 256)
    prep["w_fc1c"] = p["w_fc1c"].T.astype(bf)
    prep["b_fc1c"] = p["b_fc1c"].reshape(1, 128)
    prep["w_fc2"] = p["w_fc2"].reshape(1, 1)
    prep["b_fc2"] = p["b_fc2"].reshape(1, 1)
    return prep


# ---------------------------------------------------------------------------
# Forward pass: tiny XLA glue (branch pairing, conv2d im2col) + one fused kernel
# ---------------------------------------------------------------------------
@jax.jit
def siamese_forward(prep, x1, x2):
    B = x1.shape[0]
    assert x1.shape[1:] == (1, 3, 362) and x2.shape == x1.shape, \
        "module geometry forces (B, 1, 3, 362) NCHW input"
    bt = min(_round_up(B, 8), MAX_TILE_B)     # per-branch samples per grid step
    bp = _round_up(B, bt)                     # padded per-branch batch
    num_tiles = bp // bt
    nt = 2 * bt                               # combined rows per tile (both branches)

    # Sample-major tile pairing: tile t holds branch-0 samples [t*bt,(t+1)*bt) followed
    # by the same samples of branch 1, so the L1+fc2 epilogue pairs them in one grid step.
    xb = jnp.stack([x1, x2], axis=0)[:, :, 0]                        # (2, B, 3, 362)
    xb = jnp.pad(xb, ((0, 0), (0, bp - B), (0, 0), (0, 0)))
    xb = jnp.transpose(xb.reshape(2, num_tiles, bt, 3, 362),
                       (1, 0, 2, 3, 4)).reshape(num_tiles, nt, 3, 362)

    # conv2d im2col (tiny XLA fusion on the raw input; a stride-3 lane gather is not
    # cleanly expressible in-kernel).  Per tile the columns are ordered j-major, n-minor
    # so every in-kernel regroup is a whole-slab leading-dim reshape; taps ordered
    # kh*5+kw and zero-padded 15 -> 16 so the lane-dense contraction dim is aligned.
    cols = [xb[:, :, kh, kw:kw + 3 * 120:3] for kh in range(3) for kw in range(5)]
    patches = jnp.transpose(jnp.stack(cols, axis=1), (0, 1, 3, 2))   # (T, 15, 120, nt)
    patches = jnp.pad(patches, ((0, 0), (0, 1), (0, 0), (0, 0)))
    patches = patches.reshape(num_tiles, 16, 120 * nt)               # lane-dense operand

    out = _fused_call(prep, patches, num_tiles, bt)                  # (bp, 1)
    return out[:B]


# ---------------------------------------------------------------------------
# Pure-JAX (XLA) reference of the PyTorch module, eval mode — used for validation.
# ---------------------------------------------------------------------------
def reference_forward(p, x1, x2):
    def leaky(v):
        return jnp.where(v >= 0.0, v, NEG_SLOPE * v)

    def bn(v, g, b, rm, rv):
        shape = (1, -1) + (1,) * (v.ndim - 2)
        return (v - rm.reshape(shape)) / jnp.sqrt(rv.reshape(shape) + BN_EPS) * g.reshape(shape) \
            + b.reshape(shape)

    hp = lax.Precision.HIGHEST

    def once(x):
        y = lax.conv_general_dilated(x, p["w_c2d"], (1, 3), "VALID",
                                     dimension_numbers=("NCHW", "OIHW", "NCHW"), precision=hp)
        y = leaky(y + p["b_c2d"].reshape(1, -1, 1, 1))
        y = bn(y, p["g_bn2d"], p["be_bn2d"], p["rm_bn2d"], p["rv_bn2d"])
        y = lax.reduce_window(y, -jnp.inf, lax.max, (1, 1, 1, 2), (1, 1, 1, 2), "VALID")
        y = y[:, :, 0, :]                                            # squeeze(2): (B, 256, 60)
        y = lax.conv_general_dilated(y[:, :, None, :], p["w_c1d"][:, :, None, :], (1, 4), "VALID",
                                     dimension_numbers=("NCHW", "OIHW", "NCHW"),
                                     precision=hp)[:, :, 0, :]
        y = leaky(y + p["b_c1d"].reshape(1, -1, 1))
        y = bn(y, p["g_bn1d"], p["be_bn1d"], p["rm_bn1d"], p["rv_bn1d"])
        y = lax.reduce_window(y, -jnp.inf, lax.max, (1, 1, 4), (1, 1, 2), "VALID")   # (B, 128, 6)
        y = y.reshape(y.shape[0], -1)                                # channel-major flatten -> 768
        y = leaky(jnp.dot(y, p["w_fc1a"].T, precision=hp) + p["b_fc1a"])
        y = leaky(jnp.dot(y, p["w_fc1b"].T, precision=hp) + p["b_fc1b"])
        return jnp.dot(y, p["w_fc1c"].T, precision=hp) + p["b_fc1c"]

    y1, y2 = once(x1), once(x2)
    d = jnp.sum(jnp.abs(y1 - y2), axis=-1, keepdims=True)
    return jax.nn.sigmoid(d * p["w_fc2"].reshape(1, 1) + p["b_fc2"])


if __name__ == "__main__":
    key = jax.random.PRNGKey(0)
    kp, k1, k2 = jax.random.split(key, 3)
    params = init_params(kp)
    prep = prepare_params(params)      # one-time weight layout prep (outside jit)

    # Input geometry forced by the module: H=3 (Conv2d(3,5) + squeeze(2) -> H=1),
    # W=362 so fc1 sees exactly 128 channels * 6 positions = 768 features.
    B = 2
    x1 = jax.random.normal(k1, (B, 1, 3, 362), jnp.float32)
    x2 = jax.random.normal(k2, (B, 1, 3, 362), jnp.float32)

    out = siamese_forward(prep, x1, x2)
    jax.block_until_ready(out)
    assert out.shape == (B, 1)
    assert bool(jnp.all(jnp.isfinite(out)))

    # bf16 matmul operands (f32 accumulation) vs. a Precision.HIGHEST f32 reference:
    # bf16-class inference accuracy is expected, hence the looser tolerance.
    ref = reference_forward(params, x1, x2)
    assert bool(jnp.allclose(out, ref, rtol=5e-2, atol=5e-3)), (out, ref)
    print("KERNEL_OK")
</pallas_src>

<mosaic_0001>
module attributes {stable_mosaic.version = 11 : i64} {
  func.func @_fused_forward_kernel(%arg0: i32, %arg1: memref<1x16x1920xf32, #tpu.memory_space<vmem>>, %arg2: memref<16x256xf32, #tpu.memory_space<vmem>>, %arg3: memref<1x256xf32, #tpu.memory_space<vmem>>, %arg4: memref<1x256xf32, #tpu.memory_space<vmem>>, %arg5: memref<1x256xf32, #tpu.memory_space<vmem>>, %arg6: memref<2048x128xbf16, #tpu.memory_space<vmem>>, %arg7: memref<1x128xf32, #tpu.memory_space<vmem>>, %arg8: memref<1x128xf32, #tpu.memory_space<vmem>>, %arg9: memref<1x128xf32, #tpu.memory_space<vmem>>, %arg10: memref<768x512xbf16, #tpu.memory_space<vmem>>, %arg11: memref<1x512xf32, #tpu.memory_space<vmem>>, %arg12: memref<512x256xbf16, #tpu.memory_space<vmem>>, %arg13: memref<1x256xf32, #tpu.memory_space<vmem>>, %arg14: memref<256x128xbf16, #tpu.memory_space<vmem>>, %arg15: memref<1x128xf32, #tpu.memory_space<vmem>>, %arg16: memref<1x1xf32, #tpu.memory_space<vmem>>, %arg17: memref<1x1xf32, #tpu.memory_space<vmem>>, %arg18: memref<8x1xf32, #tpu.memory_space<vmem>>) attributes {dimension_semantics = [#tpu.dimension_semantics<parallel>], iteration_bounds = array<i64: 1>, scalar_prefetch = 0 : i64, scratch_operands = 0 : i64, tpu.core_type = #tpu.core_type<tc>, window_params = [{transform_indices = @transform_0, window_bounds = array<i64: 1, 16, 1920>}, {pipeline_mode = #tpu.pipeline_mode<synchronous>, transform_indices = @transform_1, window_bounds = array<i64: 16, 256>}, {pipeline_mode = #tpu.pipeline_mode<synchronous>, transform_indices = @transform_2, window_bounds = array<i64: 1, 256>}, {pipeline_mode = #tpu.pipeline_mode<synchronous>, transform_indices = @transform_3, window_bounds = array<i64: 1, 256>}, {pipeline_mode = #tpu.pipeline_mode<synchronous>, transform_indices = @transform_4, window_bounds = array<i64: 1, 256>}, {pipeline_mode = #tpu.pipeline_mode<synchronous>, transform_indices = @transform_5, window_bounds = array<i64: 2048, 128>}, {pipeline_mode = #tpu.pipeline_mode<synchronous>, transform_indices = @transform_6, window_bounds = array<i64: 1, 128>}, {pipeline_mode = #tpu.pipeline_mode<synchronous>, transform_indices = @transform_7, window_bounds = array<i64: 1, 128>}, {pipeline_mode = #tpu.pipeline_mode<synchronous>, transform_indices = @transform_8, window_bounds = array<i64: 1, 128>}, {pipeline_mode = #tpu.pipeline_mode<synchronous>, transform_indices = @transform_9, window_bounds = array<i64: 768, 512>}, {pipeline_mode = #tpu.pipeline_mode<synchronous>, transform_indices = @transform_10, window_bounds = array<i64: 1, 512>}, {pipeline_mode = #tpu.pipeline_mode<synchronous>, transform_indices = @transform_11, window_bounds = array<i64: 512, 256>}, {pipeline_mode = #tpu.pipeline_mode<synchronous>, transform_indices = @transform_12, window_bounds = array<i64: 1, 256>}, {pipeline_mode = #tpu.pipeline_mode<synchronous>, transform_indices = @transform_13, window_bounds = array<i64: 256, 128>}, {pipeline_mode = #tpu.pipeline_mode<synchronous>, transform_indices = @transform_14, window_bounds = array<i64: 1, 128>}, {pipeline_mode = #tpu.pipeline_mode<synchronous>, transform_indices = @transform_15, window_bounds = array<i64: 1, 1>}, {pipeline_mode = #tpu.pipeline_mode<synchronous>, transform_indices = @transform_16, window_bounds = array<i64: 1, 1>}, {transform_indices = @transform_17, window_bounds = array<i64: 8, 1>}]} {
    %c0 = arith.constant 0 : index
    %c0_0 = arith.constant 0 : index
    %c0_1 = arith.constant 0 : index
    %0 = vector.load %arg1[%c0, %c0_0, %c0_1] : memref<1x16x1920xf32, #tpu.memory_space<vmem>>, vector<1x16x1920xf32>
    %1 = vector.shape_cast %0 : vector<1x16x1920xf32> to vector<16x1920xf32>
    %c0_2 = arith.constant 0 : index
    %c0_3 = arith.constant 0 : index
    %2 = vector.load %arg2[%c0_2, %c0_3] : memref<16x256xf32, #tpu.memory_space<vmem>>, vector<16x256xf32>
    %cst = arith.constant dense<0.000000e+00> : vector<1920x256xf32>
    %3 = tpu.matmul %1, %2, %cst {dimension_numbers = #tpu.dot_dimension_numbers<[0], [0], [1], [1], [0, 1, 1, 1], [], []>} : vector<16x1920xf32>, vector<16x256xf32>, vector<1920x256xf32> -> vector<1920x256xf32>
    %c0_4 = arith.constant 0 : index
    %c0_5 = arith.constant 0 : index
    %4 = vector.load %arg3[%c0_4, %c0_5] : memref<1x256xf32, #tpu.memory_space<vmem>>, vector<1x256xf32>
    %5 = vector.broadcast %4 : vector<1x256xf32> to vector<1920x256xf32>
    %6 = arith.addf %3, %5 : vector<1920x256xf32>
    %cst_6 = arith.constant 0.000000e+00 : f32
    %7 = vector.broadcast %cst_6 : f32 to vector<1920x256xf32>
    %8 = arith.cmpf oge, %6, %7 : vector<1920x256xf32>
    %cst_7 = arith.constant 0.00999999977 : f32
    %9 = vector.broadcast %cst_7 : f32 to vector<1920x256xf32>
    %10 = arith.mulf %9, %6 : vector<1920x256xf32>
    %11 = arith.select %8, %6, %10 : vector<1920x256xi1>, vector<1920x256xf32>
    %c0_8 = arith.constant 0 : index
    %c0_9 = arith.constant 0 : index
    %12 = vector.load %arg4[%c0_8, %c0_9] : memref<1x256xf32, #tpu.memory_space<vmem>>, vector<1x256xf32>
    %13 = vector.broadcast %12 : vector<1x256xf32> to vector<1920x256xf32>
    %14 = arith.mulf %11, %13 : vector<1920x256xf32>
    %c0_10 = arith.constant 0 : index
    %c0_11 = arith.constant 0 : index
    %15 = vector.load %arg5[%c0_10, %c0_11] : memref<1x256xf32, #tpu.memory_space<vmem>>, vector<1x256xf32>
    %16 = vector.broadcast %15 : vector<1x256xf32> to vector<1920x256xf32>
    %17 = arith.addf %14, %16 : vector<1920x256xf32>
    %18 = vector.shape_cast %17 : vector<1920x256xf32> to vector<60x2x16x256xf32>
    %19 = vector.extract_strided_slice %18 {offsets = [0, 0, 0, 0], sizes = [60, 1, 16, 256], strides = [1, 1, 1, 1]} : vector<60x2x16x256xf32> to vector<60x1x16x256xf32>
    %20 = vector.shape_cast %19 : vector<60x1x16x256xf32> to vector<60x16x256xf32>
    %21 = vector.extract_strided_slice %18 {offsets = [0, 1, 0, 0], sizes = [60, 1, 16, 256], strides = [1, 1, 1, 1]} : vector<60x2x16x256xf32> to vector<60x1x16x256xf32>
    %22 = vector.shape_cast %21 : vector<60x1x16x256xf32> to vector<60x16x256xf32>
    %23 = arith.maximumf %20, %22 : vector<60x16x256xf32>
    %24 = arith.truncf %23 : vector<60x16x256xf32> to vector<60x16x256xbf16>
    %25 = vector.shape_cast %24 : vector<60x16x256xbf16> to vector<15x4x16x256xbf16>
    %26 = vector.extract_strided_slice %25 {offsets = [0, 0, 0, 0], sizes = [14, 1, 16, 256], strides = [1, 1, 1, 1]} : vector<15x4x16x256xbf16> to vector<14x1x16x256xbf16>
    %27 = vector.shape_cast %26 : vector<14x1x16x256xbf16> to vector<14x16x256xbf16>
    %28 = vector.shape_cast %27 : vector<14x16x256xbf16> to vector<224x256xbf16>
    %c0_12 = arith.constant 0 : index
    %c0_13 = arith.constant 0 : index
    %29 = vector.load %arg6[%c0_12, %c0_13] : memref<2048x128xbf16, #tpu.memory_space<vmem>>, vector<256x128xbf16>
    %cst_14 = arith.constant dense<0.000000e+00> : vector<224x128xf32>
    %30 = tpu.matmul %28, %29, %cst_14 {dimension_numbers = #tpu.dot_dimension_numbers<[1], [0], [0], [1], [0, 0, 1, 1], [], []>} : vector<224x256xbf16>, vector<256x128xbf16>, vector<224x128xf32> -> vector<224x128xf32>
    %31 = vector.extract_strided_slice %25 {offsets = [0, 1, 0, 0], sizes = [14, 1, 16, 256], strides = [1, 1, 1, 1]} : vector<15x4x16x256xbf16> to vector<14x1x16x256xbf16>
    %32 = vector.shape_cast %31 : vector<14x1x16x256xbf16> to vector<14x16x256xbf16>
    %33 = vector.shape_cast %32 : vector<14x16x256xbf16> to vector<224x256xbf16>
    %c256 = arith.constant 256 : index
    %c0_15 = arith.constant 0 : index
    %34 = vector.load %arg6[%c256, %c0_15] : memref<2048x128xbf16, #tpu.memory_space<vmem>>, vector<256x128xbf16>
    %cst_16 = arith.constant dense<0.000000e+00> : vector<224x128xf32>
    %35 = tpu.matmul %33, %34, %cst_16 {dimension_numbers = #tpu.dot_dimension_numbers<[1], [0], [0], [1], [0, 0, 1, 1], [], []>} : vector<224x256xbf16>, vector<256x128xbf16>, vector<224x128xf32> -> vector<224x128xf32>
    %36 = arith.addf %30, %35 : vector<224x128xf32>
    %37 = vector.extract_strided_slice %25 {offsets = [0, 2, 0, 0], sizes = [14, 1, 16, 256], strides = [1, 1, 1, 1]} : vector<15x4x16x256xbf16> to vector<14x1x16x256xbf16>
    %38 = vector.shape_cast %37 : vector<14x1x16x256xbf16> to vector<14x16x256xbf16>
    %39 = vector.shape_cast %38 : vector<14x16x256xbf16> to vector<224x256xbf16>
    %c512 = arith.constant 512 : index
    %c0_17 = arith.constant 0 : index
    %40 = vector.load %arg6[%c512, %c0_17] : memref<2048x128xbf16, #tpu.memory_space<vmem>>, vector<256x128xbf16>
    %cst_18 = arith.constant dense<0.000000e+00> : vector<224x128xf32>
    %41 = tpu.matmul %39, %40, %cst_18 {dimension_numbers = #tpu.dot_dimension_numbers<[1], [0], [0], [1], [0, 0, 1, 1], [], []>} : vector<224x256xbf16>, vector<256x128xbf16>, vector<224x128xf32> -> vector<224x128xf32>
    %42 = arith.addf %36, %41 : vector<224x128xf32>
    %43 = vector.extract_strided_slice %25 {offsets = [0, 3, 0, 0], sizes = [14, 1, 16, 256], strides = [1, 1, 1, 1]} : vector<15x4x16x256xbf16> to vector<14x1x16x256xbf16>
    %44 = vector.shape_cast %43 : vector<14x1x16x256xbf16> to vector<14x16x256xbf16>
    %45 = vector.shape_cast %44 : vector<14x16x256xbf16> to vector<224x256xbf16>
    %c768 = arith.constant 768 : index
    %c0_19 = arith.constant 0 : index
    %46 = vector.load %arg6[%c768, %c0_19] : memref<2048x128xbf16, #tpu.memory_space<vmem>>, vector<256x128xbf16>
    %cst_20 = arith.constant dense<0.000000e+00> : vector<224x128xf32>
    %47 = tpu.matmul %45, %46, %cst_20 {dimension_numbers = #tpu.dot_dimension_numbers<[1], [0], [0], [1], [0, 0, 1, 1], [], []>} : vector<224x256xbf16>, vector<256x128xbf16>, vector<224x128xf32> -> vector<224x128xf32>
    %48 = arith.addf %42, %47 : vector<224x128xf32>
    %49 = vector.extract_strided_slice %25 {offsets = [1, 0, 0, 0], sizes = [14, 1, 16, 256], strides = [1, 1, 1, 1]} : vector<15x4x16x256xbf16> to vector<14x1x16x256xbf16>
    %50 = vector.shape_cast %49 : vector<14x1x16x256xbf16> to vector<14x16x256xbf16>
    %51 = vector.shape_cast %50 : vector<14x16x256xbf16> to vector<224x256xbf16>
    %c1024 = arith.constant 1024 : index
    %c0_21 = arith.constant 0 : index
    %52 = vector.load %arg6[%c1024, %c0_21] : memref<2048x128xbf16, #tpu.memory_space<vmem>>, vector<256x128xbf16>
    %cst_22 = arith.constant dense<0.000000e+00> : vector<224x128xf32>
    %53 = tpu.matmul %51, %52, %cst_22 {dimension_numbers = #tpu.dot_dimension_numbers<[1], [0], [0], [1], [0, 0, 1, 1], [], []>} : vector<224x256xbf16>, vector<256x128xbf16>, vector<224x128xf32> -> vector<224x128xf32>
    %54 = arith.addf %48, %53 : vector<224x128xf32>
    %55 = vector.extract_strided_slice %25 {offsets = [1, 1, 0, 0], sizes = [14, 1, 16, 256], strides = [1, 1, 1, 1]} : vector<15x4x16x256xbf16> to vector<14x1x16x256xbf16>
    %56 = vector.shape_cast %55 : vector<14x1x16x256xbf16> to vector<14x16x256xbf16>
    %57 = vector.shape_cast %56 : vector<14x16x256xbf16> to vector<224x256xbf16>
    %c1280 = arith.constant 1280 : index
    %c0_23 = arith.constant 0 : index
    %58 = vector.load %arg6[%c1280, %c0_23] : memref<2048x128xbf16, #tpu.memory_space<vmem>>, vector<256x128xbf16>
    %cst_24 = arith.constant dense<0.000000e+00> : vector<224x128xf32>
    %59 = tpu.matmul %57, %58, %cst_24 {dimension_numbers = #tpu.dot_dimension_numbers<[1], [0], [0], [1], [0, 0, 1, 1], [], []>} : vector<224x256xbf16>, vector<256x128xbf16>, vector<224x128xf32> -> vector<224x128xf32>
    %60 = arith.addf %54, %59 : vector<224x128xf32>
    %61 = vector.extract_strided_slice %25 {offsets = [1, 2, 0, 0], sizes = [14, 1, 16, 256], strides = [1, 1, 1, 1]} : vector<15x4x16x256xbf16> to vector<14x1x16x256xbf16>
    %62 = vector.shape_cast %61 : vector<14x1x16x256xbf16> to vector<14x16x256xbf16>
    %63 = vector.shape_cast %62 : vector<14x16x256xbf16> to vector<224x256xbf16>
    %c1536 = arith.constant 1536 : index
    %c0_25 = arith.constant 0 : index
    %64 = vector.load %arg6[%c1536, %c0_25] : memref<2048x128xbf16, #tpu.memory_space<vmem>>, vector<256x128xbf16>
    %cst_26 = arith.constant dense<0.000000e+00> : vector<224x128xf32>
    %65 = tpu.matmul %63, %64, %cst_26 {dimension_numbers = #tpu.dot_dimension_numbers<[1], [0], [0], [1], [0, 0, 1, 1], [], []>} : vector<224x256xbf16>, vector<256x128xbf16>, vector<224x128xf32> -> vector<224x128xf32>
    %66 = arith.addf %60, %65 : vector<224x128xf32>
    %67 = vector.extract_strided_slice %25 {offsets = [1, 3, 0, 0], sizes = [14, 1, 16, 256], strides = [1, 1, 1, 1]} : vector<15x4x16x256xbf16> to vector<14x1x16x256xbf16>
    %68 = vector.shape_cast %67 : vector<14x1x16x256xbf16> to vector<14x16x256xbf16>
    %69 = vector.shape_cast %68 : vector<14x16x256xbf16> to vector<224x256xbf16>
    %c1792 = arith.constant 1792 : index
    %c0_27 = arith.constant 0 : index
    %70 = vector.load %arg6[%c1792, %c0_27] : memref<2048x128xbf16, #tpu.memory_space<vmem>>, vector<256x128xbf16>
    %cst_28 = arith.constant dense<0.000000e+00> : vector<224x128xf32>
    %71 = tpu.matmul %69, %70, %cst_28 {dimension_numbers = #tpu.dot_dimension_numbers<[1], [0], [0], [1], [0, 0, 1, 1], [], []>} : vector<224x256xbf16>, vector<256x128xbf16>, vector<224x128xf32> -> vector<224x128xf32>
    %72 = arith.addf %66, %71 : vector<224x128xf32>
    %c0_29 = arith.constant 0 : index
    %c0_30 = arith.constant 0 : index
    %73 = vector.load %arg7[%c0_29, %c0_30] : memref<1x128xf32, #tpu.memory_space<vmem>>, vector<1x128xf32>
    %74 = vector.broadcast %73 : vector<1x128xf32> to vector<224x128xf32>
    %75 = arith.addf %72, %74 : vector<224x128xf32>
    %cst_31 = arith.constant 0.000000e+00 : f32
    %76 = vector.broadcast %cst_31 : f32 to vector<224x128xf32>
    %77 = arith.cmpf oge, %75, %76 : vector<224x128xf32>
    %cst_32 = arith.constant 0.00999999977 : f32
    %78 = vector.broadcast %cst_32 : f32 to vector<224x128xf32>
    %79 = arith.mulf %78, %75 : vector<224x128xf32>
    %80 = arith.select %77, %75, %79 : vector<224x128xi1>, vector<224x128xf32>
    %c0_33 = arith.constant 0 : index
    %c0_34 = arith.constant 0 : index
    %81 = vector.load %arg8[%c0_33, %c0_34] : memref<1x128xf32, #tpu.memory_space<vmem>>, vector<1x128xf32>
    %82 = vector.broadcast %81 : vector<1x128xf32> to vector<224x128xf32>
    %83 = arith.mulf %80, %82 : vector<224x128xf32>
    %c0_35 = arith.constant 0 : index
    %c0_36 = arith.constant 0 : index
    %84 = vector.load %arg9[%c0_35, %c0_36] : memref<1x128xf32, #tpu.memory_space<vmem>>, vector<1x128xf32>
    %85 = vector.broadcast %84 : vector<1x128xf32> to vector<224x128xf32>
    %86 = arith.addf %83, %85 : vector<224x128xf32>
    %87 = vector.shape_cast %86 : vector<224x128xf32> to vector<14x16x128xf32>
    %88 = vector.extract_strided_slice %87 {offsets = [0, 0, 0], sizes = [4, 16, 128], strides = [1, 1, 1]} : vector<14x16x128xf32> to vector<4x16x128xf32>
    %89 = vector.extract_strided_slice %88 {offsets = [0, 0, 0], sizes = [1, 16, 128], strides = [1, 1, 1]} : vector<4x16x128xf32> to vector<1x16x128xf32>
    %90 = vector.shape_cast %89 : vector<1x16x128xf32> to vector<16x128xf32>
    %91 = vector.extract_strided_slice %88 {offsets = [1, 0, 0], sizes = [1, 16, 128], strides = [1, 1, 1]} : vector<4x16x128xf32> to vector<1x16x128xf32>
    %92 = vector.shape_cast %91 : vector<1x16x128xf32> to vector<16x128xf32>
    %93 = arith.maximumf %90, %92 : vector<16x128xf32>
    %94 = vector.extract_strided_slice %88 {offsets = [2, 0, 0], sizes = [1, 16, 128], strides = [1, 1, 1]} : vector<4x16x128xf32> to vector<1x16x128xf32>
    %95 = vector.shape_cast %94 : vector<1x16x128xf32> to vector<16x128xf32>
    %96 = vector.extract_strided_slice %88 {offsets = [3, 0, 0], sizes = [1, 16, 128], strides = [1, 1, 1]} : vector<4x16x128xf32> to vector<1x16x128xf32>
    %97 = vector.shape_cast %96 : vector<1x16x128xf32> to vector<16x128xf32>
    %98 = arith.maximumf %95, %97 : vector<16x128xf32>
    %99 = arith.maximumf %93, %98 : vector<16x128xf32>
    %100 = arith.truncf %99 : vector<16x128xf32> to vector<16x128xbf16>
    %c0_37 = arith.constant 0 : index
    %c0_38 = arith.constant 0 : index
    %101 = vector.load %arg10[%c0_37, %c0_38] : memref<768x512xbf16, #tpu.memory_space<vmem>>, vector<128x512xbf16>
    %cst_39 = arith.constant dense<0.000000e+00> : vector<16x512xf32>
    %102 = tpu.matmul %100, %101, %cst_39 {dimension_numbers = #tpu.dot_dimension_numbers<[1], [0], [0], [1], [0, 0, 1, 1], [], []>} : vector<16x128xbf16>, vector<128x512xbf16>, vector<16x512xf32> -> vector<16x512xf32>
    %103 = vector.extract_strided_slice %87 {offsets = [2, 0, 0], sizes = [4, 16, 128], strides = [1, 1, 1]} : vector<14x16x128xf32> to vector<4x16x128xf32>
    %104 = vector.extract_strided_slice %103 {offsets = [0, 0, 0], sizes = [1, 16, 128], strides = [1, 1, 1]} : vector<4x16x128xf32> to vector<1x16x128xf32>
    %105 = vector.shape_cast %104 : vector<1x16x128xf32> to vector<16x128xf32>
    %106 = vector.extract_strided_slice %103 {offsets = [1, 0, 0], sizes = [1, 16, 128], strides = [1, 1, 1]} : vector<4x16x128xf32> to vector<1x16x128xf32>
    %107 = vector.shape_cast %106 : vector<1x16x128xf32> to vector<16x128xf32>
    %108 = arith.maximumf %105, %107 : vector<16x128xf32>
    %109 = vector.extract_strided_slice %103 {offsets = [2, 0, 0], sizes = [1, 16, 128], strides = [1, 1, 1]} : vector<4x16x128xf32> to vector<1x16x128xf32>
    %110 = vector.shape_cast %109 : vector<1x16x128xf32> to vector<16x128xf32>
    %111 = vector.extract_strided_slice %103 {offsets = [3, 0, 0], sizes = [1, 16, 128], strides = [1, 1, 1]} : vector<4x16x128xf32> to vector<1x16x128xf32>
    %112 = vector.shape_cast %111 : vector<1x16x128xf32> to vector<16x128xf32>
    %113 = arith.maximumf %110, %112 : vector<16x128xf32>
    %114 = arith.maximumf %108, %113 : vector<16x128xf32>
    %115 = arith.truncf %114 : vector<16x128xf32> to vector<16x128xbf16>
    %c128 = arith.constant 128 : index
    %c0_40 = arith.constant 0 : index
    %116 = vector.load %arg10[%c128, %c0_40] : memref<768x512xbf16, #tpu.memory_space<vmem>>, vector<128x512xbf16>
    %cst_41 = arith.constant dense<0.000000e+00> : vector<16x512xf32>
    %117 = tpu.matmul %115, %116, %cst_41 {dimension_numbers = #tpu.dot_dimension_numbers<[1], [0], [0], [1], [0, 0, 1, 1], [], []>} : vector<16x128xbf16>, vector<128x512xbf16>, vector<16x512xf32> -> vector<16x512xf32>
    %118 = arith.addf %102, %117 : vector<16x512xf32>
    %119 = vector.extract_strided_slice %87 {offsets = [4, 0, 0], sizes = [4, 16, 128], strides = [1, 1, 1]} : vector<14x16x128xf32> to vector<4x16x128xf32>
    %120 = vector.extract_strided_slice %119 {offsets = [0, 0, 0], sizes = [1, 16, 128], strides = [1, 1, 1]} : vector<4x16x128xf32> to vector<1x16x128xf32>
    %121 = vector.shape_cast %120 : vector<1x16x128xf32> to vector<16x128xf32>
    %122 = vector.extract_strided_slice %119 {offsets = [1, 0, 0], sizes = [1, 16, 128], strides = [1, 1, 1]} : vector<4x16x128xf32> to vector<1x16x128xf32>
    %123 = vector.shape_cast %122 : vector<1x16x128xf32> to vector<16x128xf32>
    %124 = arith.maximumf %121, %123 : vector<16x128xf32>
    %125 = vector.extract_strided_slice %119 {offsets = [2, 0, 0], sizes = [1, 16, 128], strides = [1, 1, 1]} : vector<4x16x128xf32> to vector<1x16x128xf32>
    %126 = vector.shape_cast %125 : vector<1x16x128xf32> to vector<16x128xf32>
    %127 = vector.extract_strided_slice %119 {offsets = [3, 0, 0], sizes = [1, 16, 128], strides = [1, 1, 1]} : vector<4x16x128xf32> to vector<1x16x128xf32>
    %128 = vector.shape_cast %127 : vector<1x16x128xf32> to vector<16x128xf32>
    %129 = arith.maximumf %126, %128 : vector<16x128xf32>
    %130 = arith.maximumf %124, %129 : vector<16x128xf32>
    %131 = arith.truncf %130 : vector<16x128xf32> to vector<16x128xbf16>
    %c256_42 = arith.constant 256 : index
    %c0_43 = arith.constant 0 : index
    %132 = vector.load %arg10[%c256_42, %c0_43] : memref<768x512xbf16, #tpu.memory_space<vmem>>, vector<128x512xbf16>
    %cst_44 = arith.constant dense<0.000000e+00> : vector<16x512xf32>
    %133 = tpu.matmul %131, %132, %cst_44 {dimension_numbers = #tpu.dot_dimension_numbers<[1], [0], [0], [1], [0, 0, 1, 1], [], []>} : vector<16x128xbf16>, vector<128x512xbf16>, vector<16x512xf32> -> vector<16x512xf32>
    %134 = arith.addf %118, %133 : vector<16x512xf32>
    %135 = vector.extract_strided_slice %87 {offsets = [6, 0, 0], sizes = [4, 16, 128], strides = [1, 1, 1]} : vector<14x16x128xf32> to vector<4x16x128xf32>
    %136 = vector.extract_strided_slice %135 {offsets = [0, 0, 0], sizes = [1, 16, 128], strides = [1, 1, 1]} : vector<4x16x128xf32> to vector<1x16x128xf32>
    %137 = vector.shape_cast %136 : vector<1x16x128xf32> to vector<16x128xf32>
    %138 = vector.extract_strided_slice %135 {offsets = [1, 0, 0], sizes = [1, 16, 128], strides = [1, 1, 1]} : vector<4x16x128xf32> to vector<1x16x128xf32>
    %139 = vector.shape_cast %138 : vector<1x16x128xf32> to vector<16x128xf32>
    %140 = arith.maximumf %137, %139 : vector<16x128xf32>
    %141 = vector.extract_strided_slice %135 {offsets = [2, 0, 0], sizes = [1, 16, 128], strides = [1, 1, 1]} : vector<4x16x128xf32> to vector<1x16x128xf32>
    %142 = vector.shape_cast %141 : vector<1x16x128xf32> to vector<16x128xf32>
    %143 = vector.extract_strided_slice %135 {offsets = [3, 0, 0], sizes = [1, 16, 128], strides = [1, 1, 1]} : vector<4x16x128xf32> to vector<1x16x128xf32>
    %144 = vector.shape_cast %143 : vector<1x16x128xf32> to vector<16x128xf32>
    %145 = arith.maximumf %142, %144 : vector<16x128xf32>
    %146 = arith.maximumf %140, %145 : vector<16x128xf32>
    %147 = arith.truncf %146 : vector<16x128xf32> to vector<16x128xbf16>
    %c384 = arith.constant 384 : index
    %c0_45 = arith.constant 0 : index
    %148 = vector.load %arg10[%c384, %c0_45] : memref<768x512xbf16, #tpu.memory_space<vmem>>, vector<128x512xbf16>
    %cst_46 = arith.constant dense<0.000000e+00> : vector<16x512xf32>
    %149 = tpu.matmul %147, %148, %cst_46 {dimension_numbers = #tpu.dot_dimension_numbers<[1], [0], [0], [1], [0, 0, 1, 1], [], []>} : vector<16x128xbf16>, vector<128x512xbf16>, vector<16x512xf32> -> vector<16x512xf32>
    %150 = arith.addf %134, %149 : vector<16x512xf32>
    %151 = vector.extract_strided_slice %87 {offsets = [8, 0, 0], sizes = [4, 16, 128], strides = [1, 1, 1]} : vector<14x16x128xf32> to vector<4x16x128xf32>
    %152 = vector.extract_strided_slice %151 {offsets = [0, 0, 0], sizes = [1, 16, 128], strides = [1, 1, 1]} : vector<4x16x128xf32> to vector<1x16x128xf32>
    %153 = vector.shape_cast %152 : vector<1x16x128xf32> to vector<16x128xf32>
    %154 = vector.extract_strided_slice %151 {offsets = [1, 0, 0], sizes = [1, 16, 128], strides = [1, 1, 1]} : vector<4x16x128xf32> to vector<1x16x128xf32>
    %155 = vector.shape_cast %154 : vector<1x16x128xf32> to vector<16x128xf32>
    %156 = arith.maximumf %153, %155 : vector<16x128xf32>
    %157 = vector.extract_strided_slice %151 {offsets = [2, 0, 0], sizes = [1, 16, 128], strides = [1, 1, 1]} : vector<4x16x128xf32> to vector<1x16x128xf32>
    %158 = vector.shape_cast %157 : vector<1x16x128xf32> to vector<16x128xf32>
    %159 = vector.extract_strided_slice %151 {offsets = [3, 0, 0], sizes = [1, 16, 128], strides = [1, 1, 1]} : vector<4x16x128xf32> to vector<1x16x128xf32>
    %160 = vector.shape_cast %159 : vector<1x16x128xf32> to vector<16x128xf32>
    %161 = arith.maximumf %158, %160 : vector<16x128xf32>
    %162 = arith.maximumf %156, %161 : vector<16x128xf32>
    %163 = arith.truncf %162 : vector<16x128xf32> to vector<16x128xbf16>
    %c512_47 = arith.constant 512 : index
    %c0_48 = arith.constant 0 : index
    %164 = vector.load %arg10[%c512_47, %c0_48] : memref<768x512xbf16, #tpu.memory_space<vmem>>, vector<128x512xbf16>
    %cst_49 = arith.constant dense<0.000000e+00> : vector<16x512xf32>
    %165 = tpu.matmul %163, %164, %cst_49 {dimension_numbers = #tpu.dot_dimension_numbers<[1], [0], [0], [1], [0, 0, 1, 1], [], []>} : vector<16x128xbf16>, vector<128x512xbf16>, vector<16x512xf32> -> vector<16x512xf32>
    %166 = arith.addf %150, %165 : vector<16x512xf32>
    %167 = vector.extract_strided_slice %87 {offsets = [10, 0, 0], sizes = [4, 16, 128], strides = [1, 1, 1]} : vector<14x16x128xf32> to vector<4x16x128xf32>
    %168 = vector.extract_strided_slice %167 {offsets = [0, 0, 0], sizes = [1, 16, 128], strides = [1, 1, 1]} : vector<4x16x128xf32> to vector<1x16x128xf32>
    %169 = vector.shape_cast %168 : vector<1x16x128xf32> to vector<16x128xf32>
    %170 = vector.extract_strided_slice %167 {offsets = [1, 0, 0], sizes = [1, 16, 128], strides = [1, 1, 1]} : vector<4x16x128xf32> to vector<1x16x128xf32>
    %171 = vector.shape_cast %170 : vector<1x16x128xf32> to vector<16x128xf32>
    %172 = arith.maximumf %169, %171 : vector<16x128xf32>
    %173 = vector.extract_strided_slice %167 {offsets = [2, 0, 0], sizes = [1, 16, 128], strides = [1, 1, 1]} : vector<4x16x128xf32> to vector<1x16x128xf32>
    %174 = vector.shape_cast %173 : vector<1x16x128xf32> to vector<16x128xf32>
    %175 = vector.extract_strided_slice %167 {offsets = [3, 0, 0], sizes = [1, 16, 128], strides = [1, 1, 1]} : vector<4x16x128xf32> to vector<1x16x128xf32>
    %176 = vector.shape_cast %175 : vector<1x16x128xf32> to vector<16x128xf32>
    %177 = arith.maximumf %174, %176 : vector<16x128xf32>
    %178 = arith.maximumf %172, %177 : vector<16x128xf32>
    %179 = arith.truncf %178 : vector<16x128xf32> to vector<16x128xbf16>
    %c640 = arith.constant 640 : index
    %c0_50 = arith.constant 0 : index
    %180 = vector.load %arg10[%c640, %c0_50] : memref<768x512xbf16, #tpu.memory_space<vmem>>, vector<128x512xbf16>
    %cst_51 = arith.constant dense<0.000000e+00> : vector<16x512xf32>
    %181 = tpu.matmul %179, %180, %cst_51 {dimension_numbers = #tpu.dot_dimension_numbers<[1], [0], [0], [1], [0, 0, 1, 1], [], []>} : vector<16x128xbf16>, vector<128x512xbf16>, vector<16x512xf32> -> vector<16x512xf32>
    %182 = arith.addf %166, %181 : vector<16x512xf32>
    %c0_52 = arith.constant 0 : index
    %c0_53 = arith.constant 0 : index
    %183 = vector.load %arg11[%c0_52, %c0_53] : memref<1x512xf32, #tpu.memory_space<vmem>>, vector<1x512xf32>
    %184 = vector.broadcast %183 : vector<1x512xf32> to vector<16x512xf32>
    %185 = arith.addf %182, %184 : vector<16x512xf32>
    %cst_54 = arith.constant 0.000000e+00 : f32
    %186 = vector.broadcast %cst_54 : f32 to vector<16x512xf32>
    %187 = arith.cmpf oge, %185, %186 : vector<16x512xf32>
    %cst_55 = arith.constant 0.00999999977 : f32
    %188 = vector.broadcast %cst_55 : f32 to vector<16x512xf32>
    %189 = arith.mulf %188, %185 : vector<16x512xf32>
    %190 = arith.select %187, %185, %189 : vector<16x512xi1>, vector<16x512xf32>
    %191 = arith.truncf %190 : vector<16x512xf32> to vector<16x512xbf16>
    %c0_56 = arith.constant 0 : index
    %c0_57 = arith.constant 0 : index
    %192 = vector.load %arg12[%c0_56, %c0_57] : memref<512x256xbf16, #tpu.memory_space<vmem>>, vector<512x256xbf16>
    %cst_58 = arith.constant dense<0.000000e+00> : vector<16x256xf32>
    %193 = tpu.matmul %191, %192, %cst_58 {dimension_numbers = #tpu.dot_dimension_numbers<[1], [0], [0], [1], [0, 0, 1, 1], [], []>} : vector<16x512xbf16>, vector<512x256xbf16>, vector<16x256xf32> -> vector<16x256xf32>
    %c0_59 = arith.constant 0 : index
    %c0_60 = arith.constant 0 : index
    %194 = vector.load %arg13[%c0_59, %c0_60] : memref<1x256xf32, #tpu.memory_space<vmem>>, vector<1x256xf32>
    %195 = vector.broadcast %194 : vector<1x256xf32> to vector<16x256xf32>
    %196 = arith.addf %193, %195 : vector<16x256xf32>
    %cst_61 = arith.constant 0.000000e+00 : f32
    %197 = vector.broadcast %cst_61 : f32 to vector<16x256xf32>
    %198 = arith.cmpf oge, %196, %197 : vector<16x256xf32>
    %cst_62 = arith.constant 0.00999999977 : f32
    %199 = vector.broadcast %cst_62 : f32 to vector<16x256xf32>
    %200 = arith.mulf %199, %196 : vector<16x256xf32>
    %201 = arith.select %198, %196, %200 : vector<16x256xi1>, vector<16x256xf32>
    %202 = arith.truncf %201 : vector<16x256xf32> to vector<16x256xbf16>
    %c0_63 = arith.constant 0 : index
    %c0_64 = arith.constant 0 : index
    %203 = vector.load %arg14[%c0_63, %c0_64] : memref<256x128xbf16, #tpu.memory_space<vmem>>, vector<256x128xbf16>
    %cst_65 = arith.constant dense<0.000000e+00> : vector<16x128xf32>
    %204 = tpu.matmul %202, %203, %cst_65 {dimension_numbers = #tpu.dot_dimension_numbers<[1], [0], [0], [1], [0, 0, 1, 1], [], []>} : vector<16x256xbf16>, vector<256x128xbf16>, vector<16x128xf32> -> vector<16x128xf32>
    %c0_66 = arith.constant 0 : index
    %c0_67 = arith.constant 0 : index
    %205 = vector.load %arg15[%c0_66, %c0_67] : memref<1x128xf32, #tpu.memory_space<vmem>>, vector<1x128xf32>
    %206 = vector.broadcast %205 : vector<1x128xf32> to vector<16x128xf32>
    %207 = arith.addf %204, %206 : vector<16x128xf32>
    %208 = vector.shape_cast %207 : vector<16x128xf32> to vector<2x8x128xf32>
    %209 = vector.extract_strided_slice %208 {offsets = [0, 0, 0], sizes = [1, 8, 128], strides = [1, 1, 1]} : vector<2x8x128xf32> to vector<1x8x128xf32>
    %210 = vector.shape_cast %209 : vector<1x8x128xf32> to vector<8x128xf32>
    %211 = vector.extract_strided_slice %208 {offsets = [1, 0, 0], sizes = [1, 8, 128], strides = [1, 1, 1]} : vector<2x8x128xf32> to vector<1x8x128xf32>
    %212 = vector.shape_cast %211 : vector<1x8x128xf32> to vector<8x128xf32>
    %213 = arith.subf %210, %212 : vector<8x128xf32>
    %214 = math.absf %213 : vector<8x128xf32>
    %cst_68 = arith.constant dense<0.000000e+00> : vector<8xf32>
    %215 = vector.multi_reduction <add>, %214, %cst_68 [1] : vector<8x128xf32> to vector<8xf32>
    %216 = vector.shape_cast %215 : vector<8xf32> to vector<8x1xf32>
    %c0_69 = arith.constant 0 : index
    %c0_70 = arith.constant 0 : index
    %217 = vector.load %arg16[%c0_69, %c0_70] : memref<1x1xf32, #tpu.memory_space<vmem>>, vector<1x1xf32>
    %218 = vector.broadcast %217 : vector<1x1xf32> to vector<8x1xf32>
    %219 = arith.mulf %216, %218 : vector<8x1xf32>
    %c0_71 = arith.constant 0 : index
    %c0_72 = arith.constant 0 : index
    %220 = vector.load %arg17[%c0_71, %c0_72] : memref<1x1xf32, #tpu.memory_space<vmem>>, vector<1x1xf32>
    %221 = vector.broadcast %220 : vector<1x1xf32> to vector<8x1xf32>
    %222 = arith.addf %219, %221 : vector<8x1xf32>
    %223 = arith.negf %222 : vector<8x1xf32>
    %224 = math.exp %223 : vector<8x1xf32>
    %cst_73 = arith.constant 1.000000e+00 : f32
    %225 = vector.broadcast %cst_73 : f32 to vector<8x1xf32>
    %226 = arith.addf %225, %224 : vector<8x1xf32>
    %227 = arith.divf %225, %226 : vector<8x1xf32>
    %c0_74 = arith.constant 0 : index
    %c0_75 = arith.constant 0 : index
    %228 = vector.load %arg18[%c0_74, %c0_75] : memref<8x1xf32, #tpu.memory_space<vmem>>, vector<8x1xf32>
    tpu.vector_store %arg18[%c0_74, %c0_75], %227 {strides = array<i32>} : memref<8x1xf32, #tpu.memory_space<vmem>>, vector<8x1xf32>,
    return
  }
  func.func @transform_0(%arg0: i32) -> (i32, i32, i32) {
    %c0_i32 = arith.constant 0 : i32
    %c0_i32_0 = arith.constant 0 : i32
    %c0_i32_1 = arith.constant 0 : i32
    return %arg0, %c0_i32, %c0_i32_0 : i32, i32, i32
  }
  func.func @transform_1(%arg0: i32) -> (i32, i32) {
    %c0_i32 = arith.constant 0 : i32
    %c0_i32_0 = arith.constant 0 : i32
    %c0_i32_1 = arith.constant 0 : i32
    return %c0_i32, %c0_i32_0 : i32, i32
  }
  func.func @transform_2(%arg0: i32) -> (i32, i32) {
    %c0_i32 = arith.constant 0 : i32
    %c0_i32_0 = arith.constant 0 : i32
    %c0_i32_1 = arith.constant 0 : i32
    return %c0_i32, %c0_i32_0 : i32, i32
  }
  func.func @transform_3(%arg0: i32) -> (i32, i32) {
    %c0_i32 = arith.constant 0 : i32
    %c0_i32_0 = arith.constant 0 : i32
    %c0_i32_1 = arith.constant 0 : i32
    return %c0_i32, %c0_i32_0 : i32, i32
  }
  func.func @transform_4(%arg0: i32) -> (i32, i32) {
    %c0_i32 = arith.constant 0 : i32
    %c0_i32_0 = arith.constant 0 : i32
    %c0_i32_1 = arith.constant 0 : i32
    return %c0_i32, %c0_i32_0 : i32, i32
  }
  func.func @transform_5(%arg0: i32) -> (i32, i32) {
    %c0_i32 = arith.constant 0 : i32
    %c0_i32_0 = arith.constant 0 : i32
    %c0_i32_1 = arith.constant 0 : i32
    return %c0_i32, %c0_i32_0 : i32, i32
  }
  func.func @transform_6(%arg0: i32) -> (i32, i32) {
    %c0_i32 = arith.constant 0 : i32
    %c0_i32_0 = arith.constant 0 : i32
    %c0_i32_1 = arith.constant 0 : i32
    return %c0_i32, %c0_i32_0 : i32, i32
  }
  func.func @transform_7(%arg0: i32) -> (i32, i32) {
    %c0_i32 = arith.constant 0 : i32
    %c0_i32_0 = arith.constant 0 : i32
    %c0_i32_1 = arith.constant 0 : i32
    return %c0_i32, %c0_i32_0 : i32, i32
  }
  func.func @transform_8(%arg0: i32) -> (i32, i32) {
    %c0_i32 = arith.constant 0 : i32
    %c0_i32_0 = arith.constant 0 : i32
    %c0_i32_1 = arith.constant 0 : i32
    return %c0_i32, %c0_i32_0 : i32, i32
  }
  func.func @transform_9(%arg0: i32) -> (i32, i32) {
    %c0_i32 = arith.constant 0 : i32
    %c0_i32_0 = arith.constant 0 : i32
    %c0_i32_1 = arith.constant 0 : i32
    return %c0_i32, %c0_i32_0 : i32, i32
  }
  func.func @transform_10(%arg0: i32) -> (i32, i32) {
    %c0_i32 = arith.constant 0 : i32
    %c0_i32_0 = arith.constant 0 : i32
    %c0_i32_1 = arith.constant 0 : i32
    return %c0_i32, %c0_i32_0 : i32, i32
  }
  func.func @transform_11(%arg0: i32) -> (i32, i32) {
    %c0_i32 = arith.constant 0 : i32
    %c0_i32_0 = arith.constant 0 : i32
    %c0_i32_1 = arith.constant 0 : i32
    return %c0_i32, %c0_i32_0 : i32, i32
  }
  func.func @transform_12(%arg0: i32) -> (i32, i32) {
    %c0_i32 = arith.constant 0 : i32
    %c0_i32_0 = arith.constant 0 : i32
    %c0_i32_1 = arith.constant 0 : i32
    return %c0_i32, %c0_i32_0 : i32, i32
  }
  func.func @transform_13(%arg0: i32) -> (i32, i32) {
    %c0_i32 = arith.constant 0 : i32
    %c0_i32_0 = arith.constant 0 : i32
    %c0_i32_1 = arith.constant 0 : i32
    return %c0_i32, %c0_i32_0 : i32, i32
  }
  func.func @transform_14(%arg0: i32) -> (i32, i32) {
    %c0_i32 = arith.constant 0 : i32
    %c0_i32_0 = arith.constant 0 : i32
    %c0_i32_1 = arith.constant 0 : i32
    return %c0_i32, %c0_i32_0 : i32, i32
  }
  func.func @transform_15(%arg0: i32) -> (i32, i32) {
    %c0_i32 = arith.constant 0 : i32
    %c0_i32_0 = arith.constant 0 : i32
    %c0_i32_1 = arith.constant 0 : i32
    return %c0_i32, %c0_i32_0 : i32, i32
  }
  func.func @transform_16(%arg0: i32) -> (i32, i32) {
    %c0_i32 = arith.constant 0 : i32
    %c0_i32_0 = arith.constant 0 : i32
    %c0_i32_1 = arith.constant 0 : i32
    return %c0_i32, %c0_i32_0 : i32, i32
  }
  func.func @transform_17(%arg0: i32) -> (i32, i32) {
    %c0_i32 = arith.constant 0 : i32
    %c0_i32_0 = arith.constant 0 : i32
    return %arg0, %c0_i32 : i32, i32
  }
}

</mosaic_0001>

<bundles_post_ra>
// kernel: siamese_forward.1
= control target key start
LH: loop header
LB: loop body
LE: loop exit
PB: predicated region body
PF: predicated region fallthrough
CT: control target
= control target key end

     0   :  { %v17746_v2 = vmov 0.0   ;;  %vm587_vm0 = vcmask 130048   ;;  %s17726_s0 = inlined_call_operand.vmem [shape: f32[1,16,1920], index: 0, kind: input, shape index: {}]   ;;  %s17727_s1 = inlined_call_operand.vmem [shape: f32[16,256], index: 1, kind: input, shape index: {}]   ;;  %s17728_s5 = inlined_call_operand.vmem [shape: bf16[2048,128], index: 5, kind: input, shape index: {}]   ;;  %s17729_s2 = inlined_call_operand.vmem [shape: f32[1,256], index: 2, kind: input, shape index: {}]   ;;  %s17730_s3 = inlined_call_operand.vmem [shape: f32[1,256], index: 3, kind: input, shape index: {}]   ;;  %s17731_s4 = inlined_call_operand.vmem [shape: f32[1,256], index: 4, kind: input, shape index: {}]   ;;  %s17732_s9 = inlined_call_operand.vmem [shape: bf16[768,512], index: 9, kind: input, shape index: {}]   ;;  %s17733_s6 = inlined_call_operand.vmem [shape: f32[1,128], index: 6, kind: input, shape index: {}]   ;;  %s17734_s7 = inlined_call_operand.vmem [shape: f32[1,128], index: 7, kind: input, shape index: {}]   ;;  %s17735_s8 = inlined_call_operand.vmem [shape: f32[1,128], index: 8, kind: input, shape index: {}]   ;;  %s17736_s11 = inlined_call_operand.vmem [shape: bf16[512,256], index: 11, kind: input, shape index: {}]   ;;  %s17737_s13 = inlined_call_operand.vmem [shape: bf16[256,128], index: 13, kind: input, shape index: {}]   ;;  %s17738_s10 = inlined_call_operand.vmem [shape: f32[1,512], index: 10, kind: input, shape index: {}]   ;;  %s17739_s12 = inlined_call_operand.vmem [shape: f32[1,256], index: 12, kind: input, shape index: {}]   ;;  %s17740_s15 = inlined_call_operand.<no memory space> [shape: f32[1,1], index: 15, kind: input, shape index: {}]   ;;  %s17741_s16 = inlined_call_operand.<no memory space> [shape: f32[1,1], index: 16, kind: input, shape index: {}]   ;;  %s17742_s14 = inlined_call_operand.vmem [shape: f32[1,128], index: 14, kind: input, shape index: {}]   ;;  %s17743_s17 = inlined_call_operand.vmem [shape: f32[8,1], index: 17, kind: output, shape index: {}]  }
   0x1   :  { %17855 = sst [smem:[#allocation137_spill]] %s17726_s0  ;;  %1372 = vmatprep.mubr.f32.mxu0 %v17746_v2  ;;  %v12155_v43 = vld [vmem:[%s17728_s5 + $0x40] sm:$0xff]   ;;  %v12157_v46 = vld [vmem:[%s17728_s5 + $0x48] sm:$0xff]   ;;  %v12159_v49 = vld [vmem:[%s17728_s5 + $0x50] sm:$0xff]  }
   0x2   :  { %17856 = sst [smem:[#allocation138_spill]] %s17727_s1  ;;  %s17857_s26 = sld [smem:[#allocation137_spill]]  ;;  %v12156_v44 = vld [vmem:[%s17728_s5] sm:$0xff]   ;;  %11379 = vmatprep.subr.bf16.mxu1 %v12155_v43  ;;  %v12158_v47 = vld [vmem:[%s17728_s5 + $0x8] sm:$0xff]   ;;  %v12160_v50 = vld [vmem:[%s17728_s5 + $0x10] sm:$0xff]  }
   0x3   :  { %s17858_s19 = sld [smem:[#allocation138_spill]]  ;;  %11380 = vmatpush3.bf16.msra.mxu1 %v12156_v44  ;;  %v12161_v51 = vld [vmem:[%s17728_s5 + $0x58] sm:$0xff]   ;;  %v12163_v54 = vld [vmem:[%s17728_s5 + $0x60] sm:$0xff]   ;;  %v12165_v58 = vld [vmem:[%s17728_s5 + $0x68] sm:$0xff]  }
   0x4   :  { %11381 = vmatprep.subr.bf16.mxu1 %v12157_v46  ;;  %v12162_v52 = vld [vmem:[%s17728_s5 + $0x18] sm:$0xff]   ;;  %v12164_v55 = vld [vmem:[%s17728_s5 + $0x20] sm:$0xff]   ;;  %v12166_v59 = vld [vmem:[%s17728_s5 + $0x28] sm:$0xff]  }
   0x5   :  { %v12167_v61 = vld [vmem:[%s17728_s5 + $0x70] sm:$0xff]   ;;  %v4253_v43 = vld [vmem:[%s17730_s3] sm:$0x3] }
   0x6   :  { %v12168_v62 = vld [vmem:[%s17728_s5 + $0x30] sm:$0xff]  }
   0x7   :  { %11382 = vmatpush3.bf16.msra.mxu1 %v12158_v47 }
   0x8   :  { %v61_v0 = vld [vmem:[%s17857_s26] sm:$0xff]  ;;  %v62_v1 = vld [vmem:[%s17857_s26 + $0x8] sm:$0xff]  ;;  %v76_v3 = vld [vmem:[%s17857_s26 + $0x78] sm:$0xff]  ;;  %11383 = vmatprep.subr.bf16.mxu1 %v12159_v49 }
   0x9   :  { %107 = vxpose.xlu0.b32.start [1/2] (short) %v61_v0, 128  ;;  %139 = vxpose.xlu1.b32.start [1/2] (short) %v62_v1, 128  ;;  %v92_v4 = vld [vmem:[%s17858_s19 + $0x8] sm:$0xff]  ;;  %v94_v5 = vld [vmem:[%s17858_s19 + $0x18] sm:$0xff]  ;;  %v77_v6 = vld [vmem:[%s17857_s26 + $0x80] sm:$0xff] }
   0xa   :  { %v12101_v7 = vpack.c.bf16 %v94_v5, %v92_v4  ;;  %v91_v8 = vld [vmem:[%s17858_s19] sm:$0xff]  ;;  %v93_v9 = vld [vmem:[%s17858_s19 + $0x10] sm:$0xff]  ;;  %v64_v12 = vld [vmem:[%s17857_s26 + $0x18] sm:$0xff] }
   0xb   :  { %v12103_v10 = vpack.c.bf16 %v93_v9, %v91_v8  ;;  %v63_v11 = vld [vmem:[%s17857_s26 + $0x10] sm:$0xff]  ;;  %v78_v13 = vld [vmem:[%s17857_s26 + $0x88] sm:$0xff]  ;;  %v65_v15 = vld [vmem:[%s17857_s26 + $0x20] sm:$0xff]  ;;  %11384 = vmatpush3.bf16.msra.mxu1 %v12160_v50 }
   0xc   :  { %12102 = vmatprep.subr.bf16.mxu0 %v12101_v7  ;;  %v79_v14 = vld [vmem:[%s17857_s26 + $0x90] sm:$0xff]  ;;  %v80_v17 = vld [vmem:[%s17857_s26 + $0x98] sm:$0xff]  ;;  %v66_v38 = vld [vmem:[%s17857_s26 + $0x28] sm:$0xff]  ;;  %11385 = vmatprep.subr.bf16.mxu1 %v12161_v51 }
   0xd   :  { %108 = vxpose.xlu0.b32.end [2/2] (short) %v76_v3, 128  ;;  %140 = vxpose.xlu1.b32.end [2/2] (short) %v77_v6, 128  ;;  %v81_v40 = vld [vmem:[%s17857_s26 + $0xa0] sm:$0xff]  ;;  %v12169_v0 = vld [vmem:[%s17728_s5 + $0x78] sm:$0xff]  }
   0xe   :  { %12104 = vmatpush1.bf16.msra.mxu0 %v12103_v10  ;;  %v12170_v1 = vld [vmem:[%s17728_s5 + $0x38] sm:$0xff]   ;;  %v67_v10 = vld [vmem:[%s17857_s26 + $0x30] sm:$0xff] }
   0xf   :  { %11386 = vmatpush3.bf16.msra.mxu1 %v12162_v52 }
  0x10   :  { %11387 = vmatprep.subr.bf16.mxu1 %v12163_v54  ;;  %v4745_v54 = vld [vmem:[%s17731_s4] sm:$0x3] }
  0x13   :  { %11388 = vmatpush3.bf16.msra.mxu1 %v12164_v55 }
  0x14   :  { %11389 = vmatprep.subr.bf16.mxu1 %v12165_v58 }
  0x17   :  { %11390 = vmatpush3.bf16.msra.mxu1 %v12166_v59 }
  0x18   :  { %11391 = vmatprep.subr.bf16.mxu1 %v12167_v61 }
  0x1b   :  { %11392 = vmatpush3.bf16.msra.mxu1 %v12168_v62 }
  0x1c   :  { %11393 = vmatprep.subr.bf16.mxu1 %v12169_v0 }
  0x1f   :  { %11394 = vmatpush3.bf16.msra.mxu1 %v12170_v1 }
  0x46   :  { %171 = vxpose.xlu0.b32.start [1/2] (short) %v63_v11, 128  ;;  %203 = vxpose.xlu1.b32.start [1/2] (short) %v64_v12, 128  ;;  %v82_v11 = vld [vmem:[%s17857_s26 + $0xa8] sm:$0xff] }
  0x4a   :  { %172 = vxpose.xlu0.b32.end [2/2] (short) %v78_v13, 128  ;;  %204 = vxpose.xlu1.b32.end [2/2] (short) %v79_v14, 128 }
  0x83   :  { %235 = vxpose.xlu0.b32.start [1/2] (short) %v65_v15, 128  ;;  %267 = vxpose.xlu1.b32.start [1/2] (short) %v66_v38, 128 }
  0x87   :  { %236 = vxpose.xlu0.b32.end [2/2] (short) %v80_v17, 128  ;;  %268 = vxpose.xlu1.b32.end [2/2] (short) %v81_v40, 128 }
  0x89   :  { %v123_v16 = vpop.trf.xlu0  ;;  %v155_v26 = vpop.trf.xlu1 }
  0x8a   :  { %10632 = vmatmul.mubr.msk.f32.vlgmr.msra.gmra.mrb[0].mxu0 %vm587_vm0, %v123_v16 }
  0x8b   :  { %1378 = vmatprep.mubr.f32.mxu0 %v17746_v2 }
  0x8d   :  { %v124_v18 = vpop.trf.xlu0  ;;  %v156_v28 = vpop.trf.xlu1 }
  0x8e   :  { %10633 = vmatmul.mubr.msk.f32.gmra.mrb[2].mxu0 %vm587_vm0, %v124_v18 }
  0x8f   :  { %1384 = vmatprep.mubr.f32.mxu0 %v17746_v2 }
  0x91   :  { %v125_v19 = vpop.trf.xlu0  ;;  %v157_v31 = vpop.trf.xlu1 }
  0x92   :  { %10634 = vmatmul.mubr.msk.f32.gmra.mrb[4].mxu0 %vm587_vm0, %v125_v19 }
  0x93   :  { %1390 = vmatprep.mubr.f32.mxu0 %v17746_v2 }
  0x95   :  { %v126_v20 = vpop.trf.xlu0  ;;  %v158_v33 = vpop.trf.xlu1 }
  0x96   :  { %10635 = vmatmul.mubr.msk.f32.gmra.mrb[6].mxu0 %vm587_vm0, %v126_v20 }
  0x97   :  { %1396 = vmatprep.mubr.f32.mxu0 %v17746_v2 }
  0x99   :  { %v127_v21 = vpop.trf.xlu0  ;;  %v159_v36 = vpop.trf.xlu1 }
  0x9a   :  { %10636 = vmatmul.mubr.msk.f32.gmra.mrb[8].mxu0 %vm587_vm0, %v127_v21 }
  0x9b   :  { %1402 = vmatprep.mubr.f32.mxu0 %v17746_v2 }
  0x9d   :  { %v128_v22 = vpop.trf.xlu0  ;;  %v160_v39 = vpop.trf.xlu1 }
  0x9e   :  { %10637 = vmatmul.mubr.msk.f32.gmra.mrb[10].mxu0 %vm587_vm0, %v128_v22 }
  0x9f   :  { %1408 = vmatprep.mubr.f32.mxu0 %v17746_v2 }
  0xa1   :  { %v129_v23 = vpop.trf.xlu0  ;;  %v161_v41 = vpop.trf.xlu1 }
  0xa2   :  { %10638 = vmatmul.mubr.msk.f32.gmra.mrb[12].mxu0 %vm587_vm0, %v129_v23 }
  0xa3   :  { %1414 = vmatprep.mubr.f32.mxu0 %v17746_v2 }
  0xa5   :  { %v130_v24 = vpop.trf.xlu0  ;;  %v162_v42 = vpop.trf.xlu1 }
  0xa6   :  { %10639 = vmatmul.mubr.msk.f32.gmra.mrb[14].mxu0 %vm587_vm0, %v130_v24 }
  0xa7   :  { %1420 = vmatprep.mubr.f32.mxu0 %v17746_v2 }
  0xa9   :  { %v131_v25 = vpop.trf.xlu0  ;;  %v163_v45 = vpop.trf.xlu1 }
  0xaa   :  { %10640 = vmatmul.mubr.msk.f32.gmra.mrb[16].mxu0 %vm587_vm0, %v131_v25 }
  0xab   :  { %1426 = vmatprep.mubr.f32.mxu0 %v17746_v2 }
  0xad   :  { %v132_v27 = vpop.trf.xlu0  ;;  %v164_v48 = vpop.trf.xlu1 }
  0xae   :  { %10641 = vmatmul.mubr.msk.f32.gmra.mrb[18].mxu0 %vm587_vm0, %v132_v27 }
  0xaf   :  { %1432 = vmatprep.mubr.f32.mxu0 %v17746_v2 }
  0xb1   :  { %v133_v29 = vpop.trf.xlu0  ;;  %v165_v53 = vpop.trf.xlu1 }
  0xb2   :  { %10642 = vmatmul.mubr.msk.f32.gmra.mrb[20].mxu0 %vm587_vm0, %v133_v29  ;;  %v83_v29 = vld [vmem:[%s17857_s26 + $0xb0] sm:$0xff] }
  0xb3   :  { %1438 = vmatprep.mubr.f32.mxu0 %v17746_v2 }
  0xb5   :  { %v134_v30 = vpop.trf.xlu0  ;;  %v166_v57 = vpop.trf.xlu1 }
  0xb6   :  { %10643 = vmatmul.mubr.msk.f32.gmra.mrb[22].mxu0 %vm587_vm0, %v134_v30 }
  0xb7   :  { %1444 = vmatprep.mubr.f32.mxu0 %v17746_v2 }
  0xb9   :  { %v135_v32 = vpop.trf.xlu0  ;;  %v167_v63 = vpop.trf.xlu1 }
  0xba   :  { %10644 = vmatmul.mubr.msk.f32.gmra.mrb[24].mxu0 %vm587_vm0, %v135_v32 }
  0xbb   :  { %1450 = vmatprep.mubr.f32.mxu0 %v17746_v2 }
  0xbd   :  { %v136_v34 = vpop.trf.xlu0  ;;  %v168_v4 = vpop.trf.xlu1 }
  0xbe   :  { %10645 = vmatmul.mubr.msk.f32.gmra.mrb[26].mxu0 %vm587_vm0, %v136_v34 }
  0xbf   :  { %1456 = vmatprep.mubr.f32.mxu0 %v17746_v2 }
  0xc1   :  { %v137_v35 = vpop.trf.xlu0  ;;  %v169_v6 = vpop.trf.xlu1  ;;  %299 = vxpose.xlu0.b32.start [1/2] (short) %v67_v10, 128 }
  0xc2   :  { %10646 = vmatmul.mubr.msk.f32.gmra.mrb[28].mxu0 %vm587_vm0, %v137_v35  ;;  %v95_v35 = vld [vmem:[%s17729_s2] sm:$0x3] }
  0xc3   :  { %1462 = vmatprep.mubr.f32.mxu0 %v17746_v2 }
  0xc5   :  { %v138_v37 = vpop.trf.xlu0  ;;  %v170_v8 = vpop.trf.xlu1  ;;  %300 = vxpose.xlu0.b32.end [2/2] (short) %v82_v11, 128 }
  0xc6   :  { %10647 = vmatmul.mubr.msk.f32.gmra.mrb[30].mxu0 %vm587_vm0, %v138_v37 }
  0xc7   :  { %1468 = vmatprep.mubr.f32.mxu0 %v17746_v2 }
  0xc9   :  { %v187_v56 = vpop.trf.xlu0  ;;  %v219_v17 = vpop.trf.xlu1 }
  0xca   :  { %10648 = vmatmul.mubr.msk.f32.gmra.mrb[32].mxu0 %vm587_vm0, %v155_v26 }
  0xcb   :  { %1474 = vmatprep.mubr.f32.mxu0 %v17746_v2 }
  0xcd   :  { %v188_v60 = vpop.trf.xlu0  ;;  %v220_v19 = vpop.trf.xlu1 }
  0xce   :  { %10649 = vmatmul.mubr.msk.f32.gmra.mrb[34].mxu0 %vm587_vm0, %v156_v28  ;;  %v68_v28 = vld [vmem:[%s17857_s26 + $0x38] sm:$0xff] }
  0xcf   :  { %1480 = vmatprep.mubr.f32.mxu0 %v17746_v2  ;;  %331 = vxpose.xlu1.b32.start [1/2] (short) %v68_v28, 128 }
  0xd1   :  { %v189_v3 = vpop.trf.xlu0  ;;  %v221_v21 = vpop.trf.xlu1 }
  0xd2   :  { %10650 = vmatmul.mubr.msk.f32.gmra.mrb[36].mxu0 %vm587_vm0, %v157_v31  ;;  %v97_v31 = vlaneseq }
  0xd3   :  { %1486 = vmatprep.mubr.f32.mxu0 %v17746_v2  ;;  %332 = vxpose.xlu1.b32.end [2/2] (short) %v83_v29, 128 }
  0xd4   :  { %v12989_v32 = vshrl.u32 %v97_v31, 7 }
  0xd5   :  { %v190_v5 = vpop.trf.xlu0  ;;  %v222_v23 = vpop.trf.xlu1 }
  0xd6   :  { %10651 = vmatmul.mubr.msk.f32.gmra.mrb[38].mxu0 %vm587_vm0, %v158_v33  ;;  %17859 = vst [vmem:[#allocation4_spill] sm:$0xff] %v12989_v32  ;;  %v12994_v34 = vsub.s32 0, %v12989_v32 }
  0xd7   :  { %1492 = vmatprep.mubr.f32.mxu0 %v17746_v2 }
  0xd8   :  { %17860 = vst [vmem:[#allocation5_spill] sm:$0xff] %v12994_v34  ;;  %v13005_v38 = vrot.slane %v95_v35, %v12994_v34  ;;  %v13019_v49 = vrot.slane %v4253_v43, %v12994_v34 }
  0xd9   :  { %v191_v7 = vpop.trf.xlu0  ;;  %v223_v25 = vpop.trf.xlu1 }
  0xda   :  { %10652 = vmatmul.mubr.msk.f32.gmra.mrb[40].mxu0 %vm587_vm0, %v159_v36  ;;  %v13001_v36 = vsub.s32 1, %v12989_v32 }
  0xdb   :  { %1498 = vmatprep.mubr.f32.mxu0 %v17746_v2 }
  0xdc   :  { %17861 = vst [vmem:[#allocation6_spill] sm:$0xff] %v13001_v36  ;;  %v13029_v55 = vrot.slane %v4253_v43, %v13001_v36 }
  0xdd   :  { %v192_v9 = vpop.trf.xlu0  ;;  %v224_v27 = vpop.trf.xlu1 }
  0xde   :  { %10653 = vmatmul.mubr.msk.f32.gmra.mrb[42].mxu0 %vm587_vm0, %v160_v39  ;;  %v13009_v39 = vrot.slane %v95_v35, %v13001_v36 }
  0xdf   :  { %1504 = vmatprep.mubr.f32.mxu0 %v17746_v2 }
  0xe0   :  { %17862 = vst [vmem:[#allocation7_spill] sm:$0xff] %v13009_v39 }
  0xe1   :  { %v193_v12 = vpop.trf.xlu0  ;;  %v225_v30 = vpop.trf.xlu1 }
  0xe2   :  { %10654 = vmatmul.mubr.msk.f32.gmra.mrb[44].mxu0 %vm587_vm0, %v161_v41 }
  0xe3   :  { %1510 = vmatprep.mubr.f32.mxu0 %v17746_v2 }
  0xe5   :  { %v194_v13 = vpop.trf.xlu0  ;;  %v226_v33 = vpop.trf.xlu1 }
  0xe6   :  { %10655 = vmatmul.mubr.msk.f32.gmra.mrb[46].mxu0 %vm587_vm0, %v162_v42 }
  0xe7   :  { %1516 = vmatprep.mubr.f32.mxu0 %v17746_v2 }
  0xe9   :  { %v195_v14 = vpop.trf.xlu0  ;;  %v227_v37 = vpop.trf.xlu1 }
  0xea   :  { %10656 = vmatmul.mubr.msk.f32.gmra.mrb[48].mxu0 %vm587_vm0, %v163_v45 }
  0xeb   :  { %1522 = vmatprep.mubr.f32.mxu0 %v17746_v2 }
  0xed   :  { %v196_v15 = vpop.trf.xlu0  ;;  %v228_v45 = vpop.trf.xlu1 }
  0xee   :  { %10657 = vmatmul.mubr.msk.f32.gmra.mrb[50].mxu0 %vm587_vm0, %v164_v48 }
  0xef   :  { %1528 = vmatprep.mubr.f32.mxu0 %v17746_v2 }
  0xf1   :  { %v197_v16 = vpop.trf.xlu0 }
  0xf2   :  { %10658 = vmatmul.mubr.msk.f32.gmra.mrb[52].mxu0 %vm587_vm0, %v165_v53 }
  0xf3   :  { %1534 = vmatprep.mubr.f32.mxu0 %v17746_v2 }
  0xf5   :  { %v198_v18 = vpop.trf.xlu0 }
  0xf6   :  { %10659 = vmatmul.mubr.msk.f32.gmra.mrb[54].mxu0 %vm587_vm0, %v166_v57  ;;  %v13031_v57 = vpop.trf.xlu1 }
  0xf7   :  { %1540 = vmatprep.mubr.f32.mxu0 %v17746_v2 }
  0xf9   :  { %v199_v20 = vpop.trf.xlu0 }
  0xfa   :  { %10660 = vmatmul.mubr.msk.f32.gmra.mrb[56].mxu0 %vm587_vm0, %v167_v63  ;;  %v13037_v63 = vrot.slane %v4745_v54, %v12994_v34 }
  0xfb   :  { %1546 = vmatprep.mubr.f32.mxu0 %v17746_v2 }
  0xfd   :  { %v200_v22 = vpop.trf.xlu0 }
  0xfe   :  { %10661 = vmatmul.mubr.msk.f32.gmra.mrb[58].mxu0 %vm587_vm0, %v168_v4 }
  0xff   :  { %1552 = vmatprep.mubr.f32.mxu0 %v17746_v2 }
 0x101   :  { %v201_v24 = vpop.trf.xlu0 }
 0x102   :  { %10662 = vmatmul.mubr.msk.f32.gmra.mrb[60].mxu0 %vm587_vm0, %v169_v6 }
 0x103   :  { %1558 = vmatprep.mubr.f32.mxu0 %v17746_v2 }
 0x105   :  { %v202_v26 = vpop.trf.xlu0 }
 0x106   :  { %10663 = vmatmul.mubr.msk.f32.gmra.mrb[62].mxu0 %vm587_vm0, %v170_v8 }
 0x107   :  { %1564 = vmatprep.mubr.f32.mxu0 %v17746_v2 }
 0x109   :  { %v13045_v8 = vpop.trf.xlu0 }
 0x10a   :  { %10664 = vmatmul.mubr.msk.f32.gmra.mrb[64].mxu0 %vm587_vm0, %v187_v56 }
 0x10b   :  { %1570 = vmatprep.mubr.f32.mxu0 %v17746_v2 }
 0x10e   :  { %10665 = vmatmul.mubr.msk.f32.gmra.mrb[66].mxu0 %vm587_vm0, %v188_v60 }
 0x10f   :  { %1576 = vmatprep.mubr.f32.mxu0 %v17746_v2 }
 0x112   :  { %10666 = vmatmul.mubr.msk.f32.gmra.mrb[68].mxu0 %vm587_vm0, %v189_v3  ;;  %v13042_v3 = vrot.slane %v4745_v54, %v13001_v36  ;;  %v17886_v36 = vmov 0.0  }
 0x113   :  { %1582 = vmatprep.mubr.f32.mxu0 %v17746_v2 }
 0x116   :  { %10667 = vmatmul.mubr.msk.f32.gmra.mrb[70].mxu0 %vm587_vm0, %v190_v5 }
 0x117   :  { %1588 = vmatprep.mubr.f32.mxu0 %v17746_v2 }
 0x11a   :  { %10668 = vmatmul.mubr.msk.f32.gmra.mrb[72].mxu0 %vm587_vm0, %v191_v7 }
 0x11b   :  { %1594 = vmatprep.mubr.f32.mxu0 %v17746_v2 }
 0x11e   :  { %10669 = vmatmul.mubr.msk.f32.gmra.mrb[74].mxu0 %vm587_vm0, %v192_v9 }
 0x11f   :  { %1600 = vmatprep.mubr.f32.mxu0 %v17746_v2 }
 0x122   :  { %10670 = vmatmul.mubr.msk.f32.gmra.mrb[76].mxu0 %vm587_vm0, %v193_v12 }
 0x123   :  { %1606 = vmatprep.mubr.f32.mxu0 %v17746_v2 }
 0x126   :  { %10671 = vmatmul.mubr.msk.f32.gmra.mrb[78].mxu0 %vm587_vm0, %v194_v13 }
 0x127   :  { %1612 = vmatprep.mubr.f32.mxu0 %v17746_v2 }
 0x12a   :  { %10672 = vmatmul.mubr.msk.f32.gmra.mrb[80].mxu0 %vm587_vm0, %v195_v14 }
 0x12b   :  { %1618 = vmatprep.mubr.f32.mxu0 %v17746_v2 }
 0x12e   :  { %10673 = vmatmul.mubr.msk.f32.gmra.mrb[82].mxu0 %vm587_vm0, %v196_v15 }
 0x12f   :  { %1624 = vmatprep.mubr.f32.mxu0 %v17746_v2 }
 0x132   :  { %10674 = vmatmul.mubr.msk.f32.gmra.mrb[84].mxu0 %vm587_vm0, %v197_v16  ;;  %v230_v16 = vpop.trf.xlu1 }
 0x133   :  { %1630 = vmatprep.mubr.f32.mxu0 %v17746_v2 }
 0x136   :  { %10675 = vmatmul.mubr.msk.f32.gmra.mrb[86].mxu0 %vm587_vm0, %v198_v18 }
 0x137   :  { %1636 = vmatprep.mubr.f32.mxu0 %v17746_v2 }
 0x13a   :  { %10676 = vmatmul.mubr.msk.f32.gmra.mrb[88].mxu0 %vm587_vm0, %v199_v20 }
 0x13b   :  { %1642 = vmatprep.mubr.f32.mxu0 %v17746_v2 }
 0x13e   :  { %10677 = vmatmul.mubr.msk.f32.gmra.mrb[90].mxu0 %vm587_vm0, %v200_v22 }
 0x13f   :  { %1648 = vmatprep.mubr.f32.mxu0 %v17746_v2 }
 0x142   :  { %10678 = vmatmul.mubr.msk.f32.gmra.mrb[92].mxu0 %vm587_vm0, %v201_v24 }
 0x143   :  { %1654 = vmatprep.mubr.f32.mxu0 %v17746_v2 }
 0x146   :  { %10679 = vmatmul.mubr.msk.f32.gmra.mrb[94].mxu0 %vm587_vm0, %v202_v26 }
 0x147   :  { %1660 = vmatprep.mubr.f32.mxu0 %v17746_v2 }
 0x14a   :  { %10680 = vmatmul.mubr.msk.f32.gmra.mrb[96].mxu0 %vm587_vm0, %v219_v17 }
 0x14b   :  { %1666 = vmatprep.mubr.f32.mxu0 %v17746_v2 }
 0x14e   :  { %10681 = vmatmul.mubr.msk.f32.gmra.mrb[98].mxu0 %vm587_vm0, %v220_v19 }
 0x14f   :  { %1672 = vmatprep.mubr.f32.mxu0 %v17746_v2 }
 0x152   :  { %10682 = vmatmul.mubr.msk.f32.gmra.mrb[100].mxu0 %vm587_vm0, %v221_v21 }
 0x153   :  { %1678 = vmatprep.mubr.f32.mxu0 %v17746_v2 }
 0x156   :  { %10683 = vmatmul.mubr.msk.f32.gmra.mrb[102].mxu0 %vm587_vm0, %v222_v23 }
 0x157   :  { %1684 = vmatprep.mubr.f32.mxu0 %v17746_v2 }
 0x15a   :  { %10684 = vmatmul.mubr.msk.f32.gmra.mrb[104].mxu0 %vm587_vm0, %v223_v25 }
 0x15b   :  { %1690 = vmatprep.mubr.f32.mxu0 %v17746_v2 }
 0x15d   :  { %v1374_v40 = vpop.f32.mrb[0].mxu0 }
 0x15e   :  { %v1375_v41 = vadd.f32 %v1374_v40, %v13005_v38  ;;  %v1376_v42 = vpop.f32.mrb[1].mxu0  ;;  %10685 = vmatmul.mubr.msk.f32.gmra.mrb[106].mxu0 %vm587_vm0, %v224_v27  ;;  %v13065_v40 = vpop.trf.xlu0 }
 0x15f   :  { %v1377_v44 = vadd.f32 %v1376_v42, %v13009_v39  ;;  %1696 = vmatprep.mubr.f32.mxu0 %v17746_v2 }
 0x160   :  { %vm2813_vm1 = vcmp.ge.f32.partialorder %v1375_v41, 0.0  ;;  %v3293_v46 = vmul.f32 0.01, %v1375_v41 }
 0x161   :  { %v3294_v47 = vmul.f32 0.01, %v1377_v44  ;;  %v1380_v48 = vpop.f32.mrb[2].mxu0  ;;  %vm2814_vm2 = vcmp.ge.f32.partialorder %v1377_v44, 0.0 }
 0x162   :  { %v1381_v50 = vadd.f32 %v1380_v48, %v13005_v38  ;;  %v1382_v51 = vpop.f32.mrb[3].mxu0  ;;  %10686 = vmatmul.mubr.msk.f32.gmra.mrb[108].mxu0 %vm587_vm0, %v225_v30  ;;  %v3773_v52 = vsel %vm2813_vm1, %v1375_v41, %v3293_v46  ;;  %v231_v46 = vpop.trf.xlu1 }
 0x163   :  { %v1383_v53 = vadd.f32 %v1382_v51, %v13009_v39  ;;  %1702 = vmatprep.mubr.f32.mxu0 %v17746_v2  ;;  %v3774_v58 = vsel %vm2814_vm2, %v1377_v44, %v3294_v47  ;;  %v4265_v59 = vmul.f32 %v13019_v49, %v3773_v52 }
 0x164   :  { %v3295_v60 = vmul.f32 0.01, %v1381_v50  ;;  %vm2815_vm3 = vcmp.ge.f32.partialorder %v1381_v50, 0.0  ;;  %v4266_v5 = vmul.f32 %v13029_v55, %v3774_v58 }
 0x165   :  { %v1386_v56 = vpop.f32.mrb[4].mxu0  ;;  %v3296_v0 = vmul.f32 0.01, %v1383_v53  ;;  %vm2816_vm4 = vcmp.ge.f32.partialorder %v1383_v53, 0.0  ;;  %v4757_v13 = vadd.f32 %v13037_v63, %v4265_v59 }
 0x166   :  { %v1387_v61 = vadd.f32 %v1386_v56, %v13005_v38  ;;  %v1388_v62 = vpop.f32.mrb[5].mxu0  ;;  %10687 = vmatmul.mubr.msk.f32.gmra.mrb[110].mxu0 %vm587_vm0, %v226_v33  ;;  %v3775_v9 = vsel %vm2815_vm3, %v1381_v50, %v3295_v60  ;;  %v4758_v21 = vadd.f32 %v13042_v3, %v4266_v5 }
 0x167   :  { %v1389_v1 = vadd.f32 %v1388_v62, %v13009_v39  ;;  %1708 = vmatprep.mubr.f32.mxu0 %v17746_v2  ;;  %v3776_v17 = vsel %vm2816_vm4, %v1383_v53, %v3296_v0  ;;  %v4267_v22 = vmul.f32 %v13019_v49, %v3775_v9  ;;  %v13077_v0 = vpop.trf.xlu0 }
 0x168   :  { %vm2817_vm5 = vcmp.ge.f32.partialorder %v1387_v61, 0.0  ;;  %v3297_v4 = vmul.f32 0.01, %v1387_v61  ;;  %v4268_v29 = vmul.f32 %v13029_v55, %v3776_v17 }
 0x169   :  { %vm2818_vm6 = vcmp.ge.f32.partialorder %v1389_v1, 0.0  ;;  %v3298_v6 = vmul.f32 0.01, %v1389_v1  ;;  %v1392_v7 = vpop.f32.mrb[6].mxu0  ;;  %v4759_v47 = vadd.f32 %v13037_v63, %v4267_v22 }
 0x16a   :  { %v3777_v10 = vsel %vm2817_vm5, %v1387_v61, %v3297_v4  ;;  %v1393_v11 = vadd.f32 %v1392_v7, %v13005_v38  ;;  %v1394_v12 = vpop.f32.mrb[7].mxu0  ;;  %10688 = vmatmul.mubr.msk.f32.gmra.mrb[112].mxu0 %vm587_vm0, %v227_v37  ;;  %v4760_v52 = vadd.f32 %v13042_v3, %v4268_v29 }
 0x16b   :  { %v4269_v14 = vmul.f32 %v13019_v49, %v3777_v10  ;;  %v1395_v15 = vadd.f32 %v1394_v12, %v13009_v39  ;;  %1714 = vmatprep.mubr.f32.mxu0 %v17746_v2  ;;  %v3778_v18 = vsel %vm2818_vm6, %v1389_v1, %v3298_v6  ;;  %v232_v10 = vpop.trf.xlu1 }
 0x16c   :  { %vm2819_vm7 = vcmp.ge.f32.partialorder %v1393_v11, 0.0  ;;  %v3299_v19 = vmul.f32 0.01, %v1393_v11  ;;  %v4270_v20 = vmul.f32 %v13029_v55, %v3778_v18 }
 0x16d   :  { %vm2820_vm8 = vcmp.ge.f32.partialorder %v1395_v15, 0.0  ;;  %v3300_v23 = vmul.f32 0.01, %v1395_v15  ;;  %v1398_v24 = vpop.f32.mrb[8].mxu0  ;;  %v4761_v25 = vadd.f32 %v13037_v63, %v4269_v14 }
 0x16e   :  { %v3779_v26 = vsel %vm2819_vm7, %v1393_v11, %v3299_v19  ;;  %v1399_v27 = vadd.f32 %v1398_v24, %v13005_v38  ;;  %v1400_v28 = vpop.f32.mrb[9].mxu0  ;;  %10689 = vmatmul.mubr.msk.f32.gmra.mrb[114].mxu0 %vm587_vm0, %v228_v45  ;;  %v4762_v30 = vadd.f32 %v13042_v3, %v4270_v20  ;;  %v13091_v24 = vpop.trf.xlu0 }
 0x16f   :  { %v4271_v31 = vmul.f32 %v13019_v49, %v3779_v26  ;;  %v1401_v33 = vadd.f32 %v1400_v28, %v13009_v39  ;;  %1720 = vmatprep.mubr.f32.mxu0 %v17746_v2  ;;  %v3780_v35 = vsel %vm2820_vm8, %v1395_v15, %v3300_v23  ;;  %v5237_v37 = vmax.f32 %v4757_v13, %v4761_v25 }
 0x170   :  { %vm2821_vm9 = vcmp.ge.f32.partialorder %v1399_v27, 0.0  ;;  %v3301_v41 = vmul.f32 0.01, %v1399_v27  ;;  %v4272_v42 = vmul.f32 %v13029_v55, %v3780_v35  ;;  %v5238_v43 = vmax.f32 %v4758_v21, %v4762_v30 }
 0x171   :  { %v3302_v44 = vmul.f32 0.01, %v1401_v33  ;;  %v1404_v45 = vpop.f32.mrb[10].mxu0  ;;  %v4763_v48 = vadd.f32 %v13037_v63, %v4271_v31  ;;  %vm2822_vm10 = vcmp.ge.f32.partialorder %v1401_v33, 0.0 }
 0x172   :  { %v1405_v50 = vadd.f32 %v1404_v45, %v13005_v38  ;;  %v1406_v51 = vpop.f32.mrb[11].mxu0  ;;  %10690 = vmatmul.mubr.msk.f32.gmra.mrb[116].mxu0 %vm587_vm0, %v13031_v57  ;;  %v4764_v53 = vadd.f32 %v13042_v3, %v4272_v42  ;;  %v3781_v54 = vsel %vm2821_vm9, %v1399_v27, %v3301_v41 }
 0x173   :  { %v1407_v56 = vadd.f32 %v1406_v51, %v13009_v39  ;;  %1726 = vmatprep.mubr.f32.mxu0 %v17746_v2  ;;  %v5239_v58 = vmax.f32 %v4759_v47, %v4763_v48  ;;  %v3782_v60 = vsel %vm2822_vm10, %v1401_v33, %v3302_v44  ;;  %v4273_v1 = vmul.f32 %v13019_v49, %v3781_v54  ;;  %v233_v33 = vpop.trf.xlu1 }
 0x174   :  { %v5240_v59 = vmax.f32 %v4760_v52, %v4764_v53  ;;  %v3303_v4 = vmul.f32 0.01, %v1405_v50  ;;  %vm2823_vm11 = vcmp.ge.f32.partialorder %v1405_v50, 0.0  ;;  %v4274_v11 = vmul.f32 %v13029_v55, %v3782_v60 }
 0x175   :  { %v1410_v61 = vpop.f32.mrb[12].mxu0  ;;  %v5477_v62 = vpack.c.bf16 %v5239_v58, %v5237_v37  ;;  %v3304_v7 = vmul.f32 0.01, %v1407_v56  ;;  %vm2824_vm12 = vcmp.ge.f32.partialorder %v1407_v56, 0.0  ;;  %v4765_v15 = vadd.f32 %v13037_v63, %v4273_v1  ;;  %v13107_v58 = vpop.trf.xlu0 }
 0x176   :  { %v1411_v57 = vadd.f32 %v1410_v61, %v13005_v38  ;;  %v1412_v5 = vpop.f32.mrb[13].mxu0  ;;  %10691 = vmatmul.mubr.msk.f32.gmra.mrb[118].mxu0 %vm587_vm0, %v230_v16  ;;  %v5478_v6 = vpack.c.bf16 %v5240_v59, %v5238_v43  ;;  %v3783_v16 = vsel %vm2823_vm11, %v1405_v50, %v3303_v4  ;;  %v4766_v27 = vadd.f32 %v13042_v3, %v4274_v11 }
 0x177   :  { %v1413_v9 = vadd.f32 %v1412_v5, %v13009_v39  ;;  %1732 = vmatprep.mubr.f32.mxu0 %v17746_v2  ;;  %v3784_v20 = vsel %vm2824_vm12, %v1407_v56, %v3304_v7  ;;  %v4275_v28 = vmul.f32 %v13019_v49, %v3783_v16  ;;  %v234_v5 = vpop.trf.xlu1 }
 0x178   :  { %vm2825_vm13 = vcmp.ge.f32.partialorder %v1411_v57, 0.0  ;;  %v3305_v12 = vmul.f32 0.01, %v1411_v57  ;;  %6030 = vmatprep.mubr.bf16.mxu1 %v5478_v6  ;;  %v4276_v35 = vmul.f32 %v13029_v55, %v3784_v20 }
 0x179   :  { %vm2826_vm14 = vcmp.ge.f32.partialorder %v1413_v9, 0.0  ;;  %v3306_v13 = vmul.f32 0.01, %v1413_v9  ;;  %v1416_v14 = vpop.f32.mrb[14].mxu0  ;;  %6031 = vmatmul.mubr.bf16.vlgmr.msra.gmra.mrb[0].mxu1 %v5477_v62  ;;  %v4767_v52 = vadd.f32 %v13037_v63, %v4275_v28 }
 0x17a   :  { %v3785_v17 = vsel %vm2825_vm13, %v1411_v57, %v3305_v12  ;;  %v1417_v18 = vadd.f32 %v1416_v14, %v13005_v38  ;;  %v1418_v19 = vpop.f32.mrb[15].mxu0  ;;  %10692 = vmatmul.mubr.msk.f32.gmra.mrb[120].mxu0 %vm587_vm0, %v231_v46  ;;  %v4768_v61 = vadd.f32 %v13042_v3, %v4276_v35 }
 0x17b   :  { %v4277_v21 = vmul.f32 %v13019_v49, %v3785_v17  ;;  %v3786_v22 = vsel %vm2826_vm14, %v1413_v9, %v3306_v13  ;;  %v1419_v23 = vadd.f32 %v1418_v19, %v13009_v39  ;;  %1738 = vmatprep.mubr.f32.mxu0 %v17746_v2 }
 0x17c   :  { %v4278_v25 = vmul.f32 %v13029_v55, %v3786_v22  ;;  %vm2827_vm15 = vcmp.ge.f32.partialorder %v1417_v18, 0.0  ;;  %v3307_v26 = vmul.f32 0.01, %v1417_v18 }
 0x17d   :  { %v4769_v29 = vadd.f32 %v13037_v63, %v4277_v21  ;;  %vm2828_vm1 = vcmp.ge.f32.partialorder %v1419_v23, 0.0  ;;  %v3308_v30 = vmul.f32 0.01, %v1419_v23  ;;  %v1422_v31 = vpop.f32.mrb[16].mxu0  ;;  %v69_v21 = vld [vmem:[%s17857_s26 + $0x40] sm:$0xff] }
 0x17e   :  { %v3787_v37 = vsel %vm2827_vm15, %v1417_v18, %v3307_v26  ;;  %v1423_v41 = vadd.f32 %v1422_v31, %v13005_v38  ;;  %v1424_v42 = vpop.f32.mrb[17].mxu0  ;;  %10693 = vmatmul.mubr.msk.f32.gmra.mrb[122].mxu0 %vm587_vm0, %v232_v10  ;;  %v4770_v43 = vadd.f32 %v13042_v3, %v4278_v25  ;;  %v13124_v18 = vpop.trf.xlu0  ;;  %363 = vxpose.xlu0.b32.start [1/2] (short) %v69_v21, 128 }
 0x17f   :  { %v5241_v44 = vmax.f32 %v4765_v15, %v4769_v29  ;;  %v4279_v45 = vmul.f32 %v13019_v49, %v3787_v37  ;;  %v3788_v46 = vsel %vm2828_vm1, %v1419_v23, %v3308_v30  ;;  %v1425_v47 = vadd.f32 %v1424_v42, %v13009_v39  ;;  %1744 = vmatprep.mubr.f32.mxu0 %v17746_v2  ;;  %v84_v42 = vld [vmem:[%s17857_s26 + $0xb8] sm:$0xff] }
 0x180   :  { %v4280_v48 = vmul.f32 %v13029_v55, %v3788_v46  ;;  %vm2829_vm2 = vcmp.ge.f32.partialorder %v1423_v41, 0.0  ;;  %v3309_v50 = vmul.f32 0.01, %v1423_v41  ;;  %v5242_v51 = vmax.f32 %v4766_v27, %v4770_v43 }
 0x181   :  { %v4771_v53 = vadd.f32 %v13037_v63, %v4279_v45  ;;  %v3310_v54 = vmul.f32 0.01, %v1425_v47  ;;  %v1428_v56 = vpop.f32.mrb[18].mxu0  ;;  %vm2830_vm3 = vcmp.ge.f32.partialorder %v1425_v47, 0.0 }
 0x182   :  { %v1429_v59 = vadd.f32 %v1428_v56, %v13005_v38  ;;  %v1430_v60 = vpop.f32.mrb[19].mxu0  ;;  %10694 = vmatmul.mubr.msk.f32.gmra.mrb[124].mxu0 %vm587_vm0, %v233_v33  ;;  %v4772_v62 = vadd.f32 %v13042_v3, %v4280_v48  ;;  %v3789_v4 = vsel %vm2829_vm2, %v1423_v41, %v3309_v50  ;;  %364 = vxpose.xlu0.b32.end [2/2] (short) %v84_v42, 128 }
 0x183   :  { %v5243_v1 = vmax.f32 %v4767_v52, %v4771_v53  ;;  %v1431_v57 = vadd.f32 %v1430_v60, %v13009_v39  ;;  %1750 = vmatprep.mubr.f32.mxu0 %v17746_v2  ;;  %v3790_v9 = vsel %vm2830_vm3, %v1425_v47, %v3310_v54  ;;  %v4281_v11 = vmul.f32 %v13019_v49, %v3789_v4  ;;  %v13144_v47 = vpop.trf.xlu0 }
 0x184   :  { %v5244_v6 = vmax.f32 %v4768_v61, %v4772_v62  ;;  %v3311_v12 = vmul.f32 0.01, %v1429_v59  ;;  %vm2831_vm4 = vcmp.ge.f32.partialorder %v1429_v59, 0.0  ;;  %v4282_v19 = vmul.f32 %v13029_v55, %v3790_v9 }
 0x185   :  { %v13115_v7 = vpack.c.bf16 %v5243_v1, %v5241_v44  ;;  %v1434_v10 = vpop.f32.mrb[20].mxu0  ;;  %v3312_v16 = vmul.f32 0.01, %v1431_v57  ;;  %vm2832_vm5 = vcmp.ge.f32.partialorder %v1431_v57, 0.0  ;;  %v4773_v25 = vadd.f32 %v13037_v63, %v4281_v11 }
 0x186   :  { %v1435_v13 = vadd.f32 %v1434_v10, %v13005_v38  ;;  %v1436_v14 = vpop.f32.mrb[21].mxu0  ;;  %10695 = vmatmul.mubr.msk.f32.gmra.mrb[126].mxu0 %vm587_vm0, %v234_v5  ;;  %v13120_v15 = vpack.c.bf16 %v5244_v6, %v5242_v51  ;;  %v3791_v26 = vsel %vm2831_vm4, %v1429_v59, %v3311_v12  ;;  %v4774_v43 = vadd.f32 %v13042_v3, %v4282_v19 }
 0x187   :  { %v1437_v17 = vadd.f32 %v1436_v14, %v13009_v39  ;;  %1756 = vmatprep.mubr.f32.mxu0 %v17746_v2  ;;  %v3792_v30 = vsel %vm2832_vm5, %v1431_v57, %v3312_v16  ;;  %v13164_v16 = vpop.trf.xlu0 }
 0x188   :  { %vm2833_vm6 = vcmp.ge.f32.partialorder %v1435_v13, 0.0  ;;  %v3313_v20 = vmul.f32 0.01, %v1435_v13  ;;  %v4284_v48 = vmul.f32 %v13029_v55, %v3792_v30 }
 0x189   :  { %vm2834_vm7 = vcmp.ge.f32.partialorder %v1437_v17, 0.0  ;;  %v3314_v22 = vmul.f32 0.01, %v1437_v17  ;;  %v1440_v23 = vpop.f32.mrb[22].mxu0 }
 0x18a   :  { %v3793_v27 = vsel %vm2833_vm6, %v1435_v13, %v3313_v20  ;;  %v1441_v28 = vadd.f32 %v1440_v23, %v13005_v38  ;;  %v1442_v29 = vpop.f32.mrb[23].mxu0  ;;  %10696 = vmatmul.mubr.msk.f32.gmra.mrb[128].mxu0 %vm587_vm0, %v13045_v8  ;;  %v4283_v8 = vmul.f32 %v13019_v49, %v3791_v26  ;;  %v4776_v10 = vadd.f32 %v13042_v3, %v4284_v48 }
 0x18b   :  { %v4285_v31 = vmul.f32 %v13019_v49, %v3793_v27  ;;  %v3794_v33 = vsel %vm2834_vm7, %v1437_v17, %v3314_v22  ;;  %v1443_v35 = vadd.f32 %v1442_v29, %v13009_v39  ;;  %1762 = vmatprep.mubr.f32.mxu0 %v17746_v2 }
 0x18c   :  { %v4286_v37 = vmul.f32 %v13029_v55, %v3794_v33  ;;  %vm2835_vm8 = vcmp.ge.f32.partialorder %v1441_v28, 0.0  ;;  %v3315_v41 = vmul.f32 0.01, %v1441_v28  ;;  %v4775_v4 = vadd.f32 %v13037_v63, %v4283_v8 }
 0x18d   :  { %v4777_v44 = vadd.f32 %v13037_v63, %v4285_v31  ;;  %vm2836_vm9 = vcmp.ge.f32.partialorder %v1443_v35, 0.0  ;;  %v3316_v45 = vmul.f32 0.01, %v1443_v35  ;;  %v1446_v46 = vpop.f32.mrb[24].mxu0 }
 0x18e   :  { %v3795_v50 = vsel %vm2835_vm8, %v1441_v28, %v3315_v41  ;;  %v1447_v51 = vadd.f32 %v1446_v46, %v13005_v38  ;;  %v1448_v52 = vpop.f32.mrb[25].mxu0  ;;  %10697 = vmatmul.mubr.msk.f32.gmra.mrb[130].mxu0 %vm587_vm0, %v13065_v40  ;;  %v4778_v53 = vadd.f32 %v13042_v3, %v4286_v37 }
 0x18f   :  { %v5245_v54 = vmax.f32 %v4773_v25, %v4777_v44  ;;  %v4287_v56 = vmul.f32 %v13019_v49, %v3795_v50  ;;  %v3796_v59 = vsel %vm2836_vm9, %v1443_v35, %v3316_v45  ;;  %v1449_v60 = vadd.f32 %v1448_v52, %v13009_v39  ;;  %1768 = vmatprep.mubr.f32.mxu0 %v17746_v2  ;;  %v13177_v35 = vpop.trf.xlu0 }
 0x190   :  { %v4288_v61 = vmul.f32 %v13029_v55, %v3796_v59  ;;  %vm2837_vm10 = vcmp.ge.f32.partialorder %v1447_v51, 0.0  ;;  %v3317_v62 = vmul.f32 0.01, %v1447_v51  ;;  %v5246_v1 = vmax.f32 %v4774_v43, %v4778_v53 }
 0x191   :  { %v4779_v57 = vadd.f32 %v13037_v63, %v4287_v56  ;;  %v3318_v40 = vmul.f32 0.01, %v1449_v60  ;;  %v1452_v5 = vpop.f32.mrb[26].mxu0  ;;  %vm2838_vm11 = vcmp.ge.f32.partialorder %v1449_v60, 0.0 }
 0x192   :  { %v1453_v6 = vadd.f32 %v1452_v5, %v13005_v38  ;;  %v1454_v9 = vpop.f32.mrb[27].mxu0  ;;  %10698 = vmatmul.mubr.msk.f32.gmra.mrb[132].mxu0 %vm587_vm0, %v13077_v0  ;;  %v4780_v11 = vadd.f32 %v13042_v3, %v4288_v61  ;;  %v3797_v13 = vsel %vm2837_vm10, %v1447_v51, %v3317_v62 }
 0x193   :  { %v5247_v12 = vmax.f32 %v4775_v4, %v4779_v57  ;;  %v1455_v14 = vadd.f32 %v1454_v9, %v13009_v39  ;;  %1774 = vmatprep.mubr.f32.mxu0 %v17746_v2  ;;  %v3798_v19 = vsel %vm2838_vm11, %v1449_v60, %v3318_v40  ;;  %v4289_v22 = vmul.f32 %v13019_v49, %v3797_v13  ;;  %v13198_v5 = vpop.trf.xlu0 }
 0x194   :  { %v5248_v17 = vmax.f32 %v4776_v10, %v4780_v11  ;;  %v3319_v0 = vmul.f32 0.01, %v1453_v6  ;;  %vm2839_vm12 = vcmp.ge.f32.partialorder %v1453_v6, 0.0  ;;  %v4290_v29 = vmul.f32 %v13029_v55, %v3798_v19 }
 0x195   :  { %v1458_v20 = vpop.f32.mrb[28].mxu0  ;;  %v13166_v21 = vpack.c.bf16 %v5247_v12, %v5245_v54  ;;  %v3320_v27 = vmul.f32 0.01, %v1455_v14  ;;  %vm2840_vm13 = vcmp.ge.f32.partialorder %v1455_v14, 0.0 }
 0x196   :  { %v1459_v23 = vadd.f32 %v1458_v20, %v13005_v38  ;;  %v1460_v25 = vpop.f32.mrb[29].mxu0  ;;  %10699 = vmatmul.mubr.msk.f32.gmra.mrb[134].mxu0 %vm587_vm0, %v13091_v24  ;;  %v13172_v26 = vpack.c.bf16 %v5248_v17, %v5246_v1  ;;  %v4781_v24 = vadd.f32 %v13037_v63, %v4289_v22  ;;  %v3799_v37 = vsel %vm2839_vm12, %v1453_v6, %v3319_v0 }
 0x197   :  { %v1461_v28 = vadd.f32 %v1460_v25, %v13009_v39  ;;  %1780 = vmatprep.mubr.f32.mxu0 %v17746_v2  ;;  %v3800_v8 = vsel %vm2840_vm13, %v1455_v14, %v3320_v27  ;;  %v4782_v51 = vadd.f32 %v13042_v3, %v4290_v29  ;;  %v4291_v52 = vmul.f32 %v13019_v49, %v3799_v37  ;;  %v13210_v29 = vpop.trf.xlu0 }
 0x198   :  { %vm2841_vm14 = vcmp.ge.f32.partialorder %v1459_v23, 0.0  ;;  %v3321_v30 = vmul.f32 0.01, %v1459_v23  ;;  %v4292_v56 = vmul.f32 %v13029_v55, %v3800_v8 }
 0x199   :  { %vm2842_vm15 = vcmp.ge.f32.partialorder %v1461_v28, 0.0  ;;  %v3322_v31 = vmul.f32 0.01, %v1461_v28  ;;  %v1464_v33 = vpop.f32.mrb[30].mxu0  ;;  %v4783_v11 = vadd.f32 %v13037_v63, %v4291_v52 }
 0x19a   :  { %v3801_v41 = vsel %vm2841_vm14, %v1459_v23, %v3321_v30  ;;  %v1465_v42 = vadd.f32 %v1464_v33, %v13005_v38  ;;  %v1466_v43 = vpop.f32.mrb[31].mxu0  ;;  %10700 = vmatmul.mubr.msk.f32.gmra.mrb[136].mxu0 %vm587_vm0, %v13107_v58  ;;  %v4784_v19 = vadd.f32 %v13042_v3, %v4292_v56 }
 0x19b   :  { %v4293_v44 = vmul.f32 %v13019_v49, %v3801_v41  ;;  %v3802_v45 = vsel %vm2842_vm15, %v1461_v28, %v3322_v31  ;;  %v1467_v46 = vadd.f32 %v1466_v43, %v13009_v39  ;;  %1786 = vmatprep.mubr.f32.mxu0 %v17746_v2 }
 0x19c   :  { %v4294_v48 = vmul.f32 %v13029_v55, %v3802_v45  ;;  %vm2843_vm1 = vcmp.ge.f32.partialorder %v1465_v42, 0.0  ;;  %v3323_v50 = vmul.f32 0.01, %v1465_v42 }
 0x19d   :  { %v4785_v53 = vadd.f32 %v13037_v63, %v4293_v44  ;;  %vm2844_vm2 = vcmp.ge.f32.partialorder %v1467_v46, 0.0  ;;  %v3324_v58 = vmul.f32 0.01, %v1467_v46  ;;  %v1470_v54 = vpop.f32.mrb[32].mxu0 }
 0x19e   :  { %v3803_v59 = vsel %vm2843_vm1, %v1465_v42, %v3323_v50  ;;  %v1471_v60 = vadd.f32 %v1470_v54, %v13005_v38  ;;  %v1472_v61 = vpop.f32.mrb[33].mxu0  ;;  %10701 = vmatmul.mubr.msk.f32.gmra.mrb[138].mxu0 %vm587_vm0, %v13124_v18  ;;  %v4786_v62 = vadd.f32 %v13042_v3, %v4294_v48 }
 0x19f   :  { %v5249_v1 = vmax.f32 %v4781_v24, %v4785_v53  ;;  %v4295_v4 = vmul.f32 %v13019_v49, %v3803_v59  ;;  %v3804_v57 = vsel %vm2844_vm2, %v1467_v46, %v3324_v58  ;;  %v1473_v40 = vadd.f32 %v1472_v61, %v13009_v39  ;;  %1792 = vmatprep.mubr.f32.mxu0 %v17746_v2  ;;  %v13223_v46 = vpop.trf.xlu1  ;;  %v262_v59 = vpop.trf.xlu0 }
 0x1a0   :  { %v4296_v6 = vmul.f32 %v13029_v55, %v3804_v57  ;;  %vm2845_vm3 = vcmp.ge.f32.partialorder %v1471_v60, 0.0  ;;  %v3325_v9 = vmul.f32 0.01, %v1471_v60  ;;  %v5250_v10 = vmax.f32 %v4782_v51, %v4786_v62 }
 0x1a1   :  { %v4787_v18 = vadd.f32 %v13037_v63, %v4295_v4  ;;  %v3326_v12 = vmul.f32 0.01, %v1473_v40  ;;  %v1476_v13 = vpop.f32.mrb[34].mxu0  ;;  %vm2846_vm4 = vcmp.ge.f32.partialorder %v1473_v40, 0.0 }
 0x1a2   :  { %v1477_v14 = vadd.f32 %v1476_v13, %v13005_v38  ;;  %v1478_v17 = vpop.f32.mrb[35].mxu0  ;;  %10702 = vmatmul.mubr.msk.f32.gmra.mrb[140].mxu0 %vm587_vm0, %v13144_v47  ;;  %v4788_v20 = vadd.f32 %v13042_v3, %v4296_v6  ;;  %v3805_v0 = vsel %vm2845_vm3, %v1471_v60, %v3325_v9 }
 0x1a3   :  { %v5251_v22 = vmax.f32 %v4783_v11, %v4787_v18  ;;  %v1479_v23 = vadd.f32 %v1478_v17, %v13009_v39  ;;  %1798 = vmatprep.mubr.f32.mxu0 %v17746_v2  ;;  %v3806_v27 = vsel %vm2846_vm4, %v1473_v40, %v3326_v12  ;;  %v4297_v31 = vmul.f32 %v13019_v49, %v3805_v0  ;;  %v13244_v17 = vpop.trf.xlu1 }
 0x1a4   :  { %v5252_v25 = vmax.f32 %v4784_v19, %v4788_v20  ;;  %v3327_v47 = vmul.f32 0.01, %v1477_v14  ;;  %vm2847_vm5 = vcmp.ge.f32.partialorder %v1477_v14, 0.0  ;;  %v4298_v43 = vmul.f32 %v13029_v55, %v3806_v27  ;;  %v263_v27 = vpop.trf.xlu0 }
 0x1a5   :  { %v1482_v28 = vpop.f32.mrb[36].mxu0  ;;  %v13212_v30 = vpack.c.bf16 %v5251_v22, %v5249_v1  ;;  %v3328_v41 = vmul.f32 0.01, %v1479_v23  ;;  %vm2848_vm6 = vcmp.ge.f32.partialorder %v1479_v23, 0.0  ;;  %v4789_v52 = vadd.f32 %v13037_v63, %v4297_v31 }
 0x1a6   :  { %v1483_v33 = vadd.f32 %v1482_v28, %v13005_v38  ;;  %v1484_v24 = vpop.f32.mrb[37].mxu0  ;;  %10703 = vmatmul.mubr.msk.f32.gmra.mrb[142].mxu0 %vm587_vm0, %v13164_v16  ;;  %v13218_v37 = vpack.c.bf16 %v5252_v25, %v5250_v10  ;;  %v3807_v48 = vsel %vm2847_vm5, %v1477_v14, %v3327_v47  ;;  %v4790_v62 = vadd.f32 %v13042_v3, %v4298_v43 }
 0x1a7   :  { %17863 = vst [vmem:[#allocation8_spill] sm:$0xff] %v13212_v30  ;;  %v1485_v42 = vadd.f32 %v1484_v24, %v13009_v39  ;;  %1804 = vmatprep.mubr.f32.mxu0 %v17746_v2  ;;  %v3808_v53 = vsel %vm2848_vm6, %v1479_v23, %v3328_v41  ;;  %v4299_v1 = vmul.f32 %v13019_v49, %v3807_v48  ;;  %v13258_v48 = vpop.trf.xlu1 }
 0x1a8   :  { %17864 = vst [vmem:[#allocation9_spill] sm:$0xff] %v13218_v37  ;;  %vm2849_vm7 = vcmp.ge.f32.partialorder %v1483_v33, 0.0  ;;  %v3329_v8 = vmul.f32 0.01, %v1483_v33  ;;  %v4300_v40 = vmul.f32 %v13029_v55, %v3808_v53 }
 0x1a9   :  { %vm2850_vm8 = vcmp.ge.f32.partialorder %v1485_v42, 0.0  ;;  %v3330_v44 = vmul.f32 0.01, %v1485_v42  ;;  %v1488_v45 = vpop.f32.mrb[38].mxu0 }
 0x1aa   :  { %v3809_v16 = vsel %vm2849_vm7, %v1483_v33, %v3329_v8  ;;  %v1489_v50 = vadd.f32 %v1488_v45, %v13005_v38  ;;  %v1490_v51 = vpop.f32.mrb[39].mxu0  ;;  %10704 = vmatmul.mubr.msk.f32.gmra.mrb[144].mxu0 %vm587_vm0, %v13177_v35  ;;  %v4792_v47 = vadd.f32 %v13042_v3, %v4300_v40 }
 0x1ab   :  { %v4301_v58 = vmul.f32 %v13019_v49, %v3809_v16  ;;  %v3810_v54 = vsel %vm2850_vm8, %v1485_v42, %v3330_v44  ;;  %v1491_v56 = vadd.f32 %v1490_v51, %v13009_v39  ;;  %1810 = vmatprep.mubr.f32.mxu0 %v17746_v2 }
 0x1ac   :  { %v4302_v60 = vmul.f32 %v13029_v55, %v3810_v54  ;;  %vm2851_vm9 = vcmp.ge.f32.partialorder %v1489_v50, 0.0  ;;  %v3331_v61 = vmul.f32 0.01, %v1489_v50  ;;  %v264_v54 = vpop.trf.xlu0 }
 0x1ad   :  { %vm2852_vm10 = vcmp.ge.f32.partialorder %v1491_v56, 0.0  ;;  %v3332_v35 = vmul.f32 0.01, %v1491_v56  ;;  %v1494_v4 = vpop.f32.mrb[40].mxu0  ;;  %v4793_v57 = vadd.f32 %v13037_v63, %v4301_v58 }
 0x1ae   :  { %v3811_v6 = vsel %vm2851_vm9, %v1489_v50, %v3331_v61  ;;  %v1495_v9 = vadd.f32 %v1494_v4, %v13005_v38  ;;  %v1496_v10 = vpop.f32.mrb[41].mxu0  ;;  %10705 = vmatmul.mubr.msk.f32.gmra.mrb[146].mxu0 %vm587_vm0, %v13198_v5  ;;  %v4794_v11 = vadd.f32 %v13042_v3, %v4302_v60  ;;  %v4791_v5 = vadd.f32 %v13037_v63, %v4299_v1 }
 0x1af   :  { %v4303_v18 = vmul.f32 %v13019_v49, %v3811_v6  ;;  %v3812_v12 = vsel %vm2852_vm10, %v1491_v56, %v3332_v35  ;;  %v1497_v13 = vadd.f32 %v1496_v10, %v13009_v39  ;;  %1816 = vmatprep.mubr.f32.mxu0 %v17746_v2  ;;  %v5253_v14 = vmax.f32 %v4789_v52, %v4793_v57 }
 0x1b0   :  { %v4304_v19 = vmul.f32 %v13029_v55, %v3812_v12  ;;  %vm2853_vm11 = vcmp.ge.f32.partialorder %v1495_v9, 0.0  ;;  %v3333_v20 = vmul.f32 0.01, %v1495_v9  ;;  %v5254_v22 = vmax.f32 %v4790_v62, %v4794_v11  ;;  %v13276_v11 = vpop.trf.xlu1 }
 0x1b1   :  { %v3334_v0 = vmul.f32 0.01, %v1497_v13  ;;  %v1500_v23 = vpop.f32.mrb[42].mxu0  ;;  %v4795_v25 = vadd.f32 %v13037_v63, %v4303_v18  ;;  %vm2854_vm12 = vcmp.ge.f32.partialorder %v1497_v13, 0.0 }
 0x1b2   :  { %v1501_v28 = vadd.f32 %v1500_v23, %v13005_v38  ;;  %v1502_v31 = vpop.f32.mrb[43].mxu0  ;;  %10706 = vmatmul.mubr.msk.f32.gmra.mrb[148].mxu0 %vm587_vm0, %v13210_v29  ;;  %v4796_v33 = vadd.f32 %v13042_v3, %v4304_v19  ;;  %v3813_v24 = vsel %vm2853_vm11, %v1495_v9, %v3333_v20 }
 0x1b3   :  { %v1503_v41 = vadd.f32 %v1502_v31, %v13009_v39  ;;  %1822 = vmatprep.mubr.f32.mxu0 %v17746_v2  ;;  %v5255_v42 = vmax.f32 %v4791_v5, %v4795_v25  ;;  %v3814_v8 = vsel %vm2854_vm12, %v1497_v13, %v3334_v0  ;;  %v4305_v16 = vmul.f32 %v13019_v49, %v3813_v24  ;;  %v265_v0 = vpop.trf.xlu0 }
 0x1b4   :  { %v5256_v43 = vmax.f32 %v4792_v47, %v4796_v33  ;;  %v3335_v29 = vmul.f32 0.01, %v1501_v28  ;;  %vm2855_vm13 = vcmp.ge.f32.partialorder %v1501_v28, 0.0  ;;  %v4306_v56 = vmul.f32 %v13029_v55, %v3814_v8 }
 0x1b5   :  { %v1506_v44 = vpop.f32.mrb[44].mxu0  ;;  %v13256_v45 = vpack.c.bf16 %v5255_v42, %v5253_v14  ;;  %v3336_v53 = vmul.f32 0.01, %v1503_v41  ;;  %vm2856_vm14 = vcmp.ge.f32.partialorder %v1503_v41, 0.0 }
 0x1b6   :  { %v1507_v50 = vadd.f32 %v1506_v44, %v13005_v38  ;;  %v1508_v51 = vpop.f32.mrb[45].mxu0  ;;  %10707 = vmatmul.mubr.msk.f32.gmra.mrb[150].mxu0 %vm587_vm0, %v262_v59  ;;  %v13263_v52 = vpack.c.bf16 %v5256_v43, %v5254_v22  ;;  %v4797_v59 = vadd.f32 %v13037_v63, %v4305_v16  ;;  %v3815_v1 = vsel %vm2855_vm13, %v1501_v28, %v3335_v29 }
 0x1b7   :  { %17865 = vst [vmem:[#allocation10_spill] sm:$0xff] %v13256_v45  ;;  %v1509_v58 = vadd.f32 %v1508_v51, %v13009_v39  ;;  %1828 = vmatprep.mubr.f32.mxu0 %v17746_v2  ;;  %v3816_v40 = vsel %vm2856_vm14, %v1503_v41, %v3336_v53  ;;  %v4798_v13 = vadd.f32 %v13042_v3, %v4306_v56 }
 0x1b8   :  { %17866 = vst [vmem:[#allocation11_spill] sm:$0xff] %v13263_v52  ;;  %vm2857_vm15 = vcmp.ge.f32.partialorder %v1507_v50, 0.0  ;;  %v3337_v60 = vmul.f32 0.01, %v1507_v50  ;;  %6038 = vmatprep.mubr.bf16.mxu1 %v13263_v52  ;;  %v4307_v14 = vmul.f32 %v13019_v49, %v3815_v1  ;;  %v4308_v23 = vmul.f32 %v13029_v55, %v3816_v40 }
 0x1b9   :  { %vm2858_vm1 = vcmp.ge.f32.partialorder %v1509_v58, 0.0  ;;  %v3338_v61 = vmul.f32 0.01, %v1509_v58  ;;  %v1512_v62 = vpop.f32.mrb[46].mxu0  ;;  %6039 = vmatmul.mubr.bf16.gmra.mrb[4].mxu1 %v13256_v45 }
 0x1ba   :  { %v3817_v35 = vsel %vm2857_vm15, %v1507_v50, %v3337_v60  ;;  %v1513_v4 = vadd.f32 %v1512_v62, %v13005_v38  ;;  %v1514_v57 = vpop.f32.mrb[47].mxu0  ;;  %10708 = vmatmul.mubr.msk.f32.gmra.mrb[152].mxu0 %vm587_vm0, %v263_v27  ;;  %v4799_v8 = vadd.f32 %v13037_v63, %v4307_v14  ;;  %v13292_v50 = vpop.trf.xlu1 }
 0x1bb   :  { %v4309_v6 = vmul.f32 %v13019_v49, %v3817_v35  ;;  %v3818_v9 = vsel %vm2858_vm1, %v1509_v58, %v3338_v61  ;;  %v1515_v10 = vadd.f32 %v1514_v57, %v13009_v39  ;;  %1834 = vmatprep.mubr.f32.mxu0 %v17746_v2  ;;  %v4800_v58 = vadd.f32 %v13042_v3, %v4308_v23  ;;  %v266_v62 = vpop.trf.xlu0 }
 0x1bc   :  { %v4310_v18 = vmul.f32 %v13029_v55, %v3818_v9  ;;  %vm2859_vm2 = vcmp.ge.f32.partialorder %v1513_v4, 0.0  ;;  %v3339_v12 = vmul.f32 0.01, %v1513_v4 }
 0x1bd   :  { %v4801_v19 = vadd.f32 %v13037_v63, %v4309_v6  ;;  %vm2860_vm3 = vcmp.ge.f32.partialorder %v1515_v10, 0.0  ;;  %v3340_v20 = vmul.f32 0.01, %v1515_v10  ;;  %v1518_v22 = vpop.f32.mrb[48].mxu0 }
 0x1be   :  { %v3819_v5 = vsel %vm2859_vm2, %v1513_v4, %v3339_v12  ;;  %v1519_v25 = vadd.f32 %v1518_v22, %v13005_v38  ;;  %v1520_v27 = vpop.f32.mrb[49].mxu0  ;;  %10709 = vmatmul.mubr.msk.f32.gmra.mrb[154].mxu0 %vm587_vm0, %v264_v54  ;;  %v4802_v28 = vadd.f32 %v13042_v3, %v4310_v18 }
 0x1bf   :  { %v5257_v31 = vmax.f32 %v4797_v59, %v4801_v19  ;;  %v4311_v47 = vmul.f32 %v13019_v49, %v3819_v5  ;;  %v3820_v33 = vsel %vm2860_vm3, %v1515_v10, %v3340_v20  ;;  %v1521_v24 = vadd.f32 %v1520_v27, %v13009_v39  ;;  %1840 = vmatprep.mubr.f32.mxu0 %v17746_v2  ;;  %v70_v20 = vld [vmem:[%s17857_s26 + $0x48] sm:$0xff] }
 0x1c0   :  { %v4312_v41 = vmul.f32 %v13029_v55, %v3820_v33  ;;  %vm2861_vm4 = vcmp.ge.f32.partialorder %v1519_v25, 0.0  ;;  %v3341_v42 = vmul.f32 0.01, %v1519_v25  ;;  %v5258_v43 = vmax.f32 %v4798_v13, %v4802_v28  ;;  %v13309_v13 = vpop.trf.xlu1  ;;  %395 = vxpose.xlu1.b32.start [1/2] (short) %v70_v20, 128 }
 0x1c1   :  { %v4803_v44 = vadd.f32 %v13037_v63, %v4311_v47  ;;  %v3342_v16 = vmul.f32 0.01, %v1521_v24  ;;  %v1524_v29 = vpop.f32.mrb[50].mxu0  ;;  %vm2862_vm5 = vcmp.ge.f32.partialorder %v1521_v24, 0.0 }
 0x1c2   :  { %v1525_v51 = vadd.f32 %v1524_v29, %v13005_v38  ;;  %v1526_v53 = vpop.f32.mrb[51].mxu0  ;;  %10710 = vmatmul.mubr.msk.f32.gmra.mrb[156].mxu0 %vm587_vm0, %v265_v0  ;;  %v4804_v54 = vadd.f32 %v13042_v3, %v4312_v41  ;;  %v3821_v60 = vsel %vm2861_vm4, %v1519_v25, %v3341_v42 }
 0x1c3   :  { %v5259_v56 = vmax.f32 %v4799_v8, %v4803_v44  ;;  %v1527_v61 = vadd.f32 %v1526_v53, %v13009_v39  ;;  %1846 = vmatprep.mubr.f32.mxu0 %v17746_v2  ;;  %v3822_v35 = vsel %vm2862_vm5, %v1521_v24, %v3342_v16  ;;  %v4313_v57 = vmul.f32 %v13019_v49, %v3821_v60 }
 0x1c4   :  { %v5260_v59 = vmax.f32 %v4800_v58, %v4804_v54  ;;  %v3343_v40 = vmul.f32 0.01, %v1525_v51  ;;  %vm2863_vm6 = vcmp.ge.f32.partialorder %v1525_v51, 0.0  ;;  %v4314_v14 = vmul.f32 %v13029_v55, %v3822_v35  ;;  %v13328_v29 = vpop.trf.xlu1 }
 0x1c5   :  { %v13300_v1 = vpack.c.bf16 %v5259_v56, %v5257_v31  ;;  %v1530_v4 = vpop.f32.mrb[52].mxu0  ;;  %v3344_v18 = vmul.f32 0.01, %v1527_v61  ;;  %vm2864_vm7 = vcmp.ge.f32.partialorder %v1527_v61, 0.0  ;;  %v4805_v28 = vadd.f32 %v13037_v63, %v4313_v57 }
 0x1c6   :  { %v1531_v6 = vadd.f32 %v1530_v4, %v13005_v38  ;;  %v1532_v9 = vpop.f32.mrb[53].mxu0  ;;  %10711 = vmatmul.mubr.msk.f32.gmra.mrb[158].mxu0 %vm587_vm0, %v266_v62  ;;  %v13305_v10 = vpack.c.bf16 %v5260_v59, %v5258_v43  ;;  %v3823_v23 = vsel %vm2863_vm6, %v1525_v51, %v3343_v40  ;;  %v85_v43 = vld [vmem:[%s17857_s26 + $0xc0] sm:$0xff] }
 0x1c7   :  { %17867 = vst [vmem:[#allocation12_spill] sm:$0xff] %v13300_v1  ;;  %v1533_v12 = vadd.f32 %v1532_v9, %v13009_v39  ;;  %1852 = vmatprep.mubr.f32.mxu0 %v17746_v2  ;;  %v3824_v31 = vsel %vm2864_vm7, %v1527_v61, %v3344_v18  ;;  %v4315_v8 = vmul.f32 %v13019_v49, %v3823_v23 }
 0x1c8   :  { %17868 = vst [vmem:[#allocation13_spill] sm:$0xff] %v13305_v10  ;;  %vm2865_vm8 = vcmp.ge.f32.partialorder %v1531_v6, 0.0  ;;  %v3345_v19 = vmul.f32 0.01, %v1531_v6  ;;  %396 = vxpose.xlu1.b32.end [2/2] (short) %v85_v43, 128  ;;  %v4316_v53 = vmul.f32 %v13029_v55, %v3824_v31  ;;  %v13349_v23 = vpop.trf.xlu1 }
 0x1c9   :  { %vm2866_vm9 = vcmp.ge.f32.partialorder %v1533_v12, 0.0  ;;  %v3346_v22 = vmul.f32 0.01, %v1533_v12  ;;  %v1536_v0 = vpop.f32.mrb[54].mxu0  ;;  %v4807_v18 = vadd.f32 %v13037_v63, %v4315_v8 }
 0x1ca   :  { %v3825_v5 = vsel %vm2865_vm8, %v1531_v6, %v3345_v19  ;;  %v1537_v25 = vadd.f32 %v1536_v0, %v13005_v38  ;;  %v1538_v27 = vpop.f32.mrb[55].mxu0  ;;  %10712 = vmatmul.mubr.msk.f32.gmra.mrb[160].mxu0 %vm587_vm0, %v13223_v46  ;;  %v4806_v46 = vadd.f32 %v13042_v3, %v4314_v14  ;;  %v4808_v19 = vadd.f32 %v13042_v3, %v4316_v53 }
 0x1cb   :  { %v4317_v47 = vmul.f32 %v13019_v49, %v3825_v5  ;;  %v3826_v33 = vsel %vm2866_vm9, %v1533_v12, %v3346_v22  ;;  %v1539_v24 = vadd.f32 %v1538_v27, %v13009_v39  ;;  %1858 = vmatprep.mubr.f32.mxu0 %v17746_v2 }
 0x1cc   :  { %v4318_v41 = vmul.f32 %v13029_v55, %v3826_v33  ;;  %vm2867_vm10 = vcmp.ge.f32.partialorder %v1537_v25, 0.0  ;;  %v3347_v42 = vmul.f32 0.01, %v1537_v25 }
 0x1cd   :  { %vm2868_vm11 = vcmp.ge.f32.partialorder %v1539_v24, 0.0  ;;  %v3348_v44 = vmul.f32 0.01, %v1539_v24  ;;  %v1542_v16 = vpop.f32.mrb[56].mxu0  ;;  %v4809_v51 = vadd.f32 %v13037_v63, %v4317_v47 }
 0x1ce   :  { %v3827_v58 = vsel %vm2867_vm10, %v1537_v25, %v3347_v42  ;;  %v1543_v54 = vadd.f32 %v1542_v16, %v13005_v38  ;;  %v1544_v56 = vpop.f32.mrb[57].mxu0  ;;  %10713 = vmatmul.mubr.msk.f32.gmra.mrb[162].mxu0 %vm587_vm0, %v13244_v17  ;;  %v4810_v60 = vadd.f32 %v13042_v3, %v4318_v41 }
 0x1cf   :  { %v4319_v61 = vmul.f32 %v13019_v49, %v3827_v58  ;;  %v3828_v62 = vsel %vm2868_vm11, %v1539_v24, %v3348_v44  ;;  %v1545_v59 = vadd.f32 %v1544_v56, %v13009_v39  ;;  %1864 = vmatprep.mubr.f32.mxu0 %v17746_v2  ;;  %v5261_v35 = vmax.f32 %v4805_v28, %v4809_v51  ;;  %v13362_v51 = vpop.trf.xlu1 }
 0x1d0   :  { %v4320_v4 = vmul.f32 %v13029_v55, %v3828_v62  ;;  %vm2869_vm12 = vcmp.ge.f32.partialorder %v1543_v54, 0.0  ;;  %v3349_v57 = vmul.f32 0.01, %v1543_v54  ;;  %v5262_v40 = vmax.f32 %v4806_v46, %v4810_v60 }
 0x1d1   :  { %v3350_v6 = vmul.f32 0.01, %v1545_v59  ;;  %v1548_v9 = vpop.f32.mrb[58].mxu0  ;;  %v4811_v17 = vadd.f32 %v13037_v63, %v4319_v61  ;;  %vm2870_vm13 = vcmp.ge.f32.partialorder %v1545_v59, 0.0 }
 0x1d2   :  { %v1549_v12 = vadd.f32 %v1548_v9, %v13005_v38  ;;  %v1550_v14 = vpop.f32.mrb[59].mxu0  ;;  %10714 = vmatmul.mubr.msk.f32.gmra.mrb[164].mxu0 %vm587_vm0, %v13258_v48  ;;  %v4812_v20 = vadd.f32 %v13042_v3, %v4320_v4  ;;  %v3829_v22 = vsel %vm2869_vm12, %v1543_v54, %v3349_v57 }
 0x1d3   :  { %v1551_v0 = vadd.f32 %v1550_v14, %v13009_v39  ;;  %1870 = vmatprep.mubr.f32.mxu0 %v17746_v2  ;;  %v5263_v5 = vmax.f32 %v4807_v18, %v4811_v17  ;;  %v3830_v27 = vsel %vm2870_vm13, %v1545_v59, %v3350_v6  ;;  %v4321_v47 = vmul.f32 %v13019_v49, %v3829_v22 }
 0x1d4   :  { %v5264_v25 = vmax.f32 %v4808_v19, %v4812_v20  ;;  %v3351_v48 = vmul.f32 0.01, %v1549_v12  ;;  %vm2871_vm14 = vcmp.ge.f32.partialorder %v1549_v12, 0.0  ;;  %v4322_v46 = vmul.f32 %v13029_v55, %v3830_v27 }
 0x1d5   :  { %v1554_v28 = vpop.f32.mrb[60].mxu0  ;;  %v13351_v31 = vpack.c.bf16 %v5263_v5, %v5261_v35  ;;  %v3352_v42 = vmul.f32 0.01, %v1551_v0  ;;  %vm2872_vm15 = vcmp.ge.f32.partialorder %v1551_v0, 0.0  ;;  %v4813_v56 = vadd.f32 %v13037_v63, %v4321_v47  ;;  %v13383_v5 = vpop.trf.xlu1 }
 0x1d6   :  { %v1555_v33 = vadd.f32 %v1554_v28, %v13005_v38  ;;  %v1556_v24 = vpop.f32.mrb[61].mxu0  ;;  %10715 = vmatmul.mubr.msk.f32.gmra.mrb[166].mxu0 %vm587_vm0, %v13276_v11  ;;  %v13357_v41 = vpack.c.bf16 %v5264_v25, %v5262_v40  ;;  %v3831_v53 = vsel %vm2871_vm14, %v1549_v12, %v3351_v48  ;;  %v4814_v57 = vadd.f32 %v13042_v3, %v4322_v46 }
 0x1d7   :  { %17869 = vst [vmem:[#allocation14_spill] sm:$0xff] %v13351_v31  ;;  %v1557_v43 = vadd.f32 %v1556_v24, %v13009_v39  ;;  %1876 = vmatprep.mubr.f32.mxu0 %v17746_v2  ;;  %v3832_v60 = vsel %vm2872_vm15, %v1551_v0, %v3352_v42  ;;  %v4323_v40 = vmul.f32 %v13019_v49, %v3831_v53 }
 0x1d8   :  { %17870 = vst [vmem:[#allocation15_spill] sm:$0xff] %v13357_v41  ;;  %vm2873_vm1 = vcmp.ge.f32.partialorder %v1555_v33, 0.0  ;;  %v3353_v8 = vmul.f32 0.01, %v1555_v33  ;;  %v4324_v18 = vmul.f32 %v13029_v55, %v3832_v60 }
 0x1d9   :  { %vm2874_vm2 = vcmp.ge.f32.partialorder %v1557_v43, 0.0  ;;  %v3354_v44 = vmul.f32 0.01, %v1557_v43  ;;  %v1560_v16 = vpop.f32.mrb[62].mxu0 }
 0x1da   :  { %v3833_v11 = vsel %vm2873_vm1, %v1555_v33, %v3353_v8  ;;  %v1561_v58 = vadd.f32 %v1560_v16, %v13005_v38  ;;  %v1562_v54 = vpop.f32.mrb[63].mxu0  ;;  %10716 = vmatmul.mubr.msk.f32.gmra.mrb[168].mxu0 %vm587_vm0, %v13292_v50  ;;  %v4816_v46 = vadd.f32 %v13042_v3, %v4324_v18  ;;  %v13408_v18 = vpop.trf.xlu0 }
 0x1db   :  { %v4325_v61 = vmul.f32 %v13019_v49, %v3833_v11  ;;  %v3834_v62 = vsel %vm2874_vm2, %v1557_v43, %v3354_v44  ;;  %v1563_v59 = vadd.f32 %v1562_v54, %v13009_v39  ;;  %1882 = vmatprep.mubr.f32.mxu0 %v17746_v2 }
 0x1dc   :  { %v4326_v35 = vmul.f32 %v13029_v55, %v3834_v62  ;;  %vm2875_vm3 = vcmp.ge.f32.partialorder %v1561_v58, 0.0  ;;  %v3355_v4 = vmul.f32 0.01, %v1561_v58 }
 0x1dd   :  { %vm2876_vm4 = vcmp.ge.f32.partialorder %v1563_v59, 0.0  ;;  %v3356_v50 = vmul.f32 0.01, %v1563_v59  ;;  %v1566_v6 = vpop.f32.mrb[64].mxu0  ;;  %v4817_v9 = vadd.f32 %v13037_v63, %v4325_v61 }
 0x1de   :  { %v3835_v17 = vsel %vm2875_vm3, %v1561_v58, %v3355_v4  ;;  %v1567_v12 = vadd.f32 %v1566_v6, %v13005_v38  ;;  %v1568_v14 = vpop.f32.mrb[65].mxu0  ;;  %10717 = vmatmul.mubr.msk.f32.gmra.mrb[170].mxu0 %vm587_vm0, %v13309_v13  ;;  %v4818_v19 = vadd.f32 %v13042_v3, %v4326_v35  ;;  %v4815_v13 = vadd.f32 %v13037_v63, %v4323_v40 }
 0x1df   :  { %v4327_v20 = vmul.f32 %v13019_v49, %v3835_v17  ;;  %v3836_v22 = vsel %vm2876_vm4, %v1563_v59, %v3356_v50  ;;  %v1569_v0 = vadd.f32 %v1568_v14, %v13009_v39  ;;  %1888 = vmatprep.mubr.f32.mxu0 %v17746_v2  ;;  %v5265_v25 = vmax.f32 %v4813_v56, %v4817_v9  ;;  %v13395_v56 = vpop.trf.xlu1 }
 0x1e0   :  { %v4328_v27 = vmul.f32 %v13029_v55, %v3836_v22  ;;  %vm2877_vm5 = vcmp.ge.f32.partialorder %v1567_v12, 0.0  ;;  %v3357_v28 = vmul.f32 0.01, %v1567_v12  ;;  %v5266_v47 = vmax.f32 %v4814_v57, %v4818_v19 }
 0x1e1   :  { %v3358_v48 = vmul.f32 0.01, %v1569_v0  ;;  %v1572_v33 = vpop.f32.mrb[66].mxu0  ;;  %v4819_v24 = vadd.f32 %v13037_v63, %v4327_v20  ;;  %vm2878_vm6 = vcmp.ge.f32.partialorder %v1569_v0, 0.0 }
 0x1e2   :  { %v1573_v42 = vadd.f32 %v1572_v33, %v13005_v38  ;;  %v1574_v43 = vpop.f32.mrb[67].mxu0  ;;  %10718 = vmatmul.mubr.msk.f32.gmra.mrb[172].mxu0 %vm587_vm0, %v13328_v29  ;;  %v4820_v8 = vadd.f32 %v13042_v3, %v4328_v27  ;;  %v3837_v44 = vsel %vm2877_vm5, %v1567_v12, %v3357_v28 }
 0x1e3   :  { %v1575_v16 = vadd.f32 %v1574_v43, %v13009_v39  ;;  %1894 = vmatprep.mubr.f32.mxu0 %v17746_v2  ;;  %v5267_v53 = vmax.f32 %v4815_v13, %v4819_v24  ;;  %v3838_v58 = vsel %vm2878_vm6, %v1569_v0, %v3358_v48  ;;  %v4329_v61 = vmul.f32 %v13019_v49, %v3837_v44  ;;  %v294_v27 = vpop.trf.xlu1 }
 0x1e4   :  { %v5268_v11 = vmax.f32 %v4816_v46, %v4820_v8  ;;  %v3359_v29 = vmul.f32 0.01, %v1573_v42  ;;  %vm2879_vm7 = vcmp.ge.f32.partialorder %v1573_v42, 0.0  ;;  %v4330_v40 = vmul.f32 %v13029_v55, %v3838_v58 }
 0x1e5   :  { %v1578_v54 = vpop.f32.mrb[68].mxu0  ;;  %v13397_v60 = vpack.c.bf16 %v5267_v53, %v5265_v25  ;;  %v3360_v4 = vmul.f32 0.01, %v1575_v16  ;;  %vm2880_vm8 = vcmp.ge.f32.partialorder %v1575_v16, 0.0  ;;  %v4821_v19 = vadd.f32 %v13037_v63, %v4329_v61 }
 0x1e6   :  { %v1579_v62 = vadd.f32 %v1578_v54, %v13005_v38  ;;  %v1580_v59 = vpop.f32.mrb[69].mxu0  ;;  %10719 = vmatmul.mubr.msk.f32.gmra.mrb[174].mxu0 %vm587_vm0, %v13349_v23  ;;  %v13403_v35 = vpack.c.bf16 %v5268_v11, %v5266_v47  ;;  %v3839_v17 = vsel %vm2879_vm7, %v1573_v42, %v3359_v29  ;;  %v4822_v48 = vadd.f32 %v13042_v3, %v4330_v40  ;;  %v13429_v54 = vpop.trf.xlu0 }
 0x1e7   :  { %17871 = vst [vmem:[#allocation16_spill] sm:$0xff] %v13397_v60  ;;  %v1581_v57 = vadd.f32 %v1580_v59, %v13009_v39  ;;  %1900 = vmatprep.mubr.f32.mxu0 %v17746_v2  ;;  %v3840_v20 = vsel %vm2880_vm8, %v1575_v16, %v3360_v4  ;;  %v4331_v33 = vmul.f32 %v13019_v49, %v3839_v17 }
 0x1e8   :  { %17872 = vst [vmem:[#allocation17_spill] sm:$0xff] %v13403_v35  ;;  %vm2881_vm9 = vcmp.ge.f32.partialorder %v1579_v62, 0.0  ;;  %v3361_v50 = vmul.f32 0.01, %v1579_v62  ;;  %v4332_v42 = vmul.f32 %v13029_v55, %v3840_v20 }
 0x1e9   :  { %vm2882_vm10 = vcmp.ge.f32.partialorder %v1581_v57, 0.0  ;;  %v3362_v6 = vmul.f32 0.01, %v1581_v57  ;;  %v1584_v9 = vpop.f32.mrb[70].mxu0 }
 0x1ea   :  { %v3841_v23 = vsel %vm2881_vm9, %v1579_v62, %v3361_v50  ;;  %v1585_v12 = vadd.f32 %v1584_v9, %v13005_v38  ;;  %v1586_v14 = vpop.f32.mrb[71].mxu0  ;;  %10720 = vmatmul.mubr.msk.f32.gmra.mrb[176].mxu0 %vm587_vm0, %v13362_v51  ;;  %v4824_v9 = vadd.f32 %v13042_v3, %v4332_v42 }
 0x1eb   :  { %v4333_v22 = vmul.f32 %v13019_v49, %v3841_v23  ;;  %v3842_v0 = vsel %vm2882_vm10, %v1581_v57, %v3362_v6  ;;  %v1587_v25 = vadd.f32 %v1586_v14, %v13009_v39  ;;  %1906 = vmatprep.mubr.f32.mxu0 %v17746_v2  ;;  %v4823_v57 = vadd.f32 %v13037_v63, %v4331_v33 }
 0x1ec   :  { %v4334_v28 = vmul.f32 %v13029_v55, %v3842_v0  ;;  %vm2883_vm11 = vcmp.ge.f32.partialorder %v1585_v12, 0.0  ;;  %v3363_v47 = vmul.f32 0.01, %v1585_v12 }
 0x1ed   :  { %vm2884_vm12 = vcmp.ge.f32.partialorder %v1587_v25, 0.0  ;;  %v3364_v51 = vmul.f32 0.01, %v1587_v25  ;;  %v1590_v13 = vpop.f32.mrb[72].mxu0  ;;  %v4825_v24 = vadd.f32 %v13037_v63, %v4333_v22 }
 0x1ee   :  { %v3843_v43 = vsel %vm2883_vm11, %v1585_v12, %v3363_v47  ;;  %v1591_v46 = vadd.f32 %v1590_v13, %v13005_v38  ;;  %v1592_v8 = vpop.f32.mrb[73].mxu0  ;;  %10721 = vmatmul.mubr.msk.f32.gmra.mrb[178].mxu0 %vm587_vm0, %v13383_v5  ;;  %v4826_v44 = vadd.f32 %v13042_v3, %v4334_v28  ;;  %v295_v5 = vpop.trf.xlu1 }
 0x1ef   :  { %v4335_v16 = vmul.f32 %v13019_v49, %v3843_v43  ;;  %v3844_v53 = vsel %vm2884_vm12, %v1587_v25, %v3364_v51  ;;  %v1593_v11 = vadd.f32 %v1592_v8, %v13009_v39  ;;  %1912 = vmatprep.mubr.f32.mxu0 %v17746_v2  ;;  %v5269_v58 = vmax.f32 %v4821_v19, %v4825_v24  ;;  %v13443_v25 = vpop.trf.xlu0 }
 0x1f0   :  { %v4336_v61 = vmul.f32 %v13029_v55, %v3844_v53  ;;  %vm2885_vm13 = vcmp.ge.f32.partialorder %v1591_v46, 0.0  ;;  %v3365_v29 = vmul.f32 0.01, %v1591_v46  ;;  %v5270_v62 = vmax.f32 %v4822_v48, %v4826_v44 }
 0x1f1   :  { %v3366_v59 = vmul.f32 0.01, %v1593_v11  ;;  %v1596_v4 = vpop.f32.mrb[74].mxu0  ;;  %v4827_v40 = vadd.f32 %v13037_v63, %v4335_v16  ;;  %vm2886_vm14 = vcmp.ge.f32.partialorder %v1593_v11, 0.0 }
 0x1f2   :  { %v1597_v50 = vadd.f32 %v1596_v4, %v13005_v38  ;;  %v1598_v6 = vpop.f32.mrb[75].mxu0  ;;  %10722 = vmatmul.mubr.msk.f32.gmra.mrb[180].mxu0 %vm587_vm0, %v13395_v56  ;;  %v4828_v17 = vadd.f32 %v13042_v3, %v4336_v61  ;;  %v3845_v23 = vsel %vm2885_vm13, %v1591_v46, %v3365_v29  ;;  %v296_v24 = vpop.trf.xlu1 }
 0x1f3   :  { %v1599_v12 = vadd.f32 %v1598_v6, %v13009_v39  ;;  %1918 = vmatprep.mubr.f32.mxu0 %v17746_v2  ;;  %v5271_v14 = vmax.f32 %v4823_v57, %v4827_v40  ;;  %v3846_v20 = vsel %vm2886_vm14, %v1593_v11, %v3366_v59  ;;  %v4337_v28 = vmul.f32 %v13019_v49, %v3845_v23  ;;  %v13461_v59 = vpop.trf.xlu0 }
 0x1f4   :  { %v5272_v19 = vmax.f32 %v4824_v9, %v4828_v17  ;;  %v3367_v56 = vmul.f32 0.01, %v1597_v50  ;;  %vm2887_vm15 = vcmp.ge.f32.partialorder %v1597_v50, 0.0  ;;  %v4338_v42 = vmul.f32 %v13029_v55, %v3846_v20 }
 0x1f5   :  { %v1602_v22 = vpop.f32.mrb[76].mxu0  ;;  %v13441_v0 = vpack.c.bf16 %v5271_v14, %v5269_v58  ;;  %v3368_v51 = vmul.f32 0.01, %v1599_v12  ;;  %vm2888_vm1 = vcmp.ge.f32.partialorder %v1599_v12, 0.0 }
 0x1f6   :  { %v1603_v47 = vadd.f32 %v1602_v22, %v13005_v38  ;;  %v1604_v48 = vpop.f32.mrb[77].mxu0  ;;  %10723 = vmatmul.mubr.msk.f32.gmra.mrb[182].mxu0 %vm587_vm0, %v294_v27  ;;  %v13448_v33 = vpack.c.bf16 %v5272_v19, %v5270_v62  ;;  %v4829_v27 = vadd.f32 %v13037_v63, %v4337_v28  ;;  %v3847_v44 = vsel %vm2887_vm15, %v1597_v50, %v3367_v56  ;;  %v297_v17 = vpop.trf.xlu1 }
 0x1f7   :  { %17873 = vst [vmem:[#allocation18_spill] sm:$0xff] %v13441_v0  ;;  %v1605_v13 = vadd.f32 %v1604_v48, %v13009_v39  ;;  %1924 = vmatprep.mubr.f32.mxu0 %v17746_v2  ;;  %v3848_v58 = vsel %vm2888_vm1, %v1599_v12, %v3368_v51  ;;  %v4830_v40 = vadd.f32 %v13042_v3, %v4338_v42 }
 0x1f8   :  { %17874 = vst [vmem:[#allocation19_spill] sm:$0xff] %v13448_v33  ;;  %vm2889_vm2 = vcmp.ge.f32.partialorder %v1603_v47, 0.0  ;;  %v3369_v43 = vmul.f32 0.01, %v1603_v47  ;;  %6046 = vmatprep.mubr.bf16.mxu1 %v13448_v33  ;;  %v4339_v50 = vmul.f32 %v13019_v49, %v3847_v44  ;;  %v4340_v23 = vmul.f32 %v13029_v55, %v3848_v58 }
 0x1f9   :  { %vm2890_vm3 = vcmp.ge.f32.partialorder %v1605_v13, 0.0  ;;  %v3370_v46 = vmul.f32 0.01, %v1605_v13  ;;  %v1608_v8 = vpop.f32.mrb[78].mxu0  ;;  %6047 = vmatmul.mubr.bf16.gmra.mrb[8].mxu1 %v13441_v0 }
 0x1fa   :  { %v3849_v16 = vsel %vm2889_vm2, %v1603_v47, %v3369_v43  ;;  %v1609_v53 = vadd.f32 %v1608_v8, %v13005_v38  ;;  %v1610_v11 = vpop.f32.mrb[79].mxu0  ;;  %10724 = vmatmul.mubr.msk.f32.gmra.mrb[184].mxu0 %vm587_vm0, %v295_v5  ;;  %v4831_v42 = vadd.f32 %v13037_v63, %v4339_v50  ;;  %v13477_v8 = vpop.trf.xlu0 }
 0x1fb   :  { %v4341_v61 = vmul.f32 %v13019_v49, %v3849_v16  ;;  %v3850_v29 = vsel %vm2890_vm3, %v1605_v13, %v3370_v46  ;;  %v1611_v62 = vadd.f32 %v1610_v11, %v13009_v39  ;;  %1930 = vmatprep.mubr.f32.mxu0 %v17746_v2  ;;  %v4832_v16 = vadd.f32 %v13042_v3, %v4340_v23 }
 0x1fc   :  { %v4342_v4 = vmul.f32 %v13029_v55, %v3850_v29  ;;  %vm2891_vm4 = vcmp.ge.f32.partialorder %v1609_v53, 0.0  ;;  %v3371_v57 = vmul.f32 0.01, %v1609_v53  ;;  %v298_v29 = vpop.trf.xlu1 }
 0x1fd   :  { %v4833_v5 = vadd.f32 %v13037_v63, %v4341_v61  ;;  %vm2892_vm5 = vcmp.ge.f32.partialorder %v1611_v62, 0.0  ;;  %v3372_v6 = vmul.f32 0.01, %v1611_v62  ;;  %v1614_v9 = vpop.f32.mrb[80].mxu0 }
 0x1fe   :  { %v3851_v12 = vsel %vm2891_vm4, %v1609_v53, %v3371_v57  ;;  %v1615_v14 = vadd.f32 %v1614_v9, %v13005_v38  ;;  %v1616_v19 = vpop.f32.mrb[81].mxu0  ;;  %10725 = vmatmul.mubr.msk.f32.gmra.mrb[186].mxu0 %vm587_vm0, %v296_v24  ;;  %v4834_v20 = vadd.f32 %v13042_v3, %v4342_v4 }
 0x1ff   :  { %v5273_v22 = vmax.f32 %v4829_v27, %v4833_v5  ;;  %v4343_v28 = vmul.f32 %v13019_v49, %v3851_v12  ;;  %v3852_v56 = vsel %vm2892_vm5, %v1611_v62, %v3372_v6  ;;  %v1617_v47 = vadd.f32 %v1616_v19, %v13009_v39  ;;  %1936 = vmatprep.mubr.f32.mxu0 %v17746_v2 }
 0x200   :  { %v4344_v48 = vmul.f32 %v13029_v55, %v3852_v56  ;;  %vm2893_vm6 = vcmp.ge.f32.partialorder %v1615_v14, 0.0  ;;  %v3373_v51 = vmul.f32 0.01, %v1615_v14  ;;  %v5274_v13 = vmax.f32 %v4830_v40, %v4834_v20 }
 0x201   :  { %v4835_v43 = vadd.f32 %v13037_v63, %v4343_v28  ;;  %v3374_v24 = vmul.f32 0.01, %v1617_v47  ;;  %v1620_v46 = vpop.f32.mrb[82].mxu0  ;;  %vm2894_vm7 = vcmp.ge.f32.partialorder %v1617_v47, 0.0 }
 0x202   :  { %v1621_v27 = vadd.f32 %v1620_v46, %v13005_v38  ;;  %v1622_v44 = vpop.f32.mrb[83].mxu0  ;;  %10726 = vmatmul.mubr.msk.f32.gmra.mrb[188].mxu0 %vm587_vm0, %v297_v17  ;;  %v4836_v53 = vadd.f32 %v13042_v3, %v4344_v48  ;;  %v3853_v58 = vsel %vm2893_vm6, %v1615_v14, %v3373_v51  ;;  %v13494_v14 = vpop.trf.xlu0 }
 0x203   :  { %v5275_v11 = vmax.f32 %v4831_v42, %v4835_v43  ;;  %v1623_v61 = vadd.f32 %v1622_v44, %v13009_v39  ;;  %1942 = vmatprep.mubr.f32.mxu0 %v17746_v2  ;;  %v3854_v57 = vsel %vm2894_vm7, %v1617_v47, %v3374_v24  ;;  %v4345_v50 = vmul.f32 %v13019_v49, %v3853_v58 }
 0x204   :  { %v5276_v62 = vmax.f32 %v4832_v16, %v4836_v53  ;;  %v3375_v5 = vmul.f32 0.01, %v1621_v27  ;;  %vm2895_vm8 = vcmp.ge.f32.partialorder %v1621_v27, 0.0  ;;  %v4346_v19 = vmul.f32 %v13029_v55, %v3854_v57  ;;  %v86_v53 = vld [vmem:[%s17857_s26 + $0xc8] sm:$0xff] }
 0x205   :  { %v13485_v4 = vpack.c.bf16 %v5275_v11, %v5273_v22  ;;  %v1626_v40 = vpop.f32.mrb[84].mxu0  ;;  %v3376_v23 = vmul.f32 0.01, %v1623_v61  ;;  %vm2896_vm9 = vcmp.ge.f32.partialorder %v1623_v61, 0.0  ;;  %v71_v22 = vld [vmem:[%s17857_s26 + $0x50] sm:$0xff]  ;;  %v4837_v42 = vadd.f32 %v13037_v63, %v4345_v50 }
 0x206   :  { %v1627_v6 = vadd.f32 %v1626_v40, %v13005_v38  ;;  %v1628_v9 = vpop.f32.mrb[85].mxu0  ;;  %10727 = vmatmul.mubr.msk.f32.gmra.mrb[190].mxu0 %vm587_vm0, %v298_v29  ;;  %v13490_v17 = vpack.c.bf16 %v5276_v62, %v5274_v13  ;;  %427 = vxpose.xlu0.b32.start [1/2] (short) %v71_v22, 128  ;;  %v3855_v47 = vsel %vm2895_vm8, %v1621_v27, %v3375_v5  ;;  %v13513_v29 = vpop.trf.xlu0 }
 0x207   :  { %17875 = vst [vmem:[#allocation20_spill] sm:$0xff] %v13485_v4  ;;  %v1629_v12 = vadd.f32 %v1628_v9, %v13009_v39  ;;  %1948 = vmatprep.mubr.f32.mxu0 %v17746_v2  ;;  %v3856_v43 = vsel %vm2896_vm9, %v1623_v61, %v3376_v23  ;;  %v4347_v11 = vmul.f32 %v13019_v49, %v3855_v47 }
 0x208   :  { %17876 = vst [vmem:[#allocation21_spill] sm:$0xff] %v13490_v17  ;;  %vm2897_vm10 = vcmp.ge.f32.partialorder %v1627_v6, 0.0  ;;  %v3377_v20 = vmul.f32 0.01, %v1627_v6  ;;  %v4348_v57 = vmul.f32 %v13029_v55, %v3856_v43 }
 0x209   :  { %vm2898_vm11 = vcmp.ge.f32.partialorder %v1629_v12, 0.0  ;;  %v3378_v28 = vmul.f32 0.01, %v1629_v12  ;;  %v1632_v56 = vpop.f32.mrb[86].mxu0 }
 0x20a   :  { %v3857_v48 = vsel %vm2897_vm10, %v1627_v6, %v3377_v20  ;;  %v1633_v51 = vadd.f32 %v1632_v56, %v13005_v38  ;;  %v1634_v13 = vpop.f32.mrb[87].mxu0  ;;  %10728 = vmatmul.mubr.msk.f32.gmra.mrb[192].mxu0 %vm587_vm0, %v13408_v18  ;;  %v4838_v18 = vadd.f32 %v13042_v3, %v4346_v19  ;;  %428 = vxpose.xlu0.b32.end [2/2] (short) %v86_v53, 128 }
 0x20b   :  { %v4349_v24 = vmul.f32 %v13019_v49, %v3857_v48  ;;  %v3858_v46 = vsel %vm2898_vm11, %v1629_v12, %v3378_v28  ;;  %v1635_v44 = vadd.f32 %v1634_v13, %v13009_v39  ;;  %1954 = vmatprep.mubr.f32.mxu0 %v17746_v2  ;;  %v4839_v48 = vadd.f32 %v13037_v63, %v4347_v11 }
 0x20c   :  { %v4350_v16 = vmul.f32 %v13029_v55, %v3858_v46  ;;  %vm2899_vm12 = vcmp.ge.f32.partialorder %v1633_v51, 0.0  ;;  %v3379_v27 = vmul.f32 0.01, %v1633_v51 }
 0x20d   :  { %vm2900_vm13 = vcmp.ge.f32.partialorder %v1635_v44, 0.0  ;;  %v3380_v58 = vmul.f32 0.01, %v1635_v44  ;;  %v1638_v61 = vpop.f32.mrb[88].mxu0  ;;  %v4841_v62 = vadd.f32 %v13037_v63, %v4349_v24 }
 0x20e   :  { %v3859_v40 = vsel %vm2899_vm12, %v1633_v51, %v3379_v27  ;;  %v1639_v50 = vadd.f32 %v1638_v61, %v13005_v38  ;;  %v1640_v5 = vpop.f32.mrb[89].mxu0  ;;  %10729 = vmatmul.mubr.msk.f32.gmra.mrb[194].mxu0 %vm587_vm0, %v13429_v54  ;;  %v4842_v6 = vadd.f32 %v13042_v3, %v4350_v16 }
 0x20f   :  { %v4351_v9 = vmul.f32 %v13019_v49, %v3859_v40  ;;  %v3860_v23 = vsel %vm2900_vm13, %v1635_v44, %v3380_v58  ;;  %v1641_v12 = vadd.f32 %v1640_v5, %v13009_v39  ;;  %1960 = vmatprep.mubr.f32.mxu0 %v17746_v2  ;;  %v5277_v19 = vmax.f32 %v4837_v42, %v4841_v62  ;;  %v13534_v44 = vpop.trf.xlu0 }
 0x210   :  { %v4352_v20 = vmul.f32 %v13029_v55, %v3860_v23  ;;  %vm2901_vm14 = vcmp.ge.f32.partialorder %v1639_v50, 0.0  ;;  %v3381_v22 = vmul.f32 0.01, %v1639_v50  ;;  %v5278_v28 = vmax.f32 %v4838_v18, %v4842_v6 }
 0x211   :  { %v3382_v56 = vmul.f32 0.01, %v1641_v12  ;;  %v1644_v47 = vpop.f32.mrb[90].mxu0  ;;  %v4843_v54 = vadd.f32 %v13037_v63, %v4351_v9  ;;  %vm2902_vm15 = vcmp.ge.f32.partialorder %v1641_v12, 0.0  ;;  %v4840_v42 = vadd.f32 %v13042_v3, %v4348_v57 }
 0x212   :  { %v1645_v51 = vadd.f32 %v1644_v47, %v13005_v38  ;;  %v1646_v13 = vpop.f32.mrb[91].mxu0  ;;  %10730 = vmatmul.mubr.msk.f32.gmra.mrb[196].mxu0 %vm587_vm0, %v13443_v25  ;;  %v4844_v43 = vadd.f32 %v13042_v3, %v4352_v20  ;;  %v3861_v24 = vsel %vm2901_vm14, %v1639_v50, %v3381_v22 }
 0x213   :  { %v1647_v46 = vadd.f32 %v1646_v13, %v13009_v39  ;;  %1966 = vmatprep.mubr.f32.mxu0 %v17746_v2  ;;  %v5279_v16 = vmax.f32 %v4839_v48, %v4843_v54  ;;  %v3862_v53 = vsel %vm2902_vm15, %v1641_v12, %v3382_v56  ;;  %v4353_v58 = vmul.f32 %v13019_v49, %v3861_v24  ;;  %v13547_v12 = vpop.trf.xlu0 }
 0x214   :  { %v5280_v27 = vmax.f32 %v4840_v42, %v4844_v43  ;;  %v3383_v25 = vmul.f32 0.01, %v1645_v51  ;;  %vm2903_vm1 = vcmp.ge.f32.partialorder %v1645_v51, 0.0  ;;  %v4354_v5 = vmul.f32 %v13029_v55, %v3862_v53 }
 0x215   :  { %v1650_v18 = vpop.f32.mrb[92].mxu0  ;;  %v13536_v11 = vpack.c.bf16 %v5279_v16, %v5277_v19  ;;  %v3384_v40 = vmul.f32 0.01, %v1647_v46  ;;  %vm2904_vm2 = vcmp.ge.f32.partialorder %v1647_v46, 0.0 }
 0x216   :  { %v1651_v61 = vadd.f32 %v1650_v18, %v13005_v38  ;;  %v1652_v62 = vpop.f32.mrb[93].mxu0  ;;  %10731 = vmatmul.mubr.msk.f32.gmra.mrb[198].mxu0 %vm587_vm0, %v13461_v59  ;;  %v13542_v57 = vpack.c.bf16 %v5280_v27, %v5278_v28  ;;  %v3863_v19 = vsel %vm2903_vm1, %v1645_v51, %v3383_v25  ;;  %v4845_v28 = vadd.f32 %v13037_v63, %v4353_v58 }
 0x217   :  { %17877 = vst [vmem:[#allocation22_spill] sm:$0xff] %v13536_v11  ;;  %v1653_v50 = vadd.f32 %v1652_v62, %v13009_v39  ;;  %1972 = vmatprep.mubr.f32.mxu0 %v17746_v2  ;;  %v3864_v56 = vsel %vm2904_vm2, %v1647_v46, %v3384_v40  ;;  %v4846_v42 = vadd.f32 %v13042_v3, %v4354_v5  ;;  %v13568_v40 = vpop.trf.xlu0 }
 0x218   :  { %17878 = vst [vmem:[#allocation23_spill] sm:$0xff] %v13542_v57  ;;  %vm2905_vm3 = vcmp.ge.f32.partialorder %v1651_v61, 0.0  ;;  %v3385_v6 = vmul.f32 0.01, %v1651_v61  ;;  %v4355_v43 = vmul.f32 %v13019_v49, %v3863_v19  ;;  %v4356_v16 = vmul.f32 %v13029_v55, %v3864_v56 }
 0x219   :  { %vm2906_vm4 = vcmp.ge.f32.partialorder %v1653_v50, 0.0  ;;  %v3386_v9 = vmul.f32 0.01, %v1653_v50  ;;  %v1656_v23 = vpop.f32.mrb[94].mxu0 }
 0x21a   :  { %v3865_v59 = vsel %vm2905_vm3, %v1651_v61, %v3385_v6  ;;  %v1657_v20 = vadd.f32 %v1656_v23, %v13005_v38  ;;  %v1658_v22 = vpop.f32.mrb[95].mxu0  ;;  %10732 = vmatmul.mubr.msk.f32.gmra.mrb[200].mxu0 %vm587_vm0, %v13477_v8 }
 0x21b   :  { %v4357_v47 = vmul.f32 %v13019_v49, %v3865_v59  ;;  %v3866_v48 = vsel %vm2906_vm4, %v1653_v50, %v3386_v9  ;;  %v1659_v54 = vadd.f32 %v1658_v22, %v13009_v39  ;;  %1978 = vmatprep.mubr.f32.mxu0 %v17746_v2 }
 0x21c   :  { %v4358_v13 = vmul.f32 %v13029_v55, %v3866_v48  ;;  %vm2907_vm5 = vcmp.ge.f32.partialorder %v1657_v20, 0.0  ;;  %v3387_v51 = vmul.f32 0.01, %v1657_v20 }
 0x21d   :  { %vm2908_vm6 = vcmp.ge.f32.partialorder %v1659_v54, 0.0  ;;  %v3388_v8 = vmul.f32 0.01, %v1659_v54  ;;  %v1662_v24 = vpop.f32.mrb[96].mxu0  ;;  %v4849_v46 = vadd.f32 %v13037_v63, %v4357_v47 }
 0x21e   :  { %v3867_v27 = vsel %vm2907_vm5, %v1657_v20, %v3387_v51  ;;  %v1663_v53 = vadd.f32 %v1662_v24, %v13005_v38  ;;  %v1664_v18 = vpop.f32.mrb[97].mxu0  ;;  %10733 = vmatmul.mubr.msk.f32.gmra.mrb[202].mxu0 %vm587_vm0, %v13494_v14  ;;  %v4850_v58 = vadd.f32 %v13042_v3, %v4358_v13  ;;  %v4847_v14 = vadd.f32 %v13037_v63, %v4355_v43  ;;  %v13580_v43 = vpop.trf.xlu0 }
 0x21f   :  { %v4359_v25 = vmul.f32 %v13019_v49, %v3867_v27  ;;  %v3868_v61 = vsel %vm2908_vm6, %v1659_v54, %v3388_v8  ;;  %v1665_v62 = vadd.f32 %v1664_v18, %v13009_v39  ;;  %1984 = vmatprep.mubr.f32.mxu0 %v17746_v2  ;;  %v5281_v50 = vmax.f32 %v4845_v28, %v4849_v46 }
 0x220   :  { %v4360_v5 = vmul.f32 %v13029_v55, %v3868_v61  ;;  %vm2909_vm7 = vcmp.ge.f32.partialorder %v1663_v53, 0.0  ;;  %v3389_v6 = vmul.f32 0.01, %v1663_v53  ;;  %v5282_v9 = vmax.f32 %v4846_v42, %v4850_v58  ;;  %v13593_v61 = vpop.trf.xlu1 }
 0x221   :  { %v3390_v23 = vmul.f32 0.01, %v1665_v62  ;;  %v1668_v19 = vpop.f32.mrb[98].mxu0  ;;  %v4851_v59 = vadd.f32 %v13037_v63, %v4359_v25  ;;  %vm2910_vm8 = vcmp.ge.f32.partialorder %v1665_v62, 0.0  ;;  %v4848_v28 = vadd.f32 %v13042_v3, %v4356_v16 }
 0x222   :  { %v1669_v20 = vadd.f32 %v1668_v19, %v13005_v38  ;;  %v1670_v22 = vpop.f32.mrb[99].mxu0  ;;  %10734 = vmatmul.mubr.msk.f32.gmra.mrb[204].mxu0 %vm587_vm0, %v13513_v29  ;;  %v4852_v56 = vadd.f32 %v13042_v3, %v4360_v5  ;;  %v3869_v47 = vsel %vm2909_vm7, %v1663_v53, %v3389_v6 }
 0x223   :  { %v1671_v48 = vadd.f32 %v1670_v22, %v13009_v39  ;;  %1990 = vmatprep.mubr.f32.mxu0 %v17746_v2  ;;  %v5283_v54 = vmax.f32 %v4847_v14, %v4851_v59  ;;  %v3870_v51 = vsel %vm2910_vm8, %v1665_v62, %v3390_v23  ;;  %v4361_v24 = vmul.f32 %v13019_v49, %v3869_v47 }
 0x224   :  { %v5284_v13 = vmax.f32 %v4848_v28, %v4852_v56  ;;  %v3391_v29 = vmul.f32 0.01, %v1669_v20  ;;  %vm2911_vm9 = vcmp.ge.f32.partialorder %v1669_v20, 0.0  ;;  %v4362_v58 = vmul.f32 %v13029_v55, %v3870_v51  ;;  %v326_v28 = vpop.trf.xlu0 }
 0x225   :  { %v1674_v42 = vpop.f32.mrb[100].mxu0  ;;  %v13582_v8 = vpack.c.bf16 %v5283_v54, %v5281_v50  ;;  %v3392_v53 = vmul.f32 0.01, %v1671_v48  ;;  %vm2912_vm10 = vcmp.ge.f32.partialorder %v1671_v48, 0.0  ;;  %v4853_v23 = vadd.f32 %v13037_v63, %v4361_v24 }
 0x226   :  { %v1675_v46 = vadd.f32 %v1674_v42, %v13005_v38  ;;  %v1676_v16 = vpop.f32.mrb[101].mxu0  ;;  %10735 = vmatmul.mubr.msk.f32.gmra.mrb[206].mxu0 %vm587_vm0, %v13534_v44  ;;  %v13588_v27 = vpack.c.bf16 %v5284_v13, %v5282_v9  ;;  %v3871_v5 = vsel %vm2911_vm9, %v1669_v20, %v3391_v29  ;;  %v4854_v47 = vadd.f32 %v13042_v3, %v4362_v58 }
 0x227   :  { %17879 = vst [vmem:[#allocation24_spill] sm:$0xff] %v13582_v8  ;;  %v1677_v18 = vadd.f32 %v1676_v16, %v13009_v39  ;;  %1996 = vmatprep.mubr.f32.mxu0 %v17746_v2  ;;  %v3872_v19 = vsel %vm2912_vm10, %v1671_v48, %v3392_v53  ;;  %v4363_v54 = vmul.f32 %v13019_v49, %v3871_v5  ;;  %v13611_v16 = vpop.trf.xlu1 }
 0x228   :  { %17880 = vst [vmem:[#allocation25_spill] sm:$0xff] %v13588_v27  ;;  %vm2913_vm11 = vcmp.ge.f32.partialorder %v1675_v46, 0.0  ;;  %v3393_v25 = vmul.f32 0.01, %v1675_v46  ;;  %v4364_v51 = vmul.f32 %v13029_v55, %v3872_v19  ;;  %v327_v19 = vpop.trf.xlu0 }
 0x229   :  { %vm2914_vm12 = vcmp.ge.f32.partialorder %v1677_v18, 0.0  ;;  %v3394_v62 = vmul.f32 0.01, %v1677_v18  ;;  %v1680_v50 = vpop.f32.mrb[102].mxu0 }
 0x22a   :  { %v3873_v44 = vsel %vm2913_vm11, %v1675_v46, %v3393_v25  ;;  %v1681_v6 = vadd.f32 %v1680_v50, %v13005_v38  ;;  %v1682_v9 = vpop.f32.mrb[103].mxu0  ;;  %10736 = vmatmul.mubr.msk.f32.gmra.mrb[208].mxu0 %vm587_vm0, %v13547_v12 }
 0x22b   :  { %v4365_v14 = vmul.f32 %v13019_v49, %v3873_v44  ;;  %v3874_v59 = vsel %vm2914_vm12, %v1677_v18, %v3394_v62  ;;  %v1683_v22 = vadd.f32 %v1682_v9, %v13009_v39  ;;  %2002 = vmatprep.mubr.f32.mxu0 %v17746_v2 }
 0x22c   :  { %v4366_v20 = vmul.f32 %v13029_v55, %v3874_v59  ;;  %vm2915_vm13 = vcmp.ge.f32.partialorder %v1681_v6, 0.0  ;;  %v3395_v56 = vmul.f32 0.01, %v1681_v6 }
 0x22d   :  { %vm2916_vm14 = vcmp.ge.f32.partialorder %v1683_v22, 0.0  ;;  %v3396_v12 = vmul.f32 0.01, %v1683_v22  ;;  %v1686_v13 = vpop.f32.mrb[104].mxu0  ;;  %v4857_v48 = vadd.f32 %v13037_v63, %v4365_v14 }
 0x22e   :  { %v3875_v42 = vsel %vm2915_vm13, %v1681_v6, %v3395_v56  ;;  %v1687_v24 = vadd.f32 %v1686_v13, %v13005_v38  ;;  %v1688_v29 = vpop.f32.mrb[105].mxu0  ;;  %10737 = vmatmul.mubr.msk.f32.gmra.mrb[210].mxu0 %vm587_vm0, %v13568_v40  ;;  %v4858_v46 = vadd.f32 %v13042_v3, %v4366_v20  ;;  %v4855_v40 = vadd.f32 %v13037_v63, %v4363_v54 }
 0x22f   :  { %v4367_v53 = vmul.f32 %v13019_v49, %v3875_v42  ;;  %v3876_v18 = vsel %vm2916_vm14, %v1683_v22, %v3396_v12  ;;  %v1689_v58 = vadd.f32 %v1688_v29, %v13009_v39  ;;  %2008 = vmatprep.mubr.f32.mxu0 %v17746_v2  ;;  %v5285_v25 = vmax.f32 %v4853_v23, %v4857_v48  ;;  %v13626_v12 = vpop.trf.xlu1 }
 0x230   :  { %v4368_v62 = vmul.f32 %v13029_v55, %v3876_v18  ;;  %vm2917_vm15 = vcmp.ge.f32.partialorder %v1687_v24, 0.0  ;;  %v3397_v50 = vmul.f32 0.01, %v1687_v24  ;;  %v5286_v5 = vmax.f32 %v4854_v47, %v4858_v46 }
 0x231   :  { %v3398_v44 = vmul.f32 0.01, %v1689_v58  ;;  %v1692_v6 = vpop.f32.mrb[106].mxu0  ;;  %v4859_v9 = vadd.f32 %v13037_v63, %v4367_v53  ;;  %vm2918_vm1 = vcmp.ge.f32.partialorder %v1689_v58, 0.0  ;;  %v4856_v23 = vadd.f32 %v13042_v3, %v4364_v51 }
 0x232   :  { %v1693_v14 = vadd.f32 %v1692_v6, %v13005_v38  ;;  %v1694_v59 = vpop.f32.mrb[107].mxu0  ;;  %10738 = vmatmul.mubr.msk.f32.gmra.mrb[212].mxu0 %vm587_vm0, %v13580_v43  ;;  %v4860_v22 = vadd.f32 %v13042_v3, %v4368_v62  ;;  %v3877_v20 = vsel %vm2917_vm15, %v1687_v24, %v3397_v50 }
 0x233   :  { %v1695_v56 = vadd.f32 %v1694_v59, %v13009_v39  ;;  %2014 = vmatprep.mubr.f32.mxu0 %v17746_v2  ;;  %v5287_v47 = vmax.f32 %v4855_v40, %v4859_v9  ;;  %v3878_v13 = vsel %vm2918_vm1, %v1689_v58, %v3398_v44  ;;  %v4369_v29 = vmul.f32 %v13019_v49, %v3877_v20  ;;  %v328_v58 = vpop.trf.xlu0  ;;  %v13643_v59 = vpop.trf.xlu1 }
 0x234   :  { %v5288_v54 = vmax.f32 %v4856_v23, %v4860_v22  ;;  %v3399_v43 = vmul.f32 0.01, %v1693_v14  ;;  %vm2919_vm2 = vcmp.ge.f32.partialorder %v1693_v14, 0.0 }
 0x235   :  { %v1698_v48 = vpop.f32.mrb[108].mxu0  ;;  %v13628_v42 = vpack.c.bf16 %v5287_v47, %v5285_v25  ;;  %v3400_v53 = vmul.f32 0.01, %v1695_v56  ;;  %v4370_v25 = vmul.f32 %v13029_v55, %v3878_v13  ;;  %vm2920_vm3 = vcmp.ge.f32.partialorder %v1695_v56, 0.0 }
 0x236   :  { %v1699_v51 = vadd.f32 %v1698_v48, %v13005_v38  ;;  %v1700_v46 = vpop.f32.mrb[109].mxu0  ;;  %10739 = vmatmul.mubr.msk.f32.gmra.mrb[214].mxu0 %vm587_vm0, %v326_v28  ;;  %v13633_v24 = vpack.c.bf16 %v5288_v54, %v5286_v5  ;;  %v4861_v28 = vadd.f32 %v13037_v63, %v4369_v29  ;;  %v3879_v5 = vsel %vm2919_vm2, %v1693_v14, %v3399_v43 }
 0x237   :  { %17881 = vst [vmem:[#allocation26_spill] sm:$0xff] %v13628_v42  ;;  %v1701_v18 = vadd.f32 %v1700_v46, %v13009_v39  ;;  %2020 = vmatprep.mubr.f32.mxu0 %v17746_v2  ;;  %v3880_v23 = vsel %vm2920_vm3, %v1695_v56, %v3400_v53  ;;  %v4862_v13 = vadd.f32 %v13042_v3, %v4370_v25  ;;  %v329_v43 = vpop.trf.xlu0 }
 0x238   :  { %17882 = vst [vmem:[#allocation27_spill] sm:$0xff] %v13633_v24  ;;  %vm2921_vm4 = vcmp.ge.f32.partialorder %v1699_v51, 0.0  ;;  %v3401_v62 = vmul.f32 0.01, %v1699_v51  ;;  %6054 = vmatprep.mubr.bf16.mxu1 %v13633_v24  ;;  %v4371_v48 = vmul.f32 %v13019_v49, %v3879_v5 }
 0x239   :  { %vm2922_vm5 = vcmp.ge.f32.partialorder %v1701_v18, 0.0  ;;  %v3402_v50 = vmul.f32 0.01, %v1701_v18  ;;  %v1704_v44 = vpop.f32.mrb[110].mxu0  ;;  %6055 = vmatmul.mubr.bf16.gmra.mrb[12].mxu1 %v13628_v42 }
 0x23a   :  { %v3881_v6 = vsel %vm2921_vm4, %v1699_v51, %v3401_v62  ;;  %v1705_v40 = vadd.f32 %v1704_v44, %v13005_v38  ;;  %v1706_v9 = vpop.f32.mrb[111].mxu0  ;;  %10740 = vmatmul.mubr.msk.f32.gmra.mrb[216].mxu0 %vm587_vm0, %v327_v19  ;;  %v4372_v51 = vmul.f32 %v13029_v55, %v3880_v23 }
 0x23b   :  { %v4373_v22 = vmul.f32 %v13019_v49, %v3881_v6  ;;  %v3882_v20 = vsel %vm2922_vm5, %v1701_v18, %v3402_v50  ;;  %v1707_v47 = vadd.f32 %v1706_v9, %v13009_v39  ;;  %2026 = vmatprep.mubr.f32.mxu0 %v17746_v2 }
 0x23c   :  { %v4374_v54 = vmul.f32 %v13029_v55, %v3882_v20  ;;  %vm2923_vm6 = vcmp.ge.f32.partialorder %v1705_v40, 0.0  ;;  %v3403_v14 = vmul.f32 0.01, %v1705_v40 }
 0x23d   :  { %v4865_v19 = vadd.f32 %v13037_v63, %v4373_v22  ;;  %vm2924_vm7 = vcmp.ge.f32.partialorder %v1707_v47, 0.0  ;;  %v3404_v29 = vmul.f32 0.01, %v1707_v47  ;;  %v1710_v56 = vpop.f32.mrb[112].mxu0  ;;  %v4863_v22 = vadd.f32 %v13037_v63, %v4371_v48  ;;  %v330_v48 = vpop.trf.xlu0 }
 0x23e   :  { %v3883_v46 = vsel %vm2923_vm6, %v1705_v40, %v3403_v14  ;;  %v1711_v53 = vadd.f32 %v1710_v56, %v13005_v38  ;;  %v1712_v18 = vpop.f32.mrb[113].mxu0  ;;  %10741 = vmatmul.mubr.msk.f32.gmra.mrb[218].mxu0 %vm587_vm0, %v328_v58  ;;  %v4866_v62 = vadd.f32 %v13042_v3, %v4374_v54  ;;  %v13660_v40 = vpop.trf.xlu1 }
 0x23f   :  { %v5289_v50 = vmax.f32 %v4861_v28, %v4865_v19  ;;  %v4375_v25 = vmul.f32 %v13019_v49, %v3883_v46  ;;  %v3884_v44 = vsel %vm2924_vm7, %v1707_v47, %v3404_v29  ;;  %v1713_v5 = vadd.f32 %v1712_v18, %v13009_v39  ;;  %2032 = vmatprep.mubr.f32.mxu0 %v17746_v2 }
 0x240   :  { %v4376_v6 = vmul.f32 %v13029_v55, %v3884_v44  ;;  %vm2925_vm8 = vcmp.ge.f32.partialorder %v1711_v53, 0.0  ;;  %v3405_v9 = vmul.f32 0.01, %v1711_v53  ;;  %v5290_v23 = vmax.f32 %v4862_v13, %v4866_v62 }
 0x241   :  { %v4867_v58 = vadd.f32 %v13037_v63, %v4375_v25  ;;  %vm2926_vm9 = vcmp.ge.f32.partialorder %v1713_v5, 0.0  ;;  %v3406_v28 = vmul.f32 0.01, %v1713_v5  ;;  %v1716_v20 = vpop.f32.mrb[114].mxu0  ;;  %v4864_v19 = vadd.f32 %v13042_v3, %v4372_v51 }
 0x242   :  { %v3885_v54 = vsel %vm2925_vm8, %v1711_v53, %v3405_v9  ;;  %v1717_v47 = vadd.f32 %v1716_v20, %v13005_v38  ;;  %v1718_v14 = vpop.f32.mrb[115].mxu0  ;;  %10742 = vmatmul.mubr.msk.f32.gmra.mrb[220].mxu0 %vm587_vm0, %v329_v43  ;;  %v4868_v29 = vadd.f32 %v13042_v3, %v4376_v6  ;;  %v13675_v6 = vpop.trf.xlu1 }
 0x243   :  { %v5291_v56 = vmax.f32 %v4863_v22, %v4867_v58  ;;  %v1719_v13 = vadd.f32 %v1718_v14, %v13009_v39  ;;  %2038 = vmatprep.mubr.f32.mxu0 %v17746_v2  ;;  %v3886_v46 = vsel %vm2926_vm9, %v1713_v5, %v3406_v28  ;;  %v4377_v53 = vmul.f32 %v13019_v49, %v3885_v54  ;;  %v72_v28 = vld [vmem:[%s17857_s26 + $0x58] sm:$0xff] }
 0x244   :  { %v5292_v18 = vmax.f32 %v4864_v19, %v4868_v29  ;;  %v3407_v25 = vmul.f32 0.01, %v1717_v47  ;;  %vm2927_vm10 = vcmp.ge.f32.partialorder %v1717_v47, 0.0  ;;  %v4378_v5 = vmul.f32 %v13029_v55, %v3886_v46  ;;  %459 = vxpose.xlu1.b32.start [1/2] (short) %v72_v28, 128 }
 0x245   :  { %v13670_v62 = vpack.c.bf16 %v5291_v56, %v5289_v50  ;;  %v1722_v44 = vpop.f32.mrb[116].mxu0  ;;  %v3408_v43 = vmul.f32 0.01, %v1719_v13  ;;  %vm2928_vm11 = vcmp.ge.f32.partialorder %v1719_v13, 0.0 }
 0x246   :  { %v1723_v51 = vadd.f32 %v1722_v44, %v13005_v38  ;;  %v1724_v9 = vpop.f32.mrb[117].mxu0  ;;  %10743 = vmatmul.mubr.msk.f32.gmra.mrb[222].mxu0 %vm587_vm0, %v330_v48  ;;  %v13677_v22 = vpack.c.bf16 %v5292_v18, %v5290_v23  ;;  %v3887_v20 = vsel %vm2927_vm10, %v1717_v47, %v3407_v25  ;;  %v4869_v48 = vadd.f32 %v13037_v63, %v4377_v53 }
 0x247   :  { %17883 = vst [vmem:[#allocation28_spill] sm:$0xff] %v13670_v62  ;;  %v1725_v50 = vadd.f32 %v1724_v9, %v13009_v39  ;;  %2044 = vmatprep.mubr.f32.mxu0 %v17746_v2  ;;  %v3888_v23 = vsel %vm2928_vm11, %v1719_v13, %v3408_v43  ;;  %v4870_v47 = vadd.f32 %v13042_v3, %v4378_v5  ;;  %v13695_v9 = vpop.trf.xlu1 }
 0x248   :  { %17884 = vst [vmem:[#allocation29_spill] sm:$0xff] %v13677_v22  ;;  %vm2929_vm12 = vcmp.ge.f32.partialorder %v1723_v51, 0.0  ;;  %v3409_v58 = vmul.f32 0.01, %v1723_v51  ;;  %v4379_v13 = vmul.f32 %v13019_v49, %v3887_v20  ;;  %v4380_v53 = vmul.f32 %v13029_v55, %v3888_v23 }
 0x249   :  { %vm2930_vm13 = vcmp.ge.f32.partialorder %v1725_v50, 0.0  ;;  %v3410_v54 = vmul.f32 0.01, %v1725_v50  ;;  %v1728_v14 = vpop.f32.mrb[118].mxu0 }
 0x24a   :  { %v3889_v19 = vsel %vm2929_vm12, %v1723_v51, %v3409_v58  ;;  %v1729_v29 = vadd.f32 %v1728_v14, %v13005_v38  ;;  %v1730_v56 = vpop.f32.mrb[119].mxu0  ;;  %10744 = vmatmul.mubr.msk.f32.gmra.mrb[224].mxu0 %vm587_vm0, %v13593_v61  ;;  %v87_v61 = vld [vmem:[%s17857_s26 + $0xd0] sm:$0xff] }
 0x24b   :  { %v4381_v46 = vmul.f32 %v13019_v49, %v3889_v19  ;;  %v3890_v18 = vsel %vm2930_vm13, %v1725_v50, %v3410_v54  ;;  %v1731_v44 = vadd.f32 %v1730_v56, %v13009_v39  ;;  %2050 = vmatprep.mubr.f32.mxu0 %v17746_v2  ;;  %460 = vxpose.xlu1.b32.end [2/2] (short) %v87_v61, 128 }
 0x24c   :  { %v4382_v25 = vmul.f32 %v13029_v55, %v3890_v18  ;;  %vm2931_vm14 = vcmp.ge.f32.partialorder %v1729_v29, 0.0  ;;  %v3411_v43 = vmul.f32 0.01, %v1729_v29  ;;  %v11395_v51 = vpop.f32.mrb[0].mxu1 }
 0x24d   :  { %vm2932_vm15 = vcmp.ge.f32.partialorder %v1731_v44, 0.0  ;;  %v3412_v50 = vmul.f32 0.01, %v1731_v44  ;;  %v1734_v58 = vpop.f32.mrb[120].mxu0  ;;  %v11396_v28 = vpop.f32.mrb[1].mxu1  ;;  %v4873_v5 = vadd.f32 %v13037_v63, %v4381_v46 }
 0x24e   :  { %v3891_v20 = vsel %vm2931_vm14, %v1729_v29, %v3411_v43  ;;  %v1735_v54 = vadd.f32 %v1734_v58, %v13005_v38  ;;  %v13703_v14 = vadd.f32 %v11396_v28, %v11395_v51  ;;  %v1736_v19 = vpop.f32.mrb[121].mxu0  ;;  %10745 = vmatmul.mubr.msk.f32.gmra.mrb[226].mxu0 %vm587_vm0, %v13611_v16  ;;  %v11398_v56 = vpop.f32.mrb[2].mxu1  ;;  %v4874_v18 = vadd.f32 %v13042_v3, %v4382_v25 }
 0x24f   :  { %v4383_v23 = vmul.f32 %v13019_v49, %v3891_v20  ;;  %v3892_v2 = vsel %vm2932_vm15, %v1731_v44, %v3412_v50  ;;  %v1737_v32 = vadd.f32 %v1736_v19, %v13009_v39  ;;  %v11399_v61 = vpop.f32.mrb[3].mxu1  ;;  %2056 = vmatprep.mubr.f32.mxu0 %v17886_v36  ;;  %v5293_v29 = vmax.f32 %v4869_v48, %v4873_v5 }
 0x250   :  { %17885 = vst [vmem:[#allocation30_spill] sm:$0xff] %v13703_v14  ;;  %v4384_v46 = vmul.f32 %v13029_v55, %v3892_v2  ;;  %vm2933_vm1 = vcmp.ge.f32.partialorder %v1735_v54, 0.0  ;;  %v3413_v43 = vmul.f32 0.01, %v1735_v54  ;;  %v13712_v51 = vadd.f32 %v11399_v61, %v11398_v56 }
 0x251   :  { %v3414_v58 = vmul.f32 0.01, %v1737_v32  ;;  %v1740_v16 = vpop.f32.mrb[122].mxu0  ;;  %v5294_v28 = vmax.f32 %v4870_v47, %v4874_v18  ;;  %v4871_v25 = vadd.f32 %v13037_v63, %v4379_v13  ;;  %v4875_v20 = vadd.f32 %v13037_v63, %v4383_v23  ;;  %v13723_v47 = vpop.trf.xlu1 }
 0x252   :  { %17887 = vst [vmem:[#allocation31_spill] sm:$0xff] %v13712_v51  ;;  %vm2934_vm2 = vcmp.ge.f32.partialorder %v1737_v32, 0.0  ;;  %v1741_v44 = vadd.f32 %v1740_v16, %v13005_v38  ;;  %v1742_v50 = vpop.f32.mrb[123].mxu0  ;;  %10746 = vmatmul.mubr.msk.f32.gmra.mrb[228].mxu0 %vm587_vm0, %v13626_v12  ;;  %v4872_v2 = vadd.f32 %v13042_v3, %v4380_v53  ;;  %v4876_v48 = vadd.f32 %v13042_v3, %v4384_v46 }
 0x253   :  { %v3893_v5 = vsel %vm2933_vm1, %v1735_v54, %v3413_v43  ;;  %v1743_v19 = vadd.f32 %v1742_v50, %v13009_v39  ;;  %2062 = vmatprep.mubr.f32.mxu0 %v17886_v36  ;;  %v5295_v13 = vmax.f32 %v4871_v25, %v4875_v20  ;;  %v3894_v18 = vsel %vm2934_vm2, %v1737_v32, %v3414_v58 }
 0x254   :  { %v5296_v56 = vmax.f32 %v4872_v2, %v4876_v48  ;;  %v4385_v16 = vmul.f32 %v13019_v49, %v3893_v5  ;;  %v3415_v12 = vmul.f32 0.01, %v1741_v44  ;;  %vm2935_vm3 = vcmp.ge.f32.partialorder %v1741_v44, 0.0 }
 0x255   :  { %v1746_v23 = vpop.f32.mrb[124].mxu0  ;;  %v13725_v61 = vpack.c.bf16 %v5295_v13, %v5293_v29  ;;  %v3416_v46 = vmul.f32 0.01, %v1743_v19  ;;  %v4386_v32 = vmul.f32 %v13029_v55, %v3894_v18  ;;  %vm2936_vm4 = vcmp.ge.f32.partialorder %v1743_v19, 0.0  ;;  %v13736_v20 = vpop.trf.xlu1 }
 0x256   :  { %v1747_v53 = vadd.f32 %v1746_v23, %v13005_v38  ;;  %v1748_v34 = vpop.f32.mrb[125].mxu0  ;;  %10747 = vmatmul.mubr.msk.f32.gmra.mrb[230].mxu0 %vm587_vm0, %v13643_v59  ;;  %v13731_v54 = vpack.c.bf16 %v5296_v56, %v5294_v28  ;;  %v3895_v50 = vsel %vm2935_vm3, %v1741_v44, %v3415_v12 }
 0x257   :  { %17888 = vst [vmem:[#allocation32_spill] sm:$0xff] %v13725_v61  ;;  %v1749_v43 = vadd.f32 %v1748_v34, %v13009_v39  ;;  %2068 = vmatprep.mubr.f32.mxu0 %v17886_v36  ;;  %v4877_v34 = vadd.f32 %v13037_v63, %v4385_v16  ;;  %v3896_v48 = vsel %vm2936_vm4, %v1743_v19, %v3416_v46 }
 0x258   :  { %17889 = vst [vmem:[#allocation33_spill] sm:$0xff] %v13731_v54  ;;  %vm2937_vm5 = vcmp.ge.f32.partialorder %v1747_v53, 0.0  ;;  %v3417_v29 = vmul.f32 0.01, %v1747_v53  ;;  %v4878_v23 = vadd.f32 %v13042_v3, %v4386_v32  ;;  %v4387_v12 = vmul.f32 %v13019_v49, %v3895_v50 }
 0x259   :  { %vm2938_vm6 = vcmp.ge.f32.partialorder %v1749_v43, 0.0  ;;  %v3418_v58 = vmul.f32 0.01, %v1749_v43  ;;  %v1752_v25 = vpop.f32.mrb[126].mxu0  ;;  %v4388_v16 = vmul.f32 %v13029_v55, %v3896_v48 }
 0x25a   :  { %v3897_v59 = vsel %vm2937_vm5, %v1747_v53, %v3417_v29  ;;  %v1753_v28 = vadd.f32 %v1752_v25, %v13005_v38  ;;  %v1754_v2 = vpop.f32.mrb[127].mxu0  ;;  %10748 = vmatmul.mubr.msk.f32.gmra.mrb[232].mxu0 %vm587_vm0, %v13660_v40 }
 0x25b   :  { %v4389_v5 = vmul.f32 %v13019_v49, %v3897_v59  ;;  %v3898_v13 = vsel %vm2938_vm6, %v1749_v43, %v3418_v58  ;;  %v1755_v56 = vadd.f32 %v1754_v2, %v13009_v39  ;;  %2074 = vmatprep.mubr.f32.mxu0 %v17886_v36  ;;  %v13757_v59 = vpop.trf.xlu1 }
 0x25c   :  { %v4390_v18 = vmul.f32 %v13029_v55, %v3898_v13  ;;  %vm2939_vm7 = vcmp.ge.f32.partialorder %v1753_v28, 0.0  ;;  %v3419_v44 = vmul.f32 0.01, %v1753_v28 }
 0x25d   :  { %vm2940_vm8 = vcmp.ge.f32.partialorder %v1755_v56, 0.0  ;;  %v3420_v40 = vmul.f32 0.01, %v1755_v56  ;;  %v1758_v53 = vpop.f32.mrb[128].mxu0  ;;  %v4881_v19 = vadd.f32 %v13037_v63, %v4389_v5 }
 0x25e   :  { %v3899_v46 = vsel %vm2939_vm7, %v1753_v28, %v3419_v44  ;;  %v1759_v43 = vadd.f32 %v1758_v53, %v13005_v38  ;;  %v1760_v29 = vpop.f32.mrb[129].mxu0  ;;  %10749 = vmatmul.mubr.msk.f32.gmra.mrb[234].mxu0 %vm587_vm0, %v13675_v6  ;;  %v4882_v58 = vadd.f32 %v13042_v3, %v4390_v18  ;;  %v4879_v6 = vadd.f32 %v13037_v63, %v4387_v12 }
 0x25f   :  { %v4391_v32 = vmul.f32 %v13019_v49, %v3899_v46  ;;  %v3900_v25 = vsel %vm2940_vm8, %v1755_v56, %v3420_v40  ;;  %v1761_v50 = vadd.f32 %v1760_v29, %v13009_v39  ;;  %2080 = vmatprep.mubr.f32.mxu0 %v17886_v36  ;;  %v5297_v2 = vmax.f32 %v4877_v34, %v4881_v19 }
 0x260   :  { %v4392_v28 = vmul.f32 %v13029_v55, %v3900_v25  ;;  %vm2941_vm9 = vcmp.ge.f32.partialorder %v1759_v43, 0.0  ;;  %v3421_v48 = vmul.f32 0.01, %v1759_v43  ;;  %v5298_v5 = vmax.f32 %v4878_v23, %v4882_v58 }
 0x261   :  { %v3422_v13 = vmul.f32 0.01, %v1761_v50  ;;  %v1764_v44 = vpop.f32.mrb[130].mxu0  ;;  %v4883_v18 = vadd.f32 %v13037_v63, %v4391_v32  ;;  %vm2942_vm10 = vcmp.ge.f32.partialorder %v1761_v50, 0.0  ;;  %v4880_v34 = vadd.f32 %v13042_v3, %v4388_v16  ;;  %v13769_v32 = vpop.trf.xlu1 }
 0x262   :  { %v1765_v56 = vadd.f32 %v1764_v44, %v13005_v38  ;;  %v1766_v40 = vpop.f32.mrb[131].mxu0  ;;  %10750 = vmatmul.mubr.msk.f32.gmra.mrb[236].mxu0 %vm587_vm0, %v13695_v9  ;;  %v4884_v53 = vadd.f32 %v13042_v3, %v4392_v28  ;;  %v3901_v19 = vsel %vm2941_vm9, %v1759_v43, %v3421_v48 }
 0x263   :  { %v1767_v23 = vadd.f32 %v1766_v40, %v13009_v39  ;;  %2086 = vmatprep.mubr.f32.mxu0 %v17886_v36  ;;  %v5299_v46 = vmax.f32 %v4879_v6, %v4883_v18  ;;  %v3902_v29 = vsel %vm2942_vm10, %v1761_v50, %v3422_v13  ;;  %v4393_v44 = vmul.f32 %v13019_v49, %v3901_v19  ;;  %v13782_v13 = vpop.trf.xlu0 }
 0x264   :  { %v5300_v12 = vmax.f32 %v4880_v34, %v4884_v53  ;;  %v3423_v9 = vmul.f32 0.01, %v1765_v56  ;;  %vm2943_vm11 = vcmp.ge.f32.partialorder %v1765_v56, 0.0 }
 0x265   :  { %v1770_v58 = vpop.f32.mrb[132].mxu0  ;;  %v13771_v25 = vpack.c.bf16 %v5299_v46, %v5297_v2  ;;  %v3424_v28 = vmul.f32 0.01, %v1767_v23  ;;  %v4394_v2 = vmul.f32 %v13029_v55, %v3902_v29  ;;  %vm2944_vm12 = vcmp.ge.f32.partialorder %v1767_v23, 0.0  ;;  %v358_v29 = vpop.trf.xlu1 }
 0x266   :  { %v1771_v16 = vadd.f32 %v1770_v58, %v13005_v38  ;;  %v1772_v42 = vpop.f32.mrb[133].mxu0  ;;  %10751 = vmatmul.mubr.msk.f32.gmra.mrb[238].mxu0 %vm587_vm0, %v13723_v47  ;;  %v13777_v43 = vpack.c.bf16 %v5300_v12, %v5298_v5  ;;  %v3903_v40 = vsel %vm2943_vm11, %v1765_v56, %v3423_v9 }
 0x267   :  { %17890 = vst [vmem:[#allocation34_spill] sm:$0xff] %v13771_v25  ;;  %v1773_v50 = vadd.f32 %v1772_v42, %v13009_v39  ;;  %2092 = vmatprep.mubr.f32.mxu0 %v17886_v36  ;;  %v4885_v42 = vadd.f32 %v13037_v63, %v4393_v44  ;;  %v3904_v53 = vsel %vm2944_vm12, %v1767_v23, %v3424_v28 }
 0x268   :  { %17891 = vst [vmem:[#allocation35_spill] sm:$0xff] %v13777_v43  ;;  %vm2945_vm13 = vcmp.ge.f32.partialorder %v1771_v16, 0.0  ;;  %v3425_v48 = vmul.f32 0.01, %v1771_v16  ;;  %v4886_v9 = vadd.f32 %v13042_v3, %v4394_v2  ;;  %v4396_v28 = vmul.f32 %v13029_v55, %v3904_v53 }
 0x269   :  { %vm2946_vm14 = vcmp.ge.f32.partialorder %v1773_v50, 0.0  ;;  %v3426_v6 = vmul.f32 0.01, %v1773_v50  ;;  %v1776_v18 = vpop.f32.mrb[134].mxu0 }
 0x26a   :  { %v3905_v47 = vsel %vm2945_vm13, %v1771_v16, %v3425_v48  ;;  %v1777_v5 = vadd.f32 %v1776_v18, %v13005_v38  ;;  %v1778_v34 = vpop.f32.mrb[135].mxu0  ;;  %10752 = vmatmul.mubr.msk.f32.gmra.mrb[240].mxu0 %vm587_vm0, %v13736_v20  ;;  %v4395_v16 = vmul.f32 %v13019_v49, %v3903_v40 }
 0x26b   :  { %v4397_v19 = vmul.f32 %v13019_v49, %v3905_v47  ;;  %v3906_v46 = vsel %vm2946_vm14, %v1773_v50, %v3426_v6  ;;  %v1779_v12 = vadd.f32 %v1778_v34, %v13009_v39  ;;  %2098 = vmatprep.mubr.f32.mxu0 %v17886_v36  ;;  %v13800_v47 = vpop.trf.xlu0 }
 0x26c   :  { %v4398_v56 = vmul.f32 %v13029_v55, %v3906_v46  ;;  %vm2947_vm15 = vcmp.ge.f32.partialorder %v1777_v5, 0.0  ;;  %v3427_v58 = vmul.f32 0.01, %v1777_v5 }
 0x26d   :  { %vm2948_vm1 = vcmp.ge.f32.partialorder %v1779_v12, 0.0  ;;  %v3428_v20 = vmul.f32 0.01, %v1779_v12  ;;  %v1782_v44 = vpop.f32.mrb[136].mxu0  ;;  %v4889_v23 = vadd.f32 %v13037_v63, %v4397_v19 }
 0x26e   :  { %v3907_v50 = vsel %vm2947_vm15, %v1777_v5, %v3427_v58  ;;  %v1783_v48 = vadd.f32 %v1782_v44, %v13005_v38  ;;  %v1784_v6 = vpop.f32.mrb[137].mxu0  ;;  %10753 = vmatmul.mubr.msk.f32.gmra.mrb[242].mxu0 %vm587_vm0, %v13757_v59  ;;  %v4890_v18 = vadd.f32 %v13042_v3, %v4398_v56  ;;  %v359_v59 = vpop.trf.xlu1  ;;  %v4887_v56 = vadd.f32 %v13037_v63, %v4395_v16 }
 0x26f   :  { %v4399_v2 = vmul.f32 %v13019_v49, %v3907_v50  ;;  %v3908_v40 = vsel %vm2948_vm1, %v1779_v12, %v3428_v20  ;;  %v1785_v34 = vadd.f32 %v1784_v6, %v13009_v39  ;;  %2104 = vmatprep.mubr.f32.mxu0 %v17886_v36  ;;  %v5301_v19 = vmax.f32 %v4885_v42, %v4889_v23 }
 0x270   :  { %v4400_v5 = vmul.f32 %v13029_v55, %v3908_v40  ;;  %vm2949_vm2 = vcmp.ge.f32.partialorder %v1783_v48, 0.0  ;;  %v3429_v53 = vmul.f32 0.01, %v1783_v48  ;;  %v5302_v46 = vmax.f32 %v4886_v9, %v4890_v18  ;;  %v13815_v18 = vpop.trf.xlu0 }
 0x271   :  { %v3430_v58 = vmul.f32 0.01, %v1785_v34  ;;  %v1788_v44 = vpop.f32.mrb[138].mxu0  ;;  %v4891_v24 = vadd.f32 %v13037_v63, %v4399_v2  ;;  %vm2950_vm3 = vcmp.ge.f32.partialorder %v1785_v34, 0.0  ;;  %v4888_v42 = vadd.f32 %v13042_v3, %v4396_v28 }
 0x272   :  { %v1789_v12 = vadd.f32 %v1788_v44, %v13005_v38  ;;  %v1790_v20 = vpop.f32.mrb[139].mxu0  ;;  %10754 = vmatmul.mubr.msk.f32.gmra.mrb[244].mxu0 %vm587_vm0, %v13769_v32  ;;  %v4892_v23 = vadd.f32 %v13042_v3, %v4400_v5  ;;  %v3909_v50 = vsel %vm2949_vm2, %v1783_v48, %v3429_v53 }
 0x273   :  { %v1791_v9 = vadd.f32 %v1790_v20, %v13009_v39  ;;  %2110 = vmatprep.mubr.f32.mxu0 %v17886_v36  ;;  %v5303_v6 = vmax.f32 %v4887_v56, %v4891_v24  ;;  %v3910_v2 = vsel %vm2950_vm3, %v1785_v34, %v3430_v58  ;;  %v4401_v0 = vmul.f32 %v13019_v49, %v3909_v50  ;;  %v360_v34 = vpop.trf.xlu1 }
 0x274   :  { %v5304_v16 = vmax.f32 %v4888_v42, %v4892_v23  ;;  %v3431_v32 = vmul.f32 0.01, %v1789_v12  ;;  %vm2951_vm4 = vcmp.ge.f32.partialorder %v1789_v12, 0.0  ;;  %v13832_v23 = vpop.trf.xlu0 }
 0x275   :  { %v1794_v40 = vpop.f32.mrb[140].mxu0  ;;  %v13817_v44 = vpack.c.bf16 %v5303_v6, %v5301_v19  ;;  %v3432_v5 = vmul.f32 0.01, %v1791_v9  ;;  %v4402_v19 = vmul.f32 %v13029_v55, %v3910_v2  ;;  %vm2952_vm5 = vcmp.ge.f32.partialorder %v1791_v9, 0.0 }
 0x276   :  { %v1795_v28 = vadd.f32 %v1794_v40, %v13005_v38  ;;  %v1796_v33 = vpop.f32.mrb[141].mxu0  ;;  %10755 = vmatmul.mubr.msk.f32.gmra.mrb[246].mxu0 %vm587_vm0, %v358_v29  ;;  %v13822_v48 = vpack.c.bf16 %v5304_v16, %v5302_v46  ;;  %v4893_v29 = vadd.f32 %v13037_v63, %v4401_v0  ;;  %v3911_v46 = vsel %vm2951_vm4, %v1789_v12, %v3431_v32 }
 0x277   :  { %17892 = vst [vmem:[#allocation36_spill] sm:$0xff] %v13817_v44  ;;  %v1797_v24 = vadd.f32 %v1796_v33, %v13009_v39  ;;  %2116 = vmatprep.mubr.f32.mxu0 %v17886_v36  ;;  %v3912_v50 = vsel %vm2952_vm5, %v1791_v9, %v3432_v5  ;;  %v4894_v12 = vadd.f32 %v13042_v3, %v4402_v19  ;;  %v361_v5 = vpop.trf.xlu1 }
 0x278   :  { %17893 = vst [vmem:[#allocation37_spill] sm:$0xff] %v13822_v48  ;;  %vm2953_vm6 = vcmp.ge.f32.partialorder %v1795_v28, 0.0  ;;  %v3433_v53 = vmul.f32 0.01, %v1795_v28  ;;  %6062 = vmatprep.mubr.bf16.mxu1 %v13822_v48  ;;  %v4403_v32 = vmul.f32 %v13019_v49, %v3911_v46 }
 0x279   :  { %vm2954_vm7 = vcmp.ge.f32.partialorder %v1797_v24, 0.0  ;;  %v3434_v58 = vmul.f32 0.01, %v1797_v24  ;;  %v1800_v56 = vpop.f32.mrb[142].mxu0  ;;  %6063 = vmatmul.mubr.bf16.gmra.mrb[16].mxu1 %v13817_v44 }
 0x27a   :  { %v3913_v20 = vsel %vm2953_vm6, %v1795_v28, %v3433_v53  ;;  %v1801_v33 = vadd.f32 %v1800_v56, %v13005_v38  ;;  %v1802_v42 = vpop.f32.mrb[143].mxu0  ;;  %10756 = vmatmul.mubr.msk.f32.gmra.mrb[248].mxu0 %vm587_vm0, %v359_v59 }
 0x27b   :  { %v4405_v6 = vmul.f32 %v13019_v49, %v3913_v20  ;;  %v3914_v16 = vsel %vm2954_vm7, %v1797_v24, %v3434_v58  ;;  %v1803_v2 = vadd.f32 %v1802_v42, %v13009_v39  ;;  %2122 = vmatprep.mubr.f32.mxu0 %v17886_v36  ;;  %v4404_v24 = vmul.f32 %v13029_v55, %v3912_v50 }
 0x27c   :  { %v4406_v40 = vmul.f32 %v13029_v55, %v3914_v16  ;;  %vm2955_vm8 = vcmp.ge.f32.partialorder %v1801_v33, 0.0  ;;  %v3435_v0 = vmul.f32 0.01, %v1801_v33 }
 0x27d   :  { %v4897_v59 = vadd.f32 %v13037_v63, %v4405_v6  ;;  %vm2956_vm9 = vcmp.ge.f32.partialorder %v1803_v2, 0.0  ;;  %v3436_v28 = vmul.f32 0.01, %v1803_v2  ;;  %v1806_v9 = vpop.f32.mrb[144].mxu0 }
 0x27e   :  { %v3915_v53 = vsel %vm2955_vm8, %v1801_v33, %v3435_v0  ;;  %v1807_v58 = vadd.f32 %v1806_v9, %v13005_v38  ;;  %v1808_v56 = vpop.f32.mrb[145].mxu0  ;;  %10757 = vmatmul.mubr.msk.f32.gmra.mrb[250].mxu0 %vm587_vm0, %v360_v34  ;;  %v4898_v20 = vadd.f32 %v13042_v3, %v4406_v40  ;;  %v13849_v33 = vpop.trf.xlu0  ;;  %v4895_v9 = vadd.f32 %v13037_v63, %v4403_v32 }
 0x27f   :  { %v5305_v42 = vmax.f32 %v4893_v29, %v4897_v59  ;;  %v4407_v19 = vmul.f32 %v13019_v49, %v3915_v53  ;;  %v3916_v46 = vsel %vm2956_vm9, %v1803_v2, %v3436_v28  ;;  %v1809_v6 = vadd.f32 %v1808_v56, %v13009_v39  ;;  %2128 = vmatprep.mubr.f32.mxu0 %v17886_v36 }
 0x280   :  { %v4408_v16 = vmul.f32 %v13029_v55, %v3916_v46  ;;  %vm2957_vm10 = vcmp.ge.f32.partialorder %v1807_v58, 0.0  ;;  %v3437_v50 = vmul.f32 0.01, %v1807_v58  ;;  %v5306_v0 = vmax.f32 %v4894_v12, %v4898_v20  ;;  %v362_v20 = vpop.trf.xlu1 }
 0x281   :  { %v4899_v34 = vadd.f32 %v13037_v63, %v4407_v19  ;;  %vm2958_vm11 = vcmp.ge.f32.partialorder %v1809_v6, 0.0  ;;  %v3438_v29 = vmul.f32 0.01, %v1809_v6  ;;  %v1812_v40 = vpop.f32.mrb[146].mxu0  ;;  %v4896_v53 = vadd.f32 %v13042_v3, %v4404_v24 }
 0x282   :  { %v3917_v59 = vsel %vm2957_vm10, %v1807_v58, %v3437_v50  ;;  %v1813_v2 = vadd.f32 %v1812_v40, %v13005_v38  ;;  %v1814_v28 = vpop.f32.mrb[147].mxu0  ;;  %10758 = vmatmul.mubr.msk.f32.gmra.mrb[252].mxu0 %vm587_vm0, %v361_v5  ;;  %v4900_v56 = vadd.f32 %v13042_v3, %v4408_v16  ;;  %v13864_v16 = vpop.trf.xlu0 }
 0x283   :  { %v5307_v46 = vmax.f32 %v4895_v9, %v4899_v34  ;;  %v1815_v12 = vadd.f32 %v1814_v28, %v13009_v39  ;;  %2134 = vmatprep.mubr.f32.mxu0 %v17886_v36  ;;  %v3918_v32 = vsel %vm2958_vm11, %v1809_v6, %v3438_v29  ;;  %v4409_v58 = vmul.f32 %v13019_v49, %v3917_v59  ;;  %v73_v29 = vld [vmem:[%s17857_s26 + $0x60] sm:$0xff] }
 0x284   :  { %v5308_v19 = vmax.f32 %v4896_v53, %v4900_v56  ;;  %v3439_v50 = vmul.f32 0.01, %v1813_v2  ;;  %vm2959_vm12 = vcmp.ge.f32.partialorder %v1813_v2, 0.0  ;;  %v4410_v6 = vmul.f32 %v13029_v55, %v3918_v32  ;;  %491 = vxpose.xlu0.b32.start [1/2] (short) %v73_v29, 128 }
 0x285   :  { %v13859_v44 = vpack.c.bf16 %v5307_v46, %v5305_v42  ;;  %v1818_v40 = vpop.f32.mrb[148].mxu0  ;;  %v3440_v5 = vmul.f32 0.01, %v1815_v12  ;;  %vm2960_vm13 = vcmp.ge.f32.partialorder %v1815_v12, 0.0 }
 0x286   :  { %v1819_v24 = vadd.f32 %v1818_v40, %v13005_v38  ;;  %v1820_v48 = vpop.f32.mrb[149].mxu0  ;;  %10759 = vmatmul.mubr.msk.f32.gmra.mrb[254].mxu0 %vm587_vm0, %v362_v20  ;;  %v13866_v9 = vpack.c.bf16 %v5308_v19, %v5306_v0  ;;  %v3919_v59 = vsel %vm2959_vm12, %v1813_v2, %v3439_v50  ;;  %v4902_v2 = vadd.f32 %v13042_v3, %v4410_v6 }
 0x287   :  { %17894 = vst [vmem:[#allocation38_spill] sm:$0xff] %v13859_v44  ;;  %v1821_v42 = vadd.f32 %v1820_v48, %v13009_v39  ;;  %2140 = vmatprep.mubr.f32.mxu0 %v17886_v36  ;;  %v3920_v0 = vsel %vm2960_vm13, %v1815_v12, %v3440_v5  ;;  %v4901_v48 = vadd.f32 %v13037_v63, %v4409_v58 }
 0x288   :  { %17895 = vst [vmem:[#allocation39_spill] sm:$0xff] %v13866_v9  ;;  %vm2961_vm14 = vcmp.ge.f32.partialorder %v1819_v24, 0.0  ;;  %v3441_v34 = vmul.f32 0.01, %v1819_v24  ;;  %v4411_v12 = vmul.f32 %v13019_v49, %v3919_v59  ;;  %v4412_v58 = vmul.f32 %v13029_v55, %v3920_v0 }
 0x289   :  { %vm2962_vm15 = vcmp.ge.f32.partialorder %v1821_v42, 0.0  ;;  %v3442_v28 = vmul.f32 0.01, %v1821_v42  ;;  %v1824_v53 = vpop.f32.mrb[150].mxu0 }
 0x28a   :  { %v3921_v56 = vsel %vm2961_vm14, %v1819_v24, %v3441_v34  ;;  %v1825_v46 = vadd.f32 %v1824_v53, %v13005_v38  ;;  %v1826_v20 = vpop.f32.mrb[151].mxu0  ;;  %10760 = vmatmul.mubr.msk.f32.gmra.mrb[0].mxu0 %vm587_vm0, %v13782_v13  ;;  %v13884_v34 = vpop.trf.xlu0  ;;  %v88_v13 = vld [vmem:[%s17857_s26 + $0xd8] sm:$0xff] }
 0x28b   :  { %v4413_v32 = vmul.f32 %v13019_v49, %v3921_v56  ;;  %v3922_v19 = vsel %vm2962_vm15, %v1821_v42, %v3442_v28  ;;  %v1827_v40 = vadd.f32 %v1826_v20, %v13009_v39  ;;  %2146 = vmatprep.mubr.f32.mxu0 %v17886_v36  ;;  %492 = vxpose.xlu0.b32.end [2/2] (short) %v88_v13, 128 }
 0x28c   :  { %v4414_v50 = vmul.f32 %v13029_v55, %v3922_v19  ;;  %vm2963_vm1 = vcmp.ge.f32.partialorder %v1825_v46, 0.0  ;;  %v3443_v5 = vmul.f32 0.01, %v1825_v46  ;;  %v11401_v24 = vpop.f32.mrb[4].mxu1 }
 0x28d   :  { %vm2964_vm2 = vcmp.ge.f32.partialorder %v1827_v40, 0.0  ;;  %v3444_v42 = vmul.f32 0.01, %v1827_v40  ;;  %v1830_v29 = vpop.f32.mrb[152].mxu0  ;;  %v11402_v28 = vpop.f32.mrb[5].mxu1  ;;  %v4905_v6 = vadd.f32 %v13037_v63, %v4413_v32 }
 0x28e   :  { %v3923_v59 = vsel %vm2963_vm1, %v1825_v46, %v3443_v5  ;;  %v1831_v53 = vadd.f32 %v1830_v29, %v13005_v38  ;;  %v13892_v56 = vadd.f32 %v11402_v28, %v11401_v24  ;;  %v1832_v20 = vpop.f32.mrb[153].mxu0  ;;  %10761 = vmatmul.mubr.msk.f32.gmra.mrb[2].mxu0 %vm587_vm0, %v13800_v47  ;;  %v11404_v19 = vpop.f32.mrb[6].mxu1  ;;  %v4906_v45 = vadd.f32 %v13042_v3, %v4414_v50 }
 0x28f   :  { %v4415_v0 = vmul.f32 %v13019_v49, %v3923_v59  ;;  %v3924_v52 = vsel %vm2964_vm2, %v1827_v40, %v3444_v42  ;;  %v1833_v25 = vadd.f32 %v1832_v20, %v13009_v39  ;;  %v11405_v13 = vpop.f32.mrb[7].mxu1  ;;  %2152 = vmatprep.mubr.f32.mxu0 %v17886_v36  ;;  %v5309_v46 = vmax.f32 %v4901_v48, %v4905_v6 }
 0x290   :  { %17896 = vst [vmem:[#allocation40_spill] sm:$0xff] %v13892_v56  ;;  %v4416_v32 = vmul.f32 %v13029_v55, %v3924_v52  ;;  %v3445_v5 = vmul.f32 0.01, %v1831_v53  ;;  %v13901_v24 = vadd.f32 %v11405_v13, %v11404_v19  ;;  %vm2965_vm3 = vcmp.ge.f32.partialorder %v1831_v53, 0.0 }
 0x291   :  { %v1836_v29 = vpop.f32.mrb[154].mxu0  ;;  %v5310_v47 = vmax.f32 %v4902_v2, %v4906_v45  ;;  %v4903_v28 = vadd.f32 %v13037_v63, %v4411_v12  ;;  %v4907_v50 = vadd.f32 %v13037_v63, %v4415_v0  ;;  %v4904_v48 = vadd.f32 %v13042_v3, %v4412_v58  ;;  %v13912_v45 = vpop.trf.xlu0 }
 0x292   :  { %17897 = vst [vmem:[#allocation41_spill] sm:$0xff] %v13901_v24  ;;  %v1837_v40 = vadd.f32 %v1836_v29, %v13005_v38  ;;  %v1838_v42 = vpop.f32.mrb[155].mxu0  ;;  %10762 = vmatmul.mubr.msk.f32.gmra.mrb[4].mxu0 %vm587_vm0, %v13815_v18  ;;  %v4908_v52 = vadd.f32 %v13042_v3, %v4416_v32  ;;  %v3446_v6 = vmul.f32 0.01, %v1833_v25  ;;  %v3925_v12 = vsel %vm2965_vm3, %v1831_v53, %v3445_v5 }
 0x293   :  { %v1839_v59 = vadd.f32 %v1838_v42, %v13009_v39  ;;  %2158 = vmatprep.mubr.f32.mxu0 %v17886_v36  ;;  %v5311_v2 = vmax.f32 %v4903_v28, %v4907_v50  ;;  %vm2966_vm4 = vcmp.ge.f32.partialorder %v1833_v25, 0.0  ;;  %v4417_v42 = vmul.f32 %v13019_v49, %v3925_v12 }
 0x294   :  { %v5312_v20 = vmax.f32 %v4904_v48, %v4908_v52  ;;  %v3447_v19 = vmul.f32 0.01, %v1837_v40  ;;  %vm2967_vm5 = vcmp.ge.f32.partialorder %v1837_v40, 0.0  ;;  %v3926_v28 = vsel %vm2966_vm4, %v1833_v25, %v3446_v6 }
 0x295   :  { %v1842_v0 = vpop.f32.mrb[156].mxu0  ;;  %v13914_v13 = vpack.c.bf16 %v5311_v2, %v5309_v46  ;;  %v3448_v18 = vmul.f32 0.01, %v1839_v59  ;;  %vm2968_vm6 = vcmp.ge.f32.partialorder %v1839_v59, 0.0  ;;  %v13924_v52 = vpop.trf.xlu0 }
 0x296   :  { %v1843_v58 = vadd.f32 %v1842_v0, %v13005_v38  ;;  %v1844_v32 = vpop.f32.mrb[157].mxu0  ;;  %10763 = vmatmul.mubr.msk.f32.gmra.mrb[6].mxu0 %vm587_vm0, %v13832_v23  ;;  %v13919_v29 = vpack.c.bf16 %v5312_v20, %v5310_v47  ;;  %v3927_v5 = vsel %vm2967_vm5, %v1837_v40, %v3447_v19  ;;  %v4418_v23 = vmul.f32 %v13029_v55, %v3926_v28 }
 0x297   :  { %17898 = vst [vmem:[#allocation42_spill] sm:$0xff] %v13914_v13  ;;  %v1845_v53 = vadd.f32 %v1844_v32, %v13009_v39  ;;  %2164 = vmatprep.mubr.f32.mxu0 %v17886_v36  ;;  %v3928_v47 = vsel %vm2968_vm6, %v1839_v59, %v3448_v18  ;;  %v4909_v19 = vadd.f32 %v13037_v63, %v4417_v42 }
 0x298   :  { %17899 = vst [vmem:[#allocation43_spill] sm:$0xff] %v13919_v29  ;;  %vm2969_vm7 = vcmp.ge.f32.partialorder %v1843_v58, 0.0  ;;  %v3449_v46 = vmul.f32 0.01, %v1843_v58  ;;  %v4419_v0 = vmul.f32 %v13019_v49, %v3927_v5  ;;  %v4910_v42 = vadd.f32 %v13042_v3, %v4418_v23 }
 0x299   :  { %vm2970_vm8 = vcmp.ge.f32.partialorder %v1845_v53, 0.0  ;;  %v3450_v50 = vmul.f32 0.01, %v1845_v53  ;;  %v1848_v48 = vpop.f32.mrb[158].mxu0 }
 0x29a   :  { %v3929_v2 = vsel %vm2969_vm7, %v1843_v58, %v3449_v46  ;;  %v1849_v12 = vadd.f32 %v1848_v48, %v13005_v38  ;;  %v1850_v25 = vpop.f32.mrb[159].mxu0  ;;  %10764 = vmatmul.mubr.msk.f32.gmra.mrb[8].mxu0 %vm587_vm0, %v13849_v33  ;;  %v4420_v58 = vmul.f32 %v13029_v55, %v3928_v47 }
 0x29b   :  { %v4421_v6 = vmul.f32 %v13019_v49, %v3929_v2  ;;  %v3930_v20 = vsel %vm2970_vm8, %v1845_v53, %v3450_v50  ;;  %v1851_v40 = vadd.f32 %v1850_v25, %v13009_v39  ;;  %2170 = vmatprep.mubr.f32.mxu0 %v17886_v36  ;;  %v13946_v25 = vpop.trf.xlu0 }
 0x29c   :  { %v4422_v59 = vmul.f32 %v13029_v55, %v3930_v20  ;;  %vm2971_vm9 = vcmp.ge.f32.partialorder %v1849_v12, 0.0  ;;  %v3451_v18 = vmul.f32 0.01, %v1849_v12  ;;  %v4912_v23 = vadd.f32 %v13042_v3, %v4420_v58 }
 0x29d   :  { %vm2972_vm10 = vcmp.ge.f32.partialorder %v1851_v40, 0.0  ;;  %v3452_v32 = vmul.f32 0.01, %v1851_v40  ;;  %v1854_v33 = vpop.f32.mrb[160].mxu0  ;;  %v4913_v28 = vadd.f32 %v13037_v63, %v4421_v6 }
 0x29e   :  { %v3931_v53 = vsel %vm2971_vm9, %v1849_v12, %v3451_v18  ;;  %v1855_v46 = vadd.f32 %v1854_v33, %v13005_v38  ;;  %v1856_v50 = vpop.f32.mrb[161].mxu0  ;;  %10765 = vmatmul.mubr.msk.f32.gmra.mrb[10].mxu0 %vm587_vm0, %v13864_v16  ;;  %v4914_v5 = vadd.f32 %v13042_v3, %v4422_v59  ;;  %v4911_v59 = vadd.f32 %v13037_v63, %v4419_v0 }
 0x29f   :  { %v4423_v48 = vmul.f32 %v13019_v49, %v3931_v53  ;;  %v3932_v2 = vsel %vm2972_vm10, %v1851_v40, %v3452_v32  ;;  %v1857_v47 = vadd.f32 %v1856_v50, %v13009_v39  ;;  %2176 = vmatprep.mubr.f32.mxu0 %v17886_v36  ;;  %v5313_v12 = vmax.f32 %v4909_v19, %v4913_v28 }
 0x2a0   :  { %v4424_v6 = vmul.f32 %v13029_v55, %v3932_v2  ;;  %vm2973_vm11 = vcmp.ge.f32.partialorder %v1855_v46, 0.0  ;;  %v3453_v20 = vmul.f32 0.01, %v1855_v46  ;;  %v5314_v18 = vmax.f32 %v4910_v42, %v4914_v5 }
 0x2a1   :  { %v3454_v16 = vmul.f32 0.01, %v1857_v47  ;;  %v1860_v33 = vpop.f32.mrb[162].mxu0  ;;  %v4915_v40 = vadd.f32 %v13037_v63, %v4423_v48  ;;  %vm2974_vm12 = vcmp.ge.f32.partialorder %v1857_v47, 0.0 }
 0x2a2   :  { %v3933_v32 = vsel %vm2973_vm11, %v1855_v46, %v3453_v20  ;;  %v1861_v53 = vadd.f32 %v1860_v33, %v13005_v38  ;;  %v1862_v50 = vpop.f32.mrb[163].mxu0  ;;  %10766 = vmatmul.mubr.msk.f32.gmra.mrb[12].mxu0 %vm587_vm0, %v13884_v34  ;;  %v4916_v19 = vadd.f32 %v13042_v3, %v4424_v6  ;;  %v13959_v46 = vpop.trf.xlu0 }
 0x2a3   :  { %v1863_v28 = vadd.f32 %v1862_v50, %v13009_v39  ;;  %2182 = vmatprep.mubr.f32.mxu0 %v17886_v36  ;;  %v5315_v42 = vmax.f32 %v4911_v59, %v4915_v40  ;;  %v4425_v0 = vmul.f32 %v13019_v49, %v3933_v32  ;;  %v3934_v5 = vsel %vm2974_vm12, %v1857_v47, %v3454_v16  ;;  %v13971_v16 = vpop.trf.xlu1  ;;  %v12171_v40 = vld [vmem:[%s17728_s5 + $0xc0] sm:$0xff]  }
 0x2a4   :  { %v5316_v58 = vmax.f32 %v4912_v23, %v4916_v19  ;;  %v3455_v20 = vmul.f32 0.01, %v1861_v53  ;;  %vm2975_vm13 = vcmp.ge.f32.partialorder %v1861_v53, 0.0  ;;  %v4426_v47 = vmul.f32 %v13029_v55, %v3934_v5  ;;  %11279 = vmatprep.subr.bf16.mxu0 %v12171_v40 }
 0x2a5   :  { %v1866_v48 = vpop.f32.mrb[164].mxu0  ;;  %v13961_v2 = vpack.c.bf16 %v5315_v42, %v5313_v12  ;;  %v3456_v59 = vmul.f32 0.01, %v1863_v28  ;;  %vm2976_vm14 = vcmp.ge.f32.partialorder %v1863_v28, 0.0  ;;  %v4917_v32 = vadd.f32 %v13037_v63, %v4425_v0 }
 0x2a6   :  { %v1867_v33 = vadd.f32 %v1866_v48, %v13005_v38  ;;  %v1868_v34 = vpop.f32.mrb[165].mxu0  ;;  %10767 = vmatmul.mubr.msk.f32.gmra.mrb[14].mxu0 %vm587_vm0, %v13912_v45  ;;  %v13966_v6 = vpack.c.bf16 %v5316_v58, %v5314_v18  ;;  %v3935_v50 = vsel %vm2975_vm13, %v1861_v53, %v3455_v20  ;;  %v12172_v53 = vld [vmem:[%s17728_s5 + $0x80] sm:$0xff]  }
 0x2a7   :  { %17900 = vst [vmem:[#allocation44_spill] sm:$0xff] %v13961_v2  ;;  %v1869_v23 = vadd.f32 %v1868_v34, %v13009_v39  ;;  %2188 = vmatprep.mubr.f32.mxu0 %v17886_v36  ;;  %v3936_v5 = vsel %vm2976_vm14, %v1863_v28, %v3456_v59  ;;  %v4427_v28 = vmul.f32 %v13019_v49, %v3935_v50 }
 0x2a8   :  { %17901 = vst [vmem:[#allocation45_spill] sm:$0xff] %v13966_v6  ;;  %vm2977_vm15 = vcmp.ge.f32.partialorder %v1867_v33, 0.0  ;;  %v3457_v12 = vmul.f32 0.01, %v1867_v33  ;;  %v390_v6 = vpop.trf.xlu0  ;;  %11280 = vmatpush3.bf16.msra.mxu0 %v12172_v53 }
 0x2a9   :  { %vm2978_vm1 = vcmp.ge.f32.partialorder %v1869_v23, 0.0  ;;  %v3458_v45 = vmul.f32 0.01, %v1869_v23  ;;  %v1872_v18 = vpop.f32.mrb[166].mxu0 }
 0x2aa   :  { %v3937_v19 = vsel %vm2977_vm15, %v1867_v33, %v3457_v12  ;;  %v1873_v42 = vadd.f32 %v1872_v18, %v13005_v38  ;;  %v1874_v58 = vpop.f32.mrb[167].mxu0  ;;  %10768 = vmatmul.mubr.msk.f32.gmra.mrb[16].mxu0 %vm587_vm0, %v13924_v52  ;;  %v4918_v52 = vadd.f32 %v13042_v3, %v4426_v47  ;;  %v4428_v12 = vmul.f32 %v13029_v55, %v3936_v5  ;;  %v13995_v47 = vpop.trf.xlu1 }
 0x2ab   :  { %v4429_v48 = vmul.f32 %v13019_v49, %v3937_v19  ;;  %v3938_v34 = vsel %vm2978_vm1, %v1869_v23, %v3458_v45  ;;  %v1875_v2 = vadd.f32 %v1874_v58, %v13009_v39  ;;  %2194 = vmatprep.mubr.f32.mxu0 %v17886_v36 }
 0x2ac   :  { %v4430_v0 = vmul.f32 %v13029_v55, %v3938_v34  ;;  %vm2979_vm2 = vcmp.ge.f32.partialorder %v1873_v42, 0.0  ;;  %v3459_v20 = vmul.f32 0.01, %v1873_v42  ;;  %v391_v43 = vpop.trf.xlu0 }
 0x2ad   :  { %vm2980_vm3 = vcmp.ge.f32.partialorder %v1875_v2, 0.0  ;;  %v3460_v33 = vmul.f32 0.01, %v1875_v2  ;;  %v1878_v59 = vpop.f32.mrb[168].mxu0  ;;  %v4921_v23 = vadd.f32 %v13037_v63, %v4429_v48 }
 0x2ae   :  { %v3939_v40 = vsel %vm2979_vm2, %v1873_v42, %v3459_v20  ;;  %v1879_v45 = vadd.f32 %v1878_v59, %v13005_v38  ;;  %v1880_v18 = vpop.f32.mrb[169].mxu0  ;;  %10769 = vmatmul.mubr.msk.f32.gmra.mrb[18].mxu0 %vm587_vm0, %v13946_v25  ;;  %v4922_v19 = vadd.f32 %v13042_v3, %v4430_v0  ;;  %v4919_v25 = vadd.f32 %v13037_v63, %v4427_v28 }
 0x2af   :  { %v4431_v50 = vmul.f32 %v13019_v49, %v3939_v40  ;;  %v3940_v58 = vsel %vm2980_vm3, %v1875_v2, %v3460_v33  ;;  %v1881_v34 = vadd.f32 %v1880_v18, %v13009_v39  ;;  %2200 = vmatprep.mubr.f32.mxu0 %v17886_v36  ;;  %v5317_v48 = vmax.f32 %v4917_v32, %v4921_v23 }
 0x2b0   :  { %v4432_v42 = vmul.f32 %v13029_v55, %v3940_v58  ;;  %vm2981_vm4 = vcmp.ge.f32.partialorder %v1879_v45, 0.0  ;;  %v3461_v5 = vmul.f32 0.01, %v1879_v45  ;;  %v5318_v53 = vmax.f32 %v4918_v52, %v4922_v19  ;;  %v14010_v19 = vpop.trf.xlu1 }
 0x2b1   :  { %v3462_v20 = vmul.f32 0.01, %v1881_v34  ;;  %v1884_v59 = vpop.f32.mrb[170].mxu0  ;;  %v4923_v0 = vadd.f32 %v13037_v63, %v4431_v50  ;;  %vm2982_vm5 = vcmp.ge.f32.partialorder %v1881_v34, 0.0  ;;  %v4920_v32 = vadd.f32 %v13042_v3, %v4428_v12 }
 0x2b2   :  { %v1885_v2 = vadd.f32 %v1884_v59, %v13005_v38  ;;  %v1886_v33 = vpop.f32.mrb[171].mxu0  ;;  %10770 = vmatmul.mubr.msk.f32.gmra.mrb[20].mxu0 %vm587_vm0, %v13959_v46  ;;  %v4924_v23 = vadd.f32 %v13042_v3, %v4432_v42  ;;  %v3941_v40 = vsel %vm2981_vm4, %v1879_v45, %v3461_v5 }
 0x2b3   :  { %v1887_v52 = vadd.f32 %v1886_v33, %v13009_v39  ;;  %2206 = vmatprep.mubr.f32.mxu0 %v17886_v36  ;;  %v5319_v28 = vmax.f32 %v4919_v25, %v4923_v0  ;;  %v3942_v50 = vsel %vm2982_vm5, %v1881_v34, %v3462_v20  ;;  %v4433_v8 = vmul.f32 %v13019_v49, %v3941_v40  ;;  %v392_v34 = vpop.trf.xlu0 }
 0x2b4   :  { %v5320_v18 = vmax.f32 %v4920_v32, %v4924_v23  ;;  %v3463_v46 = vmul.f32 0.01, %v1885_v2  ;;  %vm2983_vm6 = vcmp.ge.f32.partialorder %v1885_v2, 0.0  ;;  %v14027_v23 = vpop.trf.xlu1 }
 0x2b5   :  { %v1890_v58 = vpop.f32.mrb[172].mxu0  ;;  %v14012_v59 = vpack.c.bf16 %v5319_v28, %v5317_v48  ;;  %v3464_v42 = vmul.f32 0.01, %v1887_v52  ;;  %v4434_v48 = vmul.f32 %v13029_v55, %v3942_v50  ;;  %vm2984_vm7 = vcmp.ge.f32.partialorder %v1887_v52, 0.0 }
 0x2b6   :  { %v1891_v12 = vadd.f32 %v1890_v58, %v13005_v38  ;;  %v1892_v27 = vpop.f32.mrb[173].mxu0  ;;  %10771 = vmatmul.mubr.msk.f32.gmra.mrb[22].mxu0 %vm587_vm0, %v390_v6  ;;  %v14017_v45 = vpack.c.bf16 %v5320_v18, %v5318_v53  ;;  %v4925_v6 = vadd.f32 %v13037_v63, %v4433_v8  ;;  %v3943_v53 = vsel %vm2983_vm6, %v1885_v2, %v3463_v46 }
 0x2b7   :  { %17902 = vst [vmem:[#allocation46_spill] sm:$0xff] %v14012_v59  ;;  %v1893_v5 = vadd.f32 %v1892_v27, %v13009_v39  ;;  %2212 = vmatprep.mubr.f32.mxu0 %v17886_v36  ;;  %v3944_v40 = vsel %vm2984_vm7, %v1887_v52, %v3464_v42  ;;  %v4926_v2 = vadd.f32 %v13042_v3, %v4434_v48  ;;  %v393_v42 = vpop.trf.xlu0 }
 0x2b8   :  { %17903 = vst [vmem:[#allocation47_spill] sm:$0xff] %v14017_v45  ;;  %vm2985_vm8 = vcmp.ge.f32.partialorder %v1891_v12, 0.0  ;;  %v3465_v20 = vmul.f32 0.01, %v1891_v12  ;;  %6070 = vmatprep.mubr.bf16.mxu1 %v14017_v45  ;;  %v4435_v46 = vmul.f32 %v13019_v49, %v3943_v53 }
 0x2b9   :  { %vm2986_vm9 = vcmp.ge.f32.partialorder %v1893_v5, 0.0  ;;  %v3466_v25 = vmul.f32 0.01, %v1893_v5  ;;  %v1896_v0 = vpop.f32.mrb[174].mxu0  ;;  %6071 = vmatmul.mubr.bf16.gmra.mrb[20].mxu1 %v14012_v59 }
 0x2ba   :  { %v3945_v33 = vsel %vm2985_vm8, %v1891_v12, %v3465_v20  ;;  %v1897_v27 = vadd.f32 %v1896_v0, %v13005_v38  ;;  %v1898_v32 = vpop.f32.mrb[175].mxu0  ;;  %10772 = vmatmul.mubr.msk.f32.gmra.mrb[24].mxu0 %vm587_vm0, %v391_v43 }
 0x2bb   :  { %v4437_v28 = vmul.f32 %v13019_v49, %v3945_v33  ;;  %v3946_v18 = vsel %vm2986_vm9, %v1893_v5, %v3466_v25  ;;  %v1899_v50 = vadd.f32 %v1898_v32, %v13009_v39  ;;  %2218 = vmatprep.mubr.f32.mxu0 %v17886_v36  ;;  %v4436_v5 = vmul.f32 %v13029_v55, %v3944_v40 }
 0x2bc   :  { %v4438_v58 = vmul.f32 %v13029_v55, %v3946_v18  ;;  %vm2987_vm10 = vcmp.ge.f32.partialorder %v1897_v27, 0.0  ;;  %v3467_v8 = vmul.f32 0.01, %v1897_v27 }
 0x2bd   :  { %v4929_v43 = vadd.f32 %v13037_v63, %v4437_v28  ;;  %vm2988_vm11 = vcmp.ge.f32.partialorder %v1899_v50, 0.0  ;;  %v3468_v12 = vmul.f32 0.01, %v1899_v50  ;;  %v1902_v52 = vpop.f32.mrb[176].mxu0 }
 0x2be   :  { %v3947_v20 = vsel %vm2987_vm10, %v1897_v27, %v3467_v8  ;;  %v1903_v25 = vadd.f32 %v1902_v52, %v13005_v38  ;;  %v1904_v0 = vpop.f32.mrb[177].mxu0  ;;  %10773 = vmatmul.mubr.msk.f32.gmra.mrb[26].mxu0 %vm587_vm0, %v392_v34  ;;  %v4930_v33 = vadd.f32 %v13042_v3, %v4438_v58  ;;  %v14044_v27 = vpop.trf.xlu1  ;;  %v4927_v52 = vadd.f32 %v13037_v63, %v4435_v46 }
 0x2bf   :  { %v5321_v32 = vmax.f32 %v4925_v6, %v4929_v43  ;;  %v4439_v48 = vmul.f32 %v13019_v49, %v3947_v20  ;;  %v3948_v53 = vsel %vm2988_vm11, %v1899_v50, %v3468_v12  ;;  %v1905_v28 = vadd.f32 %v1904_v0, %v13009_v39  ;;  %2224 = vmatprep.mubr.f32.mxu0 %v17886_v36  ;;  %v394_v46 = vpop.trf.xlu0 }
 0x2c0   :  { %v4440_v18 = vmul.f32 %v13029_v55, %v3948_v53  ;;  %vm2989_vm12 = vcmp.ge.f32.partialorder %v1903_v25, 0.0  ;;  %v3469_v40 = vmul.f32 0.01, %v1903_v25  ;;  %v5322_v8 = vmax.f32 %v4926_v2, %v4930_v33 }
 0x2c1   :  { %v4931_v34 = vadd.f32 %v13037_v63, %v4439_v48  ;;  %vm2990_vm13 = vcmp.ge.f32.partialorder %v1905_v28, 0.0  ;;  %v3470_v6 = vmul.f32 0.01, %v1905_v28  ;;  %v1908_v58 = vpop.f32.mrb[178].mxu0  ;;  %v4928_v20 = vadd.f32 %v13042_v3, %v4436_v5 }
 0x2c2   :  { %v3949_v43 = vsel %vm2989_vm12, %v1903_v25, %v3469_v40  ;;  %v1909_v50 = vadd.f32 %v1908_v58, %v13005_v38  ;;  %v1910_v12 = vpop.f32.mrb[179].mxu0  ;;  %10774 = vmatmul.mubr.msk.f32.gmra.mrb[28].mxu0 %vm587_vm0, %v393_v42  ;;  %v4932_v0 = vadd.f32 %v13042_v3, %v4440_v18  ;;  %v14059_v18 = vpop.trf.xlu1 }
 0x2c3   :  { %v5323_v53 = vmax.f32 %v4927_v52, %v4931_v34  ;;  %v1911_v2 = vadd.f32 %v1910_v12, %v13009_v39  ;;  %2230 = vmatprep.mubr.f32.mxu0 %v17886_v36  ;;  %v3950_v33 = vsel %vm2990_vm13, %v1905_v28, %v3470_v6  ;;  %v4441_v25 = vmul.f32 %v13019_v49, %v3949_v43  ;;  %v74_v6 = vld [vmem:[%s17857_s26 + $0x68] sm:$0xff] }
 0x2c4   :  { %v5324_v48 = vmax.f32 %v4928_v20, %v4932_v0  ;;  %v3471_v40 = vmul.f32 0.01, %v1909_v50  ;;  %vm2991_vm14 = vcmp.ge.f32.partialorder %v1909_v50, 0.0  ;;  %v4442_v28 = vmul.f32 %v13029_v55, %v3950_v33  ;;  %523 = vxpose.xlu1.b32.start [1/2] (short) %v74_v6, 128 }
 0x2c5   :  { %v14054_v59 = vpack.c.bf16 %v5323_v53, %v5321_v32  ;;  %v1914_v58 = vpop.f32.mrb[180].mxu0  ;;  %v3472_v42 = vmul.f32 0.01, %v1911_v2  ;;  %vm2992_vm15 = vcmp.ge.f32.partialorder %v1911_v2, 0.0 }
 0x2c6   :  { %v1915_v5 = vadd.f32 %v1914_v58, %v13005_v38  ;;  %v1916_v45 = vpop.f32.mrb[181].mxu0  ;;  %10775 = vmatmul.mubr.msk.f32.gmra.mrb[30].mxu0 %vm587_vm0, %v394_v46  ;;  %v14061_v52 = vpack.c.bf16 %v5324_v48, %v5322_v8  ;;  %v3951_v43 = vsel %vm2991_vm14, %v1909_v50, %v3471_v40  ;;  %v4934_v50 = vadd.f32 %v13042_v3, %v4442_v28 }
 0x2c7   :  { %17904 = vst [vmem:[#allocation48_spill] sm:$0xff] %v14054_v59  ;;  %v1917_v32 = vadd.f32 %v1916_v45, %v13009_v39  ;;  %2236 = vmatprep.mubr.f32.mxu0 %v17886_v36  ;;  %v3952_v8 = vsel %vm2992_vm15, %v1911_v2, %v3472_v42  ;;  %v4933_v45 = vadd.f32 %v13037_v63, %v4441_v25 }
 0x2c8   :  { %17905 = vst [vmem:[#allocation49_spill] sm:$0xff] %v14061_v52  ;;  %vm2993_vm1 = vcmp.ge.f32.partialorder %v1915_v5, 0.0  ;;  %v3473_v34 = vmul.f32 0.01, %v1915_v5  ;;  %v4443_v2 = vmul.f32 %v13019_v49, %v3951_v43  ;;  %v4444_v25 = vmul.f32 %v13029_v55, %v3952_v8 }
 0x2c9   :  { %vm2994_vm2 = vcmp.ge.f32.partialorder %v1917_v32, 0.0  ;;  %v3474_v12 = vmul.f32 0.01, %v1917_v32  ;;  %v1920_v20 = vpop.f32.mrb[182].mxu0 }
 0x2ca   :  { %v3953_v0 = vsel %vm2993_vm1, %v1915_v5, %v3473_v34  ;;  %v1921_v53 = vadd.f32 %v1920_v20, %v13005_v38  ;;  %v1922_v46 = vpop.f32.mrb[183].mxu0  ;;  %10776 = vmatmul.mubr.msk.f32.gmra.mrb[32].mxu0 %vm587_vm0, %v13971_v16  ;;  %v14079_v34 = vpop.trf.xlu1  ;;  %v89_v16 = vld [vmem:[%s17857_s26 + $0xe0] sm:$0xff] }
 0x2cb   :  { %v4445_v33 = vmul.f32 %v13019_v49, %v3953_v0  ;;  %v3954_v48 = vsel %vm2994_vm2, %v1917_v32, %v3474_v12  ;;  %v1923_v58 = vadd.f32 %v1922_v46, %v13009_v39  ;;  %2242 = vmatprep.mubr.f32.mxu0 %v17886_v36  ;;  %524 = vxpose.xlu1.b32.end [2/2] (short) %v89_v16, 128 }
 0x2cc   :  { %v4446_v40 = vmul.f32 %v13029_v55, %v3954_v48  ;;  %vm2995_vm3 = vcmp.ge.f32.partialorder %v1921_v53, 0.0  ;;  %v3475_v42 = vmul.f32 0.01, %v1921_v53  ;;  %v11407_v5 = vpop.f32.mrb[8].mxu1 }
 0x2cd   :  { %vm2996_vm4 = vcmp.ge.f32.partialorder %v1923_v58, 0.0  ;;  %v3476_v32 = vmul.f32 0.01, %v1923_v58  ;;  %v1926_v6 = vpop.f32.mrb[184].mxu0  ;;  %v11408_v12 = vpop.f32.mrb[9].mxu1  ;;  %v4937_v28 = vadd.f32 %v13037_v63, %v4445_v33 }
 0x2ce   :  { %v3955_v43 = vsel %vm2995_vm3, %v1921_v53, %v3475_v42  ;;  %v1927_v20 = vadd.f32 %v1926_v6, %v13005_v38  ;;  %v14087_v0 = vadd.f32 %v11408_v12, %v11407_v5  ;;  %v1928_v46 = vpop.f32.mrb[185].mxu0  ;;  %10777 = vmatmul.mubr.msk.f32.gmra.mrb[34].mxu0 %vm587_vm0, %v13995_v47  ;;  %v11410_v48 = vpop.f32.mrb[10].mxu1  ;;  %v4938_v60 = vadd.f32 %v13042_v3, %v4446_v40 }
 0x2cf   :  { %v4447_v8 = vmul.f32 %v13019_v49, %v3955_v43  ;;  %v3956_v35 = vsel %vm2996_vm4, %v1923_v58, %v3476_v32  ;;  %v1929_v30 = vadd.f32 %v1928_v46, %v13009_v39  ;;  %v11411_v16 = vpop.f32.mrb[11].mxu1  ;;  %2248 = vmatprep.mubr.f32.mxu0 %v17886_v36  ;;  %v5325_v53 = vmax.f32 %v4933_v45, %v4937_v28 }
 0x2d0   :  { %17906 = vst [vmem:[#allocation50_spill] sm:$0xff] %v14087_v0  ;;  %v4448_v33 = vmul.f32 %v13029_v55, %v3956_v35  ;;  %vm2997_vm5 = vcmp.ge.f32.partialorder %v1927_v20, 0.0  ;;  %v3477_v42 = vmul.f32 0.01, %v1927_v20  ;;  %v14096_v5 = vadd.f32 %v11411_v16, %v11410_v48 }
 0x2d1   :  { %v3478_v6 = vmul.f32 0.01, %v1929_v30  ;;  %v1932_v47 = vpop.f32.mrb[186].mxu0  ;;  %v5326_v12 = vmax.f32 %v4934_v50, %v4938_v60  ;;  %v4935_v40 = vadd.f32 %v13037_v63, %v4443_v2  ;;  %v4939_v43 = vadd.f32 %v13037_v63, %v4447_v8  ;;  %v14107_v60 = vpop.trf.xlu1 }
 0x2d2   :  { %17907 = vst [vmem:[#allocation51_spill] sm:$0xff] %v14096_v5  ;;  %vm2998_vm6 = vcmp.ge.f32.partialorder %v1929_v30, 0.0  ;;  %v1933_v58 = vadd.f32 %v1932_v47, %v13005_v38  ;;  %v1934_v32 = vpop.f32.mrb[187].mxu0  ;;  %10778 = vmatmul.mubr.msk.f32.gmra.mrb[36].mxu0 %vm587_vm0, %v14010_v19  ;;  %v4936_v35 = vadd.f32 %v13042_v3, %v4444_v25  ;;  %v4940_v45 = vadd.f32 %v13042_v3, %v4448_v33 }
 0x2d3   :  { %v3957_v28 = vsel %vm2997_vm5, %v1927_v20, %v3477_v42  ;;  %v1935_v46 = vadd.f32 %v1934_v32, %v13009_v39  ;;  %2254 = vmatprep.mubr.f32.mxu0 %v17886_v36  ;;  %v5327_v50 = vmax.f32 %v4935_v40, %v4939_v43  ;;  %v3958_v48 = vsel %vm2998_vm6, %v1929_v30, %v3478_v6 }
 0x2d4   :  { %v5328_v2 = vmax.f32 %v4936_v35, %v4940_v45  ;;  %v4449_v47 = vmul.f32 %v13019_v49, %v3957_v28  ;;  %v3479_v19 = vmul.f32 0.01, %v1933_v58  ;;  %vm2999_vm7 = vcmp.ge.f32.partialorder %v1933_v58, 0.0 }
 0x2d5   :  { %v1938_v8 = vpop.f32.mrb[188].mxu0  ;;  %v14109_v16 = vpack.c.bf16 %v5327_v50, %v5325_v53  ;;  %v3480_v33 = vmul.f32 0.01, %v1935_v46  ;;  %v4450_v30 = vmul.f32 %v13029_v55, %v3958_v48  ;;  %vm3000_vm8 = vcmp.ge.f32.partialorder %v1935_v46, 0.0  ;;  %v14120_v43 = vpop.trf.xlu1 }
 0x2d6   :  { %v1939_v25 = vadd.f32 %v1938_v8, %v13005_v38  ;;  %v1940_v5 = vpop.f32.mrb[189].mxu0  ;;  %10779 = vmatmul.mubr.msk.f32.gmra.mrb[38].mxu0 %vm587_vm0, %v14027_v23  ;;  %v14115_v20 = vpack.c.bf16 %v5328_v2, %v5326_v12  ;;  %v3959_v32 = vsel %vm2999_vm7, %v1933_v58, %v3479_v19 }
 0x2d7   :  { %17908 = vst [vmem:[#allocation52_spill] sm:$0xff] %v14109_v16  ;;  %v1941_v42 = vadd.f32 %v1940_v5, %v13009_v39  ;;  %2260 = vmatprep.mubr.f32.mxu0 %v17886_v36  ;;  %v4941_v5 = vadd.f32 %v13037_v63, %v4449_v47  ;;  %v3960_v45 = vsel %vm3000_vm8, %v1935_v46, %v3480_v33 }
 0x2d8   :  { %17909 = vst [vmem:[#allocation53_spill] sm:$0xff] %v14115_v20  ;;  %vm3001_vm9 = vcmp.ge.f32.partialorder %v1939_v25, 0.0  ;;  %v3481_v53 = vmul.f32 0.01, %v1939_v25  ;;  %v4942_v8 = vadd.f32 %v13042_v3, %v4450_v30  ;;  %v4451_v19 = vmul.f32 %v13019_v49, %v3959_v32 }
 0x2d9   :  { %vm3002_vm10 = vcmp.ge.f32.partialorder %v1941_v42, 0.0  ;;  %v3482_v6 = vmul.f32 0.01, %v1941_v42  ;;  %v1944_v40 = vpop.f32.mrb[190].mxu0  ;;  %v4452_v47 = vmul.f32 %v13029_v55, %v3960_v45 }
 0x2da   :  { %v3961_v23 = vsel %vm3001_vm9, %v1939_v25, %v3481_v53  ;;  %v1945_v12 = vadd.f32 %v1944_v40, %v13005_v38  ;;  %v1946_v35 = vpop.f32.mrb[191].mxu0  ;;  %10780 = vmatmul.mubr.msk.f32.gmra.mrb[40].mxu0 %vm587_vm0, %v14044_v27 }
 0x2db   :  { %v4453_v28 = vmul.f32 %v13019_v49, %v3961_v23  ;;  %v3962_v50 = vsel %vm3002_vm10, %v1941_v42, %v3482_v6  ;;  %v1947_v2 = vadd.f32 %v1946_v35, %v13009_v39  ;;  %2266 = vmatprep.mubr.f32.mxu0 %v17886_v36  ;;  %v14141_v23 = vpop.trf.xlu1 }
 0x2dc   :  { %v4454_v48 = vmul.f32 %v13029_v55, %v3962_v50  ;;  %vm3003_vm11 = vcmp.ge.f32.partialorder %v1945_v12, 0.0  ;;  %v3483_v58 = vmul.f32 0.01, %v1945_v12 }
 0x2dd   :  { %vm3004_vm12 = vcmp.ge.f32.partialorder %v1947_v2, 0.0  ;;  %v3484_v27 = vmul.f32 0.01, %v1947_v2  ;;  %v1950_v25 = vpop.f32.mrb[192].mxu0  ;;  %v4945_v46 = vadd.f32 %v13037_v63, %v4453_v28 }
 0x2de   :  { %v3963_v33 = vsel %vm3003_vm11, %v1945_v12, %v3483_v58  ;;  %v1951_v42 = vadd.f32 %v1950_v25, %v13005_v38  ;;  %v1952_v53 = vpop.f32.mrb[193].mxu0  ;;  %10781 = vmatmul.mubr.msk.f32.gmra.mrb[42].mxu0 %vm587_vm0, %v14059_v18  ;;  %v4946_v6 = vadd.f32 %v13042_v3, %v4454_v48  ;;  %v4943_v18 = vadd.f32 %v13037_v63, %v4451_v19 }
 0x2df   :  { %v4455_v30 = vmul.f32 %v13019_v49, %v3963_v33  ;;  %v3964_v40 = vsel %vm3004_vm12, %v1947_v2, %v3484_v27  ;;  %v1953_v32 = vadd.f32 %v1952_v53, %v13009_v39  ;;  %2272 = vmatprep.mubr.f32.mxu0 %v17886_v36  ;;  %v5329_v35 = vmax.f32 %v4941_v5, %v4945_v46 }
 0x2e0   :  { %v4456_v12 = vmul.f32 %v13029_v55, %v3964_v40  ;;  %vm3005_vm13 = vcmp.ge.f32.partialorder %v1951_v42, 0.0  ;;  %v3485_v45 = vmul.f32 0.01, %v1951_v42  ;;  %v5330_v28 = vmax.f32 %v4942_v8, %v4946_v6 }
 0x2e1   :  { %v3486_v50 = vmul.f32 0.01, %v1953_v32  ;;  %v1956_v58 = vpop.f32.mrb[194].mxu0  ;;  %v4947_v48 = vadd.f32 %v13037_v63, %v4455_v30  ;;  %vm3006_vm14 = vcmp.ge.f32.partialorder %v1953_v32, 0.0  ;;  %v4944_v5 = vadd.f32 %v13042_v3, %v4452_v47  ;;  %v14153_v30 = vpop.trf.xlu1 }
 0x2e2   :  { %v1957_v2 = vadd.f32 %v1956_v58, %v13005_v38  ;;  %v1958_v27 = vpop.f32.mrb[195].mxu0  ;;  %10782 = vmatmul.mubr.msk.f32.gmra.mrb[44].mxu0 %vm587_vm0, %v14079_v34  ;;  %v4948_v25 = vadd.f32 %v13042_v3, %v4456_v12  ;;  %v3965_v46 = vsel %vm3005_vm13, %v1951_v42, %v3485_v45 }
 0x2e3   :  { %v1959_v8 = vadd.f32 %v1958_v27, %v13009_v39  ;;  %2278 = vmatprep.mubr.f32.mxu0 %v17886_v36  ;;  %v5331_v33 = vmax.f32 %v4943_v18, %v4947_v48  ;;  %v3966_v53 = vsel %vm3006_vm14, %v1953_v32, %v3486_v50  ;;  %v4457_v58 = vmul.f32 %v13019_v49, %v3965_v46  ;;  %v14166_v50 = vpop.trf.xlu0 }
 0x2e4   :  { %v5332_v19 = vmax.f32 %v4944_v5, %v4948_v25  ;;  %v3487_v34 = vmul.f32 0.01, %v1957_v2  ;;  %vm3007_vm15 = vcmp.ge.f32.partialorder %v1957_v2, 0.0 }
 0x2e5   :  { %v1962_v6 = vpop.f32.mrb[196].mxu0  ;;  %v14155_v40 = vpack.c.bf16 %v5331_v33, %v5329_v35  ;;  %v3488_v12 = vmul.f32 0.01, %v1959_v8  ;;  %v4458_v35 = vmul.f32 %v13029_v55, %v3966_v53  ;;  %vm3008_vm1 = vcmp.ge.f32.partialorder %v1959_v8, 0.0  ;;  %v422_v53 = vpop.trf.xlu1 }
 0x2e6   :  { %v1963_v47 = vadd.f32 %v1962_v6, %v13005_v38  ;;  %v1964_v0 = vpop.f32.mrb[197].mxu0  ;;  %10783 = vmatmul.mubr.msk.f32.gmra.mrb[46].mxu0 %vm587_vm0, %v14107_v60  ;;  %v14161_v42 = vpack.c.bf16 %v5332_v19, %v5330_v28  ;;  %v3967_v27 = vsel %vm3007_vm15, %v1957_v2, %v3487_v34 }
 0x2e7   :  { %17910 = vst [vmem:[#allocation54_spill] sm:$0xff] %v14155_v40  ;;  %v1965_v32 = vadd.f32 %v1964_v0, %v13009_v39  ;;  %2284 = vmatprep.mubr.f32.mxu0 %v17886_v36  ;;  %v4949_v0 = vadd.f32 %v13037_v63, %v4457_v58  ;;  %v3968_v25 = vsel %vm3008_vm1, %v1959_v8, %v3488_v12 }
 0x2e8   :  { %17911 = vst [vmem:[#allocation55_spill] sm:$0xff] %v14161_v42  ;;  %vm3009_vm2 = vcmp.ge.f32.partialorder %v1963_v47, 0.0  ;;  %v3489_v45 = vmul.f32 0.01, %v1963_v47  ;;  %v4950_v34 = vadd.f32 %v13042_v3, %v4458_v35  ;;  %v4460_v12 = vmul.f32 %v13029_v55, %v3968_v25 }
 0x2e9   :  { %vm3010_vm3 = vcmp.ge.f32.partialorder %v1965_v32, 0.0  ;;  %v3490_v18 = vmul.f32 0.01, %v1965_v32  ;;  %v1968_v48 = vpop.f32.mrb[198].mxu0 }
 0x2ea   :  { %v3969_v60 = vsel %vm3009_vm2, %v1963_v47, %v3489_v45  ;;  %v1969_v28 = vadd.f32 %v1968_v48, %v13005_v38  ;;  %v1970_v5 = vpop.f32.mrb[199].mxu0  ;;  %10784 = vmatmul.mubr.msk.f32.gmra.mrb[48].mxu0 %vm587_vm0, %v14120_v43  ;;  %v4459_v47 = vmul.f32 %v13019_v49, %v3967_v27 }
 0x2eb   :  { %v4461_v46 = vmul.f32 %v13019_v49, %v3969_v60  ;;  %v3970_v33 = vsel %vm3010_vm3, %v1965_v32, %v3490_v18  ;;  %v1971_v19 = vadd.f32 %v1970_v5, %v13009_v39  ;;  %2290 = vmatprep.mubr.f32.mxu0 %v17886_v36  ;;  %v14184_v60 = vpop.trf.xlu0 }
 0x2ec   :  { %v4462_v2 = vmul.f32 %v13029_v55, %v3970_v33  ;;  %vm3011_vm4 = vcmp.ge.f32.partialorder %v1969_v28, 0.0  ;;  %v3491_v6 = vmul.f32 0.01, %v1969_v28 }
 0x2ed   :  { %vm3012_vm5 = vcmp.ge.f32.partialorder %v1971_v19, 0.0  ;;  %v3492_v43 = vmul.f32 0.01, %v1971_v19  ;;  %v1974_v58 = vpop.f32.mrb[200].mxu0  ;;  %v4953_v8 = vadd.f32 %v13037_v63, %v4461_v46 }
 0x2ee   :  { %v3971_v32 = vsel %vm3011_vm4, %v1969_v28, %v3491_v6  ;;  %v1975_v45 = vadd.f32 %v1974_v58, %v13005_v38  ;;  %v1976_v18 = vpop.f32.mrb[201].mxu0  ;;  %10785 = vmatmul.mubr.msk.f32.gmra.mrb[50].mxu0 %vm587_vm0, %v14141_v23  ;;  %v4954_v48 = vadd.f32 %v13042_v3, %v4462_v2  ;;  %v423_v23 = vpop.trf.xlu1  ;;  %v4951_v2 = vadd.f32 %v13037_v63, %v4459_v47 }
 0x2ef   :  { %v4463_v35 = vmul.f32 %v13019_v49, %v3971_v32  ;;  %v3972_v27 = vsel %vm3012_vm5, %v1971_v19, %v3492_v43  ;;  %v1977_v5 = vadd.f32 %v1976_v18, %v13009_v39  ;;  %2296 = vmatprep.mubr.f32.mxu0 %v17886_v36  ;;  %v5333_v46 = vmax.f32 %v4949_v0, %v4953_v8 }
 0x2f0   :  { %v4464_v28 = vmul.f32 %v13029_v55, %v3972_v27  ;;  %vm3013_vm6 = vcmp.ge.f32.partialorder %v1975_v45, 0.0  ;;  %v3493_v25 = vmul.f32 0.01, %v1975_v45  ;;  %v5334_v33 = vmax.f32 %v4950_v34, %v4954_v48  ;;  %v14199_v48 = vpop.trf.xlu0 }
 0x2f1   :  { %v3494_v6 = vmul.f32 0.01, %v1977_v5  ;;  %v1980_v58 = vpop.f32.mrb[202].mxu0  ;;  %v4955_v40 = vadd.f32 %v13037_v63, %v4463_v35  ;;  %vm3014_vm7 = vcmp.ge.f32.partialorder %v1977_v5, 0.0  ;;  %v4952_v0 = vadd.f32 %v13042_v3, %v4460_v12 }
 0x2f2   :  { %v1981_v19 = vadd.f32 %v1980_v58, %v13005_v38  ;;  %v1982_v43 = vpop.f32.mrb[203].mxu0  ;;  %10786 = vmatmul.mubr.msk.f32.gmra.mrb[52].mxu0 %vm587_vm0, %v14153_v30  ;;  %v4956_v8 = vadd.f32 %v13042_v3, %v4464_v28  ;;  %v3973_v32 = vsel %vm3013_vm6, %v1975_v45, %v3493_v25 }
 0x2f3   :  { %v1983_v34 = vadd.f32 %v1982_v43, %v13009_v39  ;;  %2302 = vmatprep.mubr.f32.mxu0 %v17886_v36  ;;  %v5335_v18 = vmax.f32 %v4951_v2, %v4955_v40  ;;  %v3974_v35 = vsel %vm3014_vm7, %v1977_v5, %v3494_v6  ;;  %v4465_v42 = vmul.f32 %v13019_v49, %v3973_v32  ;;  %v424_v5 = vpop.trf.xlu1 }
 0x2f4   :  { %v5336_v47 = vmax.f32 %v4952_v0, %v4956_v8  ;;  %v3495_v30 = vmul.f32 0.01, %v1981_v19  ;;  %vm3015_vm8 = vcmp.ge.f32.partialorder %v1981_v19, 0.0  ;;  %v14216_v8 = vpop.trf.xlu0 }
 0x2f5   :  { %v1986_v27 = vpop.f32.mrb[204].mxu0  ;;  %v14201_v58 = vpack.c.bf16 %v5335_v18, %v5333_v46  ;;  %v3496_v28 = vmul.f32 0.01, %v1983_v34  ;;  %v4466_v46 = vmul.f32 %v13029_v55, %v3974_v35  ;;  %vm3016_vm9 = vcmp.ge.f32.partialorder %v1983_v34, 0.0 }
 0x2f6   :  { %v1987_v12 = vadd.f32 %v1986_v27, %v13005_v38  ;;  %v1988_v24 = vpop.f32.mrb[205].mxu0  ;;  %10787 = vmatmul.mubr.msk.f32.gmra.mrb[54].mxu0 %vm587_vm0, %v422_v53  ;;  %v14206_v45 = vpack.c.bf16 %v5336_v47, %v5334_v33  ;;  %v4957_v53 = vadd.f32 %v13037_v63, %v4465_v42  ;;  %v3975_v33 = vsel %vm3015_vm8, %v1981_v19, %v3495_v30 }
 0x2f7   :  { %17912 = vst [vmem:[#allocation56_spill] sm:$0xff] %v14201_v58  ;;  %v1989_v40 = vadd.f32 %v1988_v24, %v13009_v39  ;;  %2308 = vmatprep.mubr.f32.mxu0 %v17886_v36  ;;  %v3976_v32 = vsel %vm3016_vm9, %v1983_v34, %v3496_v28  ;;  %v4958_v19 = vadd.f32 %v13042_v3, %v4466_v46  ;;  %v425_v28 = vpop.trf.xlu1 }
 0x2f8   :  { %17913 = vst [vmem:[#allocation57_spill] sm:$0xff] %v14206_v45  ;;  %vm3017_vm10 = vcmp.ge.f32.partialorder %v1987_v12, 0.0  ;;  %v3497_v25 = vmul.f32 0.01, %v1987_v12  ;;  %6078 = vmatprep.mubr.bf16.mxu1 %v14206_v45  ;;  %v4467_v30 = vmul.f32 %v13019_v49, %v3975_v33 }
 0x2f9   :  { %vm3018_vm11 = vcmp.ge.f32.partialorder %v1989_v40, 0.0  ;;  %v3498_v6 = vmul.f32 0.01, %v1989_v40  ;;  %v1992_v2 = vpop.f32.mrb[206].mxu0  ;;  %6079 = vmatmul.mubr.bf16.gmra.mrb[24].mxu1 %v14201_v58 }
 0x2fa   :  { %v3977_v43 = vsel %vm3017_vm10, %v1987_v12, %v3497_v25  ;;  %v1993_v24 = vadd.f32 %v1992_v2, %v13005_v38  ;;  %v1994_v0 = vpop.f32.mrb[207].mxu0  ;;  %10788 = vmatmul.mubr.msk.f32.gmra.mrb[56].mxu0 %vm587_vm0, %v423_v23 }
 0x2fb   :  { %v4469_v18 = vmul.f32 %v13019_v49, %v3977_v43  ;;  %v3978_v47 = vsel %vm3018_vm11, %v1989_v40, %v3498_v6  ;;  %v1995_v35 = vadd.f32 %v1994_v0, %v13009_v39  ;;  %2314 = vmatprep.mubr.f32.mxu0 %v17886_v36  ;;  %v4468_v40 = vmul.f32 %v13029_v55, %v3976_v32 }
 0x2fc   :  { %v4470_v27 = vmul.f32 %v13029_v55, %v3978_v47  ;;  %vm3019_vm12 = vcmp.ge.f32.partialorder %v1993_v24, 0.0  ;;  %v3499_v42 = vmul.f32 0.01, %v1993_v24 }
 0x2fd   :  { %v4961_v23 = vadd.f32 %v13037_v63, %v4469_v18  ;;  %vm3020_vm13 = vcmp.ge.f32.partialorder %v1995_v35, 0.0  ;;  %v3500_v12 = vmul.f32 0.01, %v1995_v35  ;;  %v1998_v34 = vpop.f32.mrb[208].mxu0 }
 0x2fe   :  { %v3979_v25 = vsel %vm3019_vm12, %v1993_v24, %v3499_v42  ;;  %v1999_v6 = vadd.f32 %v1998_v34, %v13005_v38  ;;  %v2000_v2 = vpop.f32.mrb[209].mxu0  ;;  %10789 = vmatmul.mubr.msk.f32.gmra.mrb[58].mxu0 %vm587_vm0, %v424_v5  ;;  %v4962_v43 = vadd.f32 %v13042_v3, %v4470_v27  ;;  %v14233_v24 = vpop.trf.xlu0  ;;  %v4959_v34 = vadd.f32 %v13037_v63, %v4467_v30 }
 0x2ff   :  { %v5337_v0 = vmax.f32 %v4957_v53, %v4961_v23  ;;  %v4471_v46 = vmul.f32 %v13019_v49, %v3979_v25  ;;  %v3980_v33 = vsel %vm3020_vm13, %v1995_v35, %v3500_v12  ;;  %v2001_v18 = vadd.f32 %v2000_v2, %v13009_v39  ;;  %2320 = vmatprep.mubr.f32.mxu0 %v17886_v36 }
 0x300   :  { %v4472_v47 = vmul.f32 %v13029_v55, %v3980_v33  ;;  %vm3021_vm14 = vcmp.ge.f32.partialorder %v1999_v6, 0.0  ;;  %v3501_v32 = vmul.f32 0.01, %v1999_v6  ;;  %v5338_v42 = vmax.f32 %v4958_v19, %v4962_v43  ;;  %v426_v43 = vpop.trf.xlu1 }
 0x301   :  { %v4963_v5 = vadd.f32 %v13037_v63, %v4471_v46  ;;  %vm3022_vm15 = vcmp.ge.f32.partialorder %v2001_v18, 0.0  ;;  %v3502_v53 = vmul.f32 0.01, %v2001_v18  ;;  %v2004_v27 = vpop.f32.mrb[210].mxu0  ;;  %v4960_v25 = vadd.f32 %v13042_v3, %v4468_v40 }
 0x302   :  { %v3981_v23 = vsel %vm3021_vm14, %v1999_v6, %v3501_v32  ;;  %v2005_v35 = vadd.f32 %v2004_v27, %v13005_v38  ;;  %v2006_v12 = vpop.f32.mrb[211].mxu0  ;;  %10790 = vmatmul.mubr.msk.f32.gmra.mrb[60].mxu0 %vm587_vm0, %v425_v28  ;;  %v4964_v2 = vadd.f32 %v13042_v3, %v4472_v47  ;;  %v14248_v47 = vpop.trf.xlu0 }
 0x303   :  { %v5339_v33 = vmax.f32 %v4959_v34, %v4963_v5  ;;  %v2007_v19 = vadd.f32 %v2006_v12, %v13009_v39  ;;  %2326 = vmatprep.mubr.f32.mxu0 %v17886_v36  ;;  %v3982_v30 = vsel %vm3022_vm15, %v2001_v18, %v3502_v53  ;;  %v4473_v6 = vmul.f32 %v13019_v49, %v3981_v23  ;;  %v75_v53 = vld [vmem:[%s17857_s26 + $0x70] sm:$0xff] }
 0x304   :  { %v5340_v46 = vmax.f32 %v4960_v25, %v4964_v2  ;;  %v3503_v32 = vmul.f32 0.01, %v2005_v35  ;;  %vm3023_vm1 = vcmp.ge.f32.partialorder %v2005_v35, 0.0  ;;  %v4474_v18 = vmul.f32 %v13029_v55, %v3982_v30  ;;  %555 = vxpose.xlu0.b32.start [1/2] (short) %v75_v53, 128 }
 0x305   :  { %v14243_v58 = vpack.c.bf16 %v5339_v33, %v5337_v0  ;;  %v2010_v27 = vpop.f32.mrb[212].mxu0  ;;  %v3504_v28 = vmul.f32 0.01, %v2007_v19  ;;  %vm3024_vm2 = vcmp.ge.f32.partialorder %v2007_v19, 0.0 }
 0x306   :  { %v2011_v40 = vadd.f32 %v2010_v27, %v13005_v38  ;;  %v2012_v45 = vpop.f32.mrb[213].mxu0  ;;  %10791 = vmatmul.mubr.msk.f32.gmra.mrb[62].mxu0 %vm587_vm0, %v426_v43  ;;  %v14250_v34 = vpack.c.bf16 %v5340_v46, %v5338_v42  ;;  %v3983_v23 = vsel %vm3023_vm1, %v2005_v35, %v3503_v32  ;;  %v4966_v35 = vadd.f32 %v13042_v3, %v4474_v18 }
 0x307   :  { %17914 = vst [vmem:[#allocation58_spill] sm:$0xff] %v14243_v58  ;;  %v2013_v0 = vadd.f32 %v2012_v45, %v13009_v39  ;;  %2332 = vmatprep.mubr.f32.mxu0 %v17886_v36  ;;  %v3984_v42 = vsel %vm3024_vm2, %v2007_v19, %v3504_v28  ;;  %v4965_v45 = vadd.f32 %v13037_v63, %v4473_v6 }
 0x308   :  { %17915 = vst [vmem:[#allocation59_spill] sm:$0xff] %v14250_v34  ;;  %vm3025_vm3 = vcmp.ge.f32.partialorder %v2011_v40, 0.0  ;;  %v3505_v5 = vmul.f32 0.01, %v2011_v40  ;;  %v4475_v19 = vmul.f32 %v13019_v49, %v3983_v23  ;;  %v4476_v6 = vmul.f32 %v13029_v55, %v3984_v42 }
 0x309   :  { %vm3026_vm4 = vcmp.ge.f32.partialorder %v2013_v0, 0.0  ;;  %v3506_v12 = vmul.f32 0.01, %v2013_v0  ;;  %v2016_v25 = vpop.f32.mrb[214].mxu0 }
 0x30a   :  { %v3985_v2 = vsel %vm3025_vm3, %v2011_v40, %v3505_v5  ;;  %v2017_v33 = vadd.f32 %v2016_v25, %v13005_v38  ;;  %v2018_v43 = vpop.f32.mrb[215].mxu0  ;;  %10792 = vmatmul.mubr.msk.f32.gmra.mrb[64].mxu0 %vm587_vm0, %v14166_v50  ;;  %v14268_v5 = vpop.trf.xlu0  ;;  %v90_v50 = vld [vmem:[%s17857_s26 + $0xe8] sm:$0xff] }
 0x30b   :  { %v4477_v30 = vmul.f32 %v13019_v49, %v3985_v2  ;;  %v3986_v46 = vsel %vm3026_vm4, %v2013_v0, %v3506_v12  ;;  %v2019_v27 = vadd.f32 %v2018_v43, %v13009_v39  ;;  %2338 = vmatprep.mubr.f32.mxu0 %v17886_v36  ;;  %556 = vxpose.xlu0.b32.end [2/2] (short) %v90_v50, 128 }
 0x30c   :  { %v4478_v32 = vmul.f32 %v13029_v55, %v3986_v46  ;;  %vm3027_vm5 = vcmp.ge.f32.partialorder %v2017_v33, 0.0  ;;  %v3507_v28 = vmul.f32 0.01, %v2017_v33  ;;  %v11413_v40 = vpop.f32.mrb[12].mxu1 }
 0x30d   :  { %vm3028_vm6 = vcmp.ge.f32.partialorder %v2019_v27, 0.0  ;;  %v3508_v0 = vmul.f32 0.01, %v2019_v27  ;;  %v2022_v53 = vpop.f32.mrb[216].mxu0  ;;  %v11414_v12 = vpop.f32.mrb[13].mxu1  ;;  %v4969_v18 = vadd.f32 %v13037_v63, %v4477_v30 }
 0x30e   :  { %v3987_v23 = vsel %vm3027_vm5, %v2017_v33, %v3507_v28  ;;  %v2023_v25 = vadd.f32 %v2022_v53, %v13005_v38  ;;  %v14276_v2 = vadd.f32 %v11414_v12, %v11413_v40  ;;  %v2024_v43 = vpop.f32.mrb[217].mxu0  ;;  %10793 = vmatmul.mubr.msk.f32.gmra.mrb[66].mxu0 %vm587_vm0, %v14184_v60  ;;  %v11416_v46 = vpop.f32.mrb[14].mxu1  ;;  %v4970_v37 = vadd.f32 %v13042_v3, %v4478_v32 }
 0x30f   :  { %v4479_v42 = vmul.f32 %v13019_v49, %v3987_v23  ;;  %v3988_v56 = vsel %vm3028_vm6, %v2019_v27, %v3508_v0  ;;  %v2025_v51 = vadd.f32 %v2024_v43, %v13009_v39  ;;  %v11417_v50 = vpop.f32.mrb[15].mxu1  ;;  %2344 = vmatprep.mubr.f32.mxu0 %v17886_v36  ;;  %v5341_v33 = vmax.f32 %v4965_v45, %v4969_v18 }
 0x310   :  { %17916 = vst [vmem:[#allocation60_spill] sm:$0xff] %v14276_v2  ;;  %v4480_v30 = vmul.f32 %v13029_v55, %v3988_v56  ;;  %vm3029_vm7 = vcmp.ge.f32.partialorder %v2023_v25, 0.0  ;;  %v3509_v28 = vmul.f32 0.01, %v2023_v25  ;;  %v14285_v40 = vadd.f32 %v11417_v50, %v11416_v46 }
 0x311   :  { %v3510_v53 = vmul.f32 0.01, %v2025_v51  ;;  %v2028_v60 = vpop.f32.mrb[218].mxu0  ;;  %v5342_v12 = vmax.f32 %v4966_v35, %v4970_v37  ;;  %v4967_v32 = vadd.f32 %v13037_v63, %v4475_v19  ;;  %v4971_v23 = vadd.f32 %v13037_v63, %v4479_v42  ;;  %v14296_v37 = vpop.trf.xlu0 }
 0x312   :  { %17917 = vst [vmem:[#allocation61_spill] sm:$0xff] %v14285_v40  ;;  %vm3030_vm8 = vcmp.ge.f32.partialorder %v2025_v51, 0.0  ;;  %v2029_v27 = vadd.f32 %v2028_v60, %v13005_v38  ;;  %v2030_v0 = vpop.f32.mrb[219].mxu0  ;;  %10794 = vmatmul.mubr.msk.f32.gmra.mrb[68].mxu0 %vm587_vm0, %v14199_v48  ;;  %v4968_v56 = vadd.f32 %v13042_v3, %v4476_v6  ;;  %v4972_v45 = vadd.f32 %v13042_v3, %v4480_v30 }
 0x313   :  { %v3989_v18 = vsel %vm3029_vm7, %v2023_v25, %v3509_v28  ;;  %v2031_v43 = vadd.f32 %v2030_v0, %v13009_v39  ;;  %2350 = vmatprep.mubr.f32.mxu0 %v17886_v36  ;;  %v5343_v35 = vmax.f32 %v4967_v32, %v4971_v23  ;;  %v3990_v46 = vsel %vm3030_vm8, %v2025_v51, %v3510_v53 }
 0x314   :  { %v5344_v19 = vmax.f32 %v4968_v56, %v4972_v45  ;;  %v4481_v60 = vmul.f32 %v13019_v49, %v3989_v18  ;;  %v3511_v48 = vmul.f32 0.01, %v2029_v27  ;;  %vm3031_vm9 = vcmp.ge.f32.partialorder %v2029_v27, 0.0 }
 0x315   :  { %v2034_v42 = vpop.f32.mrb[220].mxu0  ;;  %v14298_v50 = vpack.c.bf16 %v5343_v35, %v5341_v33  ;;  %v3512_v30 = vmul.f32 0.01, %v2031_v43  ;;  %v4482_v51 = vmul.f32 %v13029_v55, %v3990_v46  ;;  %vm3032_vm10 = vcmp.ge.f32.partialorder %v2031_v43, 0.0  ;;  %v14309_v23 = vpop.trf.xlu0 }
 0x316   :  { %v2035_v6 = vadd.f32 %v2034_v42, %v13005_v38  ;;  %v2036_v40 = vpop.f32.mrb[221].mxu0  ;;  %10795 = vmatmul.mubr.msk.f32.gmra.mrb[70].mxu0 %vm587_vm0, %v14216_v8  ;;  %v14304_v25 = vpack.c.bf16 %v5344_v19, %v5342_v12  ;;  %v3991_v0 = vsel %vm3031_vm9, %v2029_v27, %v3511_v48 }
 0x317   :  { %17918 = vst [vmem:[#allocation62_spill] sm:$0xff] %v14298_v50  ;;  %v2037_v28 = vadd.f32 %v2036_v40, %v13009_v39  ;;  %2356 = vmatprep.mubr.f32.mxu0 %v17886_v36  ;;  %v4973_v40 = vadd.f32 %v13037_v63, %v4481_v60  ;;  %v3992_v45 = vsel %vm3032_vm10, %v2031_v43, %v3512_v30 }
 0x318   :  { %17919 = vst [vmem:[#allocation63_spill] sm:$0xff] %v14304_v25  ;;  %vm3033_vm11 = vcmp.ge.f32.partialorder %v2035_v6, 0.0  ;;  %v3513_v33 = vmul.f32 0.01, %v2035_v6  ;;  %v4974_v42 = vadd.f32 %v13042_v3, %v4482_v51  ;;  %v4483_v48 = vmul.f32 %v13019_v49, %v3991_v0 }
 0x319   :  { %vm3034_vm12 = vcmp.ge.f32.partialorder %v2037_v28, 0.0  ;;  %v3514_v53 = vmul.f32 0.01, %v2037_v28  ;;  %v2040_v32 = vpop.f32.mrb[222].mxu0  ;;  %v4484_v60 = vmul.f32 %v13029_v55, %v3992_v45 }
 0x31a   :  { %v3993_v8 = vsel %vm3033_vm11, %v2035_v6, %v3513_v33  ;;  %v2041_v12 = vadd.f32 %v2040_v32, %v13005_v38  ;;  %v2042_v56 = vpop.f32.mrb[223].mxu0  ;;  %10796 = vmatmul.mubr.msk.f32.gmra.mrb[72].mxu0 %vm587_vm0, %v14233_v24 }
 0x31b   :  { %v4485_v18 = vmul.f32 %v13019_v49, %v3993_v8  ;;  %v3994_v35 = vsel %vm3034_vm12, %v2037_v28, %v3514_v53  ;;  %v2043_v19 = vadd.f32 %v2042_v56, %v13009_v39  ;;  %2362 = vmatprep.mubr.f32.mxu0 %v17886_v36  ;;  %v14330_v8 = vpop.trf.xlu0 }
 0x31c   :  { %v4486_v46 = vmul.f32 %v13029_v55, %v3994_v35  ;;  %vm3035_vm13 = vcmp.ge.f32.partialorder %v2041_v12, 0.0  ;;  %v3515_v27 = vmul.f32 0.01, %v2041_v12 }
 0x31d   :  { %vm3036_vm14 = vcmp.ge.f32.partialorder %v2043_v19, 0.0  ;;  %v3516_v24 = vmul.f32 0.01, %v2043_v19  ;;  %v2046_v6 = vpop.f32.mrb[224].mxu0  ;;  %v4977_v43 = vadd.f32 %v13037_v63, %v4485_v18 }
 0x31e   :  { %v3995_v30 = vsel %vm3035_vm13, %v2041_v12, %v3515_v27  ;;  %v2047_v28 = vadd.f32 %v2046_v6, %v13005_v38  ;;  %v2048_v33 = vpop.f32.mrb[225].mxu0  ;;  %10797 = vmatmul.mubr.msk.f32.gmra.mrb[74].mxu0 %vm587_vm0, %v14248_v47  ;;  %v4978_v53 = vadd.f32 %v13042_v3, %v4486_v46  ;;  %v12173_v47 = vld [vmem:[%s17728_s5 + $0xc8] sm:$0xff]  }
 0x31f   :  { %v4487_v51 = vmul.f32 %v13019_v49, %v3995_v30  ;;  %v3996_v32 = vsel %vm3036_vm14, %v2043_v19, %v3516_v24  ;;  %v2049_v0 = vadd.f32 %v2048_v33, %v13009_v39  ;;  %2368 = vmatprep.mubr.f32.mxu0 %v17886_v36  ;;  %v5345_v56 = vmax.f32 %v4973_v40, %v4977_v43 }
 0x320   :  { %v4488_v12 = vmul.f32 %v13029_v55, %v3996_v32  ;;  %vm3037_vm15 = vcmp.ge.f32.partialorder %v2047_v28, 0.0  ;;  %v3517_v45 = vmul.f32 0.01, %v2047_v28  ;;  %v5346_v18 = vmax.f32 %v4974_v42, %v4978_v53  ;;  %11281 = vmatprep.subr.bf16.mxu0 %v12173_v47 }
 0x321   :  { %v3518_v35 = vmul.f32 0.01, %v2049_v0  ;;  %v2052_v46 = vpop.f32.mrb[226].mxu0  ;;  %v4975_v19 = vadd.f32 %v13037_v63, %v4483_v48  ;;  %v4979_v27 = vadd.f32 %v13037_v63, %v4487_v51  ;;  %vm3038_vm1 = vcmp.ge.f32.partialorder %v2049_v0, 0.0  ;;  %v12174_v48 = vld [vmem:[%s17728_s5 + $0x88] sm:$0xff]  }
 0x322   :  { %v2053_v24 = vadd.f32 %v2052_v46, %v13005_v38  ;;  %v2054_v6 = vpop.f32.mrb[227].mxu0  ;;  %10798 = vmatmul.mubr.msk.f32.gmra.mrb[76].mxu0 %vm587_vm0, %v14268_v5  ;;  %v4976_v40 = vadd.f32 %v13042_v3, %v4484_v60  ;;  %v4980_v43 = vadd.f32 %v13042_v3, %v4488_v12  ;;  %v3997_v30 = vsel %vm3037_vm15, %v2047_v28, %v3517_v45  ;;  %v14348_v46 = vpop.trf.xlu0 }
 0x323   :  { %v2055_v42 = vadd.f32 %v2054_v6, %v13009_v39  ;;  %2374 = vmatprep.mubr.f32.mxu0 %v17886_v36  ;;  %v5347_v33 = vmax.f32 %v4975_v19, %v4979_v27  ;;  %v3998_v51 = vsel %vm3038_vm1, %v2049_v0, %v3518_v35  ;;  %11282 = vmatpush3.bf16.msra.mxu0 %v12174_v48  ;;  %v14361_v27 = vpop.trf.xlu1 }
 0x324   :  { %v5348_v53 = vmax.f32 %v4976_v40, %v4980_v43  ;;  %v4489_v60 = vmul.f32 %v13019_v49, %v3997_v30  ;;  %v3519_v28 = vmul.f32 0.01, %v2053_v24  ;;  %vm3039_vm2 = vcmp.ge.f32.partialorder %v2053_v24, 0.0 }
 0x325   :  { %v2058_v32 = vpop.f32.mrb[228].mxu0  ;;  %v14350_v5 = vpack.c.bf16 %v5347_v33, %v5345_v56  ;;  %v3520_v19 = vmul.f32 0.01, %v2055_v42  ;;  %v4490_v56 = vmul.f32 %v13029_v55, %v3998_v51  ;;  %vm3040_vm3 = vcmp.ge.f32.partialorder %v2055_v42, 0.0 }
 0x326   :  { %v2059_v12 = vadd.f32 %v2058_v32, %v13005_v38  ;;  %v2060_v45 = vpop.f32.mrb[229].mxu0  ;;  %10799 = vmatmul.mubr.msk.f32.gmra.mrb[78].mxu0 %vm587_vm0, %v14296_v37  ;;  %v14356_v47 = vpack.c.bf16 %v5348_v53, %v5346_v18  ;;  %v3999_v43 = vsel %vm3039_vm2, %v2053_v24, %v3519_v28  ;;  %v4981_v48 = vadd.f32 %v13037_v63, %v4489_v60 }
 0x327   :  { %17920 = vst [vmem:[#allocation64_spill] sm:$0xff] %v14350_v5  ;;  %v2061_v0 = vadd.f32 %v2060_v45, %v13009_v39  ;;  %2380 = vmatprep.mubr.f32.mxu0 %v17886_v36  ;;  %v4000_v33 = vsel %vm3040_vm3, %v2055_v42, %v3520_v19  ;;  %v454_v45 = vpop.trf.xlu0 }
 0x328   :  { %17921 = vst [vmem:[#allocation65_spill] sm:$0xff] %v14356_v47  ;;  %vm3041_vm4 = vcmp.ge.f32.partialorder %v2059_v12, 0.0  ;;  %v3521_v35 = vmul.f32 0.01, %v2059_v12  ;;  %v4492_v19 = vmul.f32 %v13029_v55, %v4000_v33 }
 0x329   :  { %vm3042_vm5 = vcmp.ge.f32.partialorder %v2061_v0, 0.0  ;;  %v3522_v6 = vmul.f32 0.01, %v2061_v0  ;;  %v2064_v40 = vpop.f32.mrb[230].mxu0 }
 0x32a   :  { %v4001_v37 = vsel %vm3041_vm4, %v2059_v12, %v3521_v35  ;;  %v2065_v18 = vadd.f32 %v2064_v40, %v13005_v38  ;;  %v2066_v30 = vpop.f32.mrb[231].mxu0  ;;  %10800 = vmatmul.mubr.msk.f32.gmra.mrb[80].mxu0 %vm587_vm0, %v14309_v23  ;;  %v4982_v12 = vadd.f32 %v13042_v3, %v4490_v56  ;;  %v4491_v35 = vmul.f32 %v13019_v49, %v3999_v43 }
 0x32b   :  { %v4493_v53 = vmul.f32 %v13019_v49, %v4001_v37  ;;  %v4002_v51 = vsel %vm3042_vm5, %v2061_v0, %v3522_v6  ;;  %v2067_v32 = vadd.f32 %v2066_v30, %v13009_v39  ;;  %2386 = vmatprep.mubr.f32.mxu0 %v17886_v36  ;;  %v14379_v30 = vpop.trf.xlu1  ;;  %v455_v47 = vpop.trf.xlu0 }
 0x32c   :  { %v4494_v24 = vmul.f32 %v13029_v55, %v4002_v51  ;;  %vm3043_vm6 = vcmp.ge.f32.partialorder %v2065_v18, 0.0  ;;  %v3523_v28 = vmul.f32 0.01, %v2065_v18 }
 0x32d   :  { %vm3044_vm7 = vcmp.ge.f32.partialorder %v2067_v32, 0.0  ;;  %v3524_v23 = vmul.f32 0.01, %v2067_v32  ;;  %v2070_v60 = vpop.f32.mrb[232].mxu0  ;;  %v4985_v42 = vadd.f32 %v13037_v63, %v4493_v53 }
 0x32e   :  { %v4003_v0 = vsel %vm3043_vm6, %v2065_v18, %v3523_v28  ;;  %v2071_v6 = vadd.f32 %v2070_v60, %v13005_v38  ;;  %v2072_v40 = vpop.f32.mrb[233].mxu0  ;;  %10801 = vmatmul.mubr.msk.f32.gmra.mrb[82].mxu0 %vm587_vm0, %v14330_v8  ;;  %v4986_v37 = vadd.f32 %v13042_v3, %v4494_v24  ;;  %v4983_v8 = vadd.f32 %v13037_v63, %v4491_v35 }
 0x32f   :  { %v4495_v56 = vmul.f32 %v13019_v49, %v4003_v0  ;;  %v4004_v43 = vsel %vm3044_vm7, %v2067_v32, %v3524_v23  ;;  %v2073_v51 = vadd.f32 %v2072_v40, %v13009_v39  ;;  %2392 = vmatprep.mubr.f32.mxu0 %v17886_v36  ;;  %v5349_v53 = vmax.f32 %v4981_v48, %v4985_v42 }
 0x330   :  { %v4496_v18 = vmul.f32 %v13029_v55, %v4004_v43  ;;  %vm3045_vm8 = vcmp.ge.f32.partialorder %v2071_v6, 0.0  ;;  %v3525_v33 = vmul.f32 0.01, %v2071_v6  ;;  %v5350_v28 = vmax.f32 %v4982_v12, %v4986_v37  ;;  %v14394_v37 = vpop.trf.xlu1 }
 0x331   :  { %v3526_v60 = vmul.f32 0.01, %v2073_v51  ;;  %v2076_v5 = vpop.f32.mrb[234].mxu0  ;;  %v4987_v24 = vadd.f32 %v13037_v63, %v4495_v56  ;;  %vm3046_vm9 = vcmp.ge.f32.partialorder %v2073_v51, 0.0  ;;  %v4984_v48 = vadd.f32 %v13042_v3, %v4492_v19 }
 0x332   :  { %v2077_v32 = vadd.f32 %v2076_v5, %v13005_v38  ;;  %v2078_v23 = vpop.f32.mrb[235].mxu0  ;;  %10802 = vmatmul.mubr.msk.f32.gmra.mrb[84].mxu0 %vm587_vm0, %v14348_v46  ;;  %v4988_v42 = vadd.f32 %v13042_v3, %v4496_v18  ;;  %v4005_v0 = vsel %vm3045_vm8, %v2071_v6, %v3525_v33 }
 0x333   :  { %v2079_v12 = vadd.f32 %v2078_v23, %v13009_v39  ;;  %2398 = vmatprep.mubr.f32.mxu0 %v17886_v36  ;;  %v5351_v35 = vmax.f32 %v4983_v8, %v4987_v24  ;;  %v4006_v56 = vsel %vm3046_vm9, %v2073_v51, %v3526_v60  ;;  %v4497_v2 = vmul.f32 %v13019_v49, %v4005_v0  ;;  %v456_v51 = vpop.trf.xlu0 }
 0x334   :  { %v5352_v40 = vmax.f32 %v4984_v48, %v4988_v42  ;;  %v3527_v46 = vmul.f32 0.01, %v2077_v32  ;;  %vm3047_vm10 = vcmp.ge.f32.partialorder %v2077_v32, 0.0  ;;  %v14411_v42 = vpop.trf.xlu1 }
 0x335   :  { %v2082_v43 = vpop.f32.mrb[236].mxu0  ;;  %v14396_v5 = vpack.c.bf16 %v5351_v35, %v5349_v53  ;;  %v3528_v18 = vmul.f32 0.01, %v2079_v12  ;;  %v4498_v53 = vmul.f32 %v13029_v55, %v4006_v56  ;;  %vm3048_vm11 = vcmp.ge.f32.partialorder %v2079_v12, 0.0 }
 0x336   :  { %v2083_v19 = vadd.f32 %v2082_v43, %v13005_v38  ;;  %v2084_v14 = vpop.f32.mrb[237].mxu0  ;;  %10803 = vmatmul.mubr.msk.f32.gmra.mrb[86].mxu0 %vm587_vm0, %v454_v45  ;;  %v14401_v6 = vpack.c.bf16 %v5352_v40, %v5350_v28  ;;  %v4989_v45 = vadd.f32 %v13037_v63, %v4497_v2  ;;  %v4007_v28 = vsel %vm3047_vm10, %v2077_v32, %v3527_v46 }
 0x337   :  { %17922 = vst [vmem:[#allocation66_spill] sm:$0xff] %v14396_v5  ;;  %v2085_v33 = vadd.f32 %v2084_v14, %v13009_v39  ;;  %2404 = vmatprep.mubr.f32.mxu0 %v17886_v36  ;;  %v4008_v0 = vsel %vm3048_vm11, %v2079_v12, %v3528_v18  ;;  %v4990_v32 = vadd.f32 %v13042_v3, %v4498_v53  ;;  %v457_v18 = vpop.trf.xlu0 }
 0x338   :  { %17923 = vst [vmem:[#allocation67_spill] sm:$0xff] %v14401_v6  ;;  %vm3049_vm12 = vcmp.ge.f32.partialorder %v2083_v19, 0.0  ;;  %v3529_v60 = vmul.f32 0.01, %v2083_v19  ;;  %6086 = vmatprep.mubr.bf16.mxu1 %v14401_v6  ;;  %v4499_v46 = vmul.f32 %v13019_v49, %v4007_v28 }
 0x339   :  { %vm3050_vm13 = vcmp.ge.f32.partialorder %v2085_v33, 0.0  ;;  %v3530_v8 = vmul.f32 0.01, %v2085_v33  ;;  %v2088_v24 = vpop.f32.mrb[238].mxu0  ;;  %6087 = vmatmul.mubr.bf16.gmra.mrb[28].mxu1 %v14396_v5 }
 0x33a   :  { %v4009_v23 = vsel %vm3049_vm12, %v2083_v19, %v3529_v60  ;;  %v2089_v14 = vadd.f32 %v2088_v24, %v13005_v38  ;;  %v2090_v48 = vpop.f32.mrb[239].mxu0  ;;  %10804 = vmatmul.mubr.msk.f32.gmra.mrb[88].mxu0 %vm587_vm0, %v455_v47 }
 0x33b   :  { %v4501_v35 = vmul.f32 %v13019_v49, %v4009_v23  ;;  %v4010_v40 = vsel %vm3050_vm13, %v2085_v33, %v3530_v8  ;;  %v2091_v56 = vadd.f32 %v2090_v48, %v13009_v39  ;;  %2410 = vmatprep.mubr.f32.mxu0 %v17886_v36  ;;  %v4500_v33 = vmul.f32 %v13029_v55, %v4008_v0 }
 0x33c   :  { %v4502_v43 = vmul.f32 %v13029_v55, %v4010_v40  ;;  %vm3051_vm14 = vcmp.ge.f32.partialorder %v2089_v14, 0.0  ;;  %v3531_v2 = vmul.f32 0.01, %v2089_v14 }
 0x33d   :  { %v4993_v47 = vadd.f32 %v13037_v63, %v4501_v35  ;;  %vm3052_vm15 = vcmp.ge.f32.partialorder %v2091_v56, 0.0  ;;  %v3532_v19 = vmul.f32 0.01, %v2091_v56  ;;  %v2094_v12 = vpop.f32.mrb[240].mxu0 }
 0x33e   :  { %v4011_v60 = vsel %vm3051_vm14, %v2089_v14, %v3531_v2  ;;  %v2095_v8 = vadd.f32 %v2094_v12, %v13005_v38  ;;  %v2096_v24 = vpop.f32.mrb[241].mxu0  ;;  %10805 = vmatmul.mubr.msk.f32.gmra.mrb[90].mxu0 %vm587_vm0, %v456_v51  ;;  %v4994_v23 = vadd.f32 %v13042_v3, %v4502_v43  ;;  %v14428_v14 = vpop.trf.xlu1  ;;  %v4991_v12 = vadd.f32 %v13037_v63, %v4499_v46 }
 0x33f   :  { %v5353_v48 = vmax.f32 %v4989_v45, %v4993_v47  ;;  %v4503_v53 = vmul.f32 %v13019_v49, %v4011_v60  ;;  %v4012_v28 = vsel %vm3052_vm15, %v2091_v56, %v3532_v19  ;;  %v2097_v35 = vadd.f32 %v2096_v24, %v13009_v39  ;;  %2416 = vmatprep.mubr.f32.mxu0 %v17886_v36  ;;  %v458_v46 = vpop.trf.xlu0 }
 0x340   :  { %v4504_v40 = vmul.f32 %v13029_v55, %v4012_v28  ;;  %vm3053_vm1 = vcmp.ge.f32.partialorder %v2095_v8, 0.0  ;;  %v3533_v0 = vmul.f32 0.01, %v2095_v8  ;;  %v5354_v2 = vmax.f32 %v4990_v32, %v4994_v23 }
 0x341   :  { %v4995_v51 = vadd.f32 %v13037_v63, %v4503_v53  ;;  %vm3054_vm2 = vcmp.ge.f32.partialorder %v2097_v35, 0.0  ;;  %v3534_v45 = vmul.f32 0.01, %v2097_v35  ;;  %v2100_v43 = vpop.f32.mrb[242].mxu0  ;;  %v4992_v60 = vadd.f32 %v13042_v3, %v4500_v33 }
 0x342   :  { %v4013_v47 = vsel %vm3053_vm1, %v2095_v8, %v3533_v0  ;;  %v2101_v56 = vadd.f32 %v2100_v43, %v13005_v38  ;;  %v2102_v19 = vpop.f32.mrb[243].mxu0  ;;  %10806 = vmatmul.mubr.msk.f32.gmra.mrb[92].mxu0 %vm587_vm0, %v457_v18  ;;  %v4996_v24 = vadd.f32 %v13042_v3, %v4504_v40  ;;  %v14443_v40 = vpop.trf.xlu1 }
 0x343   :  { %v5355_v28 = vmax.f32 %v4991_v12, %v4995_v51  ;;  %v2103_v32 = vadd.f32 %v2102_v19, %v13009_v39  ;;  %2422 = vmatprep.mubr.f32.mxu0 %v17886_v36  ;;  %v4014_v23 = vsel %vm3054_vm2, %v2097_v35, %v3534_v45  ;;  %v4505_v8 = vmul.f32 %v13019_v49, %v4013_v47 }
 0x344   :  { %v5356_v53 = vmax.f32 %v4992_v60, %v4996_v24  ;;  %v3535_v0 = vmul.f32 0.01, %v2101_v56  ;;  %vm3055_vm3 = vcmp.ge.f32.partialorder %v2101_v56, 0.0  ;;  %v4506_v35 = vmul.f32 %v13029_v55, %v4014_v23 }
 0x345   :  { %v14438_v5 = vpack.c.bf16 %v5355_v28, %v5353_v48  ;;  %v2106_v43 = vpop.f32.mrb[244].mxu0  ;;  %v3536_v18 = vmul.f32 0.01, %v2103_v32  ;;  %vm3056_vm4 = vcmp.ge.f32.partialorder %v2103_v32, 0.0 }
 0x346   :  { %v2107_v33 = vadd.f32 %v2106_v43, %v13005_v38  ;;  %v2108_v6 = vpop.f32.mrb[245].mxu0  ;;  %10807 = vmatmul.mubr.msk.f32.gmra.mrb[94].mxu0 %vm587_vm0, %v458_v46  ;;  %v14445_v12 = vpack.c.bf16 %v5356_v53, %v5354_v2  ;;  %v4015_v45 = vsel %vm3055_vm3, %v2101_v56, %v3535_v0  ;;  %v4997_v2 = vadd.f32 %v13037_v63, %v4505_v8 }
 0x347   :  { %17924 = vst [vmem:[#allocation68_spill] sm:$0xff] %v14438_v5  ;;  %v2109_v48 = vadd.f32 %v2108_v6, %v13009_v39  ;;  %2428 = vmatprep.mubr.f32.mxu0 %v17886_v36  ;;  %v4016_v60 = vsel %vm3056_vm4, %v2103_v32, %v3536_v18  ;;  %v4998_v56 = vadd.f32 %v13042_v3, %v4506_v35 }
 0x348   :  { %17925 = vst [vmem:[#allocation69_spill] sm:$0xff] %v14445_v12  ;;  %vm3057_vm5 = vcmp.ge.f32.partialorder %v2107_v33, 0.0  ;;  %v3537_v51 = vmul.f32 0.01, %v2107_v33  ;;  %v4507_v32 = vmul.f32 %v13019_v49, %v4015_v45 }
 0x349   :  { %vm3058_vm6 = vcmp.ge.f32.partialorder %v2109_v48, 0.0  ;;  %v3538_v47 = vmul.f32 0.01, %v2109_v48  ;;  %v2112_v19 = vpop.f32.mrb[246].mxu0 }
 0x34a   :  { %v4017_v24 = vsel %vm3057_vm5, %v2107_v33, %v3537_v51  ;;  %v2113_v28 = vadd.f32 %v2112_v19, %v13005_v38  ;;  %v2114_v46 = vpop.f32.mrb[247].mxu0  ;;  %10808 = vmatmul.mubr.msk.f32.gmra.mrb[96].mxu0 %vm587_vm0, %v14361_v27  ;;  %v14460_v33 = vpop.trf.xlu1  ;;  %v4508_v27 = vmul.f32 %v13029_v55, %v4016_v60 }
 0x34b   :  { %v4509_v6 = vmul.f32 %v13019_v49, %v4017_v24  ;;  %v4018_v23 = vsel %vm3058_vm6, %v2109_v48, %v3538_v47  ;;  %v2115_v53 = vadd.f32 %v2114_v46, %v13009_v39  ;;  %2434 = vmatprep.mubr.f32.mxu0 %v17886_v36 }
 0x34c   :  { %v4510_v0 = vmul.f32 %v13029_v55, %v4018_v23  ;;  %vm3059_vm7 = vcmp.ge.f32.partialorder %v2113_v28, 0.0  ;;  %v3539_v43 = vmul.f32 0.01, %v2113_v28  ;;  %v11419_v18 = vpop.f32.mrb[16].mxu1 }
 0x34d   :  { %vm3060_vm8 = vcmp.ge.f32.partialorder %v2115_v53, 0.0  ;;  %v3540_v8 = vmul.f32 0.01, %v2115_v53  ;;  %v2118_v48 = vpop.f32.mrb[248].mxu0  ;;  %v11420_v51 = vpop.f32.mrb[17].mxu1  ;;  %v5001_v47 = vadd.f32 %v13037_v63, %v4509_v6 }
 0x34e   :  { %v4019_v19 = vsel %vm3059_vm7, %v2113_v28, %v3539_v43  ;;  %v2119_v35 = vadd.f32 %v2118_v48, %v13005_v38  ;;  %v14465_v24 = vadd.f32 %v11420_v51, %v11419_v18  ;;  %v2120_v45 = vpop.f32.mrb[249].mxu0  ;;  %10809 = vmatmul.mubr.msk.f32.gmra.mrb[98].mxu0 %vm587_vm0, %v14379_v30  ;;  %v11422_v46 = vpop.f32.mrb[18].mxu1  ;;  %v5002_v23 = vadd.f32 %v13042_v3, %v4510_v0 }
 0x34f   :  { %v4511_v60 = vmul.f32 %v13019_v49, %v4019_v19  ;;  %v4020_v50 = vsel %vm3060_vm8, %v2115_v53, %v3540_v8  ;;  %v2121_v25 = vadd.f32 %v2120_v45, %v13009_v39  ;;  %v11423_v16 = vpop.f32.mrb[19].mxu1  ;;  %2440 = vmatprep.mubr.f32.mxu0 %v17886_v36  ;;  %v5357_v28 = vmax.f32 %v4997_v2, %v5001_v47 }
 0x350   :  { %17926 = vst [vmem:[#allocation70_spill] sm:$0xff] %v14465_v24  ;;  %v4512_v6 = vmul.f32 %v13029_v55, %v4020_v50  ;;  %vm3061_vm9 = vcmp.ge.f32.partialorder %v2119_v35, 0.0  ;;  %v3541_v43 = vmul.f32 0.01, %v2119_v35  ;;  %v14474_v18 = vadd.f32 %v11423_v16, %v11422_v46 }
 0x351   :  { %v3542_v48 = vmul.f32 0.01, %v2121_v25  ;;  %v2124_v30 = vpop.f32.mrb[250].mxu0  ;;  %v5358_v51 = vmax.f32 %v4998_v56, %v5002_v23  ;;  %v4999_v0 = vadd.f32 %v13037_v63, %v4507_v32  ;;  %v5003_v19 = vadd.f32 %v13037_v63, %v4511_v60  ;;  %v14485_v56 = vpop.trf.xlu1 }
 0x352   :  { %17927 = vst [vmem:[#allocation71_spill] sm:$0xff] %v14474_v18  ;;  %vm3062_vm10 = vcmp.ge.f32.partialorder %v2121_v25, 0.0  ;;  %v2125_v53 = vadd.f32 %v2124_v30, %v13005_v38  ;;  %v2126_v8 = vpop.f32.mrb[251].mxu0  ;;  %10810 = vmatmul.mubr.msk.f32.gmra.mrb[100].mxu0 %vm587_vm0, %v14394_v37  ;;  %v5000_v50 = vadd.f32 %v13042_v3, %v4508_v27  ;;  %v5004_v2 = vadd.f32 %v13042_v3, %v4512_v6 }
 0x353   :  { %v4021_v16 = vsel %vm3061_vm9, %v2119_v35, %v3541_v43  ;;  %v2127_v47 = vadd.f32 %v2126_v8, %v13009_v39  ;;  %2446 = vmatprep.mubr.f32.mxu0 %v17886_v36  ;;  %v5359_v32 = vmax.f32 %v4999_v0, %v5003_v19  ;;  %v4022_v46 = vsel %vm3062_vm10, %v2121_v25, %v3542_v48 }
 0x354   :  { %v5360_v45 = vmax.f32 %v5000_v50, %v5004_v2  ;;  %v4513_v30 = vmul.f32 %v13019_v49, %v4021_v16  ;;  %v3543_v37 = vmul.f32 0.01, %v2125_v53  ;;  %vm3063_vm11 = vcmp.ge.f32.partialorder %v2125_v53, 0.0 }
 0x355   :  { %v2130_v23 = vpop.f32.mrb[252].mxu0  ;;  %v14487_v60 = vpack.c.bf16 %v5359_v32, %v5357_v28  ;;  %v3544_v6 = vmul.f32 0.01, %v2127_v47  ;;  %v4514_v25 = vmul.f32 %v13029_v55, %v4022_v46  ;;  %vm3064_vm12 = vcmp.ge.f32.partialorder %v2127_v47, 0.0  ;;  %v14498_v19 = vpop.trf.xlu1 }
 0x356   :  { %v2131_v27 = vadd.f32 %v2130_v23, %v13005_v38  ;;  %v2132_v18 = vpop.f32.mrb[253].mxu0  ;;  %10811 = vmatmul.mubr.msk.f32.gmra.mrb[102].mxu0 %vm587_vm0, %v14411_v42  ;;  %v14493_v35 = vpack.c.bf16 %v5360_v45, %v5358_v51  ;;  %v4023_v8 = vsel %vm3063_vm11, %v2125_v53, %v3543_v37 }
 0x357   :  { %17928 = vst [vmem:[#allocation72_spill] sm:$0xff] %v14487_v60  ;;  %v2133_v43 = vadd.f32 %v2132_v18, %v13009_v39  ;;  %2452 = vmatprep.mubr.f32.mxu0 %v17886_v36  ;;  %v5005_v18 = vadd.f32 %v13037_v63, %v4513_v30  ;;  %v4024_v2 = vsel %vm3064_vm12, %v2127_v47, %v3544_v6 }
 0x358   :  { %17929 = vst [vmem:[#allocation73_spill] sm:$0xff] %v14493_v35  ;;  %vm3065_vm13 = vcmp.ge.f32.partialorder %v2131_v27, 0.0  ;;  %v3545_v28 = vmul.f32 0.01, %v2131_v27  ;;  %v5006_v23 = vadd.f32 %v13042_v3, %v4514_v25  ;;  %v4515_v37 = vmul.f32 %v13019_v49, %v4023_v8 }
 0x359   :  { %vm3066_vm14 = vcmp.ge.f32.partialorder %v2133_v43, 0.0  ;;  %v3546_v48 = vmul.f32 0.01, %v2133_v43  ;;  %v2136_v0 = vpop.f32.mrb[254].mxu0  ;;  %v4516_v30 = vmul.f32 %v13029_v55, %v4024_v2 }
 0x35a   :  { %v4025_v42 = vsel %vm3065_vm13, %v2131_v27, %v3545_v28  ;;  %v2137_v51 = vadd.f32 %v2136_v0, %v13005_v38  ;;  %v2138_v50 = vpop.f32.mrb[255].mxu0  ;;  %10812 = vmatmul.mubr.msk.f32.gmra.mrb[104].mxu0 %vm587_vm0, %v14428_v14 }
 0x35b   :  { %v4517_v16 = vmul.f32 %v13019_v49, %v4025_v42  ;;  %v4026_v32 = vsel %vm3066_vm14, %v2133_v43, %v3546_v48  ;;  %v2139_v45 = vadd.f32 %v2138_v50, %v13009_v39  ;;  %2458 = vmatprep.mubr.f32.mxu0 %v17886_v36  ;;  %v14519_v42 = vpop.trf.xlu1 }
 0x35c   :  { %v4518_v46 = vmul.f32 %v13029_v55, %v4026_v32  ;;  %vm3067_vm15 = vcmp.ge.f32.partialorder %v2137_v51, 0.0  ;;  %v3547_v53 = vmul.f32 0.01, %v2137_v51 }
 0x35d   :  { %vm3068_vm1 = vcmp.ge.f32.partialorder %v2139_v45, 0.0  ;;  %v3548_v14 = vmul.f32 0.01, %v2139_v45  ;;  %v2142_v27 = vpop.f32.mrb[0].mxu0  ;;  %v5009_v47 = vadd.f32 %v13037_v63, %v4517_v16 }
 0x35e   :  { %v4027_v6 = vsel %vm3067_vm15, %v2137_v51, %v3547_v53  ;;  %v2143_v43 = vadd.f32 %v2142_v27, %v13005_v38  ;;  %v2144_v28 = vpop.f32.mrb[1].mxu0  ;;  %10813 = vmatmul.mubr.msk.f32.gmra.mrb[106].mxu0 %vm587_vm0, %v14443_v40  ;;  %v5010_v48 = vadd.f32 %v13042_v3, %v4518_v46  ;;  %v5007_v40 = vadd.f32 %v13037_v63, %v4515_v37 }
 0x35f   :  { %v4519_v25 = vmul.f32 %v13019_v49, %v4027_v6  ;;  %v4028_v0 = vsel %vm3068_vm1, %v2139_v45, %v3548_v14  ;;  %v2145_v8 = vadd.f32 %v2144_v28, %v13009_v39  ;;  %2464 = vmatprep.mubr.f32.mxu0 %v17886_v36  ;;  %v5361_v50 = vmax.f32 %v5005_v18, %v5009_v47 }
 0x360   :  { %v4520_v51 = vmul.f32 %v13029_v55, %v4028_v0  ;;  %vm3069_vm2 = vcmp.ge.f32.partialorder %v2143_v43, 0.0  ;;  %v3549_v2 = vmul.f32 0.01, %v2143_v43  ;;  %v5362_v16 = vmax.f32 %v5006_v23, %v5010_v48 }
 0x361   :  { %v3550_v32 = vmul.f32 0.01, %v2145_v8  ;;  %v2148_v53 = vpop.f32.mrb[2].mxu0  ;;  %v5011_v46 = vadd.f32 %v13037_v63, %v4519_v25  ;;  %vm3070_vm3 = vcmp.ge.f32.partialorder %v2145_v8, 0.0  ;;  %v5008_v18 = vadd.f32 %v13042_v3, %v4516_v30  ;;  %v14531_v25 = vpop.trf.xlu1 }
 0x362   :  { %v2149_v45 = vadd.f32 %v2148_v53, %v13005_v38  ;;  %v2150_v14 = vpop.f32.mrb[3].mxu0  ;;  %10814 = vmatmul.mubr.msk.f32.gmra.mrb[108].mxu0 %vm587_vm0, %v14460_v33  ;;  %v5012_v27 = vadd.f32 %v13042_v3, %v4520_v51  ;;  %v4029_v47 = vsel %vm3069_vm2, %v2143_v43, %v3549_v2 }
 0x363   :  { %v2151_v23 = vadd.f32 %v2150_v14, %v13009_v39  ;;  %2470 = vmatprep.mubr.f32.mxu0 %v17886_v36  ;;  %v5363_v6 = vmax.f32 %v5007_v40, %v5011_v46  ;;  %v4030_v28 = vsel %vm3070_vm3, %v2145_v8, %v3550_v32  ;;  %v4521_v53 = vmul.f32 %v13019_v49, %v4029_v47  ;;  %v14544_v32 = vpop.trf.xlu0 }
 0x364   :  { %v5364_v37 = vmax.f32 %v5008_v18, %v5012_v27  ;;  %v3551_v33 = vmul.f32 0.01, %v2149_v45  ;;  %vm3071_vm4 = vcmp.ge.f32.partialorder %v2149_v45, 0.0 }
 0x365   :  { %v2154_v48 = vpop.f32.mrb[4].mxu0  ;;  %v14533_v0 = vpack.c.bf16 %v5363_v6, %v5361_v50  ;;  %v3552_v51 = vmul.f32 0.01, %v2151_v23  ;;  %v4522_v50 = vmul.f32 %v13029_v55, %v4030_v28  ;;  %vm3072_vm5 = vcmp.ge.f32.partialorder %v2151_v23, 0.0  ;;  %v486_v28 = vpop.trf.xlu1 }
 0x366   :  { %v2155_v30 = vadd.f32 %v2154_v48, %v13005_v38  ;;  %v2156_v24 = vpop.f32.mrb[5].mxu0  ;;  %10815 = vmatmul.mubr.msk.f32.gmra.mrb[110].mxu0 %vm587_vm0, %v14485_v56  ;;  %v14539_v43 = vpack.c.bf16 %v5364_v37, %v5362_v16  ;;  %v4031_v14 = vsel %vm3071_vm4, %v2149_v45, %v3551_v33 }
 0x367   :  { %17930 = vst [vmem:[#allocation74_spill] sm:$0xff] %v14533_v0  ;;  %v2157_v8 = vadd.f32 %v2156_v24, %v13009_v39  ;;  %2476 = vmatprep.mubr.f32.mxu0 %v17886_v36  ;;  %v5013_v24 = vadd.f32 %v13037_v63, %v4521_v53  ;;  %v4032_v27 = vsel %vm3072_vm5, %v2151_v23, %v3552_v51 }
 0x368   :  { %17931 = vst [vmem:[#allocation75_spill] sm:$0xff] %v14539_v43  ;;  %vm3073_vm6 = vcmp.ge.f32.partialorder %v2155_v30, 0.0  ;;  %v3553_v2 = vmul.f32 0.01, %v2155_v30  ;;  %v5014_v33 = vadd.f32 %v13042_v3, %v4522_v50  ;;  %v4524_v51 = vmul.f32 %v13029_v55, %v4032_v27 }
 0x369   :  { %vm3074_vm7 = vcmp.ge.f32.partialorder %v2157_v8, 0.0  ;;  %v3554_v40 = vmul.f32 0.01, %v2157_v8  ;;  %v2160_v46 = vpop.f32.mrb[6].mxu0 }
 0x36a   :  { %v4033_v56 = vsel %vm3073_vm6, %v2155_v30, %v3553_v2  ;;  %v2161_v16 = vadd.f32 %v2160_v46, %v13005_v38  ;;  %v2162_v18 = vpop.f32.mrb[7].mxu0  ;;  %10816 = vmatmul.mubr.msk.f32.gmra.mrb[112].mxu0 %vm587_vm0, %v14498_v19  ;;  %v4523_v30 = vmul.f32 %v13019_v49, %v4031_v14 }
 0x36b   :  { %v4525_v47 = vmul.f32 %v13019_v49, %v4033_v56  ;;  %v4034_v6 = vsel %vm3074_vm7, %v2157_v8, %v3554_v40  ;;  %v2163_v37 = vadd.f32 %v2162_v18, %v13009_v39  ;;  %2482 = vmatprep.mubr.f32.mxu0 %v17886_v36  ;;  %v14562_v56 = vpop.trf.xlu0 }
 0x36c   :  { %v4526_v45 = vmul.f32 %v13029_v55, %v4034_v6  ;;  %vm3075_vm8 = vcmp.ge.f32.partialorder %v2161_v16, 0.0  ;;  %v3555_v48 = vmul.f32 0.01, %v2161_v16 }
 0x36d   :  { %vm3076_vm9 = vcmp.ge.f32.partialorder %v2163_v37, 0.0  ;;  %v3556_v19 = vmul.f32 0.01, %v2163_v37  ;;  %v2166_v53 = vpop.f32.mrb[8].mxu0  ;;  %v5017_v23 = vadd.f32 %v13037_v63, %v4525_v47 }
 0x36e   :  { %v4035_v8 = vsel %vm3075_vm8, %v2161_v16, %v3555_v48  ;;  %v2167_v2 = vadd.f32 %v2166_v53, %v13005_v38  ;;  %v2168_v40 = vpop.f32.mrb[9].mxu0  ;;  %10817 = vmatmul.mubr.msk.f32.gmra.mrb[114].mxu0 %vm587_vm0, %v14519_v42  ;;  %v5018_v46 = vadd.f32 %v13042_v3, %v4526_v45  ;;  %v487_v42 = vpop.trf.xlu1  ;;  %v5015_v45 = vadd.f32 %v13037_v63, %v4523_v30 }
 0x36f   :  { %v4527_v50 = vmul.f32 %v13019_v49, %v4035_v8  ;;  %v4036_v14 = vsel %vm3076_vm9, %v2163_v37, %v3556_v19  ;;  %v2169_v18 = vadd.f32 %v2168_v40, %v13009_v39  ;;  %2488 = vmatprep.mubr.f32.mxu0 %v17886_v36  ;;  %v5365_v47 = vmax.f32 %v5013_v24, %v5017_v23 }
 0x370   :  { %v4528_v16 = vmul.f32 %v13029_v55, %v4036_v14  ;;  %vm3077_vm10 = vcmp.ge.f32.partialorder %v2167_v2, 0.0  ;;  %v3557_v27 = vmul.f32 0.01, %v2167_v2  ;;  %v5366_v6 = vmax.f32 %v5014_v33, %v5018_v46  ;;  %v14577_v46 = vpop.trf.xlu0 }
 0x371   :  { %v3558_v48 = vmul.f32 0.01, %v2169_v18  ;;  %v2172_v53 = vpop.f32.mrb[10].mxu0  ;;  %v5019_v0 = vadd.f32 %v13037_v63, %v4527_v50  ;;  %vm3078_vm11 = vcmp.ge.f32.partialorder %v2169_v18, 0.0  ;;  %v5016_v24 = vadd.f32 %v13042_v3, %v4524_v51 }
 0x372   :  { %v2173_v37 = vadd.f32 %v2172_v53, %v13005_v38  ;;  %v2174_v19 = vpop.f32.mrb[11].mxu0  ;;  %10818 = vmatmul.mubr.msk.f32.gmra.mrb[116].mxu0 %vm587_vm0, %v14531_v25  ;;  %v5020_v23 = vadd.f32 %v13042_v3, %v4528_v16  ;;  %v4037_v8 = vsel %vm3077_vm10, %v2167_v2, %v3557_v27 }
 0x373   :  { %v2175_v33 = vadd.f32 %v2174_v19, %v13009_v39  ;;  %2494 = vmatprep.mubr.f32.mxu0 %v17886_v36  ;;  %v5367_v40 = vmax.f32 %v5015_v45, %v5019_v0  ;;  %v4038_v50 = vsel %vm3078_vm11, %v2169_v18, %v3558_v48  ;;  %v4529_v43 = vmul.f32 %v13019_v49, %v4037_v8  ;;  %v488_v18 = vpop.trf.xlu1 }
 0x374   :  { %v5368_v30 = vmax.f32 %v5016_v24, %v5020_v23  ;;  %v3559_v25 = vmul.f32 0.01, %v2173_v37  ;;  %vm3079_vm12 = vcmp.ge.f32.partialorder %v2173_v37, 0.0  ;;  %v14594_v23 = vpop.trf.xlu0 }
 0x375   :  { %v2178_v14 = vpop.f32.mrb[12].mxu0  ;;  %v14579_v53 = vpack.c.bf16 %v5367_v40, %v5365_v47  ;;  %v3560_v16 = vmul.f32 0.01, %v2175_v33  ;;  %v4530_v47 = vmul.f32 %v13029_v55, %v4038_v50  ;;  %vm3080_vm13 = vcmp.ge.f32.partialorder %v2175_v33, 0.0 }
 0x376   :  { %v2179_v51 = vadd.f32 %v2178_v14, %v13005_v38  ;;  %v2180_v60 = vpop.f32.mrb[13].mxu0  ;;  %10819 = vmatmul.mubr.msk.f32.gmra.mrb[118].mxu0 %vm587_vm0, %v486_v28  ;;  %v14584_v2 = vpack.c.bf16 %v5368_v30, %v5366_v6  ;;  %v5021_v28 = vadd.f32 %v13037_v63, %v4529_v43  ;;  %v4039_v6 = vsel %vm3079_vm12, %v2173_v37, %v3559_v25 }
 0x377   :  { %17932 = vst [vmem:[#allocation76_spill] sm:$0xff] %v14579_v53  ;;  %v2181_v0 = vadd.f32 %v2180_v60, %v13009_v39  ;;  %2500 = vmatprep.mubr.f32.mxu0 %v17886_v36  ;;  %v4040_v8 = vsel %vm3080_vm13, %v2175_v33, %v3560_v16  ;;  %v5022_v37 = vadd.f32 %v13042_v3, %v4530_v47  ;;  %v489_v16 = vpop.trf.xlu1 }
 0x378   :  { %17933 = vst [vmem:[#allocation77_spill] sm:$0xff] %v14584_v2  ;;  %vm3081_vm14 = vcmp.ge.f32.partialorder %v2179_v51, 0.0  ;;  %v3561_v27 = vmul.f32 0.01, %v2179_v51  ;;  %6094 = vmatprep.mubr.bf16.mxu1 %v14584_v2  ;;  %v4531_v25 = vmul.f32 %v13019_v49, %v4039_v6 }
 0x379   :  { %vm3082_vm15 = vcmp.ge.f32.partialorder %v2181_v0, 0.0  ;;  %v3562_v48 = vmul.f32 0.01, %v2181_v0  ;;  %v2184_v45 = vpop.f32.mrb[14].mxu0  ;;  %6095 = vmatmul.mubr.bf16.gmra.mrb[32].mxu1 %v14579_v53 }
 0x37a   :  { %v4041_v19 = vsel %vm3081_vm14, %v2179_v51, %v3561_v27  ;;  %v2185_v60 = vadd.f32 %v2184_v45, %v13005_v38  ;;  %v2186_v24 = vpop.f32.mrb[15].mxu0  ;;  %10820 = vmatmul.mubr.msk.f32.gmra.mrb[120].mxu0 %vm587_vm0, %v487_v42 }
 0x37b   :  { %v4533_v40 = vmul.f32 %v13019_v49, %v4041_v19  ;;  %v4042_v30 = vsel %vm3082_vm15, %v2181_v0, %v3562_v48  ;;  %v2187_v50 = vadd.f32 %v2186_v24, %v13009_v39  ;;  %2506 = vmatprep.mubr.f32.mxu0 %v17886_v36  ;;  %v4532_v0 = vmul.f32 %v13029_v55, %v4040_v8 }
 0x37c   :  { %v4534_v14 = vmul.f32 %v13029_v55, %v4042_v30  ;;  %vm3083_vm1 = vcmp.ge.f32.partialorder %v2185_v60, 0.0  ;;  %v3563_v43 = vmul.f32 0.01, %v2185_v60 }
 0x37d   :  { %v5025_v42 = vadd.f32 %v13037_v63, %v4533_v40  ;;  %vm3084_vm2 = vcmp.ge.f32.partialorder %v2187_v50, 0.0  ;;  %v3564_v51 = vmul.f32 0.01, %v2187_v50  ;;  %v2190_v33 = vpop.f32.mrb[16].mxu0 }
 0x37e   :  { %v4043_v27 = vsel %vm3083_vm1, %v2185_v60, %v3563_v43  ;;  %v2191_v48 = vadd.f32 %v2190_v33, %v13005_v38  ;;  %v2192_v45 = vpop.f32.mrb[17].mxu0  ;;  %10821 = vmatmul.mubr.msk.f32.gmra.mrb[122].mxu0 %vm587_vm0, %v488_v18  ;;  %v5026_v19 = vadd.f32 %v13042_v3, %v4534_v14  ;;  %v14611_v60 = vpop.trf.xlu0  ;;  %v5023_v33 = vadd.f32 %v13037_v63, %v4531_v25 }
 0x37f   :  { %v5369_v24 = vmax.f32 %v5021_v28, %v5025_v42  ;;  %v4535_v47 = vmul.f32 %v13019_v49, %v4043_v27  ;;  %v4044_v6 = vsel %vm3084_vm2, %v2187_v50, %v3564_v51  ;;  %v2193_v40 = vadd.f32 %v2192_v45, %v13009_v39  ;;  %2512 = vmatprep.mubr.f32.mxu0 %v17886_v36 }
 0x380   :  { %v4536_v30 = vmul.f32 %v13029_v55, %v4044_v6  ;;  %vm3085_vm3 = vcmp.ge.f32.partialorder %v2191_v48, 0.0  ;;  %v3565_v8 = vmul.f32 0.01, %v2191_v48  ;;  %v5370_v43 = vmax.f32 %v5022_v37, %v5026_v19  ;;  %v490_v19 = vpop.trf.xlu1 }
 0x381   :  { %v5027_v18 = vadd.f32 %v13037_v63, %v4535_v47  ;;  %vm3086_vm4 = vcmp.ge.f32.partialorder %v2193_v40, 0.0  ;;  %v3566_v28 = vmul.f32 0.01, %v2193_v40  ;;  %v2196_v14 = vpop.f32.mrb[18].mxu0  ;;  %v5024_v27 = vadd.f32 %v13042_v3, %v4532_v0 }
 0x382   :  { %v4045_v42 = vsel %vm3085_vm3, %v2191_v48, %v3565_v8  ;;  %v2197_v50 = vadd.f32 %v2196_v14, %v13005_v38  ;;  %v2198_v51 = vpop.f32.mrb[19].mxu0  ;;  %10822 = vmatmul.mubr.msk.f32.gmra.mrb[124].mxu0 %vm587_vm0, %v489_v16  ;;  %v5028_v45 = vadd.f32 %v13042_v3, %v4536_v30 }
 0x383   :  { %v5371_v6 = vmax.f32 %v5023_v33, %v5027_v18  ;;  %v2199_v37 = vadd.f32 %v2198_v51, %v13009_v39  ;;  %2518 = vmatprep.mubr.f32.mxu0 %v17886_v36  ;;  %v4046_v25 = vsel %vm3086_vm4, %v2193_v40, %v3566_v28  ;;  %v4537_v8 = vmul.f32 %v13019_v49, %v4045_v42  ;;  %v14626_v33 = vpop.trf.xlu0 }
 0x384   :  { %vm3087_vm5 = vcmp.ge.f32.partialorder %v2197_v50, 0.0  ;;  %v3567_v47 = vmul.f32 0.01, %v2197_v50  ;;  %v5372_v53 = vmax.f32 %v5024_v27, %v5028_v45  ;;  %v4538_v40 = vmul.f32 %v13029_v55, %v4046_v25 }
 0x385   :  { %v14621_v48 = vpack.c.bf16 %v5371_v6, %v5369_v24  ;;  %v3568_v14 = vmul.f32 0.01, %v2199_v37  ;;  %v2202_v16 = vpop.f32.mrb[20].mxu0  ;;  %vm3088_vm6 = vcmp.ge.f32.partialorder %v2199_v37, 0.0 }
 0x386   :  { %v4047_v2 = vsel %vm3087_vm5, %v2197_v50, %v3567_v47  ;;  %v2203_v0 = vadd.f32 %v2202_v16, %v13005_v38  ;;  %v2204_v30 = vpop.f32.mrb[21].mxu0  ;;  %10823 = vmatmul.mubr.msk.f32.gmra.mrb[126].mxu0 %vm587_vm0, %v490_v19  ;;  %v14628_v18 = vpack.c.bf16 %v5372_v53, %v5370_v43  ;;  %v5029_v53 = vadd.f32 %v13037_v63, %v4537_v8 }
 0x387   :  { %17934 = vst [vmem:[#allocation78_spill] sm:$0xff] %v14621_v48  ;;  %v2205_v24 = vadd.f32 %v2204_v30, %v13009_v39  ;;  %2524 = vmatprep.mubr.f32.mxu0 %v17886_v36  ;;  %v4539_v42 = vmul.f32 %v13019_v49, %v4047_v2  ;;  %v4048_v50 = vsel %vm3088_vm6, %v2199_v37, %v3568_v14  ;;  %v14644_v30 = vpop.trf.xlu0 }
 0x388   :  { %17935 = vst [vmem:[#allocation79_spill] sm:$0xff] %v14628_v18  ;;  %vm3089_vm7 = vcmp.ge.f32.partialorder %v2203_v0, 0.0  ;;  %v3569_v28 = vmul.f32 0.01, %v2203_v0  ;;  %v5030_v2 = vadd.f32 %v13042_v3, %v4538_v40  ;;  %v4540_v37 = vmul.f32 %v13029_v55, %v4048_v50 }
 0x389   :  { %vm3090_vm8 = vcmp.ge.f32.partialorder %v2205_v24, 0.0  ;;  %v3570_v51 = vmul.f32 0.01, %v2205_v24  ;;  %v2208_v27 = vpop.f32.mrb[22].mxu0 }
 0x38a   :  { %v4049_v45 = vsel %vm3089_vm7, %v2203_v0, %v3569_v28  ;;  %v2209_v6 = vadd.f32 %v2208_v27, %v13005_v38  ;;  %v2210_v19 = vpop.f32.mrb[23].mxu0  ;;  %10824 = vmatmul.mubr.msk.f32.gmra.mrb[128].mxu0 %vm587_vm0, %v14544_v32 }
 0x38b   :  { %v4541_v43 = vmul.f32 %v13019_v49, %v4049_v45  ;;  %v4050_v25 = vsel %vm3090_vm8, %v2205_v24, %v3570_v51  ;;  %v2211_v47 = vadd.f32 %v2210_v19, %v13009_v39  ;;  %2530 = vmatprep.mubr.f32.mxu0 %v17886_v36  ;;  %v5031_v24 = vadd.f32 %v13037_v63, %v4539_v42 }
 0x38c   :  { %v4542_v14 = vmul.f32 %v13029_v55, %v4050_v25  ;;  %vm3091_vm9 = vcmp.ge.f32.partialorder %v2209_v6, 0.0  ;;  %v3571_v16 = vmul.f32 0.01, %v2209_v6  ;;  %v11425_v0 = vpop.f32.mrb[20].mxu1 }
 0x38d   :  { %vm3092_vm10 = vcmp.ge.f32.partialorder %v2211_v47, 0.0  ;;  %v3572_v32 = vmul.f32 0.01, %v2211_v47  ;;  %v2214_v8 = vpop.f32.mrb[24].mxu0  ;;  %v11426_v28 = vpop.f32.mrb[21].mxu1  ;;  %v5033_v51 = vadd.f32 %v13037_v63, %v4541_v43 }
 0x38e   :  { %v4051_v27 = vsel %vm3091_vm9, %v2209_v6, %v3571_v16  ;;  %v2215_v40 = vadd.f32 %v2214_v8, %v13005_v38  ;;  %v14649_v45 = vadd.f32 %v11426_v28, %v11425_v0  ;;  %v2216_v50 = vpop.f32.mrb[25].mxu0  ;;  %10825 = vmatmul.mubr.msk.f32.gmra.mrb[130].mxu0 %vm587_vm0, %v14562_v56  ;;  %v11428_v19 = vpop.f32.mrb[22].mxu1  ;;  %v5034_v25 = vadd.f32 %v13042_v3, %v4542_v14 }
 0x38f   :  { %v4543_v35 = vmul.f32 %v13019_v49, %v4051_v27  ;;  %v4052_v20 = vsel %vm3092_vm10, %v2211_v47, %v3572_v32  ;;  %v2217_v13 = vadd.f32 %v2216_v50, %v13009_v39  ;;  %v11429_v42 = vpop.f32.mrb[23].mxu1  ;;  %2536 = vmatprep.mubr.f32.mxu0 %v17886_v36  ;;  %v5373_v6 = vmax.f32 %v5029_v53, %v5033_v51  ;;  %v14668_v51 = vpop.trf.xlu0 }
 0x390   :  { %17936 = vst [vmem:[#allocation80_spill] sm:$0xff] %v14649_v45  ;;  %v4544_v43 = vmul.f32 %v13029_v55, %v4052_v20  ;;  %vm3093_vm11 = vcmp.ge.f32.partialorder %v2215_v40, 0.0  ;;  %v3573_v16 = vmul.f32 0.01, %v2215_v40  ;;  %v14658_v0 = vadd.f32 %v11429_v42, %v11428_v19 }
 0x391   :  { %v3574_v8 = vmul.f32 0.01, %v2217_v13  ;;  %v2220_v56 = vpop.f32.mrb[26].mxu0  ;;  %v5032_v28 = vadd.f32 %v13042_v3, %v4540_v37  ;;  %v5374_v14 = vmax.f32 %v5030_v2, %v5034_v25  ;;  %v5035_v27 = vadd.f32 %v13037_v63, %v4543_v35 }
 0x392   :  { %17937 = vst [vmem:[#allocation81_spill] sm:$0xff] %v14658_v0  ;;  %v4053_v47 = vsel %vm3093_vm11, %v2215_v40, %v3573_v16  ;;  %vm3094_vm12 = vcmp.ge.f32.partialorder %v2217_v13, 0.0  ;;  %v2221_v32 = vadd.f32 %v2220_v56, %v13005_v38  ;;  %v2222_v50 = vpop.f32.mrb[27].mxu0  ;;  %10826 = vmatmul.mubr.msk.f32.gmra.mrb[132].mxu0 %vm587_vm0, %v14577_v46  ;;  %v5036_v20 = vadd.f32 %v13042_v3, %v4544_v43 }
 0x393   :  { %v2223_v53 = vadd.f32 %v2222_v50, %v13009_v39  ;;  %2542 = vmatprep.mubr.f32.mxu0 %v17886_v36  ;;  %v5375_v37 = vmax.f32 %v5031_v24, %v5035_v27  ;;  %v4054_v19 = vsel %vm3094_vm12, %v2217_v13, %v3574_v8  ;;  %v4545_v25 = vmul.f32 %v13019_v49, %v4053_v47 }
 0x394   :  { %v5376_v2 = vmax.f32 %v5032_v28, %v5036_v20  ;;  %v3575_v42 = vmul.f32 0.01, %v2221_v32  ;;  %vm3095_vm13 = vcmp.ge.f32.partialorder %v2221_v32, 0.0  ;;  %v4546_v8 = vmul.f32 %v13029_v55, %v4054_v19 }
 0x395   :  { %v2226_v35 = vpop.f32.mrb[28].mxu0  ;;  %v14670_v40 = vpack.c.bf16 %v5375_v37, %v5373_v6  ;;  %v3576_v56 = vmul.f32 0.01, %v2223_v53  ;;  %vm3096_vm14 = vcmp.ge.f32.partialorder %v2223_v53, 0.0  ;;  %v12175_v6 = vld [vmem:[%s17728_s5 + $0xd0] sm:$0xff]   ;;  %v5037_v27 = vadd.f32 %v13037_v63, %v4545_v25 }
 0x396   :  { %v2227_v16 = vadd.f32 %v2226_v35, %v13005_v38  ;;  %v2228_v46 = vpop.f32.mrb[29].mxu0  ;;  %10827 = vmatmul.mubr.msk.f32.gmra.mrb[134].mxu0 %vm587_vm0, %v14594_v23  ;;  %v14676_v43 = vpack.c.bf16 %v5376_v2, %v5374_v14  ;;  %v14684_v14 = vpop.trf.xlu0  ;;  %v4055_v47 = vsel %vm3095_vm13, %v2221_v32, %v3575_v42  ;;  %11283 = vmatprep.subr.bf16.mxu0 %v12175_v6  ;;  %v12176_v32 = vld [vmem:[%s17728_s5 + $0x90] sm:$0xff]  }
 0x397   :  { %17938 = vst [vmem:[#allocation82_spill] sm:$0xff] %v14670_v40  ;;  %v2229_v24 = vadd.f32 %v2228_v46, %v13009_v39  ;;  %2548 = vmatprep.mubr.f32.mxu0 %v17886_v36  ;;  %v4056_v2 = vsel %vm3096_vm14, %v2223_v53, %v3576_v56  ;;  %11284 = vmatpush3.bf16.msra.mxu0 %v12176_v32 }
 0x398   :  { %17939 = vst [vmem:[#allocation83_spill] sm:$0xff] %v14676_v43  ;;  %vm3097_vm15 = vcmp.ge.f32.partialorder %v2227_v16, 0.0  ;;  %v3577_v13 = vmul.f32 0.01, %v2227_v16  ;;  %v4547_v56 = vmul.f32 %v13019_v49, %v4055_v47 }
 0x399   :  { %vm3098_vm1 = vcmp.ge.f32.partialorder %v2229_v24, 0.0  ;;  %v3578_v28 = vmul.f32 0.01, %v2229_v24  ;;  %v2232_v23 = vpop.f32.mrb[30].mxu0 }
 0x39a   :  { %v4057_v50 = vsel %vm3097_vm15, %v2227_v16, %v3577_v13  ;;  %v2233_v20 = vadd.f32 %v2232_v23, %v13005_v38  ;;  %v2234_v37 = vpop.f32.mrb[31].mxu0  ;;  %10828 = vmatmul.mubr.msk.f32.gmra.mrb[136].mxu0 %vm587_vm0, %v14611_v60  ;;  %v5038_v60 = vadd.f32 %v13042_v3, %v4546_v8  ;;  %v4548_v23 = vmul.f32 %v13029_v55, %v4056_v2  ;;  %v14709_v47 = vpop.trf.xlu0 }
 0x39b   :  { %v4549_v19 = vmul.f32 %v13019_v49, %v4057_v50  ;;  %v4058_v35 = vsel %vm3098_vm1, %v2229_v24, %v3578_v28  ;;  %v2235_v46 = vadd.f32 %v2234_v37, %v13009_v39  ;;  %2554 = vmatprep.mubr.f32.mxu0 %v17886_v36  ;;  %v5039_v2 = vadd.f32 %v13037_v63, %v4547_v56 }
 0x39c   :  { %v4550_v25 = vmul.f32 %v13029_v55, %v4058_v35  ;;  %vm3099_vm2 = vcmp.ge.f32.partialorder %v2233_v20, 0.0  ;;  %v3579_v42 = vmul.f32 0.01, %v2233_v20 }
 0x39d   :  { %vm3100_vm3 = vcmp.ge.f32.partialorder %v2235_v46, 0.0  ;;  %v3580_v16 = vmul.f32 0.01, %v2235_v46  ;;  %v2238_v53 = vpop.f32.mrb[32].mxu0  ;;  %v5041_v24 = vadd.f32 %v13037_v63, %v4549_v19 }
 0x39e   :  { %v4059_v13 = vsel %vm3099_vm2, %v2233_v20, %v3579_v42  ;;  %v2239_v6 = vadd.f32 %v2238_v53, %v13005_v38  ;;  %v2240_v28 = vpop.f32.mrb[33].mxu0  ;;  %10829 = vmatmul.mubr.msk.f32.gmra.mrb[138].mxu0 %vm587_vm0, %v14626_v33  ;;  %v5042_v50 = vadd.f32 %v13042_v3, %v4550_v25 }
 0x39f   :  { %v4551_v8 = vmul.f32 %v13019_v49, %v4059_v13  ;;  %v4060_v37 = vsel %vm3100_vm3, %v2235_v46, %v3580_v16  ;;  %v2241_v35 = vadd.f32 %v2240_v28, %v13009_v39  ;;  %2560 = vmatprep.mubr.f32.mxu0 %v17886_v36  ;;  %v5377_v20 = vmax.f32 %v5037_v27, %v5041_v24 }
 0x3a0   :  { %v4552_v19 = vmul.f32 %v13029_v55, %v4060_v37  ;;  %v3581_v32 = vmul.f32 0.01, %v2239_v6  ;;  %v5378_v42 = vmax.f32 %v5038_v60, %v5042_v50  ;;  %vm3101_vm4 = vcmp.ge.f32.partialorder %v2239_v6, 0.0  ;;  %v14721_v37 = vpop.trf.xlu0 }
 0x3a1   :  { %v2244_v33 = vpop.f32.mrb[34].mxu0  ;;  %v5043_v25 = vadd.f32 %v13037_v63, %v4551_v8  ;;  %v5040_v16 = vadd.f32 %v13042_v3, %v4548_v23  ;;  %v3582_v24 = vmul.f32 0.01, %v2241_v35  ;;  %vm3102_vm5 = vcmp.ge.f32.partialorder %v2241_v35, 0.0 }
 0x3a2   :  { %v2245_v53 = vadd.f32 %v2244_v33, %v13005_v38  ;;  %v2246_v46 = vpop.f32.mrb[35].mxu0  ;;  %10830 = vmatmul.mubr.msk.f32.gmra.mrb[140].mxu0 %vm587_vm0, %v14644_v30  ;;  %v5044_v27 = vadd.f32 %v13042_v3, %v4552_v19  ;;  %v4061_v28 = vsel %vm3101_vm4, %v2239_v6, %v3581_v32 }
 0x3a3   :  { %v2247_v13 = vadd.f32 %v2246_v46, %v13009_v39  ;;  %2566 = vmatprep.mubr.f32.mxu0 %v17886_v36  ;;  %v5379_v60 = vmax.f32 %v5039_v2, %v5043_v25  ;;  %v4553_v6 = vmul.f32 %v13019_v49, %v4061_v28  ;;  %v4062_v32 = vsel %vm3102_vm5, %v2241_v35, %v3582_v24  ;;  %v14733_v25 = vpop.trf.xlu1 }
 0x3a4   :  { %v5380_v56 = vmax.f32 %v5040_v16, %v5044_v27  ;;  %v3583_v50 = vmul.f32 0.01, %v2245_v53  ;;  %vm3103_vm6 = vcmp.ge.f32.partialorder %v2245_v53, 0.0 }
 0x3a5   :  { %v2250_v8 = vpop.f32.mrb[36].mxu0  ;;  %v14723_v33 = vpack.c.bf16 %v5379_v60, %v5377_v20  ;;  %v3584_v30 = vmul.f32 0.01, %v2247_v13  ;;  %vm3104_vm7 = vcmp.ge.f32.partialorder %v2247_v13, 0.0 }
 0x3a6   :  { %v2251_v23 = vadd.f32 %v2250_v8, %v13005_v38  ;;  %v2252_v19 = vpop.f32.mrb[37].mxu0  ;;  %10831 = vmatmul.mubr.msk.f32.gmra.mrb[142].mxu0 %vm587_vm0, %v14668_v51  ;;  %v14728_v46 = vpack.c.bf16 %v5380_v56, %v5378_v42  ;;  %v4063_v16 = vsel %vm3103_vm6, %v2245_v53, %v3583_v50  ;;  %v4554_v51 = vmul.f32 %v13029_v55, %v4062_v32  ;;  %v518_v53 = vpop.trf.xlu0 }
 0x3a7   :  { %17940 = vst [vmem:[#allocation84_spill] sm:$0xff] %v14723_v33  ;;  %v2253_v2 = vadd.f32 %v2252_v19, %v13009_v39  ;;  %2572 = vmatprep.mubr.f32.mxu0 %v17886_v36  ;;  %v4064_v42 = vsel %vm3104_vm7, %v2247_v13, %v3584_v30  ;;  %v5045_v50 = vadd.f32 %v13037_v63, %v4553_v6 }
 0x3a8   :  { %17941 = vst [vmem:[#allocation85_spill] sm:$0xff] %v14728_v46  ;;  %vm3105_vm8 = vcmp.ge.f32.partialorder %v2251_v23, 0.0  ;;  %v3585_v20 = vmul.f32 0.01, %v2251_v23  ;;  %v4555_v32 = vmul.f32 %v13019_v49, %v4063_v16  ;;  %v5046_v6 = vadd.f32 %v13042_v3, %v4554_v51 }
 0x3a9   :  { %vm3106_vm9 = vcmp.ge.f32.partialorder %v2253_v2, 0.0  ;;  %v3586_v27 = vmul.f32 0.01, %v2253_v2  ;;  %v2256_v60 = vpop.f32.mrb[38].mxu0 }
 0x3aa   :  { %v4065_v56 = vsel %vm3105_vm8, %v2251_v23, %v3585_v20  ;;  %v2257_v28 = vadd.f32 %v2256_v60, %v13005_v38  ;;  %v2258_v35 = vpop.f32.mrb[39].mxu0  ;;  %10832 = vmatmul.mubr.msk.f32.gmra.mrb[144].mxu0 %vm587_vm0, %v14684_v14  ;;  %v4556_v23 = vmul.f32 %v13029_v55, %v4064_v42 }
 0x3ab   :  { %v4557_v24 = vmul.f32 %v13019_v49, %v4065_v56  ;;  %v4066_v8 = vsel %vm3106_vm9, %v2253_v2, %v3586_v27  ;;  %v2259_v19 = vadd.f32 %v2258_v35, %v13009_v39  ;;  %2578 = vmatprep.mubr.f32.mxu0 %v17886_v36  ;;  %v14752_v35 = vpop.trf.xlu1 }
 0x3ac   :  { %v4558_v13 = vmul.f32 %v13029_v55, %v4066_v8  ;;  %vm3107_vm10 = vcmp.ge.f32.partialorder %v2257_v28, 0.0  ;;  %v3587_v30 = vmul.f32 0.01, %v2257_v28  ;;  %v5048_v51 = vadd.f32 %v13042_v3, %v4556_v23 }
 0x3ad   :  { %vm3108_vm11 = vcmp.ge.f32.partialorder %v2259_v19, 0.0  ;;  %v3588_v14 = vmul.f32 0.01, %v2259_v19  ;;  %v2262_v20 = vpop.f32.mrb[40].mxu0  ;;  %v5049_v2 = vadd.f32 %v13037_v63, %v4557_v24 }
 0x3ae   :  { %v4067_v27 = vsel %vm3107_vm10, %v2257_v28, %v3587_v30  ;;  %v2263_v60 = vadd.f32 %v2262_v20, %v13005_v38  ;;  %v2264_v56 = vpop.f32.mrb[41].mxu0  ;;  %10833 = vmatmul.mubr.msk.f32.gmra.mrb[146].mxu0 %vm587_vm0, %v14709_v47  ;;  %v5050_v16 = vadd.f32 %v13042_v3, %v4558_v13  ;;  %v5047_v13 = vadd.f32 %v13037_v63, %v4555_v32 }
 0x3af   :  { %v4559_v42 = vmul.f32 %v13019_v49, %v4067_v27  ;;  %v4068_v8 = vsel %vm3108_vm11, %v2259_v19, %v3588_v14  ;;  %v2265_v33 = vadd.f32 %v2264_v56, %v13009_v39  ;;  %2584 = vmatprep.mubr.f32.mxu0 %v17886_v36  ;;  %v5381_v28 = vmax.f32 %v5045_v50, %v5049_v2  ;;  %v519_v27 = vpop.trf.xlu0 }
 0x3b0   :  { %v4560_v24 = vmul.f32 %v13029_v55, %v4068_v8  ;;  %vm3109_vm12 = vcmp.ge.f32.partialorder %v2263_v60, 0.0  ;;  %v3589_v30 = vmul.f32 0.01, %v2263_v60  ;;  %v5382_v20 = vmax.f32 %v5046_v6, %v5050_v16  ;;  %v14767_v16 = vpop.trf.xlu1 }
 0x3b1   :  { %v3590_v47 = vmul.f32 0.01, %v2265_v33  ;;  %v2268_v46 = vpop.f32.mrb[42].mxu0  ;;  %v5051_v0 = vadd.f32 %v13037_v63, %v4559_v42  ;;  %vm3110_vm13 = vcmp.ge.f32.partialorder %v2265_v33, 0.0 }
 0x3b2   :  { %v4069_v19 = vsel %vm3109_vm12, %v2263_v60, %v3589_v30  ;;  %v2269_v14 = vadd.f32 %v2268_v46, %v13005_v38  ;;  %v2270_v56 = vpop.f32.mrb[43].mxu0  ;;  %10834 = vmatmul.mubr.msk.f32.gmra.mrb[148].mxu0 %vm587_vm0, %v14721_v37  ;;  %v5052_v50 = vadd.f32 %v13042_v3, %v4560_v24  ;;  %v12177_v46 = vld [vmem:[%s17728_s5 + $0xd8] sm:$0xff]  }
 0x3b3   :  { %v2271_v2 = vadd.f32 %v2270_v56, %v13009_v39  ;;  %2590 = vmatprep.mubr.f32.mxu0 %v17886_v36  ;;  %v5383_v23 = vmax.f32 %v5047_v13, %v5051_v0  ;;  %v4561_v60 = vmul.f32 %v13019_v49, %v4069_v19  ;;  %v4070_v42 = vsel %vm3110_vm13, %v2265_v33, %v3590_v47  ;;  %v12178_v0 = vld [vmem:[%s17728_s5 + $0x98] sm:$0xff]  }
 0x3b4   :  { %vm3111_vm14 = vcmp.ge.f32.partialorder %v2269_v14, 0.0  ;;  %v3591_v32 = vmul.f32 0.01, %v2269_v14  ;;  %v5384_v6 = vmax.f32 %v5048_v51, %v5052_v50  ;;  %11285 = vmatprep.subr.bf16.mxu0 %v12177_v46  ;;  %v4562_v47 = vmul.f32 %v13029_v55, %v4070_v42 }
 0x3b5   :  { %v3592_v37 = vmul.f32 0.01, %v2271_v2  ;;  %v2274_v8 = vpop.f32.mrb[44].mxu0  ;;  %v14773_v24 = vpack.c.bf16 %v5383_v23, %v5381_v28  ;;  %vm3112_vm15 = vcmp.ge.f32.partialorder %v2271_v2, 0.0  ;;  %v520_v28 = vpop.trf.xlu0  ;;  %11286 = vmatpush3.bf16.msra.mxu0 %v12178_v0 }
 0x3b6   :  { %v2275_v30 = vadd.f32 %v2274_v8, %v13005_v38  ;;  %v2276_v51 = vpop.f32.mrb[45].mxu0  ;;  %10835 = vmatmul.mubr.msk.f32.gmra.mrb[150].mxu0 %vm587_vm0, %v518_v53  ;;  %v14780_v13 = vpack.c.bf16 %v5384_v6, %v5382_v20  ;;  %v4071_v19 = vsel %vm3111_vm14, %v2269_v14, %v3591_v32  ;;  %v12179_v53 = vld [vmem:[%s17728_s5 + $0xe0] sm:$0xff]   ;;  %v14791_v20 = vadd.f32 %v13037_v63, %v4561_v60  ;;  %v14801_v60 = vpop.trf.xlu1 }
 0x3b7   :  { %17942 = vst [vmem:[#allocation86_spill] sm:$0xff] %v14773_v24  ;;  %v2277_v33 = vadd.f32 %v2276_v51, %v13009_v39  ;;  %2596 = vmatprep.mubr.f32.mxu0 %v17886_v36  ;;  %v4072_v14 = vsel %vm3112_vm15, %v2271_v2, %v3592_v37  ;;  %v12180_v32 = vld [vmem:[%s17728_s5 + $0xa0] sm:$0xff]   ;;  %v4563_v6 = vmul.f32 %v13019_v49, %v4071_v19 }
 0x3b8   :  { %17943 = vst [vmem:[#allocation87_spill] sm:$0xff] %v14780_v13  ;;  %vm3113_vm1 = vcmp.ge.f32.partialorder %v2275_v30, 0.0  ;;  %v3593_v56 = vmul.f32 0.01, %v2275_v30  ;;  %6102 = vmatprep.mubr.bf16.mxu1 %v14780_v13  ;;  %11287 = vmatprep.subr.bf16.mxu0 %v12179_v53  ;;  %v4564_v51 = vmul.f32 %v13029_v55, %v4072_v14  ;;  %v5054_v14 = vadd.f32 %v13042_v3, %v4562_v47 }
 0x3b9   :  { %vm3114_vm2 = vcmp.ge.f32.partialorder %v2277_v33, 0.0  ;;  %v3594_v50 = vmul.f32 0.01, %v2277_v33  ;;  %v2280_v23 = vpop.f32.mrb[46].mxu0  ;;  %6103 = vmatmul.mubr.bf16.gmra.mrb[36].mxu1 %v14773_v24  ;;  %11288 = vmatpush3.bf16.msra.mxu0 %v12180_v32 }
 0x3ba   :  { %v4073_v46 = vsel %vm3113_vm1, %v2275_v30, %v3593_v56  ;;  %v2281_v42 = vadd.f32 %v2280_v23, %v13005_v38  ;;  %v2282_v8 = vpop.f32.mrb[47].mxu0  ;;  %10836 = vmatmul.mubr.msk.f32.gmra.mrb[152].mxu0 %vm587_vm0, %v519_v27  ;;  %v12181_v27 = vld [vmem:[%s17728_s5 + $0xe8] sm:$0xff]  }
 0x3bb   :  { %v4565_v2 = vmul.f32 %v13019_v49, %v4073_v46  ;;  %v4074_v37 = vsel %vm3114_vm2, %v2277_v33, %v3594_v50  ;;  %v2283_v0 = vadd.f32 %v2282_v8, %v13009_v39  ;;  %2602 = vmatprep.mubr.f32.mxu0 %v17886_v36  ;;  %v521_v50 = vpop.trf.xlu0  ;;  %v12182_v23 = vld [vmem:[%s17728_s5 + $0xa8] sm:$0xff]   ;;  %11289 = vmatprep.subr.bf16.mxu0 %v12181_v27 }
 0x3bc   :  { %v4566_v30 = vmul.f32 %v13029_v55, %v4074_v37  ;;  %vm3115_vm3 = vcmp.ge.f32.partialorder %v2281_v42, 0.0  ;;  %v3595_v19 = vmul.f32 0.01, %v2281_v42 }
 0x3bd   :  { %v5057_v56 = vadd.f32 %v13037_v63, %v4565_v2  ;;  %vm3116_vm4 = vcmp.ge.f32.partialorder %v2283_v0, 0.0  ;;  %v3596_v53 = vmul.f32 0.01, %v2283_v0  ;;  %v2286_v33 = vpop.f32.mrb[48].mxu0  ;;  %11290 = vmatpush3.bf16.msra.mxu0 %v12182_v23  ;;  %v5056_v23 = vadd.f32 %v13042_v3, %v4564_v51 }
 0x3be   :  { %v4075_v32 = vsel %vm3115_vm3, %v2281_v42, %v3595_v19  ;;  %v2287_v46 = vadd.f32 %v2286_v33, %v13005_v38  ;;  %v2288_v8 = vpop.f32.mrb[49].mxu0  ;;  %10837 = vmatmul.mubr.msk.f32.gmra.mrb[154].mxu0 %vm587_vm0, %v520_v28  ;;  %v5058_v37 = vadd.f32 %v13042_v3, %v4566_v30  ;;  %v14824_v19 = vpop.trf.xlu1  ;;  %v12183_v28 = vld [vmem:[%s17728_s5 + $0xf0] sm:$0xff]  }
 0x3bf   :  { %v5385_v2 = vmax.f32 %v14791_v20, %v5057_v56  ;;  %v4567_v24 = vmul.f32 %v13019_v49, %v4075_v32  ;;  %v4076_v13 = vsel %vm3116_vm4, %v2283_v0, %v3596_v53  ;;  %v2289_v45 = vadd.f32 %v2288_v8, %v13009_v39  ;;  %2608 = vmatprep.mubr.f32.mxu0 %v17886_v36  ;;  %v522_v8 = vpop.trf.xlu0 }
 0x3c0   :  { %v4568_v47 = vmul.f32 %v13029_v55, %v4076_v13  ;;  %vm3117_vm5 = vcmp.ge.f32.partialorder %v2287_v46, 0.0  ;;  %v3597_v42 = vmul.f32 0.01, %v2287_v46  ;;  %v5386_v30 = vmax.f32 %v5054_v14, %v5058_v37  ;;  %v12184_v13 = vld [vmem:[%s17728_s5 + $0xb0] sm:$0xff]   ;;  %11291 = vmatprep.subr.bf16.mxu0 %v12183_v28 }
 0x3c1   :  { %v5055_v20 = vadd.f32 %v13037_v63, %v4563_v6  ;;  %v5059_v0 = vadd.f32 %v13037_v63, %v4567_v24  ;;  %v3598_v27 = vmul.f32 0.01, %v2289_v45  ;;  %v2292_v56 = vpop.f32.mrb[50].mxu0  ;;  %vm3118_vm6 = vcmp.ge.f32.partialorder %v2289_v45, 0.0  ;;  %11292 = vmatpush3.bf16.msra.mxu0 %v12184_v13 }
 0x3c2   :  { %v2293_v53 = vadd.f32 %v2292_v56, %v13005_v38  ;;  %v2294_v33 = vpop.f32.mrb[51].mxu0  ;;  %10838 = vmatmul.mubr.msk.f32.gmra.mrb[156].mxu0 %vm587_vm0, %v521_v50  ;;  %v5060_v14 = vadd.f32 %v13042_v3, %v4568_v47  ;;  %v4077_v24 = vsel %vm3117_vm5, %v2287_v46, %v3597_v42  ;;  %v12185_v56 = vld [vmem:[%s17728_s5 + $0xf8] sm:$0xff]  }
 0x3c3   :  { %v5387_v6 = vmax.f32 %v5055_v20, %v5059_v0  ;;  %v2295_v32 = vadd.f32 %v2294_v33, %v13009_v39  ;;  %2614 = vmatprep.mubr.f32.mxu0 %v17886_v36  ;;  %v4078_v51 = vsel %vm3118_vm6, %v2289_v45, %v3598_v27  ;;  %v12186_v46 = vld [vmem:[%s17728_s5 + $0xb8] sm:$0xff]   ;;  %v4569_v42 = vmul.f32 %v13019_v49, %v4077_v24  ;;  %v14853_v33 = vpop.trf.xlu1 }
 0x3c4   :  { %v3599_v37 = vmul.f32 0.01, %v2293_v53  ;;  %v5388_v50 = vmax.f32 %v5056_v23, %v5060_v14  ;;  %vm3119_vm7 = vcmp.ge.f32.partialorder %v2293_v53, 0.0  ;;  %11293 = vmatprep.subr.bf16.mxu0 %v12185_v56  ;;  %v4570_v27 = vmul.f32 %v13029_v55, %v4078_v51 }
 0x3c5   :  { %v14844_v28 = vpack.c.bf16 %v5387_v6, %v5385_v2  ;;  %v2298_v47 = vpop.f32.mrb[52].mxu0  ;;  %v3600_v20 = vmul.f32 0.01, %v2295_v32  ;;  %vm3120_vm8 = vcmp.ge.f32.partialorder %v2295_v32, 0.0  ;;  %11294 = vmatpush3.bf16.msra.mxu0 %v12186_v46 }
 0x3c6   :  { %v2299_v0 = vadd.f32 %v2298_v47, %v13005_v38  ;;  %v2300_v13 = vpop.f32.mrb[53].mxu0  ;;  %10839 = vmatmul.mubr.msk.f32.gmra.mrb[158].mxu0 %vm587_vm0, %v522_v8  ;;  %v14855_v2 = vpack.c.bf16 %v5388_v50, %v5386_v30  ;;  %v4079_v23 = vsel %vm3119_vm7, %v2293_v53, %v3599_v37  ;;  %v5061_v50 = vadd.f32 %v13037_v63, %v4569_v42 }
 0x3c7   :  { %17944 = vst [vmem:[#allocation88_spill] sm:$0xff] %v14844_v28  ;;  %v2301_v45 = vadd.f32 %v2300_v13, %v13009_v39  ;;  %2620 = vmatprep.mubr.f32.mxu0 %v17886_v36  ;;  %v4080_v8 = vsel %vm3120_vm8, %v2295_v32, %v3600_v20  ;;  %v4571_v13 = vmul.f32 %v13019_v49, %v4079_v23 }
 0x3c8   :  { %17945 = vst [vmem:[#allocation89_spill] sm:$0xff] %v14855_v2  ;;  %vm3121_vm9 = vcmp.ge.f32.partialorder %v2299_v0, 0.0  ;;  %v3601_v14 = vmul.f32 0.01, %v2299_v0  ;;  %v4572_v42 = vmul.f32 %v13029_v55, %v4080_v8 }
 0x3c9   :  { %vm3122_vm10 = vcmp.ge.f32.partialorder %v2301_v45, 0.0  ;;  %v3602_v6 = vmul.f32 0.01, %v2301_v45  ;;  %v2304_v24 = vpop.f32.mrb[54].mxu0 }
 0x3ca   :  { %v4081_v47 = vsel %vm3121_vm9, %v2299_v0, %v3601_v14  ;;  %v2305_v56 = vadd.f32 %v2304_v24, %v13005_v38  ;;  %v2306_v30 = vpop.f32.mrb[55].mxu0  ;;  %10840 = vmatmul.mubr.msk.f32.gmra.mrb[160].mxu0 %vm587_vm0, %v14733_v25  ;;  %v14869_v0 = vpop.trf.xlu1  ;;  %v5062_v25 = vadd.f32 %v13042_v3, %v4570_v27 }
 0x3cb   :  { %v4573_v53 = vmul.f32 %v13019_v49, %v4081_v47  ;;  %v4082_v37 = vsel %vm3122_vm10, %v2301_v45, %v3602_v6  ;;  %v2307_v51 = vadd.f32 %v2306_v30, %v13009_v39  ;;  %2626 = vmatprep.mubr.f32.mxu0 %v17886_v36 }
 0x3cc   :  { %v4574_v32 = vmul.f32 %v13029_v55, %v4082_v37  ;;  %vm3123_vm11 = vcmp.ge.f32.partialorder %v2305_v56, 0.0  ;;  %v3603_v46 = vmul.f32 0.01, %v2305_v56  ;;  %v11431_v20 = vpop.f32.mrb[24].mxu1 }
 0x3cd   :  { %vm3124_vm12 = vcmp.ge.f32.partialorder %v2307_v51, 0.0  ;;  %v3604_v23 = vmul.f32 0.01, %v2307_v51  ;;  %v2310_v14 = vpop.f32.mrb[56].mxu0  ;;  %v11432_v24 = vpop.f32.mrb[25].mxu1  ;;  %v5065_v45 = vadd.f32 %v13037_v63, %v4573_v53 }
 0x3ce   :  { %v4083_v6 = vsel %vm3123_vm11, %v2305_v56, %v3603_v46  ;;  %v2311_v47 = vadd.f32 %v2310_v14, %v13005_v38  ;;  %v14875_v30 = vadd.f32 %v11432_v24, %v11431_v20  ;;  %v2312_v37 = vpop.f32.mrb[57].mxu0  ;;  %10841 = vmatmul.mubr.msk.f32.gmra.mrb[162].mxu0 %vm587_vm0, %v14752_v35  ;;  %v11434_v40 = vpop.f32.mrb[26].mxu1  ;;  %v5066_v27 = vadd.f32 %v13042_v3, %v4574_v32 }
 0x3cf   :  { %v4575_v8 = vmul.f32 %v13019_v49, %v4083_v6  ;;  %v4084_v43 = vsel %vm3124_vm12, %v2307_v51, %v3604_v23  ;;  %v2313_v29 = vadd.f32 %v2312_v37, %v13009_v39  ;;  %v11435_v61 = vpop.f32.mrb[27].mxu1  ;;  %2632 = vmatprep.mubr.f32.mxu0 %v17886_v36  ;;  %v5389_v56 = vmax.f32 %v5061_v50, %v5065_v45 }
 0x3d0   :  { %17946 = vst [vmem:[#allocation90_spill] sm:$0xff] %v14875_v30  ;;  %v4576_v53 = vmul.f32 %v13029_v55, %v4084_v43  ;;  %vm3125_vm13 = vcmp.ge.f32.partialorder %v2311_v47, 0.0  ;;  %v3605_v46 = vmul.f32 0.01, %v2311_v47  ;;  %v14884_v20 = vadd.f32 %v11435_v61, %v11434_v40  ;;  %v14895_v40 = vpop.trf.xlu1 }
 0x3d1   :  { %v2316_v14 = vpop.f32.mrb[58].mxu0  ;;  %v5064_v35 = vadd.f32 %v13042_v3, %v4572_v42  ;;  %v5390_v24 = vmax.f32 %v5062_v25, %v5066_v27  ;;  %v5063_v32 = vadd.f32 %v13037_v63, %v4571_v13  ;;  %v5067_v51 = vadd.f32 %v13037_v63, %v4575_v8  ;;  %v12187_v13 = vld [vmem:[%s17728_s5 + $0x140] sm:$0xff]  }
 0x3d2   :  { %17947 = vst [vmem:[#allocation91_spill] sm:$0xff] %v14884_v20  ;;  %v4085_v23 = vsel %vm3125_vm13, %v2311_v47, %v3605_v46  ;;  %v3606_v6 = vmul.f32 0.01, %v2313_v29  ;;  %v2317_v37 = vadd.f32 %v2316_v14, %v13005_v38  ;;  %v2318_v30 = vpop.f32.mrb[59].mxu0  ;;  %10842 = vmatmul.mubr.msk.f32.gmra.mrb[164].mxu0 %vm587_vm0, %v14767_v16  ;;  %v5068_v43 = vadd.f32 %v13042_v3, %v4576_v53 }
 0x3d3   :  { %vm3126_vm14 = vcmp.ge.f32.partialorder %v2313_v29, 0.0  ;;  %v2319_v61 = vadd.f32 %v2318_v30, %v13009_v39  ;;  %2638 = vmatprep.mubr.f32.mxu0 %v17886_v36  ;;  %v5391_v50 = vmax.f32 %v5063_v32, %v5067_v51  ;;  %v4577_v42 = vmul.f32 %v13019_v49, %v4085_v23  ;;  %11479 = vmatprep.subr.bf16.mxu1 %v12187_v13 }
 0x3d4   :  { %v5392_v25 = vmax.f32 %v5064_v35, %v5068_v43  ;;  %v3607_v45 = vmul.f32 0.01, %v2317_v37  ;;  %v4086_v27 = vsel %vm3126_vm14, %v2313_v29, %v3606_v6  ;;  %vm3127_vm15 = vcmp.ge.f32.partialorder %v2317_v37, 0.0 }
 0x3d5   :  { %v2322_v47 = vpop.f32.mrb[60].mxu0  ;;  %v14901_v16 = vpack.c.bf16 %v5391_v50, %v5389_v56  ;;  %v3608_v46 = vmul.f32 0.01, %v2319_v61  ;;  %v12188_v56 = vld [vmem:[%s17728_s5 + $0x100] sm:$0xff]   ;;  %vm3128_vm1 = vcmp.ge.f32.partialorder %v2319_v61, 0.0  ;;  %v4578_v35 = vmul.f32 %v13029_v55, %v4086_v27 }
 0x3d6   :  { %v2323_v30 = vadd.f32 %v2322_v47, %v13005_v38  ;;  %v2324_v8 = vpop.f32.mrb[61].mxu0  ;;  %10843 = vmatmul.mubr.msk.f32.gmra.mrb[166].mxu0 %vm587_vm0, %v14801_v60  ;;  %v14906_v53 = vpack.c.bf16 %v5392_v25, %v5390_v24  ;;  %v4087_v32 = vsel %vm3127_vm15, %v2317_v37, %v3607_v45  ;;  %v14914_v24 = vpop.trf.xlu1  ;;  %11480 = vmatpush3.bf16.msra.mxu1 %v12188_v56 }
 0x3d7   :  { %17948 = vst [vmem:[#allocation92_spill] sm:$0xff] %v14901_v16  ;;  %v2325_v14 = vadd.f32 %v2324_v8, %v13009_v39  ;;  %2644 = vmatprep.mubr.f32.mxu0 %v17886_v36  ;;  %v5069_v50 = vadd.f32 %v13037_v63, %v4577_v42  ;;  %v4088_v13 = vsel %vm3128_vm1, %v2319_v61, %v3608_v46 }
 0x3d8   :  { %17949 = vst [vmem:[#allocation93_spill] sm:$0xff] %v14906_v53  ;;  %vm3129_vm2 = vcmp.ge.f32.partialorder %v2323_v30, 0.0  ;;  %v3609_v29 = vmul.f32 0.01, %v2323_v30  ;;  %v4579_v45 = vmul.f32 %v13019_v49, %v4087_v32  ;;  %v4580_v42 = vmul.f32 %v13029_v55, %v4088_v13 }
 0x3d9   :  { %vm3130_vm3 = vcmp.ge.f32.partialorder %v2325_v14, 0.0  ;;  %v3610_v60 = vmul.f32 0.01, %v2325_v14  ;;  %v2328_v51 = vpop.f32.mrb[62].mxu0 }
 0x3da   :  { %v4089_v23 = vsel %vm3129_vm2, %v2323_v30, %v3609_v29  ;;  %v2329_v6 = vadd.f32 %v2328_v51, %v13005_v38  ;;  %v2330_v43 = vpop.f32.mrb[63].mxu0  ;;  %10844 = vmatmul.mubr.msk.f32.gmra.mrb[168].mxu0 %vm587_vm0, %v14824_v19  ;;  %v5070_v19 = vadd.f32 %v13042_v3, %v4578_v35  ;;  %v14935_v35 = vpop.trf.xlu1 }
 0x3db   :  { %v4581_v25 = vmul.f32 %v13019_v49, %v4089_v23  ;;  %v4090_v47 = vsel %vm3130_vm3, %v2325_v14, %v3610_v60  ;;  %v2331_v37 = vadd.f32 %v2330_v43, %v13009_v39  ;;  %2650 = vmatprep.mubr.f32.mxu0 %v17886_v36 }
 0x3dc   :  { %v4582_v27 = vmul.f32 %v13029_v55, %v4090_v47  ;;  %vm3131_vm4 = vcmp.ge.f32.partialorder %v2329_v6, 0.0  ;;  %v3611_v30 = vmul.f32 0.01, %v2329_v6 }
 0x3dd   :  { %vm3132_vm5 = vcmp.ge.f32.partialorder %v2331_v37, 0.0  ;;  %v3612_v8 = vmul.f32 0.01, %v2331_v37  ;;  %v2334_v56 = vpop.f32.mrb[64].mxu0  ;;  %v5073_v61 = vadd.f32 %v13037_v63, %v4581_v25 }
 0x3de   :  { %v4091_v46 = vsel %vm3131_vm4, %v2329_v6, %v3611_v30  ;;  %v2335_v14 = vadd.f32 %v2334_v56, %v13005_v38  ;;  %v2336_v29 = vpop.f32.mrb[65].mxu0  ;;  %10845 = vmatmul.mubr.msk.f32.gmra.mrb[170].mxu0 %vm587_vm0, %v14853_v33  ;;  %v5074_v32 = vadd.f32 %v13042_v3, %v4582_v27  ;;  %v5071_v27 = vadd.f32 %v13037_v63, %v4579_v45  ;;  %v12189_v45 = vld [vmem:[%s17728_s5 + $0x148] sm:$0xff]  }
 0x3df   :  { %v4583_v60 = vmul.f32 %v13019_v49, %v4091_v46  ;;  %v4092_v51 = vsel %vm3132_vm5, %v2331_v37, %v3612_v8  ;;  %v2337_v23 = vadd.f32 %v2336_v29, %v13009_v39  ;;  %2656 = vmatprep.mubr.f32.mxu0 %v17886_v36  ;;  %v5393_v43 = vmax.f32 %v5069_v50, %v5073_v61 }
 0x3e0   :  { %v4584_v6 = vmul.f32 %v13029_v55, %v4092_v51  ;;  %vm3133_vm6 = vcmp.ge.f32.partialorder %v2335_v14, 0.0  ;;  %v3613_v13 = vmul.f32 0.01, %v2335_v14  ;;  %v5394_v25 = vmax.f32 %v5070_v19, %v5074_v32  ;;  %v12190_v32 = vld [vmem:[%s17728_s5 + $0x108] sm:$0xff]   ;;  %11481 = vmatprep.subr.bf16.mxu1 %v12189_v45 }
 0x3e1   :  { %vm3134_vm7 = vcmp.ge.f32.partialorder %v2337_v23, 0.0  ;;  %v3614_v47 = vmul.f32 0.01, %v2337_v23  ;;  %v2340_v33 = vpop.f32.mrb[66].mxu0  ;;  %v5075_v30 = vadd.f32 %v13037_v63, %v4583_v60  ;;  %v5072_v50 = vadd.f32 %v13042_v3, %v4580_v42  ;;  %v14953_v42 = vpop.trf.xlu1  ;;  %11482 = vmatpush3.bf16.msra.mxu1 %v12190_v32 }
 0x3e2   :  { %v2341_v37 = vadd.f32 %v2340_v33, %v13005_v38  ;;  %v2342_v8 = vpop.f32.mrb[67].mxu0  ;;  %10846 = vmatmul.mubr.msk.f32.gmra.mrb[172].mxu0 %vm587_vm0, %v14869_v0  ;;  %v5076_v56 = vadd.f32 %v13042_v3, %v4584_v6  ;;  %v4093_v61 = vsel %vm3133_vm6, %v2335_v14, %v3613_v13 }
 0x3e3   :  { %v2343_v19 = vadd.f32 %v2342_v8, %v13009_v39  ;;  %2662 = vmatprep.mubr.f32.mxu0 %v17886_v36  ;;  %v5395_v46 = vmax.f32 %v5071_v27, %v5075_v30  ;;  %v4094_v29 = vsel %vm3134_vm7, %v2337_v23, %v3614_v47  ;;  %v4585_v14 = vmul.f32 %v13019_v49, %v4093_v61  ;;  %v14964_v30 = vpop.trf.xlu0 }
 0x3e4   :  { %v5396_v0 = vmax.f32 %v5072_v50, %v5076_v56  ;;  %v3615_v6 = vmul.f32 0.01, %v2341_v37  ;;  %v4586_v47 = vmul.f32 %v13029_v55, %v4094_v29  ;;  %vm3135_vm8 = vcmp.ge.f32.partialorder %v2341_v37, 0.0 }
 0x3e5   :  { %v2346_v60 = vpop.f32.mrb[68].mxu0  ;;  %v14955_v51 = vpack.c.bf16 %v5395_v46, %v5393_v43  ;;  %v3616_v33 = vmul.f32 0.01, %v2343_v19  ;;  %vm3136_vm9 = vcmp.ge.f32.partialorder %v2343_v19, 0.0  ;;  %v5077_v45 = vadd.f32 %v13037_v63, %v4585_v14 }
 0x3e6   :  { %v2347_v13 = vadd.f32 %v2346_v60, %v13005_v38  ;;  %v2348_v23 = vpop.f32.mrb[69].mxu0  ;;  %10847 = vmatmul.mubr.msk.f32.gmra.mrb[174].mxu0 %vm587_vm0, %v14895_v40  ;;  %v14966_v8 = vpack.c.bf16 %v5396_v0, %v5394_v25  ;;  %v4095_v56 = vsel %vm3135_vm8, %v2341_v37, %v3615_v6  ;;  %v550_v0 = vpop.trf.xlu1 }
 0x3e7   :  { %17950 = vst [vmem:[#allocation94_spill] sm:$0xff] %v14955_v51  ;;  %v2349_v27 = vadd.f32 %v2348_v23, %v13009_v39  ;;  %2668 = vmatprep.mubr.f32.mxu0 %v17886_v36  ;;  %v4096_v32 = vsel %vm3136_vm9, %v2343_v19, %v3616_v33 }
 0x3e8   :  { %vm3137_vm10 = vcmp.ge.f32.partialorder %v2347_v13, 0.0  ;;  %v3617_v43 = vmul.f32 0.01, %v2347_v13  ;;  %17951 = vst [vmem:[#allocation95_spill] sm:$0xff] %v14966_v8  ;;  %v4588_v33 = vmul.f32 %v13029_v55, %v4096_v32 }
 0x3e9   :  { %vm3138_vm11 = vcmp.ge.f32.partialorder %v2349_v27, 0.0  ;;  %v3618_v50 = vmul.f32 0.01, %v2349_v27  ;;  %v2352_v40 = vpop.f32.mrb[70].mxu0 }
 0x3ea   :  { %v4097_v61 = vsel %vm3137_vm10, %v2347_v13, %v3617_v43  ;;  %v2353_v46 = vadd.f32 %v2352_v40, %v13005_v38  ;;  %v2354_v29 = vpop.f32.mrb[71].mxu0  ;;  %10848 = vmatmul.mubr.msk.f32.gmra.mrb[176].mxu0 %vm587_vm0, %v14914_v24  ;;  %v5078_v13 = vadd.f32 %v13042_v3, %v4586_v47  ;;  %v4587_v43 = vmul.f32 %v13019_v49, %v4095_v56  ;;  %v551_v51 = vpop.trf.xlu1 }
 0x3eb   :  { %v4589_v60 = vmul.f32 %v13019_v49, %v4097_v61  ;;  %v4098_v23 = vsel %vm3138_vm11, %v2349_v27, %v3618_v50  ;;  %v2355_v25 = vadd.f32 %v2354_v29, %v13009_v39  ;;  %2674 = vmatprep.mubr.f32.mxu0 %v17886_v36  ;;  %v14984_v29 = vpop.trf.xlu0 }
 0x3ec   :  { %v4590_v37 = vmul.f32 %v13029_v55, %v4098_v23  ;;  %vm3139_vm12 = vcmp.ge.f32.partialorder %v2353_v46, 0.0  ;;  %v3619_v6 = vmul.f32 0.01, %v2353_v46 }
 0x3ed   :  { %vm3140_vm13 = vcmp.ge.f32.partialorder %v2355_v25, 0.0  ;;  %v3620_v24 = vmul.f32 0.01, %v2355_v25  ;;  %v2358_v14 = vpop.f32.mrb[72].mxu0  ;;  %v5081_v19 = vadd.f32 %v13037_v63, %v4589_v60 }
 0x3ee   :  { %v4099_v27 = vsel %vm3139_vm12, %v2353_v46, %v3619_v6  ;;  %v2359_v50 = vadd.f32 %v2358_v14, %v13005_v38  ;;  %v2360_v40 = vpop.f32.mrb[73].mxu0  ;;  %10849 = vmatmul.mubr.msk.f32.gmra.mrb[178].mxu0 %vm587_vm0, %v14935_v35  ;;  %v5082_v61 = vadd.f32 %v13042_v3, %v4590_v37  ;;  %v12191_v35 = vld [vmem:[%s17728_s5 + $0x150] sm:$0xff]  }
 0x3ef   :  { %v4591_v47 = vmul.f32 %v13019_v49, %v4099_v27  ;;  %v4100_v56 = vsel %vm3140_vm13, %v2355_v25, %v3620_v24  ;;  %v2361_v23 = vadd.f32 %v2360_v40, %v13009_v39  ;;  %2680 = vmatprep.mubr.f32.mxu0 %v17886_v36  ;;  %v5397_v60 = vmax.f32 %v5077_v45, %v5081_v19 }
 0x3f0   :  { %v4592_v46 = vmul.f32 %v13029_v55, %v4100_v56  ;;  %vm3141_vm14 = vcmp.ge.f32.partialorder %v2359_v50, 0.0  ;;  %v3621_v32 = vmul.f32 0.01, %v2359_v50  ;;  %v5398_v6 = vmax.f32 %v5078_v13, %v5082_v61  ;;  %11483 = vmatprep.subr.bf16.mxu1 %v12191_v35  ;;  %v15003_v56 = vpop.trf.xlu0 }
 0x3f1   :  { %v3622_v37 = vmul.f32 0.01, %v2361_v23  ;;  %v2364_v14 = vpop.f32.mrb[74].mxu0  ;;  %v5079_v27 = vadd.f32 %v13037_v63, %v4587_v43  ;;  %v5083_v25 = vadd.f32 %v13037_v63, %v4591_v47  ;;  %vm3142_vm15 = vcmp.ge.f32.partialorder %v2361_v23, 0.0 }
 0x3f2   :  { %v2365_v24 = vadd.f32 %v2364_v14, %v13005_v38  ;;  %v2366_v45 = vpop.f32.mrb[75].mxu0  ;;  %10850 = vmatmul.mubr.msk.f32.gmra.mrb[180].mxu0 %vm587_vm0, %v14953_v42  ;;  %v5080_v13 = vadd.f32 %v13042_v3, %v4588_v33  ;;  %v5084_v19 = vadd.f32 %v13042_v3, %v4592_v46  ;;  %v4101_v40 = vsel %vm3141_vm14, %v2359_v50, %v3621_v32  ;;  %v12192_v42 = vld [vmem:[%s17728_s5 + $0x110] sm:$0xff]  }
 0x3f3   :  { %v2367_v61 = vadd.f32 %v2366_v45, %v13009_v39  ;;  %2686 = vmatprep.mubr.f32.mxu0 %v17886_v36  ;;  %v5399_v43 = vmax.f32 %v5079_v27, %v5083_v25  ;;  %v4102_v14 = vsel %vm3142_vm15, %v2361_v23, %v3622_v37  ;;  %v4593_v33 = vmul.f32 %v13019_v49, %v4101_v40 }
 0x3f4   :  { %v5400_v47 = vmax.f32 %v5080_v13, %v5084_v19  ;;  %v3623_v46 = vmul.f32 0.01, %v2365_v24  ;;  %vm3143_vm1 = vcmp.ge.f32.partialorder %v2365_v24, 0.0  ;;  %11484 = vmatpush3.bf16.msra.mxu1 %v12192_v42  ;;  %v4594_v37 = vmul.f32 %v13029_v55, %v4102_v14 }
 0x3f5   :  { %v2370_v8 = vpop.f32.mrb[76].mxu0  ;;  %v15005_v20 = vpack.c.bf16 %v5399_v43, %v5397_v60  ;;  %v3624_v27 = vmul.f32 0.01, %v2367_v61  ;;  %v552_v60 = vpop.trf.xlu1  ;;  %vm3144_vm2 = vcmp.ge.f32.partialorder %v2367_v61, 0.0 }
 0x3f6   :  { %v2371_v50 = vadd.f32 %v2370_v8, %v13005_v38  ;;  %v2372_v32 = vpop.f32.mrb[77].mxu0  ;;  %10851 = vmatmul.mubr.msk.f32.gmra.mrb[182].mxu0 %vm587_vm0, %v550_v0  ;;  %v15013_v35 = vpack.c.bf16 %v5400_v47, %v5398_v6  ;;  %v5085_v6 = vadd.f32 %v13037_v63, %v4593_v33  ;;  %v4103_v45 = vsel %vm3143_vm1, %v2365_v24, %v3623_v46  ;;  %v15024_v43 = vpop.trf.xlu0 }
 0x3f7   :  { %17952 = vst [vmem:[#allocation96_spill] sm:$0xff] %v15005_v20  ;;  %v2373_v23 = vadd.f32 %v2372_v32, %v13009_v39  ;;  %2692 = vmatprep.mubr.f32.mxu0 %v17886_v36  ;;  %v4104_v47 = vsel %vm3144_vm2, %v2367_v61, %v3624_v27  ;;  %v5086_v46 = vadd.f32 %v13042_v3, %v4594_v37 }
 0x3f8   :  { %17953 = vst [vmem:[#allocation97_spill] sm:$0xff] %v15013_v35  ;;  %vm3145_vm3 = vcmp.ge.f32.partialorder %v2371_v50, 0.0  ;;  %v3625_v25 = vmul.f32 0.01, %v2371_v50  ;;  %6110 = vmatprep.mubr.bf16.mxu1 %v15013_v35 }
 0x3f9   :  { %vm3146_vm4 = vcmp.ge.f32.partialorder %v2373_v23, 0.0  ;;  %v3626_v8 = vmul.f32 0.01, %v2373_v23  ;;  %v2376_v0 = vpop.f32.mrb[78].mxu0  ;;  %6111 = vmatmul.mubr.bf16.gmra.mrb[40].mxu1 %v15005_v20  ;;  %v553_v27 = vpop.trf.xlu1 }
 0x3fa   :  { %v4105_v13 = vsel %vm3145_vm3, %v2371_v50, %v3625_v25  ;;  %v2377_v19 = vadd.f32 %v2376_v0, %v13005_v38  ;;  %v2378_v40 = vpop.f32.mrb[79].mxu0  ;;  %10852 = vmatmul.mubr.msk.f32.gmra.mrb[184].mxu0 %vm587_vm0, %v551_v51  ;;  %v4595_v50 = vmul.f32 %v13019_v49, %v4103_v45 }
 0x3fb   :  { %v4597_v14 = vmul.f32 %v13019_v49, %v4105_v13  ;;  %v4106_v42 = vsel %vm3146_vm4, %v2373_v23, %v3626_v8  ;;  %v2379_v32 = vadd.f32 %v2378_v40, %v13009_v39  ;;  %2698 = vmatprep.mubr.f32.mxu0 %v17886_v36  ;;  %v4596_v23 = vmul.f32 %v13029_v55, %v4104_v47 }
 0x3fc   :  { %v4598_v33 = vmul.f32 %v13029_v55, %v4106_v42  ;;  %vm3147_vm5 = vcmp.ge.f32.partialorder %v2377_v19, 0.0  ;;  %v3627_v24 = vmul.f32 0.01, %v2377_v19 }
 0x3fd   :  { %v5089_v51 = vadd.f32 %v13037_v63, %v4597_v14  ;;  %vm3148_vm6 = vcmp.ge.f32.partialorder %v2379_v32, 0.0  ;;  %v3628_v25 = vmul.f32 0.01, %v2379_v32  ;;  %v2382_v61 = vpop.f32.mrb[80].mxu0 }
 0x3fe   :  { %v4107_v8 = vsel %vm3147_vm5, %v2377_v19, %v3627_v24  ;;  %v2383_v0 = vadd.f32 %v2382_v61, %v13005_v38  ;;  %v2384_v13 = vpop.f32.mrb[81].mxu0  ;;  %10853 = vmatmul.mubr.msk.f32.gmra.mrb[186].mxu0 %vm587_vm0, %v552_v60  ;;  %v5090_v40 = vadd.f32 %v13042_v3, %v4598_v33  ;;  %v15041_v19 = vpop.trf.xlu0  ;;  %v5087_v61 = vadd.f32 %v13037_v63, %v4595_v50 }
 0x3ff   :  { %v5401_v42 = vmax.f32 %v5085_v6, %v5089_v51  ;;  %v4599_v37 = vmul.f32 %v13019_v49, %v4107_v8  ;;  %v4108_v45 = vsel %vm3148_vm6, %v2379_v32, %v3628_v25  ;;  %v2385_v14 = vadd.f32 %v2384_v13, %v13009_v39  ;;  %2704 = vmatprep.mubr.f32.mxu0 %v17886_v36 }
 0x400   :  { %v4600_v20 = vmul.f32 %v13029_v55, %v4108_v45  ;;  %vm3149_vm7 = vcmp.ge.f32.partialorder %v2383_v0, 0.0  ;;  %v3629_v47 = vmul.f32 0.01, %v2383_v0  ;;  %v5402_v24 = vmax.f32 %v5086_v46, %v5090_v40  ;;  %v554_v40 = vpop.trf.xlu1 }
 0x401   :  { %v5091_v60 = vadd.f32 %v13037_v63, %v4599_v37  ;;  %vm3150_vm8 = vcmp.ge.f32.partialorder %v2385_v14, 0.0  ;;  %v3630_v6 = vmul.f32 0.01, %v2385_v14  ;;  %v2388_v33 = vpop.f32.mrb[82].mxu0  ;;  %v5088_v25 = vadd.f32 %v13042_v3, %v4596_v23  ;;  %v12194_v23 = vld [vmem:[%s17728_s5 + $0x118] sm:$0xff]  }
 0x402   :  { %v2389_v32 = vadd.f32 %v2388_v33, %v13005_v38  ;;  %v2390_v51 = vpop.f32.mrb[83].mxu0  ;;  %10854 = vmatmul.mubr.msk.f32.gmra.mrb[188].mxu0 %vm587_vm0, %v553_v27  ;;  %v5092_v8 = vadd.f32 %v13042_v3, %v4600_v20  ;;  %v4109_v45 = vsel %vm3149_vm7, %v2383_v0, %v3629_v47  ;;  %v12193_v20 = vld [vmem:[%s17728_s5 + $0x158] sm:$0xff]  }
 0x403   :  { %v5403_v13 = vmax.f32 %v5087_v61, %v5091_v60  ;;  %v2391_v46 = vadd.f32 %v2390_v51, %v13009_v39  ;;  %2710 = vmatprep.mubr.f32.mxu0 %v17886_v36  ;;  %v4110_v50 = vsel %vm3150_vm8, %v2385_v14, %v3630_v6  ;;  %v4601_v0 = vmul.f32 %v13019_v49, %v4109_v45 }
 0x404   :  { %vm3151_vm9 = vcmp.ge.f32.partialorder %v2389_v32, 0.0  ;;  %v3631_v37 = vmul.f32 0.01, %v2389_v32  ;;  %v5404_v35 = vmax.f32 %v5088_v25, %v5092_v8  ;;  %v4602_v6 = vmul.f32 %v13029_v55, %v4110_v50  ;;  %11485 = vmatprep.subr.bf16.mxu1 %v12193_v20 }
 0x405   :  { %v15051_v16 = vpack.c.bf16 %v5403_v13, %v5401_v42  ;;  %vm3152_vm10 = vcmp.ge.f32.partialorder %v2391_v46, 0.0  ;;  %v3632_v33 = vmul.f32 0.01, %v2391_v46  ;;  %v2394_v27 = vpop.f32.mrb[84].mxu0  ;;  %v15062_v42 = vpop.trf.xlu0  ;;  %11486 = vmatpush3.bf16.msra.mxu1 %v12194_v23 }
 0x406   :  { %v4111_v47 = vsel %vm3151_vm9, %v2389_v32, %v3631_v37  ;;  %v2395_v14 = vadd.f32 %v2394_v27, %v13005_v38  ;;  %v2396_v61 = vpop.f32.mrb[85].mxu0  ;;  %10855 = vmatmul.mubr.msk.f32.gmra.mrb[190].mxu0 %vm587_vm0, %v554_v40  ;;  %v15064_v60 = vpack.c.bf16 %v5404_v35, %v5402_v24  ;;  %v5094_v20 = vadd.f32 %v13042_v3, %v4602_v6 }
 0x407   :  { %17954 = vst [vmem:[#allocation98_spill] sm:$0xff] %v15051_v16  ;;  %v4112_v51 = vsel %vm3152_vm10, %v2391_v46, %v3632_v33  ;;  %v2397_v25 = vadd.f32 %v2396_v61, %v13009_v39  ;;  %2716 = vmatprep.mubr.f32.mxu0 %v17886_v36  ;;  %v4603_v8 = vmul.f32 %v13019_v49, %v4111_v47 }
 0x408   :  { %17955 = vst [vmem:[#allocation99_spill] sm:$0xff] %v15064_v60  ;;  %vm3153_vm11 = vcmp.ge.f32.partialorder %v2395_v14, 0.0  ;;  %v3633_v32 = vmul.f32 0.01, %v2395_v14  ;;  %v4604_v13 = vmul.f32 %v13029_v55, %v4112_v51  ;;  %v5093_v46 = vadd.f32 %v13037_v63, %v4601_v0 }
 0x409   :  { %vm3154_vm12 = vcmp.ge.f32.partialorder %v2397_v25, 0.0  ;;  %v3634_v45 = vmul.f32 0.01, %v2397_v25  ;;  %v2400_v40 = vpop.f32.mrb[86].mxu0  ;;  %v15080_v61 = vpop.trf.xlu0  ;;  %v5095_v0 = vadd.f32 %v13037_v63, %v4603_v8 }
 0x40a   :  { %v4113_v35 = vsel %vm3153_vm11, %v2395_v14, %v3633_v32  ;;  %v2401_v24 = vadd.f32 %v2400_v40, %v13005_v38  ;;  %v2402_v50 = vpop.f32.mrb[87].mxu0  ;;  %10856 = vmatmul.mubr.msk.f32.gmra.mrb[192].mxu0 %vm587_vm0, %v14964_v30  ;;  %v12195_v30 = vld [vmem:[%s17728_s5 + $0x160] sm:$0xff]  }
 0x40b   :  { %v4605_v37 = vmul.f32 %v13019_v49, %v4113_v35  ;;  %v4114_v33 = vsel %vm3154_vm12, %v2397_v25, %v3634_v45  ;;  %v2403_v27 = vadd.f32 %v2402_v50, %v13009_v39  ;;  %2722 = vmatprep.mubr.f32.mxu0 %v17886_v36  ;;  %v5096_v45 = vadd.f32 %v13042_v3, %v4604_v13  ;;  %v12196_v13 = vld [vmem:[%s17728_s5 + $0x120] sm:$0xff]  }
 0x40c   :  { %v4606_v23 = vmul.f32 %v13029_v55, %v4114_v33  ;;  %vm3155_vm13 = vcmp.ge.f32.partialorder %v2401_v24, 0.0  ;;  %v3635_v47 = vmul.f32 0.01, %v2401_v24  ;;  %v11437_v14 = vpop.f32.mrb[28].mxu1  ;;  %11487 = vmatprep.subr.bf16.mxu1 %v12195_v30 }
 0x40d   :  { %vm3156_vm14 = vcmp.ge.f32.partialorder %v2403_v27, 0.0  ;;  %v3636_v51 = vmul.f32 0.01, %v2403_v27  ;;  %v2406_v25 = vpop.f32.mrb[88].mxu0  ;;  %v11438_v32 = vpop.f32.mrb[29].mxu1  ;;  %v5097_v6 = vadd.f32 %v13037_v63, %v4605_v37  ;;  %11488 = vmatpush3.bf16.msra.mxu1 %v12196_v13 }
 0x40e   :  { %v4115_v40 = vsel %vm3155_vm13, %v2401_v24, %v3635_v47  ;;  %v2407_v35 = vadd.f32 %v2406_v25, %v13005_v38  ;;  %v15089_v50 = vadd.f32 %v11438_v32, %v11437_v14  ;;  %v2408_v33 = vpop.f32.mrb[89].mxu0  ;;  %10857 = vmatmul.mubr.msk.f32.gmra.mrb[194].mxu0 %vm587_vm0, %v14984_v29  ;;  %v11440_v53 = vpop.f32.mrb[30].mxu1  ;;  %v5098_v24 = vadd.f32 %v13042_v3, %v4606_v23 }
 0x40f   :  { %v4607_v8 = vmul.f32 %v13019_v49, %v4115_v40  ;;  %v4116_v54 = vsel %vm3156_vm14, %v2403_v27, %v3636_v51  ;;  %v2409_v11 = vadd.f32 %v2408_v33, %v13009_v39  ;;  %v11441_v57 = vpop.f32.mrb[31].mxu1  ;;  %2728 = vmatprep.mubr.f32.mxu0 %v17886_v36  ;;  %v5405_v23 = vmax.f32 %v5093_v46, %v5097_v6 }
 0x410   :  { %v4608_v37 = vmul.f32 %v13029_v55, %v4116_v54  ;;  %vm3157_vm15 = vcmp.ge.f32.partialorder %v2407_v35, 0.0  ;;  %v3637_v29 = vmul.f32 0.01, %v2407_v35  ;;  %v15101_v47 = vadd.f32 %v11441_v57, %v11440_v53  ;;  %v15110_v53 = vpop.trf.xlu0 }
 0x411   :  { %vm3158_vm1 = vcmp.ge.f32.partialorder %v2409_v11, 0.0  ;;  %v3638_v14 = vmul.f32 0.01, %v2409_v11  ;;  %v2412_v27 = vpop.f32.mrb[90].mxu0  ;;  %v5406_v30 = vmax.f32 %v5094_v20, %v5098_v24  ;;  %v5099_v51 = vadd.f32 %v13037_v63, %v4607_v8 }
 0x412   :  { %v4117_v25 = vsel %vm3157_vm15, %v2407_v35, %v3637_v29  ;;  %v2413_v32 = vadd.f32 %v2412_v27, %v13005_v38  ;;  %v2414_v40 = vpop.f32.mrb[91].mxu0  ;;  %10858 = vmatmul.mubr.msk.f32.gmra.mrb[196].mxu0 %vm587_vm0, %v15003_v56  ;;  %v5100_v54 = vadd.f32 %v13042_v3, %v4608_v37 }
 0x413   :  { %v2415_v57 = vadd.f32 %v2414_v40, %v13009_v39  ;;  %2734 = vmatprep.mubr.f32.mxu0 %v17886_v36  ;;  %v5407_v33 = vmax.f32 %v5095_v0, %v5099_v51  ;;  %v4118_v20 = vsel %vm3158_vm1, %v2409_v11, %v3638_v14  ;;  %v4609_v13 = vmul.f32 %v13019_v49, %v4117_v25 }
 0x414   :  { %vm3159_vm2 = vcmp.ge.f32.partialorder %v2413_v32, 0.0  ;;  %v3639_v35 = vmul.f32 0.01, %v2413_v32  ;;  %v5408_v8 = vmax.f32 %v5096_v45, %v5100_v54  ;;  %v4610_v11 = vmul.f32 %v13029_v55, %v4118_v20  ;;  %v15125_v40 = vpop.trf.xlu0 }
 0x415   :  { %v3640_v24 = vmul.f32 0.01, %v2415_v57  ;;  %v2418_v29 = vpop.f32.mrb[92].mxu0  ;;  %v15114_v56 = vpack.c.bf16 %v5407_v33, %v5405_v23  ;;  %vm3160_vm3 = vcmp.ge.f32.partialorder %v2415_v57, 0.0  ;;  %v5101_v23 = vadd.f32 %v13037_v63, %v4609_v13  ;;  %v12198_v13 = vld [vmem:[%s17728_s5 + $0x128] sm:$0xff]  }
 0x416   :  { %v4119_v37 = vsel %vm3159_vm2, %v2413_v32, %v3639_v35  ;;  %v2419_v46 = vadd.f32 %v2418_v29, %v13005_v38  ;;  %v2420_v6 = vpop.f32.mrb[93].mxu0  ;;  %10859 = vmatmul.mubr.msk.f32.gmra.mrb[198].mxu0 %vm587_vm0, %v15024_v43  ;;  %v15119_v0 = vpack.c.bf16 %v5408_v8, %v5406_v30 }
 0x417   :  { %17956 = vst [vmem:[#allocation100_spill] sm:$0xff] %v15114_v56  ;;  %v2421_v45 = vadd.f32 %v2420_v6, %v13009_v39  ;;  %2740 = vmatprep.mubr.f32.mxu0 %v17886_v36  ;;  %v4611_v27 = vmul.f32 %v13019_v49, %v4119_v37  ;;  %v4120_v51 = vsel %vm3160_vm3, %v2415_v57, %v3640_v24 }
 0x418   :  { %17957 = vst [vmem:[#allocation101_spill] sm:$0xff] %v15119_v0  ;;  %vm3161_vm4 = vcmp.ge.f32.partialorder %v2419_v46, 0.0  ;;  %v3641_v14 = vmul.f32 0.01, %v2419_v46  ;;  %v5102_v57 = vadd.f32 %v13042_v3, %v4610_v11  ;;  %v4612_v8 = vmul.f32 %v13029_v55, %v4120_v51 }
 0x419   :  { %vm3162_vm5 = vcmp.ge.f32.partialorder %v2421_v45, 0.0  ;;  %v3642_v25 = vmul.f32 0.01, %v2421_v45  ;;  %v2424_v32 = vpop.f32.mrb[94].mxu0  ;;  %v5103_v6 = vadd.f32 %v13037_v63, %v4611_v27  ;;  %v15152_v27 = vpop.trf.xlu0 }
 0x41a   :  { %v4121_v54 = vsel %vm3161_vm4, %v2419_v46, %v3641_v14  ;;  %v2425_v43 = vadd.f32 %v2424_v32, %v13005_v38  ;;  %v2426_v30 = vpop.f32.mrb[95].mxu0  ;;  %10860 = vmatmul.mubr.msk.f32.gmra.mrb[200].mxu0 %vm587_vm0, %v15041_v19  ;;  %v12197_v19 = vld [vmem:[%s17728_s5 + $0x168] sm:$0xff]  }
 0x41b   :  { %v4613_v33 = vmul.f32 %v13019_v49, %v4121_v54  ;;  %v4122_v20 = vsel %vm3162_vm5, %v2421_v45, %v3642_v25  ;;  %v2427_v35 = vadd.f32 %v2426_v30, %v13009_v39  ;;  %2746 = vmatprep.mubr.f32.mxu0 %v17886_v36  ;;  %11489 = vmatprep.subr.bf16.mxu1 %v12197_v19 }
 0x41c   :  { %v4614_v24 = vmul.f32 %v13029_v55, %v4122_v20  ;;  %vm3163_vm6 = vcmp.ge.f32.partialorder %v2425_v43, 0.0  ;;  %v3643_v29 = vmul.f32 0.01, %v2425_v43  ;;  %11490 = vmatpush3.bf16.msra.mxu1 %v12198_v13  ;;  %v5104_v19 = vadd.f32 %v13042_v3, %v4612_v8 }
 0x41d   :  { %vm3164_vm7 = vcmp.ge.f32.partialorder %v2427_v35, 0.0  ;;  %v3644_v37 = vmul.f32 0.01, %v2427_v35  ;;  %v2430_v46 = vpop.f32.mrb[96].mxu0  ;;  %v5105_v11 = vadd.f32 %v13037_v63, %v4613_v33 }
 0x41e   :  { %v4123_v45 = vsel %vm3163_vm6, %v2425_v43, %v3643_v29  ;;  %v2431_v14 = vadd.f32 %v2430_v46, %v13005_v38  ;;  %v2432_v51 = vpop.f32.mrb[97].mxu0  ;;  %10861 = vmatmul.mubr.msk.f32.gmra.mrb[202].mxu0 %vm587_vm0, %v15062_v42  ;;  %v5106_v25 = vadd.f32 %v13042_v3, %v4614_v24 }
 0x41f   :  { %v4615_v32 = vmul.f32 %v13019_v49, %v4123_v45  ;;  %v4124_v54 = vsel %vm3164_vm7, %v2427_v35, %v3644_v37  ;;  %v2433_v30 = vadd.f32 %v2432_v51, %v13009_v39  ;;  %2752 = vmatprep.mubr.f32.mxu0 %v17886_v36  ;;  %v5409_v46 = vmax.f32 %v5101_v23, %v5105_v11  ;;  %v15164_v11 = vpop.trf.xlu0 }
 0x420   :  { %v4616_v43 = vmul.f32 %v13029_v55, %v4124_v54  ;;  %vm3165_vm8 = vcmp.ge.f32.partialorder %v2431_v14, 0.0  ;;  %v3645_v33 = vmul.f32 0.01, %v2431_v14  ;;  %v5410_v20 = vmax.f32 %v5102_v57, %v5106_v25 }
 0x421   :  { %v3646_v29 = vmul.f32 0.01, %v2433_v30  ;;  %v2436_v42 = vpop.f32.mrb[98].mxu0  ;;  %v5107_v24 = vadd.f32 %v13037_v63, %v4615_v32  ;;  %vm3166_vm9 = vcmp.ge.f32.partialorder %v2433_v30, 0.0 }
 0x422   :  { %v4125_v35 = vsel %vm3165_vm8, %v2431_v14, %v3645_v33  ;;  %v2437_v37 = vadd.f32 %v2436_v42, %v13005_v38  ;;  %v2438_v45 = vpop.f32.mrb[99].mxu0  ;;  %10862 = vmatmul.mubr.msk.f32.gmra.mrb[204].mxu0 %vm587_vm0, %v15080_v61  ;;  %v5108_v13 = vadd.f32 %v13042_v3, %v4616_v43 }
 0x423   :  { %v2439_v51 = vadd.f32 %v2438_v45, %v13009_v39  ;;  %2758 = vmatprep.mubr.f32.mxu0 %v17886_v36  ;;  %v5411_v57 = vmax.f32 %v5103_v6, %v5107_v24  ;;  %v4617_v8 = vmul.f32 %v13019_v49, %v4125_v35  ;;  %v4126_v32 = vsel %vm3166_vm9, %v2433_v30, %v3646_v29 }
 0x424   :  { %v5412_v25 = vmax.f32 %v5104_v19, %v5108_v13  ;;  %v3647_v54 = vmul.f32 0.01, %v2437_v37  ;;  %vm3167_vm10 = vcmp.ge.f32.partialorder %v2437_v37, 0.0  ;;  %v4618_v30 = vmul.f32 %v13029_v55, %v4126_v32  ;;  %v12199_v19 = vld [vmem:[%s17728_s5 + $0x170] sm:$0xff]  }
 0x425   :  { %v2442_v23 = vpop.f32.mrb[100].mxu0  ;;  %v15166_v14 = vpack.c.bf16 %v5411_v57, %v5409_v46  ;;  %v3648_v6 = vmul.f32 0.01, %v2439_v51  ;;  %vm3168_vm11 = vcmp.ge.f32.partialorder %v2439_v51, 0.0  ;;  %11491 = vmatprep.subr.bf16.mxu1 %v12199_v19 }
 0x426   :  { %v2443_v33 = vadd.f32 %v2442_v23, %v13005_v38  ;;  %v2444_v61 = vpop.f32.mrb[101].mxu0  ;;  %10863 = vmatmul.mubr.msk.f32.gmra.mrb[206].mxu0 %vm587_vm0, %v15110_v53  ;;  %v15171_v43 = vpack.c.bf16 %v5412_v25, %v5410_v20  ;;  %v5109_v20 = vadd.f32 %v13037_v63, %v4617_v8  ;;  %v4127_v46 = vsel %vm3167_vm10, %v2437_v37, %v3647_v54  ;;  %v12200_v37 = vld [vmem:[%s17728_s5 + $0x130] sm:$0xff]  }
 0x427   :  { %v2445_v42 = vadd.f32 %v2444_v61, %v13009_v39  ;;  %2764 = vmatprep.mubr.f32.mxu0 %v17886_v36  ;;  %v4128_v57 = vsel %vm3168_vm11, %v2439_v51, %v3648_v6  ;;  %v582_v61 = vpop.trf.xlu0  ;;  %v4619_v51 = vmul.f32 %v13019_v49, %v4127_v46  ;;  %11492 = vmatpush3.bf16.msra.mxu1 %v12200_v37  ;;  %v12201_v37 = vld [vmem:[%s17728_s5 + $0x178] sm:$0xff]  }
 0x428   :  { %vm3169_vm12 = vcmp.ge.f32.partialorder %v2443_v33, 0.0  ;;  %v3649_v29 = vmul.f32 0.01, %v2443_v33  ;;  %11493 = vmatprep.subr.bf16.mxu1 %v12201_v37 }
 0x429   :  { %vm3170_vm13 = vcmp.ge.f32.partialorder %v2445_v42, 0.0  ;;  %v3650_v24 = vmul.f32 0.01, %v2445_v42  ;;  %v2448_v53 = vpop.f32.mrb[102].mxu0 }
 0x42a   :  { %v4129_v35 = vsel %vm3169_vm12, %v2443_v33, %v3649_v29  ;;  %v2449_v45 = vadd.f32 %v2448_v53, %v13005_v38  ;;  %v2450_v13 = vpop.f32.mrb[103].mxu0  ;;  %10864 = vmatmul.mubr.msk.f32.gmra.mrb[208].mxu0 %vm587_vm0, %v15125_v40  ;;  %v5110_v40 = vadd.f32 %v13042_v3, %v4618_v30  ;;  %v4620_v29 = vmul.f32 %v13029_v55, %v4128_v57 }
 0x42b   :  { %v4621_v25 = vmul.f32 %v13019_v49, %v4129_v35  ;;  %v4130_v32 = vsel %vm3170_vm13, %v2445_v42, %v3650_v24  ;;  %v2451_v23 = vadd.f32 %v2450_v13, %v13009_v39  ;;  %2770 = vmatprep.mubr.f32.mxu0 %v17886_v36 }
 0x42c   :  { %v4622_v8 = vmul.f32 %v13029_v55, %v4130_v32  ;;  %vm3171_vm14 = vcmp.ge.f32.partialorder %v2449_v45, 0.0  ;;  %v3651_v54 = vmul.f32 0.01, %v2449_v45 }
 0x42d   :  { %vm3172_vm15 = vcmp.ge.f32.partialorder %v2451_v23, 0.0  ;;  %v3652_v33 = vmul.f32 0.01, %v2451_v23  ;;  %v2454_v6 = vpop.f32.mrb[104].mxu0  ;;  %v5113_v42 = vadd.f32 %v13037_v63, %v4621_v25 }
 0x42e   :  { %v4131_v19 = vsel %vm3171_vm14, %v2449_v45, %v3651_v54  ;;  %v2455_v24 = vadd.f32 %v2454_v6, %v13005_v38  ;;  %v2456_v53 = vpop.f32.mrb[105].mxu0  ;;  %10865 = vmatmul.mubr.msk.f32.gmra.mrb[210].mxu0 %vm587_vm0, %v15152_v27  ;;  %v5114_v35 = vadd.f32 %v13042_v3, %v4622_v8  ;;  %v5111_v8 = vadd.f32 %v13037_v63, %v4619_v51 }
 0x42f   :  { %v4623_v30 = vmul.f32 %v13019_v49, %v4131_v19  ;;  %v4132_v46 = vsel %vm3172_vm15, %v2451_v23, %v3652_v33  ;;  %v2457_v13 = vadd.f32 %v2456_v53, %v13009_v39  ;;  %2776 = vmatprep.mubr.f32.mxu0 %v17886_v36  ;;  %v5413_v25 = vmax.f32 %v5109_v20, %v5113_v42  ;;  %v583_v33 = vpop.trf.xlu0 }
 0x430   :  { %v4624_v32 = vmul.f32 %v13029_v55, %v4132_v46  ;;  %vm3173_vm1 = vcmp.ge.f32.partialorder %v2455_v24, 0.0  ;;  %v3653_v45 = vmul.f32 0.01, %v2455_v24  ;;  %v5414_v57 = vmax.f32 %v5110_v40, %v5114_v35 }
 0x431   :  { %v3654_v27 = vmul.f32 0.01, %v2457_v13  ;;  %v2460_v54 = vpop.f32.mrb[106].mxu0  ;;  %v5115_v23 = vadd.f32 %v13037_v63, %v4623_v30  ;;  %vm3174_vm2 = vcmp.ge.f32.partialorder %v2457_v13, 0.0  ;;  %v5112_v40 = vadd.f32 %v13042_v3, %v4620_v29 }
 0x432   :  { %v2461_v6 = vadd.f32 %v2460_v54, %v13005_v38  ;;  %v2462_v20 = vpop.f32.mrb[107].mxu0  ;;  %10866 = vmatmul.mubr.msk.f32.gmra.mrb[212].mxu0 %vm587_vm0, %v15164_v11  ;;  %v5116_v42 = vadd.f32 %v13042_v3, %v4624_v32  ;;  %v4133_v19 = vsel %vm3173_vm1, %v2455_v24, %v3653_v45  ;;  %v12202_v11 = vld [vmem:[%s17728_s5 + $0x138] sm:$0xff]  }
 0x433   :  { %v2463_v53 = vadd.f32 %v2462_v20, %v13009_v39  ;;  %2782 = vmatprep.mubr.f32.mxu0 %v17886_v36  ;;  %v5415_v51 = vmax.f32 %v5111_v8, %v5115_v23  ;;  %v4134_v30 = vsel %vm3174_vm2, %v2457_v13, %v3654_v27  ;;  %v4625_v29 = vmul.f32 %v13019_v49, %v4133_v19 }
 0x434   :  { %v5416_v35 = vmax.f32 %v5112_v40, %v5116_v42  ;;  %v3655_v32 = vmul.f32 0.01, %v2461_v6  ;;  %vm3175_vm3 = vcmp.ge.f32.partialorder %v2461_v6, 0.0  ;;  %11494 = vmatpush3.bf16.msra.mxu1 %v12202_v11  ;;  %v4626_v27 = vmul.f32 %v13029_v55, %v4134_v30 }
 0x435   :  { %v2466_v46 = vpop.f32.mrb[108].mxu0  ;;  %v15215_v54 = vpack.c.bf16 %v5415_v51, %v5413_v25  ;;  %v3656_v8 = vmul.f32 0.01, %v2463_v53  ;;  %v584_v25 = vpop.trf.xlu0  ;;  %vm3176_vm4 = vcmp.ge.f32.partialorder %v2463_v53, 0.0 }
 0x436   :  { %v2467_v37 = vadd.f32 %v2466_v46, %v13005_v38  ;;  %v2468_v24 = vpop.f32.mrb[109].mxu0  ;;  %10867 = vmatmul.mubr.msk.f32.gmra.mrb[214].mxu0 %vm587_vm0, %v582_v61  ;;  %v15223_v45 = vpack.c.bf16 %v5416_v35, %v5414_v57  ;;  %v5117_v57 = vadd.f32 %v13037_v63, %v4625_v29  ;;  %v4135_v40 = vsel %vm3175_vm3, %v2461_v6, %v3655_v32 }
 0x437   :  { %17958 = vst [vmem:[#allocation102_spill] sm:$0xff] %v15215_v54  ;;  %v2469_v13 = vadd.f32 %v2468_v24, %v13009_v39  ;;  %2788 = vmatprep.mubr.f32.mxu0 %v17886_v36  ;;  %v4136_v35 = vsel %vm3176_vm4, %v2463_v53, %v3656_v8  ;;  %v5118_v6 = vadd.f32 %v13042_v3, %v4626_v27 }
 0x438   :  { %17959 = vst [vmem:[#allocation103_spill] sm:$0xff] %v15223_v45  ;;  %vm3177_vm5 = vcmp.ge.f32.partialorder %v2467_v37, 0.0  ;;  %v3657_v23 = vmul.f32 0.01, %v2467_v37  ;;  %6118 = vmatprep.mubr.bf16.mxu1 %v15223_v45  ;;  %v4627_v32 = vmul.f32 %v13019_v49, %v4135_v40 }
 0x439   :  { %vm3178_vm6 = vcmp.ge.f32.partialorder %v2469_v13, 0.0  ;;  %v3658_v20 = vmul.f32 0.01, %v2469_v13  ;;  %v2472_v61 = vpop.f32.mrb[110].mxu0  ;;  %6119 = vmatmul.mubr.bf16.gmra.mrb[44].mxu1 %v15215_v54  ;;  %v585_v8 = vpop.trf.xlu0 }
 0x43a   :  { %v4137_v42 = vsel %vm3177_vm5, %v2467_v37, %v3657_v23  ;;  %v2473_v19 = vadd.f32 %v2472_v61, %v13005_v38  ;;  %v2474_v51 = vpop.f32.mrb[111].mxu0  ;;  %10868 = vmatmul.mubr.msk.f32.gmra.mrb[216].mxu0 %vm587_vm0, %v583_v33 }
 0x43b   :  { %v4629_v30 = vmul.f32 %v13019_v49, %v4137_v42  ;;  %v4138_v46 = vsel %vm3178_vm6, %v2469_v13, %v3658_v20  ;;  %v2475_v11 = vadd.f32 %v2474_v51, %v13009_v39  ;;  %2794 = vmatprep.mubr.f32.mxu0 %v17886_v36  ;;  %v4628_v13 = vmul.f32 %v13029_v55, %v4136_v35 }
 0x43c   :  { %v4630_v24 = vmul.f32 %v13029_v55, %v4138_v46  ;;  %vm3179_vm7 = vcmp.ge.f32.partialorder %v2473_v19, 0.0  ;;  %v3659_v29 = vmul.f32 0.01, %v2473_v19 }
 0x43d   :  { %v5121_v37 = vadd.f32 %v13037_v63, %v4629_v30  ;;  %vm3180_vm8 = vcmp.ge.f32.partialorder %v2475_v11, 0.0  ;;  %v3660_v33 = vmul.f32 0.01, %v2475_v11  ;;  %v2478_v53 = vpop.f32.mrb[112].mxu0 }
 0x43e   :  { %v4139_v23 = vsel %vm3179_vm7, %v2473_v19, %v3659_v29  ;;  %v2479_v20 = vadd.f32 %v2478_v53, %v13005_v38  ;;  %v2480_v61 = vpop.f32.mrb[113].mxu0  ;;  %10869 = vmatmul.mubr.msk.f32.gmra.mrb[218].mxu0 %vm587_vm0, %v584_v25  ;;  %v5122_v42 = vadd.f32 %v13042_v3, %v4630_v24  ;;  %v5119_v29 = vadd.f32 %v13037_v63, %v4627_v32  ;;  %v586_v32 = vpop.trf.xlu0 }
 0x43f   :  { %v5417_v51 = vmax.f32 %v5117_v57, %v5121_v37  ;;  %v4631_v27 = vmul.f32 %v13019_v49, %v4139_v23  ;;  %v4140_v40 = vsel %vm3180_vm8, %v2475_v11, %v3660_v33  ;;  %v2481_v30 = vadd.f32 %v2480_v61, %v13009_v39  ;;  %2800 = vmatprep.mubr.f32.mxu0 %v17886_v36 }
 0x440   :  { %v4632_v46 = vmul.f32 %v13029_v55, %v4140_v40  ;;  %vm3181_vm9 = vcmp.ge.f32.partialorder %v2479_v20, 0.0  ;;  %v3661_v35 = vmul.f32 0.01, %v2479_v20  ;;  %v5418_v19 = vmax.f32 %v5118_v6, %v5122_v42 }
 0x441   :  { %v5123_v53 = vadd.f32 %v13037_v63, %v4631_v27  ;;  %vm3182_vm10 = vcmp.ge.f32.partialorder %v2481_v30, 0.0  ;;  %v3662_v25 = vmul.f32 0.01, %v2481_v30  ;;  %v2484_v24 = vpop.f32.mrb[114].mxu0  ;;  %v5120_v33 = vadd.f32 %v13042_v3, %v4628_v13 }
 0x442   :  { %v4141_v57 = vsel %vm3181_vm9, %v2479_v20, %v3661_v35  ;;  %v2485_v37 = vadd.f32 %v2484_v24, %v13005_v38  ;;  %v2486_v11 = vpop.f32.mrb[115].mxu0  ;;  %10870 = vmatmul.mubr.msk.f32.gmra.mrb[220].mxu0 %vm587_vm0, %v585_v8  ;;  %v5124_v23 = vadd.f32 %v13042_v3, %v4632_v46  ;;  %v12203_v8 = vld [vmem:[%s17728_s5 + $0x1c0] sm:$0xff]  }
 0x443   :  { %v5419_v61 = vmax.f32 %v5119_v29, %v5123_v53  ;;  %v2487_v6 = vadd.f32 %v2486_v11, %v13009_v39  ;;  %2806 = vmatprep.mubr.f32.mxu0 %v17886_v36  ;;  %v4142_v42 = vsel %vm3182_vm10, %v2481_v30, %v3662_v25  ;;  %v4633_v20 = vmul.f32 %v13019_v49, %v4141_v57 }
 0x444   :  { %v5420_v27 = vmax.f32 %v5120_v33, %v5124_v23  ;;  %v3663_v35 = vmul.f32 0.01, %v2485_v37  ;;  %vm3183_vm11 = vcmp.ge.f32.partialorder %v2485_v37, 0.0  ;;  %11579 = vmatprep.subr.bf16.mxu1 %v12203_v8 }
 0x445   :  { %v15257_v40 = vpack.c.bf16 %v5419_v61, %v5417_v51  ;;  %v2490_v24 = vpop.f32.mrb[116].mxu0  ;;  %v3664_v13 = vmul.f32 0.01, %v2487_v6  ;;  %v4634_v51 = vmul.f32 %v13029_v55, %v4142_v42  ;;  %vm3184_vm12 = vcmp.ge.f32.partialorder %v2487_v6, 0.0 }
 0x446   :  { %v2491_v46 = vadd.f32 %v2490_v24, %v13005_v38  ;;  %v2492_v29 = vpop.f32.mrb[117].mxu0  ;;  %10871 = vmatmul.mubr.msk.f32.gmra.mrb[222].mxu0 %vm587_vm0, %v586_v32  ;;  %v15265_v36 = vpack.c.bf16 %v5420_v27, %v5418_v19  ;;  %v4143_v25 = vsel %vm3183_vm11, %v2485_v37, %v3663_v35  ;;  %v5125_v32 = vadd.f32 %v13037_v63, %v4633_v20 }
 0x447   :  { %17960 = vst [vmem:[#allocation104_spill] sm:$0xff] %v15257_v40  ;;  %v2493_v30 = vadd.f32 %v2492_v29, %v13009_v39  ;;  %5789 = vmatprep.mubr.bf16.mxu0 %v13120_v15  ;;  %v4144_v33 = vsel %vm3184_vm12, %v2487_v6, %v3664_v13  ;;  %v5126_v37 = vadd.f32 %v13042_v3, %v4634_v51 }
 0x448   :  { %17961 = vst [vmem:[#allocation105_spill] sm:$0xff] %v15265_v36  ;;  %vm3185_vm13 = vcmp.ge.f32.partialorder %v2491_v46, 0.0  ;;  %v3665_v53 = vmul.f32 0.01, %v2491_v46  ;;  %v4635_v35 = vmul.f32 %v13019_v49, %v4143_v25 }
 0x449   :  { %vm3186_vm14 = vcmp.ge.f32.partialorder %v2493_v30, 0.0  ;;  %v3666_v57 = vmul.f32 0.01, %v2493_v30  ;;  %v2496_v11 = vpop.f32.mrb[118].mxu0 }
 0x44a   :  { %v4145_v23 = vsel %vm3185_vm13, %v2491_v46, %v3665_v53  ;;  %v2497_v61 = vadd.f32 %v2496_v11, %v13005_v38  ;;  %v2498_v19 = vpop.f32.mrb[119].mxu0  ;;  %5790 = vmatmul.mubr.bf16.vlgmr.msra.gmra.mrb[224].mxu0 %v13115_v7  ;;  %v4636_v7 = vmul.f32 %v13029_v55, %v4144_v33 }
 0x44b   :  { %v4637_v42 = vmul.f32 %v13019_v49, %v4145_v23  ;;  %v4146_v27 = vsel %vm3186_vm14, %v2493_v30, %v3666_v57  ;;  %v2499_v15 = vadd.f32 %v2498_v19, %v13009_v39  ;;  %5797 = vmatprep.mubr.bf16.mxu0 %v13305_v10 }
 0x44c   :  { %v4638_v6 = vmul.f32 %v13029_v55, %v4146_v27  ;;  %vm3187_vm0 = vcmp.ge.f32.partialorder %v2497_v61, 0.0  ;;  %v3667_v24 = vmul.f32 0.01, %v2497_v61  ;;  %v11443_v8 = vpop.f32.mrb[32].mxu1 }
 0x44d   :  { %vm3188_vm15 = vcmp.ge.f32.partialorder %v2499_v15, 0.0  ;;  %v3668_v20 = vmul.f32 0.01, %v2499_v15  ;;  %v2502_v13 = vpop.f32.mrb[120].mxu0  ;;  %v11444_v46 = vpop.f32.mrb[33].mxu1  ;;  %v5129_v29 = vadd.f32 %v13037_v63, %v4637_v42 }
 0x44e   :  { %v4147_v30 = vsel %vm3187_vm0, %v2497_v61, %v3667_v24  ;;  %v2503_v53 = vadd.f32 %v2502_v13, %v13005_v38  ;;  %v15282_v57 = vadd.f32 %v11444_v46, %v11443_v8  ;;  %v2504_v51 = vpop.f32.mrb[121].mxu0  ;;  %v11446_v25 = vpop.f32.mrb[34].mxu1  ;;  %v5130_v11 = vadd.f32 %v13042_v3, %v4638_v6 }
 0x44f   :  { %v4639_v23 = vmul.f32 %v13019_v49, %v4147_v30  ;;  %v4148_v19 = vsel %vm3188_vm15, %v2499_v15, %v3668_v20  ;;  %v2505_v33 = vadd.f32 %v2504_v51, %v13009_v39  ;;  %v11447_v27 = vpop.f32.mrb[35].mxu1  ;;  %v5421_v10 = vmax.f32 %v5125_v32, %v5129_v29 }
 0x450   :  { %v4640_v54 = vmul.f32 %v13029_v55, %v4148_v19  ;;  %vm3189_vm1 = vcmp.ge.f32.partialorder %v2503_v53, 0.0  ;;  %v3669_v42 = vmul.f32 0.01, %v2503_v53  ;;  %v15288_v61 = vadd.f32 %v11447_v27, %v11446_v25 }
 0x451   :  { %v3670_v24 = vmul.f32 0.01, %v2505_v33  ;;  %v2508_v8 = vpop.f32.mrb[122].mxu0  ;;  %v5422_v13 = vmax.f32 %v5126_v37, %v5130_v11  ;;  %v5127_v46 = vadd.f32 %v13037_v63, %v4635_v35  ;;  %v5131_v6 = vadd.f32 %v13037_v63, %v4639_v23 }
 0x452   :  { %vm3190_vm2 = vcmp.ge.f32.partialorder %v2505_v33, 0.0  ;;  %v2509_v15 = vadd.f32 %v2508_v8, %v13005_v38  ;;  %v2510_v20 = vpop.f32.mrb[123].mxu0  ;;  %5798 = vmatmul.mubr.bf16.gmra.mrb[228].mxu0 %v13300_v1  ;;  %v5128_v32 = vadd.f32 %v13042_v3, %v4636_v7  ;;  %v5132_v29 = vadd.f32 %v13042_v3, %v4640_v54 }
 0x453   :  { %v4149_v30 = vsel %vm3189_vm1, %v2503_v53, %v3669_v42  ;;  %v2511_v51 = vadd.f32 %v2510_v20, %v13009_v39  ;;  %5805 = vmatprep.mubr.bf16.mxu0 %v13490_v17  ;;  %v5423_v37 = vmax.f32 %v5127_v46, %v5131_v6  ;;  %v4150_v35 = vsel %vm3190_vm2, %v2505_v33, %v3670_v24 }
 0x454   :  { %v5424_v25 = vmax.f32 %v5128_v32, %v5132_v29  ;;  %v4641_v19 = vmul.f32 %v13019_v49, %v4149_v30  ;;  %v3671_v27 = vmul.f32 0.01, %v2509_v15  ;;  %vm3191_vm3 = vcmp.ge.f32.partialorder %v2509_v15, 0.0 }
 0x455   :  { %v2514_v11 = vpop.f32.mrb[124].mxu0  ;;  %v15298_v23 = vpack.c.bf16 %v5423_v37, %v5421_v10  ;;  %v3672_v54 = vmul.f32 0.01, %v2511_v51  ;;  %v4642_v42 = vmul.f32 %v13029_v55, %v4150_v35  ;;  %vm3192_vm4 = vcmp.ge.f32.partialorder %v2511_v51, 0.0 }
 0x456   :  { %v2515_v8 = vadd.f32 %v2514_v11, %v13005_v38  ;;  %v2516_v1 = vpop.f32.mrb[125].mxu0  ;;  %v15302_v7 = vpack.c.bf16 %v5424_v25, %v5422_v13  ;;  %v4151_v46 = vsel %vm3191_vm3, %v2509_v15, %v3671_v27  ;;  %v5133_v13 = vadd.f32 %v13037_v63, %v4641_v19 }
 0x457   :  { %17962 = vst [vmem:[#allocation106_spill] sm:$0xff] %v15298_v23  ;;  %v2517_v53 = vadd.f32 %v2516_v1, %v13009_v39  ;;  %v4152_v29 = vsel %vm3192_vm4, %v2511_v51, %v3672_v54  ;;  %v5134_v35 = vadd.f32 %v13042_v3, %v4642_v42  ;;  %v4643_v11 = vmul.f32 %v13019_v49, %v4151_v46 }
 0x458   :  { %17963 = vst [vmem:[#allocation107_spill] sm:$0xff] %v15302_v7  ;;  %vm3193_vm5 = vcmp.ge.f32.partialorder %v2515_v8, 0.0  ;;  %v3673_v33 = vmul.f32 0.01, %v2515_v8  ;;  %v4644_v19 = vmul.f32 %v13029_v55, %v4152_v29 }
 0x459   :  { %vm3194_vm6 = vcmp.ge.f32.partialorder %v2517_v53, 0.0  ;;  %v3674_v10 = vmul.f32 0.01, %v2517_v53  ;;  %v2520_v24 = vpop.f32.mrb[126].mxu0 }
 0x45a   :  { %v4153_v6 = vsel %vm3193_vm5, %v2515_v8, %v3673_v33  ;;  %v2521_v20 = vadd.f32 %v2520_v24, %v13005_v38  ;;  %v2522_v32 = vpop.f32.mrb[127].mxu0  ;;  %5806 = vmatmul.mubr.bf16.gmra.mrb[232].mxu0 %v13485_v4 }
 0x45b   :  { %v4645_v1 = vmul.f32 %v13019_v49, %v4153_v6  ;;  %v4154_v30 = vsel %vm3194_vm6, %v2517_v53, %v3674_v10  ;;  %v2523_v37 = vadd.f32 %v2522_v32, %v13009_v39  ;;  %5813 = vmatprep.mubr.bf16.mxu0 %v13677_v22 }
 0x45c   :  { %v4646_v25 = vmul.f32 %v13029_v55, %v4154_v30  ;;  %vm3195_vm7 = vcmp.ge.f32.partialorder %v2521_v20, 0.0  ;;  %v3675_v15 = vmul.f32 0.01, %v2521_v20 }
 0x45d   :  { %vm3196_vm8 = vcmp.ge.f32.partialorder %v2523_v37, 0.0  ;;  %v3676_v27 = vmul.f32 0.01, %v2523_v37  ;;  %v2526_v8 = vpop.f32.mrb[128].mxu0  ;;  %v5137_v51 = vadd.f32 %v13037_v63, %v4645_v1 }
 0x45e   :  { %v4155_v54 = vsel %vm3195_vm7, %v2521_v20, %v3675_v15  ;;  %v2527_v53 = vadd.f32 %v2526_v8, %v13005_v38  ;;  %v2528_v33 = vpop.f32.mrb[129].mxu0  ;;  %v5138_v10 = vadd.f32 %v13042_v3, %v4646_v25  ;;  %v5135_v20 = vadd.f32 %v13037_v63, %v4643_v11 }
 0x45f   :  { %v4647_v24 = vmul.f32 %v13019_v49, %v4155_v54  ;;  %v4156_v6 = vsel %vm3196_vm8, %v2523_v37, %v3676_v27  ;;  %v2529_v42 = vadd.f32 %v2528_v33, %v13009_v39  ;;  %v5425_v32 = vmax.f32 %v5133_v13, %v5137_v51 }
 0x460   :  { %v4648_v46 = vmul.f32 %v13029_v55, %v4156_v6  ;;  %vm3197_vm9 = vcmp.ge.f32.partialorder %v2527_v53, 0.0  ;;  %v3677_v30 = vmul.f32 0.01, %v2527_v53  ;;  %v5426_v22 = vmax.f32 %v5134_v35, %v5138_v10 }
 0x461   :  { %v3678_v1 = vmul.f32 0.01, %v2529_v42  ;;  %v2532_v4 = vpop.f32.mrb[130].mxu0  ;;  %v5139_v29 = vadd.f32 %v13037_v63, %v4647_v24  ;;  %vm3198_vm10 = vcmp.ge.f32.partialorder %v2529_v42, 0.0  ;;  %v5136_v37 = vadd.f32 %v13042_v3, %v4644_v19 }
 0x462   :  { %v2533_v25 = vadd.f32 %v2532_v4, %v13005_v38  ;;  %v2534_v15 = vpop.f32.mrb[131].mxu0  ;;  %5814 = vmatmul.mubr.bf16.gmra.mrb[236].mxu0 %v13670_v62  ;;  %v5140_v13 = vadd.f32 %v13042_v3, %v4648_v46  ;;  %v4157_v27 = vsel %vm3197_vm9, %v2527_v53, %v3677_v30 }
 0x463   :  { %v2535_v8 = vadd.f32 %v2534_v15, %v13009_v39  ;;  %5821 = vmatprep.mubr.bf16.mxu0 %v13866_v9  ;;  %v5427_v35 = vmax.f32 %v5135_v20, %v5139_v29  ;;  %v4158_v11 = vsel %vm3198_vm10, %v2529_v42, %v3678_v1  ;;  %v4649_v4 = vmul.f32 %v13019_v49, %v4157_v27 }
 0x464   :  { %v5428_v51 = vmax.f32 %v5136_v37, %v5140_v13  ;;  %v3679_v10 = vmul.f32 0.01, %v2533_v25  ;;  %vm3199_vm11 = vcmp.ge.f32.partialorder %v2533_v25, 0.0  ;;  %v4650_v30 = vmul.f32 %v13029_v55, %v4158_v11 }
 0x465   :  { %v2538_v54 = vpop.f32.mrb[132].mxu0  ;;  %v15330_v33 = vpack.c.bf16 %v5427_v35, %v5425_v32  ;;  %v3680_v53 = vmul.f32 0.01, %v2535_v8  ;;  %vm3200_vm12 = vcmp.ge.f32.partialorder %v2535_v8, 0.0 }
 0x466   :  { %v2539_v24 = vadd.f32 %v2538_v54, %v13005_v38  ;;  %v2540_v6 = vpop.f32.mrb[133].mxu0  ;;  %v15334_v19 = vpack.c.bf16 %v5428_v51, %v5426_v22  ;;  %v4159_v20 = vsel %vm3199_vm11, %v2533_v25, %v3679_v10  ;;  %v5141_v22 = vadd.f32 %v13037_v63, %v4649_v4 }
 0x467   :  { %v2541_v46 = vadd.f32 %v2540_v6, %v13009_v39  ;;  %v4160_v13 = vsel %vm3200_vm12, %v2535_v8, %v3680_v53  ;;  %v5142_v54 = vadd.f32 %v13042_v3, %v4650_v30  ;;  %v4651_v10 = vmul.f32 %v13019_v49, %v4159_v20 }
 0x468   :  { %vm3201_vm13 = vcmp.ge.f32.partialorder %v2539_v24, 0.0  ;;  %v3681_v42 = vmul.f32 0.01, %v2539_v24  ;;  %v4652_v4 = vmul.f32 %v13029_v55, %v4160_v13 }
 0x469   :  { %vm3202_vm14 = vcmp.ge.f32.partialorder %v2541_v46, 0.0  ;;  %v3682_v32 = vmul.f32 0.01, %v2541_v46  ;;  %v2544_v1 = vpop.f32.mrb[134].mxu0 }
 0x46a   :  { %v4161_v29 = vsel %vm3201_vm13, %v2539_v24, %v3681_v42  ;;  %v2545_v15 = vadd.f32 %v2544_v1, %v13005_v38  ;;  %v2546_v37 = vpop.f32.mrb[135].mxu0  ;;  %5822 = vmatmul.mubr.bf16.gmra.mrb[240].mxu0 %v13859_v44 }
 0x46b   :  { %v4653_v27 = vmul.f32 %v13019_v49, %v4161_v29  ;;  %v4162_v35 = vsel %vm3202_vm14, %v2541_v46, %v3682_v32  ;;  %v2547_v51 = vadd.f32 %v2546_v37, %v13009_v39  ;;  %5829 = vmatprep.mubr.bf16.mxu0 %v14061_v52 }
 0x46c   :  { %v4654_v11 = vmul.f32 %v13029_v55, %v4162_v35  ;;  %vm3203_vm0 = vcmp.ge.f32.partialorder %v2545_v15, 0.0  ;;  %v3683_v25 = vmul.f32 0.01, %v2545_v15 }
 0x46d   :  { %vm3204_vm15 = vcmp.ge.f32.partialorder %v2547_v51, 0.0  ;;  %v3684_v24 = vmul.f32 0.01, %v2547_v51  ;;  %v2550_v6 = vpop.f32.mrb[136].mxu0  ;;  %v5145_v8 = vadd.f32 %v13037_v63, %v4653_v27 }
 0x46e   :  { %v4163_v53 = vsel %vm3203_vm0, %v2545_v15, %v3683_v25  ;;  %v2551_v46 = vadd.f32 %v2550_v6, %v13005_v38  ;;  %v2552_v42 = vpop.f32.mrb[137].mxu0  ;;  %v5146_v32 = vadd.f32 %v13042_v3, %v4654_v11  ;;  %v5143_v15 = vadd.f32 %v13037_v63, %v4651_v10 }
 0x46f   :  { %v4655_v1 = vmul.f32 %v13019_v49, %v4163_v53  ;;  %v4164_v29 = vsel %vm3204_vm15, %v2547_v51, %v3684_v24  ;;  %v2553_v30 = vadd.f32 %v2552_v42, %v13009_v39  ;;  %v5429_v37 = vmax.f32 %v5141_v22, %v5145_v8 }
 0x470   :  { %v4656_v20 = vmul.f32 %v13029_v55, %v4164_v29  ;;  %vm3205_vm1 = vcmp.ge.f32.partialorder %v2551_v46, 0.0  ;;  %v3685_v35 = vmul.f32 0.01, %v2551_v46  ;;  %v5430_v52 = vmax.f32 %v5142_v54, %v5146_v32 }
 0x471   :  { %v3686_v27 = vmul.f32 0.01, %v2553_v30  ;;  %v2556_v44 = vpop.f32.mrb[138].mxu0  ;;  %v5147_v13 = vadd.f32 %v13037_v63, %v4655_v1  ;;  %vm3206_vm2 = vcmp.ge.f32.partialorder %v2553_v30, 0.0  ;;  %v5144_v51 = vadd.f32 %v13042_v3, %v4652_v4 }
 0x472   :  { %v2557_v11 = vadd.f32 %v2556_v44, %v13005_v38  ;;  %v2558_v25 = vpop.f32.mrb[139].mxu0  ;;  %5830 = vmatmul.mubr.bf16.gmra.mrb[244].mxu0 %v14054_v59  ;;  %v5148_v22 = vadd.f32 %v13042_v3, %v4656_v20  ;;  %v4165_v24 = vsel %vm3205_vm1, %v2551_v46, %v3685_v35 }
 0x473   :  { %v2559_v6 = vadd.f32 %v2558_v25, %v13009_v39  ;;  %5837 = vmatprep.mubr.bf16.mxu0 %v14250_v34  ;;  %v5431_v54 = vmax.f32 %v5143_v15, %v5147_v13  ;;  %v4166_v10 = vsel %vm3206_vm2, %v2553_v30, %v3686_v27  ;;  %v4657_v44 = vmul.f32 %v13019_v49, %v4165_v24 }
 0x474   :  { %v5432_v8 = vmax.f32 %v5144_v51, %v5148_v22  ;;  %v3687_v32 = vmul.f32 0.01, %v2557_v11  ;;  %vm3207_vm3 = vcmp.ge.f32.partialorder %v2557_v11, 0.0  ;;  %v4658_v35 = vmul.f32 %v13029_v55, %v4166_v10 }
 0x475   :  { %v2562_v53 = vpop.f32.mrb[140].mxu0  ;;  %v15362_v42 = vpack.c.bf16 %v5431_v54, %v5429_v37  ;;  %v3688_v46 = vmul.f32 0.01, %v2559_v6  ;;  %vm3208_vm4 = vcmp.ge.f32.partialorder %v2559_v6, 0.0  ;;  %v5149_v15 = vadd.f32 %v13037_v63, %v4657_v44 }
 0x476   :  { %v2563_v1 = vadd.f32 %v2562_v53, %v13005_v38  ;;  %v2564_v29 = vpop.f32.mrb[141].mxu0  ;;  %v15366_v4 = vpack.c.bf16 %v5432_v8, %v5430_v52  ;;  %v4167_v52 = vsel %vm3207_vm3, %v2557_v11, %v3687_v32  ;;  %v5150_v11 = vadd.f32 %v13042_v3, %v4658_v35 }
 0x477   :  { %17964 = vst [vmem:[#allocation108_spill] sm:$0xff] %v15362_v42  ;;  %v2565_v20 = vadd.f32 %v2564_v29, %v13009_v39  ;;  %v4168_v22 = vsel %vm3208_vm4, %v2559_v6, %v3688_v46  ;;  %v4659_v44 = vmul.f32 %v13019_v49, %v4167_v52 }
 0x478   :  { %17965 = vst [vmem:[#allocation109_spill] sm:$0xff] %v15366_v4  ;;  %vm3209_vm5 = vcmp.ge.f32.partialorder %v2563_v1, 0.0  ;;  %v3689_v30 = vmul.f32 0.01, %v2563_v1  ;;  %6126 = vmatprep.mubr.bf16.mxu1 %v15366_v4  ;;  %v4660_v29 = vmul.f32 %v13029_v55, %v4168_v22 }
 0x479   :  { %vm3210_vm6 = vcmp.ge.f32.partialorder %v2565_v20, 0.0  ;;  %v3690_v37 = vmul.f32 0.01, %v2565_v20  ;;  %v2568_v27 = vpop.f32.mrb[142].mxu0  ;;  %6127 = vmatmul.mubr.bf16.gmra.mrb[48].mxu1 %v15362_v42  ;;  %v17992_v42 = vld [vmem:[#allocation83_spill] sm:$0xff] }
 0x47a   :  { %v4169_v13 = vsel %vm3209_vm5, %v2563_v1, %v3689_v30  ;;  %v2569_v25 = vadd.f32 %v2568_v27, %v13005_v38  ;;  %v2570_v51 = vpop.f32.mrb[143].mxu0  ;;  %5838 = vmatmul.mubr.bf16.gmra.mrb[248].mxu0 %v14243_v58 }
 0x47b   :  { %v4661_v24 = vmul.f32 %v13019_v49, %v4169_v13  ;;  %v4170_v54 = vsel %vm3210_vm6, %v2565_v20, %v3690_v37  ;;  %v2571_v8 = vadd.f32 %v2570_v51, %v13009_v39  ;;  %5845 = vmatprep.mubr.bf16.mxu0 %v14445_v12  ;;  %v5151_v12 = vadd.f32 %v13037_v63, %v4659_v44 }
 0x47c   :  { %v4662_v10 = vmul.f32 %v13029_v55, %v4170_v54  ;;  %vm3211_vm7 = vcmp.ge.f32.partialorder %v2569_v25, 0.0  ;;  %v3691_v53 = vmul.f32 0.01, %v2569_v25 }
 0x47d   :  { %v5153_v32 = vadd.f32 %v13037_v63, %v4661_v24  ;;  %vm3212_vm8 = vcmp.ge.f32.partialorder %v2571_v8, 0.0  ;;  %v3692_v1 = vmul.f32 0.01, %v2571_v8  ;;  %v2574_v6 = vpop.f32.mrb[144].mxu0 }
 0x47e   :  { %v4171_v46 = vsel %vm3211_vm7, %v2569_v25, %v3691_v53  ;;  %v2575_v20 = vadd.f32 %v2574_v6, %v13005_v38  ;;  %v2576_v30 = vpop.f32.mrb[145].mxu0  ;;  %v5154_v37 = vadd.f32 %v13042_v3, %v4662_v10 }
 0x47f   :  { %v5433_v27 = vmax.f32 %v5149_v15, %v5153_v32  ;;  %v4663_v13 = vmul.f32 %v13019_v49, %v4171_v46  ;;  %v4172_v51 = vsel %vm3212_vm8, %v2571_v8, %v3692_v1  ;;  %v2577_v35 = vadd.f32 %v2576_v30, %v13009_v39 }
 0x480   :  { %v4664_v52 = vmul.f32 %v13029_v55, %v4172_v51  ;;  %vm3213_vm9 = vcmp.ge.f32.partialorder %v2575_v20, 0.0  ;;  %v3693_v24 = vmul.f32 0.01, %v2575_v20  ;;  %v5434_v54 = vmax.f32 %v5150_v11, %v5154_v37 }
 0x481   :  { %v5155_v25 = vadd.f32 %v13037_v63, %v4663_v13  ;;  %vm3214_vm10 = vcmp.ge.f32.partialorder %v2577_v35, 0.0  ;;  %v3694_v22 = vmul.f32 0.01, %v2577_v35  ;;  %v2580_v53 = vpop.f32.mrb[146].mxu0  ;;  %v5152_v8 = vadd.f32 %v13042_v3, %v4660_v29 }
 0x482   :  { %v4173_v6 = vsel %vm3213_vm9, %v2575_v20, %v3693_v24  ;;  %v2581_v15 = vadd.f32 %v2580_v53, %v13005_v38  ;;  %v2582_v10 = vpop.f32.mrb[147].mxu0  ;;  %5846 = vmatmul.mubr.bf16.gmra.mrb[252].mxu0 %v14438_v5  ;;  %v5156_v32 = vadd.f32 %v13042_v3, %v4664_v52 }
 0x483   :  { %v5435_v1 = vmax.f32 %v5151_v12, %v5155_v25  ;;  %v2583_v11 = vadd.f32 %v2582_v10, %v13009_v39  ;;  %5853 = vmatprep.mubr.bf16.mxu0 %v14628_v18  ;;  %v4174_v44 = vsel %vm3214_vm10, %v2577_v35, %v3694_v22  ;;  %v4665_v20 = vmul.f32 %v13019_v49, %v4173_v6 }
 0x484   :  { %v5436_v46 = vmax.f32 %v5152_v8, %v5156_v32  ;;  %v3695_v37 = vmul.f32 0.01, %v2581_v15  ;;  %vm3215_vm11 = vcmp.ge.f32.partialorder %v2581_v15, 0.0  ;;  %v4666_v12 = vmul.f32 %v13029_v55, %v4174_v44 }
 0x485   :  { %v15396_v30 = vpack.c.bf16 %v5435_v1, %v5433_v27  ;;  %v2586_v13 = vpop.f32.mrb[148].mxu0  ;;  %v3696_v51 = vmul.f32 0.01, %v2583_v11  ;;  %vm3216_vm12 = vcmp.ge.f32.partialorder %v2583_v11, 0.0 }
 0x486   :  { %v2587_v24 = vadd.f32 %v2586_v13, %v13005_v38  ;;  %v2588_v29 = vpop.f32.mrb[149].mxu0  ;;  %v15400_v53 = vpack.c.bf16 %v5436_v46, %v5434_v54  ;;  %v4175_v27 = vsel %vm3215_vm11, %v2581_v15, %v3695_v37  ;;  %v5157_v54 = vadd.f32 %v13037_v63, %v4665_v20 }
 0x487   :  { %17966 = vst [vmem:[#allocation110_spill] sm:$0xff] %v15396_v30  ;;  %v2589_v52 = vadd.f32 %v2588_v29, %v13009_v39  ;;  %v4176_v6 = vsel %vm3216_vm12, %v2583_v11, %v3696_v51  ;;  %v5158_v15 = vadd.f32 %v13042_v3, %v4666_v12  ;;  %v4667_v37 = vmul.f32 %v13019_v49, %v4175_v27 }
 0x488   :  { %17967 = vst [vmem:[#allocation111_spill] sm:$0xff] %v15400_v53  ;;  %vm3217_vm13 = vcmp.ge.f32.partialorder %v2587_v24, 0.0  ;;  %v3697_v35 = vmul.f32 0.01, %v2587_v24 }
 0x489   :  { %vm3218_vm14 = vcmp.ge.f32.partialorder %v2589_v52, 0.0  ;;  %v3698_v25 = vmul.f32 0.01, %v2589_v52  ;;  %v2592_v22 = vpop.f32.mrb[150].mxu0 }
 0x48a   :  { %v4177_v10 = vsel %vm3217_vm13, %v2587_v24, %v3697_v35  ;;  %v2593_v8 = vadd.f32 %v2592_v22, %v13005_v38  ;;  %v2594_v32 = vpop.f32.mrb[151].mxu0  ;;  %5854 = vmatmul.mubr.bf16.gmra.mrb[0].mxu0 %v14621_v48  ;;  %v4668_v24 = vmul.f32 %v13029_v55, %v4176_v6 }
 0x48b   :  { %v4669_v1 = vmul.f32 %v13019_v49, %v4177_v10  ;;  %v4178_v44 = vsel %vm3218_vm14, %v2589_v52, %v3698_v25  ;;  %v2595_v46 = vadd.f32 %v2594_v32, %v13009_v39  ;;  %5861 = vmatprep.mubr.bf16.mxu0 %v14855_v2 }
 0x48c   :  { %v4670_v11 = vmul.f32 %v13029_v55, %v4178_v44  ;;  %vm3219_vm0 = vcmp.ge.f32.partialorder %v2593_v8, 0.0  ;;  %v3699_v13 = vmul.f32 0.01, %v2593_v8  ;;  %v11449_v51 = vpop.f32.mrb[36].mxu1 }
 0x48d   :  { %vm3220_vm15 = vcmp.ge.f32.partialorder %v2595_v46, 0.0  ;;  %v3700_v20 = vmul.f32 0.01, %v2595_v46  ;;  %v2598_v29 = vpop.f32.mrb[152].mxu0  ;;  %v11450_v35 = vpop.f32.mrb[37].mxu1  ;;  %v5161_v52 = vadd.f32 %v13037_v63, %v4669_v1 }
 0x48e   :  { %v4179_v25 = vsel %vm3219_vm0, %v2593_v8, %v3699_v13  ;;  %v2599_v22 = vadd.f32 %v2598_v29, %v13005_v38  ;;  %v15416_v10 = vadd.f32 %v11450_v35, %v11449_v51  ;;  %v2600_v12 = vpop.f32.mrb[153].mxu0  ;;  %v11452_v27 = vpop.f32.mrb[38].mxu1  ;;  %v5162_v32 = vadd.f32 %v13042_v3, %v4670_v11 }
 0x48f   :  { %v4671_v44 = vmul.f32 %v13019_v49, %v4179_v25  ;;  %v4180_v2 = vsel %vm3220_vm15, %v2595_v46, %v3700_v20  ;;  %v2601_v6 = vadd.f32 %v2600_v12, %v13009_v39  ;;  %v11453_v48 = vpop.f32.mrb[39].mxu1  ;;  %v5437_v18 = vmax.f32 %v5157_v54, %v5161_v52 }
 0x490   :  { %v4672_v5 = vmul.f32 %v13029_v55, %v4180_v2  ;;  %vm3221_vm1 = vcmp.ge.f32.partialorder %v2599_v22, 0.0  ;;  %v3701_v1 = vmul.f32 0.01, %v2599_v22  ;;  %v15422_v8 = vadd.f32 %v11453_v48, %v11452_v27 }
 0x491   :  { %v3702_v13 = vmul.f32 0.01, %v2601_v6  ;;  %v2604_v51 = vpop.f32.mrb[154].mxu0  ;;  %v5438_v29 = vmax.f32 %v5158_v15, %v5162_v32  ;;  %v5159_v35 = vadd.f32 %v13037_v63, %v4667_v37  ;;  %v5163_v11 = vadd.f32 %v13037_v63, %v4671_v44 }
 0x492   :  { %vm3222_vm2 = vcmp.ge.f32.partialorder %v2601_v6, 0.0  ;;  %v2605_v46 = vadd.f32 %v2604_v51, %v13005_v38  ;;  %v2606_v20 = vpop.f32.mrb[155].mxu0  ;;  %5862 = vmatmul.mubr.bf16.gmra.mrb[4].mxu0 %v14844_v28  ;;  %v5160_v54 = vadd.f32 %v13042_v3, %v4668_v24  ;;  %v5164_v2 = vadd.f32 %v13042_v3, %v4672_v5 }
 0x493   :  { %v4181_v52 = vsel %vm3221_vm1, %v2599_v22, %v3701_v1  ;;  %v2607_v48 = vadd.f32 %v2606_v20, %v13009_v39  ;;  %5869 = vmatprep.mubr.bf16.mxu0 %v15064_v60  ;;  %v5439_v15 = vmax.f32 %v5159_v35, %v5163_v11  ;;  %v4182_v37 = vsel %vm3222_vm2, %v2601_v6, %v3702_v13  ;;  %v17988_v60 = vld [vmem:[#allocation73_spill] sm:$0xff] }
 0x494   :  { %v5440_v25 = vmax.f32 %v5160_v54, %v5164_v2  ;;  %v4673_v32 = vmul.f32 %v13019_v49, %v4181_v52  ;;  %v3703_v44 = vmul.f32 0.01, %v2605_v46  ;;  %vm3223_vm3 = vcmp.ge.f32.partialorder %v2605_v46, 0.0 }
 0x495   :  { %v2610_v12 = vpop.f32.mrb[156].mxu0  ;;  %v15432_v27 = vpack.c.bf16 %v5439_v15, %v5437_v18  ;;  %v3704_v5 = vmul.f32 0.01, %v2607_v48  ;;  %v4674_v1 = vmul.f32 %v13029_v55, %v4182_v37  ;;  %vm3224_vm4 = vcmp.ge.f32.partialorder %v2607_v48, 0.0 }
 0x496   :  { %v2611_v51 = vadd.f32 %v2610_v12, %v13005_v38  ;;  %v2612_v28 = vpop.f32.mrb[157].mxu0  ;;  %v15436_v24 = vpack.c.bf16 %v5440_v25, %v5438_v29  ;;  %v4183_v35 = vsel %vm3223_vm3, %v2605_v46, %v3703_v44  ;;  %v5165_v29 = vadd.f32 %v13037_v63, %v4673_v32 }
 0x497   :  { %17968 = vst [vmem:[#allocation112_spill] sm:$0xff] %v15432_v27  ;;  %v2613_v22 = vadd.f32 %v2612_v28, %v13009_v39  ;;  %v4184_v2 = vsel %vm3224_vm4, %v2607_v48, %v3704_v5  ;;  %v5166_v37 = vadd.f32 %v13042_v3, %v4674_v1  ;;  %v4675_v12 = vmul.f32 %v13019_v49, %v4183_v35 }
 0x498   :  { %17969 = vst [vmem:[#allocation113_spill] sm:$0xff] %v15436_v24  ;;  %vm3225_vm5 = vcmp.ge.f32.partialorder %v2611_v51, 0.0  ;;  %v3705_v6 = vmul.f32 0.01, %v2611_v51  ;;  %v4676_v32 = vmul.f32 %v13029_v55, %v4184_v2 }
 0x499   :  { %vm3226_vm6 = vcmp.ge.f32.partialorder %v2613_v22, 0.0  ;;  %v3706_v18 = vmul.f32 0.01, %v2613_v22  ;;  %v2616_v13 = vpop.f32.mrb[158].mxu0 }
 0x49a   :  { %v4185_v11 = vsel %vm3225_vm5, %v2611_v51, %v3705_v6  ;;  %v2617_v20 = vadd.f32 %v2616_v13, %v13005_v38  ;;  %v2618_v54 = vpop.f32.mrb[159].mxu0  ;;  %5870 = vmatmul.mubr.bf16.gmra.mrb[8].mxu0 %v15051_v16 }
 0x49b   :  { %v4677_v28 = vmul.f32 %v13019_v49, %v4185_v11  ;;  %v4186_v52 = vsel %vm3226_vm6, %v2613_v22, %v3706_v18  ;;  %v2619_v15 = vadd.f32 %v2618_v54, %v13009_v39  ;;  %5877 = vmatprep.mubr.bf16.mxu0 %v15265_v36 }
 0x49c   :  { %v4678_v25 = vmul.f32 %v13029_v55, %v4186_v52  ;;  %vm3227_vm7 = vcmp.ge.f32.partialorder %v2617_v20, 0.0  ;;  %v3707_v46 = vmul.f32 0.01, %v2617_v20 }
 0x49d   :  { %vm3228_vm8 = vcmp.ge.f32.partialorder %v2619_v15, 0.0  ;;  %v3708_v44 = vmul.f32 0.01, %v2619_v15  ;;  %v2622_v51 = vpop.f32.mrb[160].mxu0  ;;  %v5169_v48 = vadd.f32 %v13037_v63, %v4677_v28 }
 0x49e   :  { %v4187_v5 = vsel %vm3227_vm7, %v2617_v20, %v3707_v46  ;;  %v2623_v22 = vadd.f32 %v2622_v51, %v13005_v38  ;;  %v2624_v6 = vpop.f32.mrb[161].mxu0  ;;  %v5170_v18 = vadd.f32 %v13042_v3, %v4678_v25  ;;  %v5167_v20 = vadd.f32 %v13037_v63, %v4675_v12 }
 0x49f   :  { %v4679_v13 = vmul.f32 %v13019_v49, %v4187_v5  ;;  %v4188_v11 = vsel %vm3228_vm8, %v2619_v15, %v3708_v44  ;;  %v2625_v1 = vadd.f32 %v2624_v6, %v13009_v39  ;;  %v5441_v54 = vmax.f32 %v5165_v29, %v5169_v48 }
 0x4a0   :  { %v4680_v35 = vmul.f32 %v13029_v55, %v4188_v11  ;;  %vm3229_vm9 = vcmp.ge.f32.partialorder %v2623_v22, 0.0  ;;  %v3709_v52 = vmul.f32 0.01, %v2623_v22  ;;  %v5442_v36 = vmax.f32 %v5166_v37, %v5170_v18 }
 0x4a1   :  { %v3710_v28 = vmul.f32 0.01, %v2625_v1  ;;  %v2628_v16 = vpop.f32.mrb[162].mxu0  ;;  %v5171_v2 = vadd.f32 %v13037_v63, %v4679_v13  ;;  %vm3230_vm10 = vcmp.ge.f32.partialorder %v2625_v1, 0.0  ;;  %v5168_v15 = vadd.f32 %v13042_v3, %v4676_v32 }
 0x4a2   :  { %v2629_v25 = vadd.f32 %v2628_v16, %v13005_v38  ;;  %v2630_v46 = vpop.f32.mrb[163].mxu0  ;;  %5878 = vmatmul.mubr.bf16.gmra.mrb[12].mxu0 %v15257_v40  ;;  %v5172_v29 = vadd.f32 %v13042_v3, %v4680_v35  ;;  %v4189_v44 = vsel %vm3229_vm9, %v2623_v22, %v3709_v52 }
 0x4a3   :  { %v2631_v51 = vadd.f32 %v2630_v46, %v13009_v39  ;;  %5885 = vmatprep.mubr.bf16.mxu0 %v15400_v53  ;;  %v5443_v37 = vmax.f32 %v5167_v20, %v5171_v2  ;;  %v4190_v12 = vsel %vm3230_vm10, %v2625_v1, %v3710_v28  ;;  %v4681_v16 = vmul.f32 %v13019_v49, %v4189_v44 }
 0x4a4   :  { %v5444_v48 = vmax.f32 %v5168_v15, %v5172_v29  ;;  %v3711_v18 = vmul.f32 0.01, %v2629_v25  ;;  %vm3231_vm11 = vcmp.ge.f32.partialorder %v2629_v25, 0.0  ;;  %v4682_v52 = vmul.f32 %v13029_v55, %v4190_v12 }
 0x4a5   :  { %v2634_v5 = vpop.f32.mrb[164].mxu0  ;;  %v15464_v6 = vpack.c.bf16 %v5443_v37, %v5441_v54  ;;  %v3712_v22 = vmul.f32 0.01, %v2631_v51  ;;  %vm3232_vm12 = vcmp.ge.f32.partialorder %v2631_v51, 0.0 }
 0x4a6   :  { %v2635_v13 = vadd.f32 %v2634_v5, %v13005_v38  ;;  %v2636_v11 = vpop.f32.mrb[165].mxu0  ;;  %v15468_v32 = vpack.c.bf16 %v5444_v48, %v5442_v36  ;;  %v4191_v20 = vsel %vm3231_vm11, %v2629_v25, %v3711_v18  ;;  %v5173_v36 = vadd.f32 %v13037_v63, %v4681_v16 }
 0x4a7   :  { %17970 = vst [vmem:[#allocation114_spill] sm:$0xff] %v15464_v6  ;;  %v2637_v35 = vadd.f32 %v2636_v11, %v13009_v39  ;;  %v4192_v29 = vsel %vm3232_vm12, %v2631_v51, %v3712_v22  ;;  %v5174_v25 = vadd.f32 %v13042_v3, %v4682_v52  ;;  %v4683_v18 = vmul.f32 %v13019_v49, %v4191_v20 }
 0x4a8   :  { %vm3233_vm13 = vcmp.ge.f32.partialorder %v2635_v13, 0.0  ;;  %v3713_v1 = vmul.f32 0.01, %v2635_v13  ;;  %v4684_v51 = vmul.f32 %v13029_v55, %v4192_v29 }
 0x4a9   :  { %vm3234_vm14 = vcmp.ge.f32.partialorder %v2637_v35, 0.0  ;;  %v3714_v54 = vmul.f32 0.01, %v2637_v35  ;;  %v2640_v28 = vpop.f32.mrb[166].mxu0 }
 0x4aa   :  { %v4193_v2 = vsel %vm3233_vm13, %v2635_v13, %v3713_v1  ;;  %v2641_v46 = vadd.f32 %v2640_v28, %v13005_v38  ;;  %v2642_v15 = vpop.f32.mrb[167].mxu0  ;;  %5886 = vmatmul.mubr.bf16.gmra.mrb[16].mxu0 %v15396_v30 }
 0x4ab   :  { %v4685_v44 = vmul.f32 %v13019_v49, %v4193_v2  ;;  %v4194_v37 = vsel %vm3234_vm14, %v2637_v35, %v3714_v54  ;;  %v2643_v48 = vadd.f32 %v2642_v15, %v13009_v39 }
 0x4ac   :  { %v4686_v12 = vmul.f32 %v13029_v55, %v4194_v37  ;;  %vm3235_vm0 = vcmp.ge.f32.partialorder %v2641_v46, 0.0  ;;  %v3715_v5 = vmul.f32 0.01, %v2641_v46 }
 0x4ad   :  { %vm3236_vm15 = vcmp.ge.f32.partialorder %v2643_v48, 0.0  ;;  %v3716_v13 = vmul.f32 0.01, %v2643_v48  ;;  %v2646_v11 = vpop.f32.mrb[168].mxu0  ;;  %v5177_v1 = vadd.f32 %v13037_v63, %v4685_v44 }
 0x4ae   :  { %v4195_v16 = vsel %vm3235_vm0, %v2641_v46, %v3715_v5  ;;  %v2647_v22 = vadd.f32 %v2646_v11, %v13005_v38  ;;  %v2648_v35 = vpop.f32.mrb[169].mxu0  ;;  %v5178_v54 = vadd.f32 %v13042_v3, %v4686_v12  ;;  %v5175_v46 = vadd.f32 %v13037_v63, %v4683_v18 }
 0x4af   :  { %v4687_v28 = vmul.f32 %v13019_v49, %v4195_v16  ;;  %v4196_v2 = vsel %vm3236_vm15, %v2643_v48, %v3716_v13  ;;  %v2649_v52 = vadd.f32 %v2648_v35, %v13009_v39  ;;  %v5445_v15 = vmax.f32 %v5173_v36, %v5177_v1 }
 0x4b0   :  { %v4688_v20 = vmul.f32 %v13029_v55, %v4196_v2  ;;  %v3717_v37 = vmul.f32 0.01, %v2647_v22  ;;  %v5446_v30 = vmax.f32 %v5174_v25, %v5178_v54  ;;  %vm3237_vm1 = vcmp.ge.f32.partialorder %v2647_v22, 0.0 }
 0x4b1   :  { %v3718_v44 = vmul.f32 0.01, %v2649_v52  ;;  %v2652_v53 = vpop.f32.mrb[170].mxu0  ;;  %v5179_v29 = vadd.f32 %v13037_v63, %v4687_v28  ;;  %vm3238_vm2 = vcmp.ge.f32.partialorder %v2649_v52, 0.0  ;;  %v5176_v48 = vadd.f32 %v13042_v3, %v4684_v51 }
 0x4b2   :  { %v2653_v12 = vadd.f32 %v2652_v53, %v13005_v38  ;;  %v2654_v5 = vpop.f32.mrb[171].mxu0  ;;  %v5180_v13 = vadd.f32 %v13042_v3, %v4688_v20  ;;  %v4197_v1 = vsel %vm3237_vm1, %v2647_v22, %v3717_v37 }
 0x4b3   :  { %v2655_v36 = vadd.f32 %v2654_v5, %v13009_v39  ;;  %v5447_v11 = vmax.f32 %v5175_v46, %v5179_v29  ;;  %v4198_v35 = vsel %vm3238_vm2, %v2649_v52, %v3718_v44  ;;  %v4689_v20 = vmul.f32 %v13019_v49, %v4197_v1 }
 0x4b4   :  { %vm3239_vm3 = vcmp.ge.f32.partialorder %v2653_v12, 0.0  ;;  %v3719_v25 = vmul.f32 0.01, %v2653_v12  ;;  %v5448_v16 = vmax.f32 %v5176_v48, %v5180_v13  ;;  %v4690_v37 = vmul.f32 %v13029_v55, %v4198_v35 }
 0x4b5   :  { %vm3240_vm4 = vcmp.ge.f32.partialorder %v2655_v36, 0.0  ;;  %v3720_v18 = vmul.f32 0.01, %v2655_v36  ;;  %v2658_v54 = vpop.f32.mrb[172].mxu0  ;;  %v15493_v28 = vpack.c.bf16 %v5447_v11, %v5445_v15 }
 0x4b6   :  { %v4199_v2 = vsel %vm3239_vm3, %v2653_v12, %v3719_v25  ;;  %v2659_v53 = vadd.f32 %v2658_v54, %v13005_v38  ;;  %v2660_v40 = vpop.f32.mrb[173].mxu0  ;;  %v15496_v51 = vpack.c.bf16 %v5448_v16, %v5446_v30  ;;  %v5182_v16 = vadd.f32 %v13042_v3, %v4690_v37 }
 0x4b7   :  { %17971 = vst [vmem:[#allocation115_spill] sm:$0xff] %v15493_v28  ;;  %v4200_v5 = vsel %vm3240_vm4, %v2655_v36, %v3720_v18  ;;  %v2661_v22 = vadd.f32 %v2660_v40, %v13009_v39  ;;  %v4691_v15 = vmul.f32 %v13019_v49, %v4199_v2  ;;  %v5181_v40 = vadd.f32 %v13037_v63, %v4689_v20 }
 0x4b8   :  { %17972 = vst [vmem:[#allocation116_spill] sm:$0xff] %v15496_v51  ;;  %vm3241_vm5 = vcmp.ge.f32.partialorder %v2659_v53, 0.0  ;;  %v3721_v52 = vmul.f32 0.01, %v2659_v53  ;;  %6134 = vmatprep.mubr.bf16.mxu1 %v15496_v51  ;;  %v4692_v30 = vmul.f32 %v13029_v55, %v4200_v5 }
 0x4b9   :  { %vm3242_vm6 = vcmp.ge.f32.partialorder %v2661_v22, 0.0  ;;  %v3722_v44 = vmul.f32 0.01, %v2661_v22  ;;  %v2664_v46 = vpop.f32.mrb[174].mxu0  ;;  %6135 = vmatmul.mubr.bf16.gmra.mrb[52].mxu1 %v15493_v28  ;;  %v5183_v35 = vadd.f32 %v13037_v63, %v4691_v15 }
 0x4ba   :  { %v4201_v29 = vsel %vm3241_vm5, %v2659_v53, %v3721_v52  ;;  %v2665_v12 = vadd.f32 %v2664_v46, %v13005_v38  ;;  %v2666_v48 = vpop.f32.mrb[175].mxu0  ;;  %6303 = vmatprep.mubr.bf16.mxu1 %v13172_v26  ;;  %v12204_v53 = vld [vmem:[%s17728_s5 + $0x180] sm:$0xff]   ;;  %v5184_v20 = vadd.f32 %v13042_v3, %v4692_v30  ;;  %v12205_v46 = vld [vmem:[%s17728_s5 + $0x1c8] sm:$0xff]  }
 0x4bb   :  { %v4693_v13 = vmul.f32 %v13019_v49, %v4201_v29  ;;  %v4202_v36 = vsel %vm3242_vm6, %v2661_v22, %v3722_v44  ;;  %v2667_v11 = vadd.f32 %v2666_v48, %v13009_v39 }
 0x4bc   :  { %v4694_v1 = vmul.f32 %v13029_v55, %v4202_v36  ;;  %vm3243_vm7 = vcmp.ge.f32.partialorder %v2665_v12, 0.0  ;;  %v3723_v25 = vmul.f32 0.01, %v2665_v12 }
 0x4bd   :  { %v5185_v18 = vadd.f32 %v13037_v63, %v4693_v13  ;;  %vm3244_vm8 = vcmp.ge.f32.partialorder %v2667_v11, 0.0  ;;  %v3724_v54 = vmul.f32 0.01, %v2667_v11  ;;  %v2670_v26 = vpop.f32.mrb[176].mxu0 }
 0x4be   :  { %v4203_v2 = vsel %vm3243_vm7, %v2665_v12, %v3723_v25  ;;  %v5186_v5 = vadd.f32 %v13042_v3, %v4694_v1  ;;  %v2671_v22 = vadd.f32 %v2670_v26, %v13005_v38  ;;  %v2672_v52 = vpop.f32.mrb[177].mxu0 }
 0x4bf   :  { %v5449_v37 = vmax.f32 %v5181_v40, %v5185_v18  ;;  %v4695_v15 = vmul.f32 %v13019_v49, %v4203_v2  ;;  %v4204_v44 = vsel %vm3244_vm8, %v2667_v11, %v3724_v54  ;;  %v2673_v29 = vadd.f32 %v2672_v52, %v13009_v39  ;;  %v12206_v11 = vld [vmem:[%s17728_s5 + $0x188] sm:$0xff]  }
 0x4c0   :  { %v4696_v12 = vmul.f32 %v13029_v55, %v4204_v44  ;;  %v5450_v48 = vmax.f32 %v5182_v16, %v5186_v5  ;;  %vm3245_vm9 = vcmp.ge.f32.partialorder %v2671_v22, 0.0  ;;  %v3725_v30 = vmul.f32 0.01, %v2671_v22 }
 0x4c1   :  { %v5187_v13 = vadd.f32 %v13037_v63, %v4695_v15  ;;  %6304 = vmatmul.mubr.bf16.vlgmr.msra.gmra.mrb[56].mxu1 %v13166_v21  ;;  %v2676_v36 = vpop.f32.mrb[178].mxu0  ;;  %v3726_v25 = vmul.f32 0.01, %v2673_v29  ;;  %v12207_v21 = vld [vmem:[%s17728_s5 + $0x1d0] sm:$0xff]   ;;  %vm3246_vm10 = vcmp.ge.f32.partialorder %v2673_v29, 0.0 }
 0x4c2   :  { %11580 = vmatpush3.bf16.msra.mxu1 %v12204_v53  ;;  %6311 = vmatprep.mubr.bf16.mxu1 %v13357_v41  ;;  %v5188_v40 = vadd.f32 %v13042_v3, %v4696_v12  ;;  %v4205_v1 = vsel %vm3245_vm9, %v2671_v22, %v3725_v30  ;;  %v2677_v16 = vadd.f32 %v2676_v36, %v13005_v38  ;;  %v2678_v18 = vpop.f32.mrb[179].mxu0 }
 0x4c3   :  { %v5451_v54 = vmax.f32 %v5183_v35, %v5187_v13  ;;  %11581 = vmatprep.subr.bf16.mxu1 %v12205_v46  ;;  %v2679_v26 = vadd.f32 %v2678_v18, %v13009_v39  ;;  %v4697_v52 = vmul.f32 %v13019_v49, %v4205_v1  ;;  %v12208_v35 = vld [vmem:[%s17728_s5 + $0x190] sm:$0xff]   ;;  %v4206_v46 = vsel %vm3246_vm10, %v2673_v29, %v3726_v25  ;;  %v17975_v1 = vld [vmem:[#allocation23_spill] sm:$0xff] }
 0x4c4   :  { %v5452_v2 = vmax.f32 %v5184_v20, %v5188_v40  ;;  %v3727_v53 = vmul.f32 0.01, %v2677_v16  ;;  %vm3247_vm11 = vcmp.ge.f32.partialorder %v2677_v16, 0.0  ;;  %v4698_v29 = vmul.f32 %v13029_v55, %v4206_v46  ;;  %v12210_v25 = vld [vmem:[%s17728_s5 + $0x198] sm:$0xff]  }
 0x4c5   :  { %v15538_v5 = vpack.c.bf16 %v5451_v54, %v5449_v37  ;;  %v3728_v22 = vmul.f32 0.01, %v2679_v26  ;;  %v2682_v15 = vpop.f32.mrb[180].mxu0  ;;  %vm3248_vm12 = vcmp.ge.f32.partialorder %v2679_v26, 0.0  ;;  %v12209_v37 = vld [vmem:[%s17728_s5 + $0x1d8] sm:$0xff]  }
 0x4c6   :  { %v15541_v44 = vpack.c.bf16 %v5452_v2, %v5450_v48  ;;  %11582 = vmatpush3.bf16.msra.mxu1 %v12206_v11  ;;  %v2683_v12 = vadd.f32 %v2682_v15, %v13005_v38  ;;  %v2684_v20 = vpop.f32.mrb[181].mxu0  ;;  %v4207_v48 = vsel %vm3247_vm11, %v2677_v16, %v3727_v53  ;;  %v12211_v15 = vld [vmem:[%s17728_s5 + $0x1e0] sm:$0xff]  }
 0x4c7   :  { %17973 = vst [vmem:[#allocation117_spill] sm:$0xff] %v15538_v5  ;;  %11583 = vmatprep.subr.bf16.mxu1 %v12207_v21  ;;  %v2685_v30 = vadd.f32 %v2684_v20, %v13009_v39  ;;  %v4208_v36 = vsel %vm3248_vm12, %v2679_v26, %v3728_v22  ;;  %v5189_v21 = vadd.f32 %v13037_v63, %v4697_v52 }
 0x4c8   :  { %17974 = vst [vmem:[#allocation118_spill] sm:$0xff] %v15541_v44  ;;  %5893 = vmatprep.mubr.bf16.mxu0 %v15541_v44  ;;  %vm3249_vm13 = vcmp.ge.f32.partialorder %v2683_v12, 0.0  ;;  %v3729_v13 = vmul.f32 0.01, %v2683_v12  ;;  %v4699_v2 = vmul.f32 %v13019_v49, %v4207_v48  ;;  %v4700_v46 = vmul.f32 %v13029_v55, %v4208_v36  ;;  %v12212_v36 = vld [vmem:[%s17728_s5 + $0x1a0] sm:$0xff]  }
 0x4c9   :  { %5894 = vmatmul.mubr.bf16.gmra.mrb[20].mxu0 %v15538_v5  ;;  %6312 = vmatmul.mubr.bf16.gmra.mrb[60].mxu1 %v13351_v31  ;;  %vm3250_vm14 = vcmp.ge.f32.partialorder %v2685_v30, 0.0  ;;  %v3730_v40 = vmul.f32 0.01, %v2685_v30  ;;  %v2688_v11 = vpop.f32.mrb[182].mxu0  ;;  %v17987_v5 = vld [vmem:[#allocation62_spill] sm:$0xff] }
 0x4ca   :  { %6319 = vmatprep.mubr.bf16.mxu1 %v17975_v1  ;;  %11584 = vmatpush3.bf16.msra.mxu1 %v12208_v35  ;;  %v4209_v16 = vsel %vm3249_vm13, %v2683_v12, %v3729_v13  ;;  %v2689_v18 = vadd.f32 %v2688_v11, %v13005_v38  ;;  %v2690_v54 = vpop.f32.mrb[183].mxu0 }
 0x4cb   :  { %11585 = vmatprep.subr.bf16.mxu1 %v12209_v37  ;;  %v4701_v26 = vmul.f32 %v13019_v49, %v4209_v16  ;;  %v4210_v53 = vsel %vm3250_vm14, %v2685_v30, %v3730_v40  ;;  %v2691_v22 = vadd.f32 %v2690_v54, %v13009_v39  ;;  %v5190_v30 = vadd.f32 %v13042_v3, %v4698_v29  ;;  %v12213_v29 = vld [vmem:[%s17728_s5 + $0x1e8] sm:$0xff]  }
 0x4cc   :  { %v11455_v35 = vpop.f32.mrb[40].mxu1  ;;  %v4702_v12 = vmul.f32 %v13029_v55, %v4210_v53  ;;  %vm3251_vm0 = vcmp.ge.f32.partialorder %v2689_v18, 0.0  ;;  %v3731_v20 = vmul.f32 0.01, %v2689_v18 }
 0x4cd   :  { %v11456_v52 = vpop.f32.mrb[41].mxu1  ;;  %vm3252_vm15 = vcmp.ge.f32.partialorder %v2691_v22, 0.0  ;;  %v3732_v37 = vmul.f32 0.01, %v2691_v22  ;;  %v15569_v48 = vpop.f32.mrb[184].mxu0  ;;  %v5193_v13 = vadd.f32 %v13037_v63, %v4701_v26 }
 0x4ce   :  { %v15573_v40 = vadd.f32 %v11456_v52, %v11455_v35  ;;  %v11458_v11 = vpop.f32.mrb[42].mxu1  ;;  %11586 = vmatpush3.bf16.msra.mxu1 %v12210_v25  ;;  %v4211_v16 = vsel %vm3251_vm0, %v2689_v18, %v3731_v20  ;;  %v15575_v54 = vpop.f32.mrb[185].mxu0  ;;  %v5194_v53 = vadd.f32 %v13042_v3, %v4702_v12  ;;  %v5191_v25 = vadd.f32 %v13037_v63, %v4699_v2  ;;  %v17976_v52 = vld [vmem:[#allocation22_spill] sm:$0xff] }
 0x4cf   :  { %v11459_v1 = vpop.f32.mrb[43].mxu1  ;;  %v4703_v31 = vmul.f32 %v13019_v49, %v4211_v16  ;;  %v4212_v41 = vsel %vm3252_vm15, %v2691_v22, %v3732_v37  ;;  %11587 = vmatprep.subr.bf16.mxu1 %v12211_v15  ;;  %v5453_v18 = vmax.f32 %v5189_v21, %v5193_v13  ;;  %v5192_v20 = vadd.f32 %v13042_v3, %v4700_v46  ;;  %v17977_v15 = vld [vmem:[#allocation33_spill] sm:$0xff] }
 0x4d0   :  { %v15586_v26 = vadd.f32 %v11459_v1, %v11458_v11  ;;  %v4704_v35 = vmul.f32 %v13029_v55, %v4212_v41  ;;  %v5454_v16 = vmax.f32 %v5190_v30, %v5194_v53  ;;  %v12214_v1 = vld [vmem:[%s17728_s5 + $0x1a8] sm:$0xff]   ;;  %v12215_v41 = vld [vmem:[%s17728_s5 + $0x1f0] sm:$0xff]   ;;  %v12217_v53 = vld [vmem:[%s17728_s5 + $0x1f8] sm:$0xff]   ;;  %v15656_v9 = vadd.f32 %v15569_v48, %v13005_v38 }
 0x4d1   :  { %6320 = vmatmul.mubr.bf16.gmra.mrb[64].mxu1 %v17976_v52  ;;  %v15591_v12 = vpop.f32.mrb[186].mxu0  ;;  %v5195_v22 = vadd.f32 %v13037_v63, %v4703_v31  ;;  %v12216_v11 = vld [vmem:[%s17728_s5 + $0x1b0] sm:$0xff]  }
 0x4d2   :  { %6327 = vmatprep.mubr.bf16.mxu1 %v17977_v15  ;;  %v2702_v37 = vpop.f32.mrb[187].mxu0  ;;  %11588 = vmatpush3.bf16.msra.mxu1 %v12212_v36  ;;  %v5196_v21 = vadd.f32 %v13042_v3, %v4704_v35  ;;  %v17981_v35 = vld [vmem:[#allocation43_spill] sm:$0xff]  ;;  %vm3253_vm5 = vcmp.ge.f32.partialorder %v15656_v9, 0.0 }
 0x4d3   :  { %11589 = vmatprep.subr.bf16.mxu1 %v12213_v29  ;;  %v5455_v2 = vmax.f32 %v5191_v25, %v5195_v22  ;;  %v17980_v29 = vld [vmem:[#allocation32_spill] sm:$0xff]  ;;  %v17985_v15 = vld [vmem:[#allocation63_spill] sm:$0xff] }
 0x4d4   :  { %v5456_v46 = vmax.f32 %v5192_v20, %v5196_v21  ;;  %v12218_v20 = vld [vmem:[%s17728_s5 + $0x1b8] sm:$0xff]  }
 0x4d5   :  { %v15602_v30 = vpop.f32.mrb[188].mxu0  ;;  %v15604_v31 = vpack.c.bf16 %v5455_v2, %v5453_v18  ;;  %v17982_v21 = vld [vmem:[#allocation42_spill] sm:$0xff]  ;;  %v17983_v2 = vld [vmem:[#allocation53_spill] sm:$0xff] }
 0x4d6   :  { %v2708_v13 = vpop.f32.mrb[189].mxu0  ;;  %11590 = vmatpush3.bf16.msra.mxu1 %v12214_v1  ;;  %v15609_v36 = vpack.c.bf16 %v5456_v46, %v5454_v16  ;;  %v12219_v16 = vld [vmem:[%s17728_s5 + $0x240] sm:$0xff]  }
 0x4d7   :  { %17978 = vst [vmem:[#allocation119_spill] sm:$0xff] %v15604_v31  ;;  %11591 = vmatprep.subr.bf16.mxu1 %v12215_v41  ;;  %v2709_v28 = vadd.f32 %v2708_v13, %v13009_v39 }
 0x4d8   :  { %17979 = vst [vmem:[#allocation120_spill] sm:$0xff] %v15609_v36 }
 0x4d9   :  { %6328 = vmatmul.mubr.bf16.gmra.mrb[68].mxu1 %v17980_v29  ;;  %v15615_v25 = vpop.f32.mrb[190].mxu0  ;;  %v3738_v45 = vmul.f32 0.01, %v2709_v28  ;;  %vm3258_vm8 = vcmp.ge.f32.partialorder %v2709_v28, 0.0 }
 0x4da   :  { %6335 = vmatprep.mubr.bf16.mxu1 %v17981_v35  ;;  %v2714_v18 = vpop.f32.mrb[191].mxu0  ;;  %11592 = vmatpush3.bf16.msra.mxu1 %v12216_v11  ;;  %v17984_v35 = vld [vmem:[#allocation52_spill] sm:$0xff] }
 0x4db   :  { %11593 = vmatprep.subr.bf16.mxu1 %v12217_v53  ;;  %v2715_v48 = vadd.f32 %v2714_v18, %v13009_v39 }
 0x4dd   :  { %v15624_v22 = vpop.f32.mrb[192].mxu0  ;;  %vm3260_vm9 = vcmp.ge.f32.partialorder %v2715_v48, 0.0 }
 0x4de   :  { %v15626_v1 = vpop.f32.mrb[193].mxu0  ;;  %11594 = vmatpush3.bf16.msra.mxu1 %v12218_v20 }
 0x4df   :  { %11679 = vmatprep.subr.bf16.mxu1 %v12219_v16 }
 0x4e1   :  { %6336 = vmatmul.mubr.bf16.gmra.mrb[72].mxu1 %v17982_v21  ;;  %v15629_v41 = vpop.f32.mrb[194].mxu0 }
 0x4e2   :  { %6343 = vmatprep.mubr.bf16.mxu1 %v17983_v2  ;;  %v15632_v46 = vpop.f32.mrb[195].mxu0 }
 0x4e5   :  { %v15634_v11 = vpop.f32.mrb[196].mxu0 }
 0x4e6   :  { %v15636_v53 = vpop.f32.mrb[197].mxu0 }
 0x4e9   :  { %6344 = vmatmul.mubr.bf16.gmra.mrb[76].mxu1 %v17984_v35  ;;  %v15639_v29 = vpop.f32.mrb[198].mxu0 }
 0x4ea   :  { %6351 = vmatprep.mubr.bf16.mxu1 %v17985_v15  ;;  %v15642_v20 = vpop.f32.mrb[199].mxu0  ;;  %v2697_v15 = vadd.f32 %v15575_v54, %v13009_v39 }
 0x4ec   :  { %vm3254_vm4 = vcmp.ge.f32.partialorder %v2697_v15, 0.0 }
 0x4ed   :  { %v2742_v16 = vpop.f32.mrb[200].mxu0 }
 0x4ee   :  { %v2743_v21 = vadd.f32 %v2742_v16, %v13005_v38  ;;  %v15645_v52 = vpop.f32.mrb[201].mxu0 }
 0x4ef   :  { %17986 = vst [vmem:[#allocation121_spill] sm:$0xff] %v15645_v52  ;;  %v4218_v52 = vsel %vm3258_vm8, %v2709_v28, %v3738_v45 }
 0x4f0   :  { %v3749_v2 = vmul.f32 0.01, %v2743_v21  ;;  %vm3269_vm1 = vcmp.ge.f32.partialorder %v2743_v21, 0.0  ;;  %v4710_v45 = vmul.f32 %v13029_v55, %v4218_v52 }
 0x4f1   :  { %6352 = vmatmul.mubr.bf16.gmra.mrb[80].mxu1 %v17987_v5  ;;  %v2748_v44 = vpop.f32.mrb[202].mxu0  ;;  %v2703_v5 = vadd.f32 %v2702_v37, %v13009_v39  ;;  %v2701_v37 = vadd.f32 %v15591_v12, %v13005_v38  ;;  %v2707_v12 = vadd.f32 %v15602_v30, %v13005_v38 }
 0x4f2   :  { %6359 = vmatprep.mubr.bf16.mxu1 %v17988_v60  ;;  %v2749_v35 = vadd.f32 %v2748_v44, %v13005_v38  ;;  %v15650_v58 = vpop.f32.mrb[203].mxu0  ;;  %v4229_v34 = vsel %vm3269_vm1, %v2743_v21, %v3749_v2  ;;  %v3734_v44 = vmul.f32 0.01, %v2697_v15  ;;  %v17991_v2 = vld [vmem:[#allocation72_spill] sm:$0xff] }
 0x4f3   :  { %17989 = vst [vmem:[#allocation122_spill] sm:$0xff] %v15650_v58  ;;  %v4721_v17 = vmul.f32 %v13019_v49, %v4229_v34  ;;  %vm3256_vm6 = vcmp.ge.f32.partialorder %v2703_v5, 0.0  ;;  %v3733_v58 = vmul.f32 0.01, %v15656_v9  ;;  %vm3255_vm11 = vcmp.ge.f32.partialorder %v2701_v37, 0.0 }
 0x4f4   :  { %v3751_v59 = vmul.f32 0.01, %v2749_v35  ;;  %vm3271_vm2 = vcmp.ge.f32.partialorder %v2749_v35, 0.0  ;;  %v4214_v4 = vsel %vm3254_vm4, %v2697_v15, %v3734_v44  ;;  %v2713_v15 = vadd.f32 %v15615_v25, %v13005_v38 }
 0x4f5   :  { %v2754_v16 = vpop.f32.mrb[204].mxu0  ;;  %vm3257_vm12 = vcmp.ge.f32.partialorder %v2707_v12, 0.0 }
 0x4f6   :  { %v2755_v62 = vadd.f32 %v2754_v16, %v13005_v38  ;;  %v15660_v60 = vpop.f32.mrb[205].mxu0  ;;  %v4231_v54 = vsel %vm3271_vm2, %v2749_v35, %v3751_v59  ;;  %v3736_v16 = vmul.f32 0.01, %v2703_v5  ;;  %v5213_v35 = vadd.f32 %v13037_v63, %v4721_v17 }
 0x4f7   :  { %17990 = vst [vmem:[#allocation123_spill] sm:$0xff] %v15660_v60  ;;  %vm3259_vm13 = vcmp.ge.f32.partialorder %v2713_v15, 0.0 }
 0x4f8   :  { %vm3273_vm3 = vcmp.ge.f32.partialorder %v2755_v62, 0.0  ;;  %v3753_v21 = vmul.f32 0.01, %v2755_v62 }
 0x4f9   :  { %6360 = vmatmul.mubr.bf16.gmra.mrb[84].mxu1 %v17991_v2  ;;  %v2760_v51 = vpop.f32.mrb[206].mxu0  ;;  %v4723_v2 = vmul.f32 %v13019_v49, %v4231_v54 }
 0x4fa   :  { %6367 = vmatprep.mubr.bf16.mxu1 %v17992_v42  ;;  %v4233_v34 = vsel %vm3273_vm3, %v2755_v62, %v3753_v21  ;;  %v2761_v13 = vadd.f32 %v2760_v51, %v13005_v38  ;;  %v15671_v59 = vpop.f32.mrb[207].mxu0  ;;  %v3740_v62 = vmul.f32 0.01, %v2715_v48  ;;  %v4216_v42 = vsel %vm3256_vm6, %v2703_v5, %v3736_v16 }
 0x4fb   :  { %17993 = vst [vmem:[#allocation124_spill] sm:$0xff] %v15671_v59  ;;  %v4725_v18 = vmul.f32 %v13019_v49, %v4233_v34  ;;  %v5215_v44 = vadd.f32 %v13037_v63, %v4723_v2  ;;  %v3735_v16 = vmul.f32 0.01, %v2701_v37  ;;  %v4708_v25 = vmul.f32 %v13029_v55, %v4216_v42 }
 0x4fc   :  { %vm3275_vm7 = vcmp.ge.f32.partialorder %v2761_v13, 0.0  ;;  %v3755_v60 = vmul.f32 0.01, %v2761_v13  ;;  %v3737_v2 = vmul.f32 0.01, %v2707_v12  ;;  %v4213_v42 = vsel %vm3253_vm5, %v15656_v9, %v3733_v58 }
 0x4fd   :  { %v5217_v51 = vadd.f32 %v13037_v63, %v4725_v18  ;;  %v2766_v21 = vpop.f32.mrb[208].mxu0  ;;  %v4706_v18 = vmul.f32 %v13029_v55, %v4214_v4  ;;  %v3739_v4 = vmul.f32 0.01, %v2713_v15 }
 0x4fe   :  { %v4235_v59 = vsel %vm3275_vm7, %v2761_v13, %v3755_v60  ;;  %v2767_v17 = vadd.f32 %v2766_v21, %v13005_v38  ;;  %v15680_v54 = vpop.f32.mrb[209].mxu0  ;;  %v4220_v60 = vsel %vm3260_vm9, %v2715_v48, %v3740_v62  ;;  %v17995_v13 = vld [vmem:[#allocation82_spill] sm:$0xff] }
 0x4ff   :  { %17994 = vst [vmem:[#allocation125_spill] sm:$0xff] %v15680_v54  ;;  %v5465_v34 = vmax.f32 %v5213_v35, %v5217_v51  ;;  %v4727_v30 = vmul.f32 %v13019_v49, %v4235_v59  ;;  %v17996_v35 = vld [vmem:[#allocation93_spill] sm:$0xff]  ;;  %v4712_v48 = vmul.f32 %v13029_v55, %v4220_v60  ;;  %v5200_v60 = vadd.f32 %v13042_v3, %v4708_v25 }
 0x500   :  { %v3757_v5 = vmul.f32 0.01, %v2767_v17  ;;  %vm3277_vm10 = vcmp.ge.f32.partialorder %v2767_v17, 0.0 }
 0x501   :  { %6368 = vmatmul.mubr.bf16.gmra.mrb[88].mxu1 %v17995_v13  ;;  %v5219_v21 = vadd.f32 %v13037_v63, %v4727_v30  ;;  %v2772_v54 = vpop.f32.mrb[210].mxu0  ;;  %v4215_v13 = vsel %vm3255_vm11, %v2701_v37, %v3735_v16  ;;  %v5204_v37 = vadd.f32 %v13042_v3, %v4712_v48 }
 0x502   :  { %6375 = vmatprep.mubr.bf16.mxu1 %v17996_v35  ;;  %v2773_v59 = vadd.f32 %v2772_v54, %v13005_v38  ;;  %v15693_v51 = vpop.f32.mrb[211].mxu0  ;;  %v4237_v62 = vsel %vm3277_vm10, %v2767_v17, %v3757_v5  ;;  %v4219_v17 = vsel %vm3259_vm13, %v2713_v15, %v3739_v4 }
 0x503   :  { %17997 = vst [vmem:[#allocation126_spill] sm:$0xff] %v15693_v51  ;;  %v5467_v28 = vmax.f32 %v5215_v44, %v5219_v21  ;;  %v4217_v51 = vsel %vm3257_vm12, %v2707_v12, %v3737_v2  ;;  %v5198_v44 = vadd.f32 %v13042_v3, %v4706_v18  ;;  %v4729_v5 = vmul.f32 %v13019_v49, %v4237_v62  ;;  %v18000_v2 = vld [vmem:[#allocation92_spill] sm:$0xff] }
 0x504   :  { %v3759_v30 = vmul.f32 0.01, %v2773_v59  ;;  %vm3279_vm14 = vcmp.ge.f32.partialorder %v2773_v59, 0.0  ;;  %v5202_v21 = vadd.f32 %v13042_v3, %v4710_v45  ;;  %v4705_v12 = vmul.f32 %v13019_v49, %v4213_v42 }
 0x505   :  { %v15700_v35 = vpack.c.bf16 %v5467_v28, %v5465_v34  ;;  %v2778_v54 = vpop.f32.mrb[212].mxu0  ;;  %v4707_v34 = vmul.f32 %v13019_v49, %v4215_v13  ;;  %v4709_v16 = vmul.f32 %v13019_v49, %v4217_v51  ;;  %v4711_v15 = vmul.f32 %v13019_v49, %v4219_v17 }
 0x506   :  { %v2779_v6 = vadd.f32 %v2778_v54, %v13005_v38  ;;  %v15703_v52 = vpop.f32.mrb[213].mxu0  ;;  %v4239_v9 = vsel %vm3279_vm14, %v2773_v59, %v3759_v30  ;;  %v5458_v25 = vmax.f32 %v5198_v44, %v5202_v21  ;;  %v5460_v28 = vmax.f32 %v5200_v60, %v5204_v37 }
 0x507   :  { %17998 = vst [vmem:[#allocation127_spill] sm:$0xff] %v15700_v35  ;;  %17999 = vst [vmem:[#allocation128_spill] sm:$0xff] %v15703_v52  ;;  %v5221_v48 = vadd.f32 %v13037_v63, %v4729_v5  ;;  %v4731_v13 = vmul.f32 %v13019_v49, %v4239_v9  ;;  %v5197_v17 = vadd.f32 %v13037_v63, %v4705_v12 }
 0x508   :  { %vm3281_vm0 = vcmp.ge.f32.partialorder %v2779_v6, 0.0  ;;  %v3761_v58 = vmul.f32 0.01, %v2779_v6  ;;  %v15722_v42 = vpack.c.bf16 %v5460_v28, %v5458_v25  ;;  %v5199_v21 = vadd.f32 %v13037_v63, %v4707_v34 }
 0x509   :  { %6376 = vmatmul.mubr.bf16.gmra.mrb[92].mxu1 %v18000_v2  ;;  %v2784_v18 = vpop.f32.mrb[214].mxu0  ;;  %v5201_v60 = vadd.f32 %v13037_v63, %v4709_v16  ;;  %v5203_v25 = vadd.f32 %v13037_v63, %v4711_v15  ;;  %v18033_v2 = vld [vmem:[#allocation55_spill] sm:$0xff] }
 0x50a   :  { %6383 = vmatprep.mubr.bf16.mxu1 %v15119_v0  ;;  %v4241_v45 = vsel %vm3281_vm0, %v2779_v6, %v3761_v58  ;;  %v2785_v59 = vadd.f32 %v2784_v18, %v13005_v38  ;;  %v15717_v4 = vpop.f32.mrb[215].mxu0  ;;  %18002 = vst [vmem:[#allocation130_spill] sm:$0xff] %v15722_v42 }
 0x50b   :  { %18001 = vst [vmem:[#allocation129_spill] sm:$0xff] %v15717_v4  ;;  %v4733_v51 = vmul.f32 %v13019_v49, %v4241_v45  ;;  %v5223_v45 = vadd.f32 %v13037_v63, %v4731_v13  ;;  %v5459_v13 = vmax.f32 %v5199_v21, %v5203_v25 }
 0x50c   :  { %v11461_v62 = vpop.f32.mrb[44].mxu1  ;;  %vm3283_vm15 = vcmp.ge.f32.partialorder %v2785_v59, 0.0  ;;  %v3763_v30 = vmul.f32 0.01, %v2785_v59 }
 0x50d   :  { %v11462_v54 = vpop.f32.mrb[45].mxu1  ;;  %v5225_v44 = vadd.f32 %v13037_v63, %v4733_v51  ;;  %v2790_v6 = vpop.f32.mrb[216].mxu0 }
 0x50e   :  { %v15728_v5 = vadd.f32 %v11462_v54, %v11461_v62  ;;  %v11464_v9 = vpop.f32.mrb[46].mxu1  ;;  %v4243_v58 = vsel %vm3283_vm15, %v2785_v59, %v3763_v30  ;;  %v2791_v37 = vadd.f32 %v2790_v6, %v13005_v38  ;;  %v15731_v18 = vpop.f32.mrb[217].mxu0  ;;  %v5457_v62 = vmax.f32 %v5197_v17, %v5201_v60 }
 0x50f   :  { %18003 = vst [vmem:[#allocation131_spill] sm:$0xff] %v15731_v18  ;;  %v11465_v28 = vpop.f32.mrb[47].mxu1  ;;  %v5469_v51 = vmax.f32 %v5221_v48, %v5225_v44  ;;  %v4735_v12 = vmul.f32 %v13019_v49, %v4243_v58  ;;  %v18032_v18 = vld [vmem:[#allocation44_spill] sm:$0xff] }
 0x510   :  { %v15736_v0 = vadd.f32 %v11465_v28, %v11464_v9  ;;  %v3765_v34 = vmul.f32 0.01, %v2791_v37  ;;  %vm3285_vm1 = vcmp.ge.f32.partialorder %v2791_v37, 0.0  ;;  %v15744_v6 = vpack.c.bf16 %v5459_v13, %v5457_v62 }
 0x511   :  { %6384 = vmatmul.mubr.bf16.gmra.mrb[96].mxu1 %v15114_v56  ;;  %v5227_v16 = vadd.f32 %v13037_v63, %v4735_v12  ;;  %v2796_v59 = vpop.f32.mrb[218].mxu0 }
 0x512   :  { %6391 = vmatprep.mubr.bf16.mxu1 %v15302_v7  ;;  %v2797_v15 = vadd.f32 %v2796_v59, %v13005_v38  ;;  %v15742_v30 = vpop.f32.mrb[219].mxu0  ;;  %v4245_v54 = vsel %vm3285_vm1, %v2791_v37, %v3765_v34  ;;  %18005 = vst [vmem:[#allocation133_spill] sm:$0xff] %v15744_v6  ;;  %v18029_v7 = vld [vmem:[#allocation45_spill] sm:$0xff] }
 0x513   :  { %18004 = vst [vmem:[#allocation132_spill] sm:$0xff] %v15742_v30  ;;  %v5471_v48 = vmax.f32 %v5223_v45, %v5227_v16  ;;  %v4737_v17 = vmul.f32 %v13019_v49, %v4245_v54 }
 0x514   :  { %v3767_v44 = vmul.f32 0.01, %v2797_v15  ;;  %vm3287_vm2 = vcmp.ge.f32.partialorder %v2797_v15, 0.0 }
 0x515   :  { %v15746_v9 = vpack.c.bf16 %v5471_v48, %v5469_v51  ;;  %v2802_v58 = vpop.f32.mrb[220].mxu0  ;;  %v5229_v51 = vadd.f32 %v13037_v63, %v4737_v17 }
 0x516   :  { %v2803_v28 = vadd.f32 %v2802_v58, %v13005_v38  ;;  %v15749_v12 = vpop.f32.mrb[221].mxu0  ;;  %v4247_v60 = vsel %vm3287_vm2, %v2797_v15, %v3767_v44 }
 0x517   :  { %18006 = vst [vmem:[#allocation134_spill] sm:$0xff] %v15746_v9  ;;  %18007 = vst [vmem:[#allocation135_spill] sm:$0xff] %v15749_v12  ;;  %v4739_v34 = vmul.f32 %v13019_v49, %v4247_v60  ;;  %v18009_v60 = vld [vmem:[#allocation30_spill] sm:$0xff] }
 0x518   :  { %vm3289_vm3 = vcmp.ge.f32.partialorder %v2803_v28, 0.0  ;;  %v3769_v59 = vmul.f32 0.01, %v2803_v28 }
 0x519   :  { %6392 = vmatmul.mubr.bf16.gmra.mrb[100].mxu1 %v15298_v23  ;;  %v2808_v21 = vpop.f32.mrb[222].mxu0  ;;  %v5231_v44 = vadd.f32 %v13037_v63, %v4739_v34 }
 0x51a   :  { %v4249_v37 = vsel %vm3289_vm3, %v2803_v28, %v3769_v59  ;;  %6399 = vmatprep.mubr.bf16.mxu1 %v15436_v24  ;;  %v2809_v25 = vadd.f32 %v2808_v21, %v13005_v38  ;;  %v15755_v45 = vpop.f32.mrb[223].mxu0 }
 0x51b   :  { %18008 = vst [vmem:[#allocation136_spill] sm:$0xff] %v15755_v45  ;;  %v4741_v16 = vmul.f32 %v13019_v49, %v4249_v37 }
 0x51c   :  { %vm3291_vm4 = vcmp.ge.f32.partialorder %v2809_v25, 0.0  ;;  %v3771_v62 = vmul.f32 0.01, %v2809_v25 }
 0x51d   :  { %v5233_v15 = vadd.f32 %v13037_v63, %v4741_v16  ;;  %v11295_v13 = vpop.f32.mrb[224].mxu0  ;;  %v18010_v16 = vld [vmem:[#allocation31_spill] sm:$0xff] }
 0x51e   :  { %v4251_v48 = vsel %vm3291_vm4, %v2809_v25, %v3771_v62  ;;  %v11296_v54 = vpop.f32.mrb[225].mxu0 }
 0x51f   :  { %v5473_v58 = vmax.f32 %v5229_v51, %v5233_v15  ;;  %v4743_v28 = vmul.f32 %v13019_v49, %v4251_v48  ;;  %v11297_v59 = vadd.f32 %v11296_v54, %v11295_v13  ;;  %v11298_v21 = vpop.f32.mrb[226].mxu0 }
 0x520   :  { %v11299_v9 = vpop.f32.mrb[227].mxu0 }
 0x521   :  { %v5235_v17 = vadd.f32 %v13037_v63, %v4743_v28  ;;  %v15765_v24 = vadd.f32 %v18009_v60, %v11297_v59  ;;  %v11300_v37 = vadd.f32 %v11299_v9, %v11298_v21  ;;  %6400 = vmatmul.mubr.bf16.gmra.mrb[104].mxu1 %v15432_v27  ;;  %v18012_v28 = vld [vmem:[#allocation40_spill] sm:$0xff]  ;;  %v18013_v9 = vld [vmem:[#allocation9_spill] sm:$0xff]  ;;  %v18028_v27 = vld [vmem:[#allocation34_spill] sm:$0xff] }
 0x522   :  { %6407 = vmatprep.mubr.bf16.mxu1 %v15609_v36  ;;  %v18014_v21 = vld [vmem:[#allocation41_spill] sm:$0xff]  ;;  %v18025_v36 = vld [vmem:[#allocation35_spill] sm:$0xff] }
 0x523   :  { %v5475_v25 = vmax.f32 %v5231_v44, %v5235_v17  ;;  %v15770_v62 = vadd.f32 %v18010_v16, %v11300_v37  ;;  %v12221_v16 = vld [vmem:[%s17728_s5 + $0x248] sm:$0xff]  }
 0x525   :  { %v15772_v51 = vpack.c.bf16 %v5475_v25, %v5473_v58  ;;  %v11301_v34 = vpop.f32.mrb[228].mxu0  ;;  %v12220_v58 = vld [vmem:[%s17728_s5 + $0x200] sm:$0xff]  }
 0x526   :  { %v11302_v15 = vpop.f32.mrb[229].mxu0 }
 0x527   :  { %18011 = vst [vmem:[#allocation30_spill] sm:$0xff] %v15772_v51  ;;  %v11303_v13 = vadd.f32 %v11302_v15, %v11301_v34  ;;  %v11304_v48 = vpop.f32.mrb[230].mxu0  ;;  %v18015_v15 = vld [vmem:[#allocation50_spill] sm:$0xff]  ;;  %v18020_v51 = vld [vmem:[#allocation16_spill] sm:$0xff] }
 0x528   :  { %v11305_v54 = vpop.f32.mrb[231].mxu0 }
 0x529   :  { %v15775_v23 = vadd.f32 %v18012_v28, %v11303_v13  ;;  %v11306_v59 = vadd.f32 %v11305_v54, %v11304_v48  ;;  %6408 = vmatmul.mubr.bf16.gmra.mrb[108].mxu1 %v15604_v31  ;;  %v18016_v54 = vld [vmem:[#allocation8_spill] sm:$0xff]  ;;  %v18017_v28 = vld [vmem:[#allocation17_spill] sm:$0xff] }
 0x52a   :  { %6604 = vmatprep.mubr.bf16.mxu1 %v18013_v9  ;;  %v18018_v9 = vld [vmem:[#allocation51_spill] sm:$0xff]  ;;  %v18024_v31 = vld [vmem:[#allocation24_spill] sm:$0xff] }
 0x52b   :  { %v15780_v44 = vadd.f32 %v18014_v21, %v11306_v59  ;;  %v12222_v59 = vld [vmem:[%s17728_s5 + $0x208] sm:$0xff]  }
 0x52d   :  { %v11307_v17 = vpop.f32.mrb[232].mxu0 }
 0x52e   :  { %v11308_v60 = vpop.f32.mrb[233].mxu0 }
 0x52f   :  { %v11309_v37 = vadd.f32 %v11308_v60, %v11307_v17  ;;  %v11310_v25 = vpop.f32.mrb[234].mxu0  ;;  %v12223_v17 = vld [vmem:[%s17728_s5 + $0x250] sm:$0xff]  }
 0x530   :  { %v11311_v34 = vpop.f32.mrb[235].mxu0 }
 0x531   :  { %v15789_v13 = vadd.f32 %v18015_v15, %v11309_v37  ;;  %v11312_v48 = vadd.f32 %v11311_v34, %v11310_v25  ;;  %6605 = vmatmul.mubr.bf16.vlgmr.msra.gmra.mrb[112].mxu1 %v18016_v54  ;;  %v12225_v15 = vld [vmem:[%s17728_s5 + $0x258] sm:$0xff]  }
 0x532   :  { %11680 = vmatpush3.bf16.msra.mxu1 %v12220_v58  ;;  %6612 = vmatprep.mubr.bf16.mxu1 %v18017_v28  ;;  %v12224_v58 = vld [vmem:[%s17728_s5 + $0x210] sm:$0xff]  }
 0x533   :  { %v15797_v21 = vadd.f32 %v18018_v9, %v11312_v48  ;;  %11681 = vmatprep.subr.bf16.mxu1 %v12221_v16  ;;  %v18019_v16 = vld [vmem:[#allocation60_spill] sm:$0xff]  ;;  %v18021_v28 = vld [vmem:[#allocation25_spill] sm:$0xff] }
 0x535   :  { %v11313_v60 = vpop.f32.mrb[236].mxu0 }
 0x536   :  { %v11314_v37 = vpop.f32.mrb[237].mxu0  ;;  %11682 = vmatpush3.bf16.msra.mxu1 %v12222_v59  ;;  %v12226_v59 = vld [vmem:[%s17728_s5 + $0x218] sm:$0xff]  }
 0x537   :  { %v11315_v25 = vadd.f32 %v11314_v37, %v11313_v60  ;;  %v11316_v34 = vpop.f32.mrb[238].mxu0  ;;  %11683 = vmatprep.subr.bf16.mxu1 %v12223_v17  ;;  %v18022_v60 = vld [vmem:[#allocation61_spill] sm:$0xff]  ;;  %v12227_v37 = vld [vmem:[%s17728_s5 + $0x260] sm:$0xff]  }
 0x538   :  { %v11317_v48 = vpop.f32.mrb[239].mxu0 }
 0x539   :  { %v15809_v54 = vadd.f32 %v18019_v16, %v11315_v25  ;;  %v11318_v9 = vadd.f32 %v11317_v48, %v11316_v34  ;;  %6613 = vmatmul.mubr.bf16.gmra.mrb[116].mxu1 %v18020_v51  ;;  %v12228_v34 = vld [vmem:[%s17728_s5 + $0x220] sm:$0xff]  }
 0x53a   :  { %6620 = vmatprep.mubr.bf16.mxu1 %v18021_v28  ;;  %11684 = vmatpush3.bf16.msra.mxu1 %v12224_v58 }
 0x53b   :  { %v15817_v17 = vadd.f32 %v18022_v60, %v11318_v9  ;;  %11685 = vmatprep.subr.bf16.mxu1 %v12225_v15  ;;  %v12229_v9 = vld [vmem:[%s17728_s5 + $0x268] sm:$0xff]   ;;  %v18023_v15 = vld [vmem:[#allocation70_spill] sm:$0xff] }
 0x53d   :  { %v11319_v25 = vpop.f32.mrb[240].mxu0 }
 0x53e   :  { %v11320_v16 = vpop.f32.mrb[241].mxu0  ;;  %11686 = vmatpush3.bf16.msra.mxu1 %v12226_v59  ;;  %v12230_v59 = vld [vmem:[%s17728_s5 + $0x228] sm:$0xff]  }
 0x53f   :  { %v11321_v58 = vadd.f32 %v11320_v16, %v11319_v25  ;;  %v11322_v48 = vpop.f32.mrb[242].mxu0  ;;  %11687 = vmatprep.subr.bf16.mxu1 %v12227_v37  ;;  %v18026_v25 = vld [vmem:[#allocation71_spill] sm:$0xff]  ;;  %v12231_v16 = vld [vmem:[%s17728_s5 + $0x270] sm:$0xff]  }
 0x540   :  { %v11323_v60 = vpop.f32.mrb[243].mxu0 }
 0x541   :  { %v15829_v28 = vadd.f32 %v18023_v15, %v11321_v58  ;;  %v11324_v51 = vadd.f32 %v11323_v60, %v11322_v48  ;;  %6621 = vmatmul.mubr.bf16.gmra.mrb[120].mxu1 %v18024_v31  ;;  %v12232_v48 = vld [vmem:[%s17728_s5 + $0x230] sm:$0xff]  }
 0x542   :  { %6628 = vmatprep.mubr.bf16.mxu1 %v18025_v36  ;;  %11688 = vmatpush3.bf16.msra.mxu1 %v12228_v34 }
 0x543   :  { %v15837_v37 = vadd.f32 %v18026_v25, %v11324_v51  ;;  %11689 = vmatprep.subr.bf16.mxu1 %v12229_v9  ;;  %v12233_v51 = vld [vmem:[%s17728_s5 + $0x278] sm:$0xff]   ;;  %v18027_v9 = vld [vmem:[#allocation80_spill] sm:$0xff] }
 0x545   :  { %v11325_v58 = vpop.f32.mrb[244].mxu0 }
 0x546   :  { %v11326_v15 = vpop.f32.mrb[245].mxu0  ;;  %11690 = vmatpush3.bf16.msra.mxu1 %v12230_v59  ;;  %v12234_v59 = vld [vmem:[%s17728_s5 + $0x238] sm:$0xff]  }
 0x547   :  { %v11327_v34 = vadd.f32 %v11326_v15, %v11325_v58  ;;  %v11328_v60 = vpop.f32.mrb[246].mxu0  ;;  %11691 = vmatprep.subr.bf16.mxu1 %v12231_v16  ;;  %v18030_v58 = vld [vmem:[#allocation81_spill] sm:$0xff]  ;;  %v12235_v15 = vld [vmem:[%s17728_s5 + $0x2c0] sm:$0xff]  }
 0x548   :  { %v11329_v25 = vpop.f32.mrb[247].mxu0 }
 0x549   :  { %v15849_v36 = vadd.f32 %v18027_v9, %v11327_v34  ;;  %v11330_v31 = vadd.f32 %v11329_v25, %v11328_v60  ;;  %6629 = vmatmul.mubr.bf16.gmra.mrb[124].mxu1 %v18028_v27 }
 0x54a   :  { %6636 = vmatprep.mubr.bf16.mxu1 %v18029_v7  ;;  %11692 = vmatpush3.bf16.msra.mxu1 %v12232_v48 }
 0x54b   :  { %v15857_v16 = vadd.f32 %v18030_v58, %v11330_v31  ;;  %11693 = vmatprep.subr.bf16.mxu1 %v12233_v51  ;;  %v18031_v51 = vld [vmem:[#allocation90_spill] sm:$0xff] }
 0x54c   :  { %v11467_v34 = vpop.f32.mrb[48].mxu1 }
 0x54d   :  { %v11331_v9 = vpop.f32.mrb[248].mxu0  ;;  %v11468_v60 = vpop.f32.mrb[49].mxu1 }
 0x54e   :  { %v15862_v25 = vadd.f32 %v11468_v60, %v11467_v34  ;;  %v11332_v27 = vpop.f32.mrb[249].mxu0  ;;  %v11470_v7 = vpop.f32.mrb[50].mxu1  ;;  %11694 = vmatpush3.bf16.msra.mxu1 %v12234_v59  ;;  %v18034_v34 = vld [vmem:[#allocation91_spill] sm:$0xff] }
 0x54f   :  { %v11333_v48 = vadd.f32 %v11332_v27, %v11331_v9  ;;  %v11334_v56 = vpop.f32.mrb[250].mxu0  ;;  %v11471_v45 = vpop.f32.mrb[51].mxu1  ;;  %11779 = vmatprep.subr.bf16.mxu1 %v12235_v15  ;;  %v18035_v15 = vld [vmem:[#allocation54_spill] sm:$0xff] }
 0x550   :  { %v15864_v12 = vadd.f32 %v11471_v45, %v11470_v7  ;;  %v11335_v31 = vpop.f32.mrb[251].mxu0 }
 0x551   :  { %v15867_v58 = vadd.f32 %v18031_v51, %v11333_v48  ;;  %v11336_v30 = vadd.f32 %v11335_v31, %v11334_v56  ;;  %6637 = vmatmul.mubr.bf16.gmra.mrb[128].mxu1 %v18032_v18  ;;  %v18036_v48 = vld [vmem:[#allocation65_spill] sm:$0xff]  ;;  %v18039_v18 = vld [vmem:[#allocation64_spill] sm:$0xff] }
 0x552   :  { %6644 = vmatprep.mubr.bf16.mxu1 %v18033_v2 }
 0x553   :  { %v15872_v60 = vadd.f32 %v18034_v34, %v11336_v30 }
 0x555   :  { %v11337_v35 = vpop.f32.mrb[252].mxu0 }
 0x556   :  { %v11338_v59 = vpop.f32.mrb[253].mxu0 }
 0x557   :  { %v11339_v27 = vadd.f32 %v11338_v59, %v11337_v35  ;;  %v11340_v9 = vpop.f32.mrb[254].mxu0 }
 0x558   :  { %v11341_v4 = vpop.f32.mrb[255].mxu0 }
 0x559   :  { %v15875_v7 = vadd.f32 %v15089_v50, %v11339_v27  ;;  %v11342_v45 = vadd.f32 %v11341_v4, %v11340_v9  ;;  %6645 = vmatmul.mubr.bf16.gmra.mrb[132].mxu1 %v18035_v15  ;;  %v18040_v50 = vld [vmem:[#allocation75_spill] sm:$0xff]  ;;  %v2721_v9 = vadd.f32 %v15626_v1, %v13009_v39 }
 0x55a   :  { %6652 = vmatprep.mubr.bf16.mxu1 %v18036_v48 }
 0x55b   :  { %v15880_v56 = vadd.f32 %v15101_v47, %v11342_v45  ;;  %v2719_v47 = vadd.f32 %v15624_v22, %v13005_v38  ;;  %v2725_v45 = vadd.f32 %v15629_v41, %v13005_v38  ;;  %v2731_v22 = vadd.f32 %v15634_v11, %v13005_v38 }
 0x55c   :  { %v2737_v41 = vadd.f32 %v15639_v29, %v13005_v38  ;;  %vm3262_vm5 = vcmp.ge.f32.partialorder %v2721_v9, 0.0 }
 0x55d   :  { %18037 = vst [vmem:[#allocation31_spill] sm:$0xff] %v15880_v56  ;;  %v11343_v31 = vpop.f32.mrb[0].mxu0  ;;  %v3741_v1 = vmul.f32 0.01, %v2719_v47  ;;  %v3745_v15 = vmul.f32 0.01, %v2731_v22 }
 0x55e   :  { %v11344_v51 = vpop.f32.mrb[1].mxu0  ;;  %vm3261_vm9 = vcmp.ge.f32.partialorder %v2719_v47, 0.0  ;;  %vm3263_vm10 = vcmp.ge.f32.partialorder %v2725_v45, 0.0  ;;  %vm3265_vm11 = vcmp.ge.f32.partialorder %v2731_v22, 0.0  ;;  %v3747_v38 = vmul.f32 0.01, %v2737_v41 }
 0x55f   :  { %v11345_v30 = vadd.f32 %v11344_v51, %v11343_v31  ;;  %v11346_v34 = vpop.f32.mrb[2].mxu0  ;;  %v2733_v31 = vadd.f32 %v15636_v53, %v13009_v39  ;;  %v3742_v53 = vmul.f32 0.01, %v2721_v9  ;;  %vm3267_vm12 = vcmp.ge.f32.partialorder %v2737_v41, 0.0  ;;  %v18046_v56 = vld [vmem:[#allocation84_spill] sm:$0xff] }
 0x560   :  { %v11347_v2 = vpop.f32.mrb[3].mxu0 }
 0x561   :  { %v15883_v35 = vadd.f32 %v15282_v57, %v11345_v30  ;;  %v11348_v59 = vadd.f32 %v11347_v2, %v11346_v34  ;;  %6653 = vmatmul.mubr.bf16.gmra.mrb[136].mxu1 %v18039_v18  ;;  %v2727_v2 = vadd.f32 %v15632_v46, %v13009_v39  ;;  %v3743_v18 = vmul.f32 0.01, %v2725_v45 }
 0x562   :  { %6660 = vmatprep.mubr.bf16.mxu1 %v18040_v50  ;;  %v18043_v50 = vld [vmem:[#allocation74_spill] sm:$0xff]  ;;  %vm3266_vm7 = vcmp.ge.f32.partialorder %v2733_v31, 0.0  ;;  %v4222_v29 = vsel %vm3262_vm5, %v2721_v9, %v3742_v53 }
 0x563   :  { %18038 = vst [vmem:[#allocation40_spill] sm:$0xff] %v15883_v35  ;;  %v15888_v4 = vadd.f32 %v15288_v61, %v11348_v59  ;;  %v2739_v61 = vadd.f32 %v15642_v20, %v13009_v39  ;;  %v18044_v20 = vld [vmem:[#allocation85_spill] sm:$0xff]  ;;  %vm3264_vm6 = vcmp.ge.f32.partialorder %v2727_v2, 0.0  ;;  %v4714_v9 = vmul.f32 %v13029_v55, %v4222_v29  ;;  %v18048_v29 = vld [vmem:[#allocation94_spill] sm:$0xff] }
 0x565   :  { %18041 = vst [vmem:[#allocation9_spill] sm:$0xff] %v15888_v4  ;;  %v11349_v27 = vpop.f32.mrb[4].mxu0  ;;  %v3748_v48 = vmul.f32 0.01, %v2739_v61  ;;  %vm3268_vm8 = vcmp.ge.f32.partialorder %v2739_v61, 0.0  ;;  %v4227_v4 = vsel %vm3267_vm12, %v2737_v41, %v3747_v38 }
 0x566   :  { %v11350_v57 = vpop.f32.mrb[5].mxu0 }
 0x567   :  { %v11351_v51 = vadd.f32 %v11350_v57, %v11349_v27  ;;  %v11352_v30 = vpop.f32.mrb[6].mxu0  ;;  %v3744_v27 = vmul.f32 0.01, %v2727_v2  ;;  %v3746_v57 = vmul.f32 0.01, %v2733_v31 }
 0x568   :  { %v11353_v34 = vpop.f32.mrb[7].mxu0 }
 0x569   :  { %v15907_v59 = vadd.f32 %v15416_v10, %v11351_v51  ;;  %v11354_v46 = vadd.f32 %v11353_v34, %v11352_v30  ;;  %6661 = vmatmul.mubr.bf16.gmra.mrb[140].mxu1 %v18043_v50  ;;  %v4224_v30 = vsel %vm3264_vm6, %v2727_v2, %v3744_v27  ;;  %v4226_v34 = vsel %vm3266_vm7, %v2733_v31, %v3746_v57  ;;  %v18047_v31 = vld [vmem:[#allocation95_spill] sm:$0xff] }
 0x56a   :  { %6668 = vmatprep.mubr.bf16.mxu1 %v18044_v20  ;;  %v4228_v20 = vsel %vm3268_vm8, %v2739_v61, %v3748_v48  ;;  %v4716_v53 = vmul.f32 %v13029_v55, %v4224_v30  ;;  %v4718_v2 = vmul.f32 %v13029_v55, %v4226_v34  ;;  %v5206_v61 = vadd.f32 %v13042_v3, %v4714_v9 }
 0x56b   :  { %18042 = vst [vmem:[#allocation41_spill] sm:$0xff] %v15907_v59  ;;  %v15912_v11 = vadd.f32 %v15422_v8, %v11354_v46  ;;  %v4221_v8 = vsel %vm3261_vm9, %v2719_v47, %v3741_v1  ;;  %v4223_v46 = vsel %vm3263_vm10, %v2725_v45, %v3743_v18  ;;  %v4720_v48 = vmul.f32 %v13029_v55, %v4228_v20 }
 0x56c   :  { %v4713_v18 = vmul.f32 %v13019_v49, %v4221_v8  ;;  %v5210_v1 = vadd.f32 %v13042_v3, %v4718_v2 }
 0x56d   :  { %18045 = vst [vmem:[#allocation50_spill] sm:$0xff] %v15912_v11  ;;  %v11355_v10 = vpop.f32.mrb[8].mxu0  ;;  %v4225_v11 = vsel %vm3265_vm11, %v2731_v22, %v3745_v15  ;;  %v4715_v15 = vmul.f32 %v13019_v49, %v4223_v46  ;;  %v5208_v22 = vadd.f32 %v13042_v3, %v4716_v53  ;;  %v5212_v41 = vadd.f32 %v13042_v3, %v4720_v48 }
 0x56e   :  { %v11356_v51 = vpop.f32.mrb[9].mxu0  ;;  %v5205_v27 = vadd.f32 %v13037_v63, %v4713_v18 }
 0x56f   :  { %v11357_v50 = vadd.f32 %v11356_v51, %v11355_v10  ;;  %v11358_v52 = vpop.f32.mrb[10].mxu0  ;;  %v5207_v57 = vadd.f32 %v13037_v63, %v4715_v15 }
 0x570   :  { %v11359_v59 = vpop.f32.mrb[11].mxu0 }
 0x571   :  { %v15916_v35 = vadd.f32 %v15573_v40, %v11357_v50  ;;  %v11360_v39 = vadd.f32 %v11359_v59, %v11358_v52  ;;  %6669 = vmatmul.mubr.bf16.gmra.mrb[144].mxu1 %v18046_v56  ;;  %v4717_v40 = vmul.f32 %v13019_v49, %v4225_v11  ;;  %v4719_v50 = vmul.f32 %v13019_v49, %v4227_v4 }
 0x572   :  { %6676 = vmatprep.mubr.bf16.mxu1 %v18047_v31  ;;  %v5462_v49 = vmax.f32 %v5206_v61, %v5210_v1  ;;  %v5464_v4 = vmax.f32 %v5208_v22, %v5212_v41 }
 0x573   :  { %v15928_v52 = vadd.f32 %v15586_v26, %v11360_v39  ;;  %v5209_v39 = vadd.f32 %v13037_v63, %v4717_v40  ;;  %v5211_v11 = vadd.f32 %v13037_v63, %v4719_v50 }
 0x574   :  { %v15944_v30 = vpack.c.bf16 %v5464_v4, %v5462_v49 }
 0x575   :  { %v11361_v47 = vpop.f32.mrb[12].mxu0  ;;  %v5461_v51 = vmax.f32 %v5205_v27, %v5209_v39  ;;  %v5463_v34 = vmax.f32 %v5207_v57, %v5211_v11  ;;  %v18050_v39 = vld [vmem:[#allocation11_spill] sm:$0xff] }
 0x576   :  { %v11362_v45 = vpop.f32.mrb[13].mxu0 }
 0x577   :  { %v11363_v59 = vadd.f32 %v11362_v45, %v11361_v47  ;;  %v11364_v20 = vpop.f32.mrb[14].mxu0  ;;  %v15949_v46 = vpack.c.bf16 %v5463_v34, %v5461_v51 }
 0x578   :  { %v11365_v26 = vpop.f32.mrb[15].mxu0 }
 0x579   :  { %v15940_v38 = vadd.f32 %v15728_v5, %v11363_v59  ;;  %v11366_v10 = vadd.f32 %v11365_v26, %v11364_v20  ;;  %6677 = vmatmul.mubr.bf16.gmra.mrb[148].mxu1 %v18048_v29 }
 0x57a   :  { %6684 = vmatprep.mubr.bf16.mxu1 %v15171_v43 }
 0x57b   :  { %v15947_v8 = vadd.f32 %v15736_v0, %v11366_v10 }
 0x57d   :  { %v11367_v9 = vpop.f32.mrb[16].mxu0 }
 0x57e   :  { %v11368_v53 = vpop.f32.mrb[17].mxu0 }
 0x57f   :  { %v11369_v63 = vadd.f32 %v11368_v53, %v11367_v9  ;;  %v11370_v2 = vpop.f32.mrb[18].mxu0 }
 0x580   :  { %v11371_v5 = vpop.f32.mrb[19].mxu0 }
 0x581   :  { %v15952_v48 = vadd.f32 %v15862_v25, %v11369_v63  ;;  %v11372_v18 = vadd.f32 %v11371_v5, %v11370_v2  ;;  %6685 = vmatmul.mubr.bf16.gmra.mrb[152].mxu1 %v15166_v14  ;;  %v18049_v25 = vld [vmem:[#allocation114_spill] sm:$0xff] }
 0x582   :  { %6692 = vmatprep.mubr.bf16.mxu1 %v15334_v19 }
 0x583   :  { %v15957_v15 = vadd.f32 %v15864_v12, %v11372_v18 }
 0x589   :  { %6693 = vmatmul.mubr.bf16.gmra.mrb[156].mxu1 %v15330_v33 }
 0x58a   :  { %6700 = vmatprep.mubr.bf16.mxu1 %v15468_v32 }
 0x58c   :  { %v11473_v0 = vpop.f32.mrb[52].mxu1 }
 0x58d   :  { %v11474_v40 = vpop.f32.mrb[53].mxu1 }
 0x58e   :  { %v11475_v50 = vadd.f32 %v11474_v40, %v11473_v0  ;;  %v11476_v47 = vpop.f32.mrb[54].mxu1  ;;  %v18051_v40 = vld [vmem:[#allocation10_spill] sm:$0xff] }
 0x58f   :  { %v11477_v45 = vpop.f32.mrb[55].mxu1 }
 0x590   :  { %v11478_v61 = vadd.f32 %v11477_v45, %v11476_v47 }
 0x591   :  { %6701 = vmatmul.mubr.bf16.gmra.mrb[160].mxu1 %v18049_v25  ;;  %v18077_v25 = vld [vmem:[#allocation97_spill] sm:$0xff] }
 0x592   :  { %6708 = vmatprep.mubr.bf16.mxu1 %v15722_v42 }
 0x594   :  { %v11495_v22 = vpop.f32.mrb[56].mxu1 }
 0x595   :  { %v11496_v1 = vpop.f32.mrb[57].mxu1 }
 0x596   :  { %v11497_v41 = vadd.f32 %v11496_v1, %v11495_v22  ;;  %v11498_v59 = vpop.f32.mrb[58].mxu1  ;;  %v18052_v22 = vld [vmem:[#allocation19_spill] sm:$0xff] }
 0x597   :  { %v11499_v12 = vpop.f32.mrb[59].mxu1 }
 0x598   :  { %v15964_v20 = vadd.f32 %v11497_v41, %v15765_v24  ;;  %v11500_v27 = vadd.f32 %v11499_v12, %v11498_v59  ;;  %v12236_v24 = vld [vmem:[%s17728_s5 + $0x280] sm:$0xff]  }
 0x599   :  { %6709 = vmatmul.mubr.bf16.gmra.mrb[164].mxu1 %v15744_v6 }
 0x59a   :  { %v15968_v57 = vadd.f32 %v11500_v27, %v15770_v62  ;;  %6905 = vmatprep.mubr.bf16.mxu1 %v18050_v39  ;;  %v12237_v62 = vld [vmem:[%s17728_s5 + $0x2c8] sm:$0xff]   ;;  %v12241_v27 = vld [vmem:[%s17728_s5 + $0x2d8] sm:$0xff]  }
 0x59c   :  { %v11373_v26 = vpop.f32.mrb[20].mxu0  ;;  %v11501_v49 = vpop.f32.mrb[60].mxu1 }
 0x59d   :  { %v11374_v4 = vpop.f32.mrb[21].mxu0  ;;  %v11502_v11 = vpop.f32.mrb[61].mxu1 }
 0x59e   :  { %v11375_v10 = vadd.f32 %v11374_v4, %v11373_v26  ;;  %v11503_v51 = vadd.f32 %v11502_v11, %v11501_v49  ;;  %v11376_v34 = vpop.f32.mrb[22].mxu0  ;;  %v11504_v9 = vpop.f32.mrb[62].mxu1  ;;  %v18053_v49 = vld [vmem:[#allocation18_spill] sm:$0xff]  ;;  %v18054_v11 = vld [vmem:[#allocation27_spill] sm:$0xff] }
 0x59f   :  { %v11377_v53 = vpop.f32.mrb[23].mxu0  ;;  %v11505_v63 = vpop.f32.mrb[63].mxu1 }
 0x5a0   :  { %v15977_v2 = vadd.f32 %v11475_v50, %v11375_v10  ;;  %v15980_v5 = vadd.f32 %v11503_v51, %v15775_v23  ;;  %v11378_v18 = vadd.f32 %v11377_v53, %v11376_v34  ;;  %v11506_v0 = vadd.f32 %v11505_v63, %v11504_v9  ;;  %v12238_v50 = vld [vmem:[%s17728_s5 + $0x288] sm:$0xff]   ;;  %v12239_v23 = vld [vmem:[%s17728_s5 + $0x2d0] sm:$0xff]   ;;  %v12242_v10 = vld [vmem:[%s17728_s5 + $0x298] sm:$0xff]  }
 0x5a1   :  { %6906 = vmatmul.mubr.bf16.vlgmr.msra.gmra.mrb[168].mxu1 %v18051_v40  ;;  %v12243_v51 = vld [vmem:[%s17728_s5 + $0x2e0] sm:$0xff]   ;;  %v12245_v63 = vld [vmem:[%s17728_s5 + $0x2e8] sm:$0xff]  }
 0x5a2   :  { %v15983_v47 = vadd.f32 %v11478_v61, %v11378_v18  ;;  %v15986_v45 = vadd.f32 %v11506_v0, %v15780_v44  ;;  %11780 = vmatpush3.bf16.msra.mxu1 %v12236_v24  ;;  %6913 = vmatprep.mubr.bf16.mxu1 %v18052_v22  ;;  %v12240_v44 = vld [vmem:[%s17728_s5 + $0x290] sm:$0xff]  }
 0x5a3   :  { %11781 = vmatprep.subr.bf16.mxu1 %v12237_v62  ;;  %v18055_v0 = vld [vmem:[#allocation26_spill] sm:$0xff]  ;;  %v18056_v22 = vld [vmem:[#allocation37_spill] sm:$0xff] }
 0x5a4   :  { %v11507_v1 = vpop.f32.mrb[64].mxu1 }
 0x5a5   :  { %v11508_v41 = vpop.f32.mrb[65].mxu1 }
 0x5a6   :  { %v11509_v59 = vadd.f32 %v11508_v41, %v11507_v1  ;;  %v11510_v61 = vpop.f32.mrb[66].mxu1  ;;  %11782 = vmatpush3.bf16.msra.mxu1 %v12238_v50  ;;  %v12246_v50 = vld [vmem:[%s17728_s5 + $0x2a8] sm:$0xff]  }
 0x5a7   :  { %v11511_v12 = vpop.f32.mrb[67].mxu1  ;;  %11783 = vmatprep.subr.bf16.mxu1 %v12239_v23  ;;  %v12247_v23 = vld [vmem:[%s17728_s5 + $0x2f0] sm:$0xff]  }
 0x5a8   :  { %v16002_v39 = vadd.f32 %v11509_v59, %v15789_v13  ;;  %v11512_v26 = vadd.f32 %v11511_v12, %v11510_v61 }
 0x5a9   :  { %6914 = vmatmul.mubr.bf16.gmra.mrb[172].mxu1 %v18053_v49 }
 0x5aa   :  { %v16006_v4 = vadd.f32 %v11512_v26, %v15797_v21  ;;  %6921 = vmatprep.mubr.bf16.mxu1 %v18054_v11  ;;  %11784 = vmatpush3.bf16.msra.mxu1 %v12240_v44  ;;  %v12244_v21 = vld [vmem:[%s17728_s5 + $0x2a0] sm:$0xff]   ;;  %v12249_v44 = vld [vmem:[%s17728_s5 + $0x2f8] sm:$0xff]  }
 0x5ab   :  { %11785 = vmatprep.subr.bf16.mxu1 %v12241_v27  ;;  %v18057_v26 = vld [vmem:[#allocation36_spill] sm:$0xff]  ;;  %v18058_v11 = vld [vmem:[#allocation47_spill] sm:$0xff] }
 0x5ac   :  { %v11513_v13 = vpop.f32.mrb[68].mxu1 }
 0x5ad   :  { %v11514_v34 = vpop.f32.mrb[69].mxu1 }
 0x5ae   :  { %v11515_v9 = vadd.f32 %v11514_v34, %v11513_v13  ;;  %v11516_v24 = vpop.f32.mrb[70].mxu1  ;;  %11786 = vmatpush3.bf16.msra.mxu1 %v12242_v10  ;;  %v12250_v10 = vld [vmem:[%s17728_s5 + $0x2b8] sm:$0xff]  }
 0x5af   :  { %v11517_v53 = vpop.f32.mrb[71].mxu1  ;;  %11787 = vmatprep.subr.bf16.mxu1 %v12243_v51  ;;  %v12251_v51 = vld [vmem:[%s17728_s5 + $0x340] sm:$0xff]  }
 0x5b0   :  { %v16022_v62 = vadd.f32 %v11515_v9, %v15809_v54  ;;  %v11518_v18 = vadd.f32 %v11517_v53, %v11516_v24  ;;  %v18059_v53 = vld [vmem:[#allocation46_spill] sm:$0xff] }
 0x5b1   :  { %6922 = vmatmul.mubr.bf16.gmra.mrb[176].mxu1 %v18055_v0 }
 0x5b2   :  { %v16026_v40 = vadd.f32 %v11518_v18, %v15817_v17  ;;  %6929 = vmatprep.mubr.bf16.mxu1 %v18056_v22  ;;  %11788 = vmatpush3.bf16.msra.mxu1 %v12244_v21  ;;  %v12248_v17 = vld [vmem:[%s17728_s5 + $0x2b0] sm:$0xff]  }
 0x5b3   :  { %11789 = vmatprep.subr.bf16.mxu1 %v12245_v63  ;;  %v18060_v18 = vld [vmem:[#allocation57_spill] sm:$0xff] }
 0x5b4   :  { %v11519_v54 = vpop.f32.mrb[72].mxu1 }
 0x5b5   :  { %v11520_v1 = vpop.f32.mrb[73].mxu1 }
 0x5b6   :  { %v11521_v41 = vadd.f32 %v11520_v1, %v11519_v54  ;;  %v11522_v59 = vpop.f32.mrb[74].mxu1  ;;  %11790 = vmatpush3.bf16.msra.mxu1 %v12246_v50 }
 0x5b7   :  { %v11523_v61 = vpop.f32.mrb[75].mxu1  ;;  %11791 = vmatprep.subr.bf16.mxu1 %v12247_v23 }
 0x5b8   :  { %v16042_v12 = vadd.f32 %v11521_v41, %v15829_v28  ;;  %v11524_v27 = vadd.f32 %v11523_v61, %v11522_v59  ;;  %v18061_v59 = vld [vmem:[#allocation56_spill] sm:$0xff] }
 0x5b9   :  { %6930 = vmatmul.mubr.bf16.gmra.mrb[180].mxu1 %v18057_v26 }
 0x5ba   :  { %v16046_v49 = vadd.f32 %v11524_v27, %v15837_v37  ;;  %6937 = vmatprep.mubr.bf16.mxu1 %v18058_v11  ;;  %11792 = vmatpush3.bf16.msra.mxu1 %v12248_v17  ;;  %v18062_v17 = vld [vmem:[#allocation67_spill] sm:$0xff] }
 0x5bb   :  { %11793 = vmatprep.subr.bf16.mxu1 %v12249_v44 }
 0x5bc   :  { %v11525_v28 = vpop.f32.mrb[76].mxu1 }
 0x5bd   :  { %v11526_v13 = vpop.f32.mrb[77].mxu1 }
 0x5be   :  { %v11527_v34 = vadd.f32 %v11526_v13, %v11525_v28  ;;  %v11528_v9 = vpop.f32.mrb[78].mxu1  ;;  %11794 = vmatpush3.bf16.msra.mxu1 %v12250_v10  ;;  %v18065_v13 = vld [vmem:[#allocation77_spill] sm:$0xff] }
 0x5bf   :  { %v11529_v24 = vpop.f32.mrb[79].mxu1  ;;  %11879 = vmatprep.subr.bf16.mxu1 %v12251_v51  ;;  %v18063_v51 = vld [vmem:[#allocation66_spill] sm:$0xff] }
 0x5c0   :  { %v16056_v37 = vadd.f32 %v11527_v34, %v15849_v36  ;;  %v11530_v21 = vadd.f32 %v11529_v24, %v11528_v9 }
 0x5c1   :  { %6938 = vmatmul.mubr.bf16.gmra.mrb[184].mxu1 %v18059_v53  ;;  %v18067_v53 = vld [vmem:[#allocation121_spill] sm:$0xff] }
 0x5c2   :  { %v16060_v63 = vadd.f32 %v11530_v21, %v15857_v16  ;;  %6945 = vmatprep.mubr.bf16.mxu1 %v18060_v18  ;;  %v18066_v21 = vld [vmem:[#allocation7_spill] sm:$0xff] }
 0x5c3   :  { %v2745_v18 = vadd.f32 %v18067_v53, %v18066_v21 }
 0x5c4   :  { %v11531_v0 = vpop.f32.mrb[80].mxu1 }
 0x5c5   :  { %v11532_v22 = vpop.f32.mrb[81].mxu1  ;;  %vm3270_vm13 = vcmp.ge.f32.partialorder %v2745_v18, 0.0 }
 0x5c6   :  { %v11533_v50 = vadd.f32 %v11532_v22, %v11531_v0  ;;  %v11534_v23 = vpop.f32.mrb[82].mxu1  ;;  %v18068_v0 = vld [vmem:[#allocation122_spill] sm:$0xff] }
 0x5c7   :  { %v11535_v54 = vpop.f32.mrb[83].mxu1  ;;  %v2751_v22 = vadd.f32 %v18068_v0, %v18066_v21 }
 0x5c8   :  { %v16064_v1 = vadd.f32 %v11533_v50, %v15867_v58  ;;  %v11536_v41 = vadd.f32 %v11535_v54, %v11534_v23  ;;  %v18064_v58 = vld [vmem:[#allocation31_spill] sm:$0xff]  ;;  %v18070_v54 = vld [vmem:[#allocation124_spill] sm:$0xff] }
 0x5c9   :  { %6946 = vmatmul.mubr.bf16.gmra.mrb[188].mxu1 %v18061_v59  ;;  %vm3272_vm14 = vcmp.ge.f32.partialorder %v2751_v22, 0.0 }
 0x5ca   :  { %v16068_v36 = vadd.f32 %v11536_v41, %v15872_v60  ;;  %6953 = vmatprep.mubr.bf16.mxu1 %v18062_v17  ;;  %v2763_v41 = vadd.f32 %v18070_v54, %v18066_v21  ;;  %v18071_v17 = vld [vmem:[#allocation40_spill] sm:$0xff] }
 0x5cc   :  { %v11537_v16 = vpop.f32.mrb[84].mxu1  ;;  %vm3276_vm15 = vcmp.ge.f32.partialorder %v2763_v41, 0.0 }
 0x5cd   :  { %v11538_v61 = vpop.f32.mrb[85].mxu1 }
 0x5ce   :  { %v11539_v44 = vadd.f32 %v11538_v61, %v11537_v16  ;;  %v11540_v27 = vpop.f32.mrb[86].mxu1  ;;  %v18072_v61 = vld [vmem:[#allocation76_spill] sm:$0xff] }
 0x5cf   :  { %v11541_v26 = vpop.f32.mrb[87].mxu1 }
 0x5d0   :  { %v16072_v11 = vadd.f32 %v11539_v44, %v15875_v7  ;;  %v11542_v10 = vadd.f32 %v11541_v26, %v11540_v27  ;;  %v18069_v7 = vld [vmem:[#allocation123_spill] sm:$0xff]  ;;  %v18074_v27 = vld [vmem:[#allocation9_spill] sm:$0xff] }
 0x5d1   :  { %6954 = vmatmul.mubr.bf16.gmra.mrb[192].mxu1 %v18063_v51  ;;  %v2757_v50 = vadd.f32 %v18069_v7, %v18066_v21  ;;  %v18073_v44 = vld [vmem:[#allocation87_spill] sm:$0xff]  ;;  %v3752_v51 = vmul.f32 0.01, %v2751_v22 }
 0x5d2   :  { %v16076_v28 = vadd.f32 %v11542_v10, %v18064_v58  ;;  %6961 = vmatprep.mubr.bf16.mxu1 %v18065_v13  ;;  %v3750_v10 = vmul.f32 0.01, %v2745_v18  ;;  %v3756_v13 = vmul.f32 0.01, %v2763_v41 }
 0x5d3   :  { %v3754_v58 = vmul.f32 0.01, %v2757_v50  ;;  %vm3274_vm0 = vcmp.ge.f32.partialorder %v2757_v50, 0.0  ;;  %v4232_v0 = vsel %vm3272_vm14, %v2751_v22, %v3752_v51 }
 0x5d4   :  { %v11543_v60 = vpop.f32.mrb[88].mxu1  ;;  %v4230_v53 = vsel %vm3270_vm13, %v2745_v18, %v3750_v10  ;;  %v4236_v54 = vsel %vm3276_vm15, %v2763_v41, %v3756_v13  ;;  %v4724_v6 = vmul.f32 %v13029_v55, %v4232_v0 }
 0x5d5   :  { %v11544_v34 = vpop.f32.mrb[89].mxu1  ;;  %v4234_v7 = vsel %vm3274_vm0, %v2757_v50, %v3754_v58  ;;  %v4728_v22 = vmul.f32 %v13029_v55, %v4236_v54  ;;  %v18080_v54 = vld [vmem:[#allocation103_spill] sm:$0xff] }
 0x5d6   :  { %v11545_v9 = vadd.f32 %v11544_v34, %v11543_v60  ;;  %v11546_v24 = vpop.f32.mrb[90].mxu1  ;;  %v4726_v42 = vmul.f32 %v13029_v55, %v4234_v7  ;;  %v5216_v13 = vadd.f32 %v13042_v3, %v4724_v6  ;;  %v18079_v7 = vld [vmem:[#allocation96_spill] sm:$0xff] }
 0x5d7   :  { %v11547_v23 = vpop.f32.mrb[91].mxu1 }
 0x5d8   :  { %v11548_v59 = vadd.f32 %v11547_v23, %v11546_v24  ;;  %v16088_v16 = vadd.f32 %v11545_v9, %v18071_v17 }
 0x5d9   :  { %6962 = vmatmul.mubr.bf16.gmra.mrb[196].mxu1 %v18072_v61 }
 0x5da   :  { %6969 = vmatprep.mubr.bf16.mxu1 %v18073_v44  ;;  %v16093_v26 = vadd.f32 %v11548_v59, %v18074_v27  ;;  %v18075_v59 = vld [vmem:[#allocation41_spill] sm:$0xff]  ;;  %v18076_v44 = vld [vmem:[#allocation86_spill] sm:$0xff]  ;;  %v4722_v27 = vmul.f32 %v13029_v55, %v4230_v53 }
 0x5dc   :  { %v11549_v60 = vpop.f32.mrb[92].mxu1  ;;  %v5214_v58 = vadd.f32 %v13042_v3, %v4722_v27 }
 0x5dd   :  { %v11550_v34 = vpop.f32.mrb[93].mxu1 }
 0x5de   :  { %v11551_v24 = vadd.f32 %v11550_v34, %v11549_v60  ;;  %v11552_v9 = vpop.f32.mrb[94].mxu1  ;;  %v18078_v60 = vld [vmem:[#allocation50_spill] sm:$0xff]  ;;  %v5218_v34 = vadd.f32 %v13042_v3, %v4726_v42 }
 0x5df   :  { %v11553_v23 = vpop.f32.mrb[95].mxu1 }
 0x5e0   :  { %v11554_v17 = vadd.f32 %v11553_v23, %v11552_v9  ;;  %v16096_v61 = vadd.f32 %v11551_v24, %v18075_v59  ;;  %v5220_v9 = vadd.f32 %v13042_v3, %v4728_v22  ;;  %v5466_v0 = vmax.f32 %v5214_v58, %v5218_v34 }
 0x5e1   :  { %6970 = vmatmul.mubr.bf16.gmra.mrb[200].mxu1 %v18076_v44 }
 0x5e2   :  { %6977 = vmatprep.mubr.bf16.mxu1 %v18077_v25  ;;  %v16104_v18 = vadd.f32 %v11554_v17, %v18078_v60  ;;  %v5468_v23 = vmax.f32 %v5216_v13, %v5220_v9 }
 0x5e4   :  { %v11555_v50 = vpop.f32.mrb[96].mxu1  ;;  %v16119_v59 = vpack.c.bf16 %v5468_v23, %v5466_v0 }
 0x5e5   :  { %v11556_v41 = vpop.f32.mrb[97].mxu1 }
 0x5e6   :  { %v11557_v10 = vadd.f32 %v11556_v41, %v11555_v50  ;;  %v11558_v51 = vpop.f32.mrb[98].mxu1  ;;  %v18081_v50 = vld [vmem:[#allocation102_spill] sm:$0xff]  ;;  %v18082_v41 = vld [vmem:[#allocation109_spill] sm:$0xff] }
 0x5e7   :  { %v11559_v24 = vpop.f32.mrb[99].mxu1 }
 0x5e8   :  { %v11560_v53 = vadd.f32 %v11559_v24, %v11558_v51  ;;  %v16112_v25 = vadd.f32 %v11557_v10, %v15916_v35 }
 0x5e9   :  { %6978 = vmatmul.mubr.bf16.gmra.mrb[204].mxu1 %v18079_v7 }
 0x5ea   :  { %6985 = vmatprep.mubr.bf16.mxu1 %v18080_v54  ;;  %v16117_v17 = vadd.f32 %v11560_v53, %v15928_v52  ;;  %v18083_v53 = vld [vmem:[#allocation108_spill] sm:$0xff] }
 0x5ec   :  { %v11561_v6 = vpop.f32.mrb[100].mxu1 }
 0x5ed   :  { %v11562_v42 = vpop.f32.mrb[101].mxu1 }
 0x5ee   :  { %v11563_v44 = vadd.f32 %v11562_v42, %v11561_v6  ;;  %v11564_v27 = vpop.f32.mrb[102].mxu1 }
 0x5ef   :  { %v11565_v60 = vpop.f32.mrb[103].mxu1 }
 0x5f0   :  { %v11566_v22 = vadd.f32 %v11565_v60, %v11564_v27  ;;  %v16122_v35 = vadd.f32 %v11563_v44, %v15940_v38  ;;  %v18084_v38 = vld [vmem:[#allocation116_spill] sm:$0xff]  ;;  %v18085_v27 = vld [vmem:[#allocation115_spill] sm:$0xff] }
 0x5f1   :  { %6986 = vmatmul.mubr.bf16.gmra.mrb[208].mxu1 %v18081_v50 }
 0x5f2   :  { %6993 = vmatprep.mubr.bf16.mxu1 %v18082_v41  ;;  %v16127_v10 = vadd.f32 %v11566_v22, %v15947_v8 }
 0x5f4   :  { %v11567_v52 = vpop.f32.mrb[104].mxu1 }
 0x5f5   :  { %v11568_v51 = vpop.f32.mrb[105].mxu1 }
 0x5f6   :  { %v11569_v58 = vadd.f32 %v11568_v51, %v11567_v52  ;;  %v11570_v13 = vpop.f32.mrb[106].mxu1 }
 0x5f7   :  { %v11571_v34 = vpop.f32.mrb[107].mxu1 }
 0x5f8   :  { %v11572_v24 = vadd.f32 %v11571_v34, %v11570_v13  ;;  %v16130_v9 = vadd.f32 %v11569_v58, %v15952_v48 }
 0x5f9   :  { %6994 = vmatmul.mubr.bf16.gmra.mrb[212].mxu1 %v18083_v53 }
 0x5fa   :  { %7001 = vmatprep.mubr.bf16.mxu1 %v18084_v38  ;;  %v16135_v0 = vadd.f32 %v11572_v24, %v15957_v15  ;;  %v12252_v24 = vld [vmem:[%s17728_s5 + $0x300] sm:$0xff]  }
 0x5fc   :  { %v11573_v7 = vpop.f32.mrb[108].mxu1 }
 0x5fd   :  { %v11574_v23 = vpop.f32.mrb[109].mxu1 }
 0x5fe   :  { %v11575_v8 = vadd.f32 %v11574_v23, %v11573_v7  ;;  %v11576_v54 = vpop.f32.mrb[110].mxu1  ;;  %v18087_v7 = vld [vmem:[#allocation12_spill] sm:$0xff] }
 0x5ff   :  { %v11577_v6 = vpop.f32.mrb[111].mxu1  ;;  %v12254_v23 = vld [vmem:[%s17728_s5 + $0x308] sm:$0xff]  }
 0x600   :  { %v11578_v42 = vadd.f32 %v11577_v6, %v11576_v54  ;;  %v16138_v44 = vadd.f32 %v11575_v8, %v15977_v2  ;;  %v18086_v2 = vld [vmem:[#allocation13_spill] sm:$0xff] }
 0x601   :  { %7002 = vmatmul.mubr.bf16.gmra.mrb[216].mxu1 %v18085_v27  ;;  %v12255_v54 = vld [vmem:[%s17728_s5 + $0x350] sm:$0xff]  }
 0x602   :  { %7009 = vmatprep.mubr.bf16.mxu1 %v15944_v30  ;;  %v16143_v48 = vadd.f32 %v11578_v42, %v15983_v47 }
 0x604   :  { %v11595_v60 = vpop.f32.mrb[112].mxu1 }
 0x605   :  { %v11596_v22 = vpop.f32.mrb[113].mxu1 }
 0x606   :  { %v11597_v15 = vadd.f32 %v11596_v22, %v11595_v60  ;;  %v11598_v50 = vpop.f32.mrb[114].mxu1  ;;  %v12256_v60 = vld [vmem:[%s17728_s5 + $0x310] sm:$0xff]  }
 0x607   :  { %v11599_v41 = vpop.f32.mrb[115].mxu1 }
 0x608   :  { %v11600_v52 = vadd.f32 %v11599_v41, %v11598_v50  ;;  %v16146_v51 = vadd.f32 %v11597_v15, %v15964_v20  ;;  %v12253_v20 = vld [vmem:[%s17728_s5 + $0x348] sm:$0xff]  }
 0x609   :  { %7010 = vmatmul.mubr.bf16.gmra.mrb[220].mxu1 %v15949_v46  ;;  %v18089_v41 = vld [vmem:[#allocation20_spill] sm:$0xff] }
 0x60a   :  { %7206 = vmatprep.mubr.bf16.mxu1 %v18086_v2  ;;  %v16151_v58 = vadd.f32 %v11600_v52, %v15968_v57  ;;  %v18088_v57 = vld [vmem:[#allocation21_spill] sm:$0xff]  ;;  %v12258_v2 = vld [vmem:[%s17728_s5 + $0x318] sm:$0xff]  }
 0x60b   :  { %v18090_v52 = vld [vmem:[#allocation29_spill] sm:$0xff] }
 0x60c   :  { %v11601_v30 = vpop.f32.mrb[116].mxu1 }
 0x60d   :  { %v11602_v13 = vpop.f32.mrb[117].mxu1 }
 0x60e   :  { %v11603_v47 = vadd.f32 %v11602_v13, %v11601_v30  ;;  %v11604_v34 = vpop.f32.mrb[118].mxu1  ;;  %v12259_v13 = vld [vmem:[%s17728_s5 + $0x360] sm:$0xff]  }
 0x60f   :  { %v11605_v53 = vpop.f32.mrb[119].mxu1 }
 0x610   :  { %v11606_v38 = vadd.f32 %v11605_v53, %v11604_v34  ;;  %v16160_v46 = vadd.f32 %v11603_v47, %v15980_v5  ;;  %v12260_v53 = vld [vmem:[%s17728_s5 + $0x320] sm:$0xff]  }
 0x611   :  { %7207 = vmatmul.mubr.bf16.vlgmr.msra.gmra.mrb[224].mxu1 %v18087_v7 }
 0x612   :  { %11880 = vmatpush3.bf16.msra.mxu1 %v12252_v24  ;;  %7214 = vmatprep.mubr.bf16.mxu1 %v18088_v57  ;;  %v16168_v8 = vadd.f32 %v11606_v38, %v15986_v45  ;;  %v12257_v45 = vld [vmem:[%s17728_s5 + $0x358] sm:$0xff]   ;;  %v18091_v57 = vld [vmem:[#allocation28_spill] sm:$0xff] }
 0x613   :  { %11881 = vmatprep.subr.bf16.mxu1 %v12253_v20 }
 0x614   :  { %v11607_v6 = vpop.f32.mrb[120].mxu1 }
 0x615   :  { %v11608_v5 = vpop.f32.mrb[121].mxu1 }
 0x616   :  { %v11609_v42 = vadd.f32 %v11608_v5, %v11607_v6  ;;  %v11610_v27 = vpop.f32.mrb[122].mxu1  ;;  %11882 = vmatpush3.bf16.msra.mxu1 %v12254_v23  ;;  %v18092_v23 = vld [vmem:[#allocation39_spill] sm:$0xff]  ;;  %v12263_v5 = vld [vmem:[%s17728_s5 + $0x370] sm:$0xff]  }
 0x617   :  { %v11611_v22 = vpop.f32.mrb[123].mxu1  ;;  %11883 = vmatprep.subr.bf16.mxu1 %v12255_v54  ;;  %v12262_v54 = vld [vmem:[%s17728_s5 + $0x328] sm:$0xff]  }
 0x618   :  { %v11612_v15 = vadd.f32 %v11611_v22, %v11610_v27  ;;  %v16180_v50 = vadd.f32 %v11609_v42, %v16002_v39  ;;  %v12264_v22 = vld [vmem:[%s17728_s5 + $0x330] sm:$0xff]  }
 0x619   :  { %7215 = vmatmul.mubr.bf16.gmra.mrb[228].mxu1 %v18089_v41 }
 0x61a   :  { %7222 = vmatprep.mubr.bf16.mxu1 %v18090_v52  ;;  %11884 = vmatpush3.bf16.msra.mxu1 %v12256_v60  ;;  %v16188_v30 = vadd.f32 %v11612_v15, %v16006_v4  ;;  %v12261_v4 = vld [vmem:[%s17728_s5 + $0x368] sm:$0xff]   ;;  %v18093_v52 = vld [vmem:[#allocation38_spill] sm:$0xff] }
 0x61b   :  { %11885 = vmatprep.subr.bf16.mxu1 %v12257_v45 }
 0x61c   :  { %v11613_v47 = vpop.f32.mrb[124].mxu1 }
 0x61d   :  { %v11614_v39 = vpop.f32.mrb[125].mxu1 }
 0x61e   :  { %v11615_v34 = vadd.f32 %v11614_v39, %v11613_v47  ;;  %v11616_v24 = vpop.f32.mrb[126].mxu1  ;;  %11886 = vmatpush3.bf16.msra.mxu1 %v12258_v2  ;;  %v18094_v2 = vld [vmem:[#allocation49_spill] sm:$0xff]  ;;  %v12267_v39 = vld [vmem:[%s17728_s5 + $0x3c0] sm:$0xff]  }
 0x61f   :  { %v11617_v20 = vpop.f32.mrb[127].mxu1  ;;  %11887 = vmatprep.subr.bf16.mxu1 %v12259_v13  ;;  %v12266_v13 = vld [vmem:[%s17728_s5 + $0x338] sm:$0xff]  }
 0x620   :  { %v11618_v38 = vadd.f32 %v11617_v20, %v11616_v24  ;;  %v16200_v7 = vadd.f32 %v11615_v34, %v16022_v62 }
 0x621   :  { %7223 = vmatmul.mubr.bf16.gmra.mrb[232].mxu1 %v18091_v57  ;;  %v18095_v57 = vld [vmem:[#allocation48_spill] sm:$0xff] }
 0x622   :  { %7230 = vmatprep.mubr.bf16.mxu1 %v18092_v23  ;;  %11888 = vmatpush3.bf16.msra.mxu1 %v12260_v53  ;;  %v16208_v6 = vadd.f32 %v11618_v38, %v16026_v40  ;;  %v12265_v40 = vld [vmem:[%s17728_s5 + $0x378] sm:$0xff]  }
 0x623   :  { %11889 = vmatprep.subr.bf16.mxu1 %v12261_v4 }
 0x624   :  { %v11619_v42 = vpop.f32.mrb[128].mxu1 }
 0x625   :  { %v11620_v62 = vpop.f32.mrb[129].mxu1 }
 0x626   :  { %v11621_v27 = vadd.f32 %v11620_v62, %v11619_v42  ;;  %v11622_v60 = vpop.f32.mrb[130].mxu1  ;;  %11890 = vmatpush3.bf16.msra.mxu1 %v12262_v54 }
 0x627   :  { %v11623_v45 = vpop.f32.mrb[131].mxu1  ;;  %11891 = vmatprep.subr.bf16.mxu1 %v12263_v5 }
 0x628   :  { %v11624_v15 = vadd.f32 %v11623_v45, %v11622_v60  ;;  %v16220_v41 = vadd.f32 %v11621_v27, %v16042_v12  ;;  %v18097_v45 = vld [vmem:[#allocation58_spill] sm:$0xff] }
 0x629   :  { %7231 = vmatmul.mubr.bf16.gmra.mrb[236].mxu1 %v18093_v52 }
 0x62a   :  { %7238 = vmatprep.mubr.bf16.mxu1 %v18094_v2  ;;  %11892 = vmatpush3.bf16.msra.mxu1 %v12264_v22  ;;  %v16228_v47 = vadd.f32 %v11624_v15, %v16046_v49  ;;  %v18096_v49 = vld [vmem:[#allocation59_spill] sm:$0xff] }
 0x62b   :  { %11893 = vmatprep.subr.bf16.mxu1 %v12265_v40 }
 0x62c   :  { %v11625_v34 = vpop.f32.mrb[132].mxu1 }
 0x62d   :  { %v11626_v12 = vpop.f32.mrb[133].mxu1 }
 0x62e   :  { %v11627_v24 = vadd.f32 %v11626_v12, %v11625_v34  ;;  %v11628_v53 = vpop.f32.mrb[134].mxu1  ;;  %11894 = vmatpush3.bf16.msra.mxu1 %v12266_v13  ;;  %v18099_v12 = vld [vmem:[#allocation68_spill] sm:$0xff] }
 0x62f   :  { %v11629_v20 = vpop.f32.mrb[135].mxu1  ;;  %11979 = vmatprep.subr.bf16.mxu1 %v12267_v39 }
 0x630   :  { %v11630_v4 = vadd.f32 %v11629_v20, %v11628_v53  ;;  %v16234_v38 = vadd.f32 %v11627_v24, %v16056_v37  ;;  %v18098_v37 = vld [vmem:[#allocation69_spill] sm:$0xff] }
 0x631   :  { %7239 = vmatmul.mubr.bf16.gmra.mrb[240].mxu1 %v18095_v57  ;;  %v18101_v57 = vld [vmem:[#allocation125_spill] sm:$0xff] }
 0x632   :  { %7246 = vmatprep.mubr.bf16.mxu1 %v18096_v49  ;;  %v16239_v23 = vadd.f32 %v11630_v4, %v16060_v63  ;;  %v2769_v49 = vadd.f32 %v18101_v57, %v18066_v21 }
 0x634   :  { %v11631_v54 = vpop.f32.mrb[136].mxu1  ;;  %vm3278_vm1 = vcmp.ge.f32.partialorder %v2769_v49, 0.0 }
 0x635   :  { %v11632_v5 = vpop.f32.mrb[137].mxu1 }
 0x636   :  { %v11634_v42 = vpop.f32.mrb[138].mxu1  ;;  %v11633_v62 = vadd.f32 %v11632_v5, %v11631_v54  ;;  %v18102_v54 = vld [vmem:[#allocation126_spill] sm:$0xff] }
 0x637   :  { %v11635_v27 = vpop.f32.mrb[139].mxu1  ;;  %v2775_v5 = vadd.f32 %v18102_v54, %v18066_v21 }
 0x638   :  { %v16242_v60 = vadd.f32 %v11633_v62, %v16064_v1  ;;  %v11636_v22 = vadd.f32 %v11635_v27, %v11634_v42  ;;  %v18100_v1 = vld [vmem:[#allocation79_spill] sm:$0xff]  ;;  %v18104_v27 = vld [vmem:[#allocation129_spill] sm:$0xff] }
 0x639   :  { %7247 = vmatmul.mubr.bf16.gmra.mrb[244].mxu1 %v18097_v45  ;;  %vm3280_vm2 = vcmp.ge.f32.partialorder %v2775_v5, 0.0 }
 0x63a   :  { %7254 = vmatprep.mubr.bf16.mxu1 %v18098_v37  ;;  %v16247_v40 = vadd.f32 %v11636_v22, %v16068_v36  ;;  %v2787_v22 = vadd.f32 %v18104_v27, %v18066_v21  ;;  %v18105_v37 = vld [vmem:[#allocation78_spill] sm:$0xff] }
 0x63c   :  { %v11637_v15 = vpop.f32.mrb[140].mxu1  ;;  %vm3284_vm4 = vcmp.ge.f32.partialorder %v2787_v22, 0.0 }
 0x63d   :  { %v11638_v52 = vpop.f32.mrb[141].mxu1 }
 0x63e   :  { %v11640_v63 = vpop.f32.mrb[142].mxu1  ;;  %v11639_v2 = vadd.f32 %v11638_v52, %v11637_v15  ;;  %v18106_v52 = vld [vmem:[#allocation89_spill] sm:$0xff] }
 0x63f   :  { %v11641_v13 = vpop.f32.mrb[143].mxu1 }
 0x640   :  { %v16250_v39 = vadd.f32 %v11639_v2, %v16072_v11  ;;  %v11642_v34 = vadd.f32 %v11641_v13, %v11640_v63  ;;  %v18103_v11 = vld [vmem:[#allocation128_spill] sm:$0xff]  ;;  %v3758_v63 = vmul.f32 0.01, %v2769_v49  ;;  %v3760_v2 = vmul.f32 0.01, %v2775_v5 }
 0x641   :  { %7255 = vmatmul.mubr.bf16.gmra.mrb[248].mxu1 %v18099_v12  ;;  %v2781_v42 = vadd.f32 %v18103_v11, %v18066_v21 }
 0x642   :  { %7262 = vmatprep.mubr.bf16.mxu1 %v18100_v1  ;;  %v16255_v24 = vadd.f32 %v11642_v34, %v16076_v28  ;;  %v3764_v34 = vmul.f32 0.01, %v2787_v22 }
 0x643   :  { %v3762_v13 = vmul.f32 0.01, %v2781_v42  ;;  %vm3282_vm3 = vcmp.ge.f32.partialorder %v2781_v42, 0.0 }
 0x644   :  { %v11643_v53 = vpop.f32.mrb[144].mxu1 }
 0x645   :  { %v11644_v20 = vpop.f32.mrb[145].mxu1 }
 0x646   :  { %v11645_v36 = vadd.f32 %v11644_v20, %v11643_v53  ;;  %v11646_v4 = vpop.f32.mrb[146].mxu1  ;;  %v4238_v20 = vsel %vm3278_vm1, %v2769_v49, %v3758_v63  ;;  %v18108_v49 = vld [vmem:[#allocation99_spill] sm:$0xff] }
 0x647   :  { %v11647_v62 = vpop.f32.mrb[147].mxu1  ;;  %v4730_v27 = vmul.f32 %v13029_v55, %v4238_v20  ;;  %v18109_v20 = vld [vmem:[#allocation98_spill] sm:$0xff] }
 0x648   :  { %v16266_v28 = vadd.f32 %v11645_v36, %v16088_v16  ;;  %v11648_v45 = vadd.f32 %v11647_v62, %v11646_v4  ;;  %v4240_v36 = vsel %vm3280_vm2, %v2775_v5, %v3760_v2  ;;  %v4242_v4 = vsel %vm3282_vm3, %v2781_v42, %v3762_v13  ;;  %v18107_v62 = vld [vmem:[#allocation88_spill] sm:$0xff] }
 0x649   :  { %7263 = vmatmul.mubr.bf16.gmra.mrb[252].mxu1 %v18105_v37  ;;  %v4734_v37 = vmul.f32 %v13029_v55, %v4242_v4  ;;  %v5222_v2 = vadd.f32 %v13042_v3, %v4730_v27 }
 0x64a   :  { %v16270_v15 = vadd.f32 %v11648_v45, %v16093_v26  ;;  %7270 = vmatprep.mubr.bf16.mxu1 %v18106_v52  ;;  %v4244_v26 = vsel %vm3284_vm4, %v2787_v22, %v3764_v34  ;;  %v4732_v45 = vmul.f32 %v13029_v55, %v4240_v36 }
 0x64b   :  { %v4736_v5 = vmul.f32 %v13029_v55, %v4244_v26  ;;  %v5226_v34 = vadd.f32 %v13042_v3, %v4734_v37 }
 0x64c   :  { %v11649_v12 = vpop.f32.mrb[148].mxu1  ;;  %v5224_v13 = vadd.f32 %v13042_v3, %v4732_v45 }
 0x64d   :  { %v11650_v1 = vpop.f32.mrb[149].mxu1 }
 0x64e   :  { %v11651_v16 = vadd.f32 %v11650_v1, %v11649_v12  ;;  %v11652_v53 = vpop.f32.mrb[150].mxu1  ;;  %v5228_v1 = vadd.f32 %v13042_v3, %v4736_v5  ;;  %v18111_v5 = vld [vmem:[#allocation104_spill] sm:$0xff] }
 0x64f   :  { %v11653_v57 = vpop.f32.mrb[151].mxu1 }
 0x650   :  { %v16274_v54 = vadd.f32 %v11651_v16, %v16096_v61  ;;  %v11654_v11 = vadd.f32 %v11653_v57, %v11652_v53  ;;  %v5470_v53 = vmax.f32 %v5222_v2, %v5226_v34  ;;  %v5472_v36 = vmax.f32 %v5224_v13, %v5228_v1  ;;  %v18110_v57 = vld [vmem:[#allocation105_spill] sm:$0xff]  ;;  %v18113_v1 = vld [vmem:[#allocation110_spill] sm:$0xff] }
 0x651   :  { %7271 = vmatmul.mubr.bf16.gmra.mrb[0].mxu1 %v18107_v62 }
 0x652   :  { %v16281_v52 = vadd.f32 %v11654_v11, %v16104_v18  ;;  %7278 = vmatprep.mubr.bf16.mxu1 %v18108_v49  ;;  %v16297_v26 = vpack.c.bf16 %v5472_v36, %v5470_v53 }
 0x654   :  { %v11655_v42 = vpop.f32.mrb[152].mxu1 }
 0x655   :  { %v11656_v22 = vpop.f32.mrb[153].mxu1 }
 0x656   :  { %v11657_v61 = vadd.f32 %v11656_v22, %v11655_v42  ;;  %v11658_v63 = vpop.f32.mrb[154].mxu1 }
 0x657   :  { %v11659_v12 = vpop.f32.mrb[155].mxu1 }
 0x658   :  { %v16290_v18 = vadd.f32 %v11657_v61, %v16112_v25  ;;  %v11660_v16 = vadd.f32 %v11659_v12, %v11658_v63 }
 0x659   :  { %7279 = vmatmul.mubr.bf16.gmra.mrb[4].mxu1 %v18109_v20 }
 0x65a   :  { %v16294_v4 = vadd.f32 %v11660_v16, %v16117_v17  ;;  %7286 = vmatprep.mubr.bf16.mxu1 %v18110_v57  ;;  %v18112_v17 = vld [vmem:[#allocation111_spill] sm:$0xff]  ;;  %v18114_v16 = vld [vmem:[#allocation118_spill] sm:$0xff] }
 0x65c   :  { %v11661_v11 = vpop.f32.mrb[156].mxu1 }
 0x65d   :  { %v11662_v62 = vpop.f32.mrb[157].mxu1 }
 0x65e   :  { %v11663_v27 = vadd.f32 %v11662_v62, %v11661_v11  ;;  %v11664_v45 = vpop.f32.mrb[158].mxu1 }
 0x65f   :  { %v11665_v37 = vpop.f32.mrb[159].mxu1 }
 0x660   :  { %v16300_v25 = vadd.f32 %v11663_v27, %v16122_v35  ;;  %v11666_v49 = vadd.f32 %v11665_v37, %v11664_v45  ;;  %v18115_v27 = vld [vmem:[#allocation117_spill] sm:$0xff] }
 0x661   :  { %7287 = vmatmul.mubr.bf16.gmra.mrb[8].mxu1 %v18111_v5 }
 0x662   :  { %v16304_v42 = vadd.f32 %v11666_v49, %v16127_v10  ;;  %7294 = vmatprep.mubr.bf16.mxu1 %v18112_v17 }
 0x664   :  { %v11667_v22 = vpop.f32.mrb[160].mxu1 }
 0x665   :  { %v11668_v61 = vpop.f32.mrb[161].mxu1 }
 0x666   :  { %v11669_v63 = vadd.f32 %v11668_v61, %v11667_v22  ;;  %v11670_v2 = vpop.f32.mrb[162].mxu1  ;;  %v18116_v61 = vld [vmem:[#allocation127_spill] sm:$0xff] }
 0x667   :  { %v11671_v13 = vpop.f32.mrb[163].mxu1 }
 0x668   :  { %v16308_v34 = vadd.f32 %v11669_v63, %v16130_v9  ;;  %v11672_v12 = vadd.f32 %v11671_v13, %v11670_v2  ;;  %v18117_v63 = vld [vmem:[#allocation15_spill] sm:$0xff] }
 0x669   :  { %7295 = vmatmul.mubr.bf16.gmra.mrb[12].mxu1 %v18113_v1 }
 0x66a   :  { %v16312_v35 = vadd.f32 %v11672_v12, %v16135_v0  ;;  %7302 = vmatprep.mubr.bf16.mxu1 %v18114_v16  ;;  %v12268_v12 = vld [vmem:[%s17728_s5 + $0x380] sm:$0xff]  }
 0x66c   :  { %v11673_v10 = vpop.f32.mrb[164].mxu1 }
 0x66d   :  { %v11674_v53 = vpop.f32.mrb[165].mxu1 }
 0x66e   :  { %v11675_v20 = vadd.f32 %v11674_v53, %v11673_v10  ;;  %v11676_v36 = vpop.f32.mrb[166].mxu1  ;;  %v18118_v10 = vld [vmem:[#allocation14_spill] sm:$0xff] }
 0x66f   :  { %v11677_v57 = vpop.f32.mrb[167].mxu1 }
 0x670   :  { %v16316_v11 = vadd.f32 %v11675_v20, %v16138_v44  ;;  %v11678_v62 = vadd.f32 %v11677_v57, %v11676_v36  ;;  %v18119_v20 = vld [vmem:[#allocation23_spill] sm:$0xff]  ;;  %v12270_v36 = vld [vmem:[%s17728_s5 + $0x388] sm:$0xff]   ;;  %v12271_v57 = vld [vmem:[%s17728_s5 + $0x3d0] sm:$0xff]  }
 0x671   :  { %7303 = vmatmul.mubr.bf16.gmra.mrb[16].mxu1 %v18115_v27 }
 0x672   :  { %v16320_v9 = vadd.f32 %v11678_v62, %v16143_v48  ;;  %7310 = vmatprep.mubr.bf16.mxu1 %v16119_v59 }
 0x674   :  { %v11695_v0 = vpop.f32.mrb[168].mxu1 }
 0x675   :  { %v11696_v45 = vpop.f32.mrb[169].mxu1 }
 0x676   :  { %v11697_v37 = vadd.f32 %v11696_v45, %v11695_v0  ;;  %v11698_v49 = vpop.f32.mrb[170].mxu1 }
 0x677   :  { %v11699_v5 = vpop.f32.mrb[171].mxu1 }
 0x678   :  { %v16324_v17 = vadd.f32 %v11697_v37, %v16146_v51  ;;  %v11700_v22 = vadd.f32 %v11699_v5, %v11698_v49  ;;  %v12269_v51 = vld [vmem:[%s17728_s5 + $0x3c8] sm:$0xff]   ;;  %v12273_v37 = vld [vmem:[%s17728_s5 + $0x3d8] sm:$0xff]  }
 0x679   :  { %7311 = vmatmul.mubr.bf16.gmra.mrb[20].mxu1 %v18116_v61 }
 0x67a   :  { %v16328_v44 = vadd.f32 %v11700_v22, %v16151_v58  ;;  %7507 = vmatprep.mubr.bf16.mxu1 %v18117_v63  ;;  %v18120_v22 = vld [vmem:[#allocation22_spill] sm:$0xff]  ;;  %v18121_v63 = vld [vmem:[#allocation33_spill] sm:$0xff] }
 0x67c   :  { %v11701_v48 = vpop.f32.mrb[172].mxu1 }
 0x67d   :  { %v11702_v2 = vpop.f32.mrb[173].mxu1 }
 0x67e   :  { %v11703_v13 = vadd.f32 %v11702_v2, %v11701_v48  ;;  %v11704_v59 = vpop.f32.mrb[174].mxu1  ;;  %v12274_v48 = vld [vmem:[%s17728_s5 + $0x398] sm:$0xff]   ;;  %v12275_v2 = vld [vmem:[%s17728_s5 + $0x3e0] sm:$0xff]  }
 0x67f   :  { %v11705_v1 = vpop.f32.mrb[175].mxu1 }
 0x680   :  { %v16338_v16 = vadd.f32 %v11703_v13, %v16160_v46  ;;  %v11706_v58 = vadd.f32 %v11705_v1, %v11704_v59 }
 0x681   :  { %7508 = vmatmul.mubr.bf16.vlgmr.msra.gmra.mrb[24].mxu1 %v18118_v10 }
 0x682   :  { %v16342_v53 = vadd.f32 %v11706_v58, %v16168_v8  ;;  %11980 = vmatpush3.bf16.msra.mxu1 %v12268_v12  ;;  %7515 = vmatprep.mubr.bf16.mxu1 %v18119_v20  ;;  %v12272_v8 = vld [vmem:[%s17728_s5 + $0x390] sm:$0xff]   ;;  %v18122_v20 = vld [vmem:[#allocation32_spill] sm:$0xff] }
 0x683   :  { %11981 = vmatprep.subr.bf16.mxu1 %v12269_v51  ;;  %v12277_v51 = vld [vmem:[%s17728_s5 + $0x3e8] sm:$0xff]  }
 0x684   :  { %v11707_v46 = vpop.f32.mrb[176].mxu1 }
 0x685   :  { %v11708_v62 = vpop.f32.mrb[177].mxu1 }
 0x686   :  { %v11709_v27 = vadd.f32 %v11708_v62, %v11707_v46  ;;  %v11710_v0 = vpop.f32.mrb[178].mxu1  ;;  %11982 = vmatpush3.bf16.msra.mxu1 %v12270_v36  ;;  %v12278_v46 = vld [vmem:[%s17728_s5 + $0x3a8] sm:$0xff]   ;;  %v12279_v62 = vld [vmem:[%s17728_s5 + $0x3f0] sm:$0xff]  }
 0x687   :  { %v11711_v45 = vpop.f32.mrb[179].mxu1  ;;  %11983 = vmatprep.subr.bf16.mxu1 %v12271_v57  ;;  %v18123_v57 = vld [vmem:[#allocation43_spill] sm:$0xff] }
 0x688   :  { %v16358_v49 = vadd.f32 %v11709_v27, %v16180_v50  ;;  %v11712_v5 = vadd.f32 %v11711_v45, %v11710_v0 }
 0x689   :  { %7516 = vmatmul.mubr.bf16.gmra.mrb[28].mxu1 %v18120_v22 }
 0x68a   :  { %v16362_v61 = vadd.f32 %v11712_v5, %v16188_v30  ;;  %7523 = vmatprep.mubr.bf16.mxu1 %v18121_v63  ;;  %11984 = vmatpush3.bf16.msra.mxu1 %v12272_v8  ;;  %v12276_v30 = vld [vmem:[%s17728_s5 + $0x3a0] sm:$0xff]   ;;  %v18124_v63 = vld [vmem:[#allocation42_spill] sm:$0xff] }
 0x68b   :  { %11985 = vmatprep.subr.bf16.mxu1 %v12273_v37  ;;  %v12281_v37 = vld [vmem:[%s17728_s5 + $0x3f8] sm:$0xff]  }
 0x68c   :  { %v11713_v50 = vpop.f32.mrb[180].mxu1 }
 0x68d   :  { %v11714_v13 = vpop.f32.mrb[181].mxu1 }
 0x68e   :  { %v11715_v59 = vadd.f32 %v11714_v13, %v11713_v50  ;;  %v11716_v12 = vpop.f32.mrb[182].mxu1  ;;  %11986 = vmatpush3.bf16.msra.mxu1 %v12274_v48  ;;  %v12282_v50 = vld [vmem:[%s17728_s5 + $0x3b8] sm:$0xff]  }
 0x68f   :  { %v11717_v1 = vpop.f32.mrb[183].mxu1  ;;  %11987 = vmatprep.subr.bf16.mxu1 %v12275_v2  ;;  %v18125_v2 = vld [vmem:[#allocation53_spill] sm:$0xff] }
 0x690   :  { %v16378_v58 = vadd.f32 %v11715_v59, %v16200_v7  ;;  %v11718_v10 = vadd.f32 %v11717_v1, %v11716_v12 }
 0x691   :  { %7524 = vmatmul.mubr.bf16.gmra.mrb[32].mxu1 %v18122_v20  ;;  %v18127_v20 = vld [vmem:[#allocation63_spill] sm:$0xff] }
 0x692   :  { %v16382_v36 = vadd.f32 %v11718_v10, %v16208_v6  ;;  %7531 = vmatprep.mubr.bf16.mxu1 %v18123_v57  ;;  %11988 = vmatpush3.bf16.msra.mxu1 %v12276_v30  ;;  %v12280_v6 = vld [vmem:[%s17728_s5 + $0x3b0] sm:$0xff]  }
 0x693   :  { %11989 = vmatprep.subr.bf16.mxu1 %v12277_v51 }
 0x694   :  { %v11719_v7 = vpop.f32.mrb[184].mxu1 }
 0x695   :  { %v11720_v27 = vpop.f32.mrb[185].mxu1 }
 0x696   :  { %v11721_v0 = vadd.f32 %v11720_v27, %v11719_v7  ;;  %v11722_v8 = vpop.f32.mrb[186].mxu1  ;;  %11990 = vmatpush3.bf16.msra.mxu1 %v12278_v46 }
 0x697   :  { %v11723_v45 = vpop.f32.mrb[187].mxu1  ;;  %11991 = vmatprep.subr.bf16.mxu1 %v12279_v62 }
 0x698   :  { %v16398_v5 = vadd.f32 %v11721_v0, %v16220_v41  ;;  %v11724_v22 = vadd.f32 %v11723_v45, %v11722_v8  ;;  %v18129_v45 = vld [vmem:[#allocation73_spill] sm:$0xff] }
 0x699   :  { %7532 = vmatmul.mubr.bf16.gmra.mrb[36].mxu1 %v18124_v63 }
 0x69a   :  { %v16402_v48 = vadd.f32 %v11724_v22, %v16228_v47  ;;  %7539 = vmatprep.mubr.bf16.mxu1 %v18125_v2  ;;  %11992 = vmatpush3.bf16.msra.mxu1 %v12280_v6  ;;  %v18126_v47 = vld [vmem:[#allocation52_spill] sm:$0xff]  ;;  %v18128_v6 = vld [vmem:[#allocation62_spill] sm:$0xff] }
 0x69b   :  { %11993 = vmatprep.subr.bf16.mxu1 %v12281_v37 }
 0x69c   :  { %v11725_v13 = vpop.f32.mrb[188].mxu1 }
 0x69d   :  { %v11726_v59 = vpop.f32.mrb[189].mxu1 }
 0x69e   :  { %v11727_v12 = vadd.f32 %v11726_v59, %v11725_v13  ;;  %v11728_v30 = vpop.f32.mrb[190].mxu1  ;;  %11994 = vmatpush3.bf16.msra.mxu1 %v12282_v50  ;;  %v18130_v59 = vld [vmem:[#allocation72_spill] sm:$0xff] }
 0x69f   :  { %v11729_v41 = vpop.f32.mrb[191].mxu1 }
 0x6a0   :  { %v16409_v1 = vadd.f32 %v11727_v12, %v16234_v38  ;;  %v11730_v51 = vadd.f32 %v11729_v41, %v11728_v30  ;;  %v18131_v12 = vld [vmem:[#allocation83_spill] sm:$0xff] }
 0x6a1   :  { %7540 = vmatmul.mubr.bf16.gmra.mrb[40].mxu1 %v18126_v47 }
 0x6a2   :  { %v16413_v10 = vadd.f32 %v11730_v51, %v16239_v23  ;;  %7547 = vmatprep.mubr.bf16.mxu1 %v18127_v20 }
 0x6a4   :  { %v11731_v57 = vpop.f32.mrb[192].mxu1 }
 0x6a5   :  { %v11732_v46 = vpop.f32.mrb[193].mxu1 }
 0x6a6   :  { %v11733_v62 = vadd.f32 %v11732_v46, %v11731_v57  ;;  %v11734_v7 = vpop.f32.mrb[194].mxu1  ;;  %v18132_v46 = vld [vmem:[#allocation82_spill] sm:$0xff] }
 0x6a7   :  { %v11735_v27 = vpop.f32.mrb[195].mxu1 }
 0x6a8   :  { %v16417_v0 = vadd.f32 %v11733_v62, %v16242_v60  ;;  %v11736_v8 = vadd.f32 %v11735_v27, %v11734_v7  ;;  %v18133_v62 = vld [vmem:[#allocation93_spill] sm:$0xff] }
 0x6a9   :  { %7548 = vmatmul.mubr.bf16.gmra.mrb[44].mxu1 %v18128_v6 }
 0x6aa   :  { %v16421_v38 = vadd.f32 %v11736_v8, %v16247_v40  ;;  %7555 = vmatprep.mubr.bf16.mxu1 %v18129_v45 }
 0x6ac   :  { %v11737_v23 = vpop.f32.mrb[196].mxu1 }
 0x6ad   :  { %v11738_v37 = vpop.f32.mrb[197].mxu1 }
 0x6ae   :  { %v11739_v22 = vadd.f32 %v11738_v37, %v11737_v23  ;;  %v11740_v63 = vpop.f32.mrb[198].mxu1  ;;  %v18134_v37 = vld [vmem:[#allocation92_spill] sm:$0xff] }
 0x6af   :  { %v11741_v2 = vpop.f32.mrb[199].mxu1 }
 0x6b0   :  { %v16425_v50 = vadd.f32 %v11739_v22, %v16250_v39  ;;  %v11742_v13 = vadd.f32 %v11741_v2, %v11740_v63  ;;  %v18135_v22 = vld [vmem:[#allocation101_spill] sm:$0xff]  ;;  %v18136_v63 = vld [vmem:[#allocation131_spill] sm:$0xff] }
 0x6b1   :  { %7556 = vmatmul.mubr.bf16.gmra.mrb[48].mxu1 %v18130_v59  ;;  %v2793_v2 = vadd.f32 %v18136_v63, %v18066_v21  ;;  %v18137_v59 = vld [vmem:[#allocation132_spill] sm:$0xff] }
 0x6b2   :  { %v16429_v60 = vadd.f32 %v11742_v13, %v16255_v24  ;;  %7563 = vmatprep.mubr.bf16.mxu1 %v18131_v12  ;;  %v2799_v12 = vadd.f32 %v18137_v59, %v18066_v21 }
 0x6b3   :  { %vm3286_vm5 = vcmp.ge.f32.partialorder %v2793_v2, 0.0 }
 0x6b4   :  { %v11743_v40 = vpop.f32.mrb[200].mxu1  ;;  %vm3288_vm6 = vcmp.ge.f32.partialorder %v2799_v12, 0.0 }
 0x6b5   :  { %v11744_v30 = vpop.f32.mrb[201].mxu1 }
 0x6b6   :  { %v11745_v41 = vadd.f32 %v11744_v30, %v11743_v40  ;;  %v11746_v51 = vpop.f32.mrb[202].mxu1  ;;  %v18138_v40 = vld [vmem:[#allocation135_spill] sm:$0xff]  ;;  %v18139_v30 = vld [vmem:[#allocation136_spill] sm:$0xff] }
 0x6b7   :  { %v11747_v47 = vpop.f32.mrb[203].mxu1 }
 0x6b8   :  { %v16433_v20 = vadd.f32 %v11745_v41, %v16266_v28  ;;  %v11748_v57 = vadd.f32 %v11747_v47, %v11746_v51  ;;  %v2811_v41 = vadd.f32 %v18139_v30, %v18066_v21 }
 0x6b9   :  { %7564 = vmatmul.mubr.bf16.gmra.mrb[52].mxu1 %v18132_v46 }
 0x6ba   :  { %v16437_v39 = vadd.f32 %v11748_v57, %v16270_v15  ;;  %7571 = vmatprep.mubr.bf16.mxu1 %v18133_v62  ;;  %v3766_v62 = vmul.f32 0.01, %v2793_v2  ;;  %vm3292_vm8 = vcmp.ge.f32.partialorder %v2811_v41, 0.0 }
 0x6bc   :  { %v11749_v24 = vpop.f32.mrb[204].mxu1 }
 0x6bd   :  { %v11750_v7 = vpop.f32.mrb[205].mxu1 }
 0x6be   :  { %v11751_v27 = vadd.f32 %v11750_v7, %v11749_v24  ;;  %v11752_v8 = vpop.f32.mrb[206].mxu1  ;;  %v18140_v24 = vld [vmem:[#allocation100_spill] sm:$0xff]  ;;  %v3768_v7 = vmul.f32 0.01, %v2799_v12 }
 0x6bf   :  { %v11753_v6 = vpop.f32.mrb[207].mxu1 }
 0x6c0   :  { %v16441_v45 = vadd.f32 %v11751_v27, %v16274_v54  ;;  %v11754_v23 = vadd.f32 %v11753_v6, %v11752_v8  ;;  %v2805_v54 = vadd.f32 %v18138_v40, %v18066_v21  ;;  %v3772_v8 = vmul.f32 0.01, %v2811_v41 }
 0x6c1   :  { %7572 = vmatmul.mubr.bf16.gmra.mrb[56].mxu1 %v18134_v37  ;;  %v4246_v37 = vsel %vm3286_vm5, %v2793_v2, %v3766_v62  ;;  %v18142_v2 = vld [vmem:[#allocation106_spill] sm:$0xff] }
 0x6c2   :  { %v16445_v28 = vadd.f32 %v11754_v23, %v16281_v52  ;;  %7579 = vmatprep.mubr.bf16.mxu1 %v18135_v22  ;;  %v3770_v27 = vmul.f32 0.01, %v2805_v54  ;;  %v18141_v23 = vld [vmem:[#allocation107_spill] sm:$0xff]  ;;  %vm3290_vm7 = vcmp.ge.f32.partialorder %v2805_v54, 0.0  ;;  %v4248_v22 = vsel %vm3288_vm6, %v2799_v12, %v3768_v7 }
 0x6c3   :  { %v4252_v63 = vsel %vm3292_vm8, %v2811_v41, %v3772_v8 }
 0x6c4   :  { %v11755_v15 = vpop.f32.mrb[208].mxu1 }
 0x6c5   :  { %v11756_v13 = vpop.f32.mrb[209].mxu1 }
 0x6c6   :  { %v11757_v51 = vadd.f32 %v11756_v13, %v11755_v15  ;;  %v11758_v47 = vpop.f32.mrb[210].mxu1  ;;  %v4250_v15 = vsel %vm3290_vm7, %v2805_v54, %v3770_v27  ;;  %v18143_v54 = vld [vmem:[#allocation113_spill] sm:$0xff] }
 0x6c7   :  { %v11759_v52 = vpop.f32.mrb[211].mxu1 }
 0x6c8   :  { %v16457_v57 = vadd.f32 %v11757_v51, %v16290_v18  ;;  %v11760_v46 = vadd.f32 %v11759_v52, %v11758_v47  ;;  %v4740_v47 = vmul.f32 %v13029_v55, %v4248_v22  ;;  %v4742_v52 = vmul.f32 %v13029_v55, %v4250_v15  ;;  %v18144_v22 = vld [vmem:[#allocation112_spill] sm:$0xff] }
 0x6c9   :  { %7580 = vmatmul.mubr.bf16.gmra.mrb[60].mxu1 %v18140_v24 }
 0x6ca   :  { %v16461_v6 = vadd.f32 %v11760_v46, %v16294_v4  ;;  %7587 = vmatprep.mubr.bf16.mxu1 %v18141_v23  ;;  %v4738_v4 = vmul.f32 %v13029_v55, %v4246_v37  ;;  %v4744_v46 = vmul.f32 %v13029_v55, %v4252_v63  ;;  %v5232_v24 = vadd.f32 %v13042_v3, %v4740_v47 }
 0x6cb   :  { %v5234_v7 = vadd.f32 %v13042_v3, %v4742_v52  ;;  %v18146_v52 = vld [vmem:[#allocation119_spill] sm:$0xff] }
 0x6cc   :  { %v11761_v21 = vpop.f32.mrb[212].mxu1  ;;  %v5236_v27 = vadd.f32 %v13042_v3, %v4744_v46 }
 0x6cd   :  { %v11762_v18 = vpop.f32.mrb[213].mxu1 }
 0x6ce   :  { %v11763_v13 = vadd.f32 %v11762_v18, %v11761_v21  ;;  %v11764_v59 = vpop.f32.mrb[214].mxu1  ;;  %v5476_v37 = vmax.f32 %v5232_v24, %v5236_v27  ;;  %v18148_v27 = vld [vmem:[#allocation17_spill] sm:$0xff] }
 0x6cf   :  { %v11765_v40 = vpop.f32.mrb[215].mxu1 }
 0x6d0   :  { %v16465_v30 = vadd.f32 %v11763_v13, %v16300_v25  ;;  %v11766_v51 = vadd.f32 %v11765_v40, %v11764_v59  ;;  %v5230_v25 = vadd.f32 %v13042_v3, %v4738_v4  ;;  %v18145_v13 = vld [vmem:[#allocation120_spill] sm:$0xff] }
 0x6d1   :  { %7588 = vmatmul.mubr.bf16.gmra.mrb[64].mxu1 %v18142_v2 }
 0x6d2   :  { %v16473_v12 = vadd.f32 %v11766_v51, %v16304_v42  ;;  %7595 = vmatprep.mubr.bf16.mxu1 %v18143_v54  ;;  %v5474_v21 = vmax.f32 %v5230_v25, %v5234_v7  ;;  %v18147_v7 = vld [vmem:[#allocation134_spill] sm:$0xff] }
 0x6d4   :  { %v11767_v41 = vpop.f32.mrb[216].mxu1  ;;  %v16484_v15 = vpack.c.bf16 %v5476_v37, %v5474_v21 }
 0x6d5   :  { %v11768_v62 = vpop.f32.mrb[217].mxu1 }
 0x6d6   :  { %v11769_v8 = vadd.f32 %v11768_v62, %v11767_v41  ;;  %v11770_v23 = vpop.f32.mrb[218].mxu1 }
 0x6d7   :  { %v11771_v55 = vpop.f32.mrb[219].mxu1 }
 0x6d8   :  { %v16481_v42 = vadd.f32 %v11769_v8, %v16308_v34  ;;  %v11772_v18 = vadd.f32 %v11771_v55, %v11770_v23 }
 0x6d9   :  { %7596 = vmatmul.mubr.bf16.gmra.mrb[68].mxu1 %v18144_v22  ;;  %v18150_v22 = vld [vmem:[#allocation25_spill] sm:$0xff] }
 0x6da   :  { %v16487_v63 = vadd.f32 %v11772_v18, %v16312_v35  ;;  %7603 = vmatprep.mubr.bf16.mxu1 %v18145_v13  ;;  %v18149_v18 = vld [vmem:[#allocation16_spill] sm:$0xff] }
 0x6dc   :  { %v11773_v59 = vpop.f32.mrb[220].mxu1 }
 0x6dd   :  { %v11774_v3 = vpop.f32.mrb[221].mxu1 }
 0x6de   :  { %v11775_v40 = vadd.f32 %v11774_v3, %v11773_v59  ;;  %v11776_v51 = vpop.f32.mrb[222].mxu1 }
 0x6df   :  { %v11777_v4 = vpop.f32.mrb[223].mxu1 }
 0x6e0   :  { %v16491_v47 = vadd.f32 %v11775_v40, %v16316_v11  ;;  %v11778_v34 = vadd.f32 %v11777_v4, %v11776_v51 }
 0x6e1   :  { %7604 = vmatmul.mubr.bf16.gmra.mrb[72].mxu1 %v18146_v52  ;;  %v18152_v52 = vld [vmem:[#allocation35_spill] sm:$0xff] }
 0x6e2   :  { %v16495_v46 = vadd.f32 %v11778_v34, %v16320_v9  ;;  %7611 = vmatprep.mubr.bf16.mxu1 %v16297_v26  ;;  %v18151_v34 = vld [vmem:[#allocation24_spill] sm:$0xff] }
 0x6e4   :  { %v11795_v35 = vpop.f32.mrb[224].mxu1 }
 0x6e5   :  { %v11796_v2 = vpop.f32.mrb[225].mxu1 }
 0x6e6   :  { %v11797_v54 = vadd.f32 %v11796_v2, %v11795_v35  ;;  %v11798_v41 = vpop.f32.mrb[226].mxu1 }
 0x6e7   :  { %v11799_v62 = vpop.f32.mrb[227].mxu1 }
 0x6e8   :  { %v16499_v25 = vadd.f32 %v11797_v54, %v16324_v17  ;;  %v11800_v24 = vadd.f32 %v11799_v62, %v11798_v41 }
 0x6e9   :  { %7612 = vmatmul.mubr.bf16.gmra.mrb[76].mxu1 %v18147_v7  ;;  %v18153_v7 = vld [vmem:[#allocation34_spill] sm:$0xff] }
 0x6ea   :  { %v16503_v11 = vadd.f32 %v11800_v24, %v16328_v44  ;;  %7808 = vmatprep.mubr.bf16.mxu1 %v18148_v27  ;;  %v18154_v27 = vld [vmem:[#allocation45_spill] sm:$0xff] }
 0x6ec   :  { %v11801_v9 = vpop.f32.mrb[228].mxu1 }
 0x6ed   :  { %v11802_v8 = vpop.f32.mrb[229].mxu1 }
 0x6ee   :  { %v11803_v23 = vadd.f32 %v11802_v8, %v11801_v9  ;;  %v11804_v26 = vpop.f32.mrb[230].mxu1 }
 0x6ef   :  { %v11805_v55 = vpop.f32.mrb[231].mxu1 }
 0x6f0   :  { %v16507_v21 = vadd.f32 %v11803_v23, %v16338_v16  ;;  %v11806_v37 = vadd.f32 %v11805_v55, %v11804_v26 }
 0x6f1   :  { %7809 = vmatmul.mubr.bf16.vlgmr.msra.gmra.mrb[80].mxu1 %v18149_v18  ;;  %v18155_v18 = vld [vmem:[#allocation44_spill] sm:$0xff] }
 0x6f2   :  { %v16511_v17 = vadd.f32 %v11806_v37, %v16342_v53  ;;  %7816 = vmatprep.mubr.bf16.mxu1 %v18150_v22  ;;  %v18156_v22 = vld [vmem:[#allocation55_spill] sm:$0xff] }
 0x6f4   :  { %v11807_v44 = vpop.f32.mrb[232].mxu1 }
 0x6f5   :  { %v11808_v13 = vpop.f32.mrb[233].mxu1 }
 0x6f6   :  { %v11809_v59 = vadd.f32 %v11808_v13, %v11807_v44  ;;  %v11810_v3 = vpop.f32.mrb[234].mxu1 }
 0x6f7   :  { %v11811_v40 = vpop.f32.mrb[235].mxu1 }
 0x6f8   :  { %v16515_v51 = vadd.f32 %v11809_v59, %v16358_v49  ;;  %v11812_v4 = vadd.f32 %v11811_v40, %v11810_v3 }
 0x6f9   :  { %7817 = vmatmul.mubr.bf16.gmra.mrb[84].mxu1 %v18151_v34  ;;  %v18157_v34 = vld [vmem:[#allocation54_spill] sm:$0xff] }
 0x6fa   :  { %v16519_v16 = vadd.f32 %v11812_v4, %v16362_v61  ;;  %7824 = vmatprep.mubr.bf16.mxu1 %v18152_v52  ;;  %v18158_v52 = vld [vmem:[#allocation65_spill] sm:$0xff] }
 0x6fc   :  { %v11813_v53 = vpop.f32.mrb[236].mxu1 }
 0x6fd   :  { %v11814_v35 = vpop.f32.mrb[237].mxu1 }
 0x6fe   :  { %v11815_v2 = vadd.f32 %v11814_v35, %v11813_v53  ;;  %v11816_v54 = vpop.f32.mrb[238].mxu1  ;;  %v12285_v35 = vld [vmem:[%s17732_s9 + $0x104] ss:$16 sps:$4 sm:$0xff]  }
 0x6ff   :  { %v11817_v41 = vpop.f32.mrb[239].mxu1  ;;  %8374 = vmatprep.subr.bf16.mxu1 %v12285_v35 }
 0x700   :  { %v16523_v62 = vadd.f32 %v11815_v2, %v16378_v58  ;;  %v11818_v24 = vadd.f32 %v11817_v41, %v11816_v54 }
 0x701   :  { %7825 = vmatmul.mubr.bf16.gmra.mrb[88].mxu1 %v18153_v7  ;;  %v18159_v7 = vld [vmem:[#allocation64_spill] sm:$0xff] }
 0x702   :  { %v16527_v49 = vadd.f32 %v11818_v24, %v16382_v36  ;;  %7832 = vmatprep.mubr.bf16.mxu1 %v18154_v27 }
 0x704   :  { %v11819_v61 = vpop.f32.mrb[240].mxu1 }
 0x705   :  { %v11820_v9 = vpop.f32.mrb[241].mxu1 }
 0x706   :  { %v11821_v8 = vadd.f32 %v11820_v9, %v11819_v61  ;;  %v11822_v23 = vpop.f32.mrb[242].mxu1  ;;  %v18160_v61 = vld [vmem:[#allocation75_spill] sm:$0xff] }
 0x707   :  { %v11823_v26 = vpop.f32.mrb[243].mxu1 }
 0x708   :  { %v16531_v55 = vadd.f32 %v11821_v8, %v16398_v5  ;;  %v11824_v37 = vadd.f32 %v11823_v26, %v11822_v23 }
 0x709   :  { %7833 = vmatmul.mubr.bf16.gmra.mrb[92].mxu1 %v18155_v18 }
 0x70a   :  { %v16535_v58 = vadd.f32 %v11824_v37, %v16402_v48  ;;  %7840 = vmatprep.mubr.bf16.mxu1 %v18156_v22  ;;  %v12283_v48 = vld [vmem:[%s17732_s9 + $0x100] ss:$16 sps:$4 sm:$0xff]  }
 0x70b   :  { %8375 = vmatpush1.bf16.msra.mxu1 %v12283_v48 }
 0x70c   :  { %v11825_v36 = vpop.f32.mrb[244].mxu1 }
 0x70d   :  { %v11826_v44 = vpop.f32.mrb[245].mxu1 }
 0x70e   :  { %v11827_v13 = vadd.f32 %v11826_v44, %v11825_v36  ;;  %v11828_v59 = vpop.f32.mrb[246].mxu1  ;;  %v18161_v36 = vld [vmem:[#allocation74_spill] sm:$0xff]  ;;  %v18162_v44 = vld [vmem:[#allocation85_spill] sm:$0xff] }
 0x70f   :  { %v11829_v3 = vpop.f32.mrb[247].mxu1 }
 0x710   :  { %v16539_v40 = vadd.f32 %v11827_v13, %v16409_v1  ;;  %v11830_v4 = vadd.f32 %v11829_v3, %v11828_v59  ;;  %v12288_v13 = vld [vmem:[%s17732_s9 + $0x124] ss:$16 sps:$4 sm:$0xff]  }
 0x711   :  { %7841 = vmatmul.mubr.bf16.gmra.mrb[96].mxu1 %v18157_v34  ;;  %8376 = vmatprep.subr.bf16.mxu1 %v12288_v13 }
 0x712   :  { %v16543_v5 = vadd.f32 %v11830_v4, %v16413_v10  ;;  %7848 = vmatprep.mubr.bf16.mxu1 %v18158_v52 }
 0x714   :  { %v11831_v53 = vpop.f32.mrb[248].mxu1 }
 0x715   :  { %v11832_v2 = vpop.f32.mrb[249].mxu1 }
 0x716   :  { %v11833_v1 = vadd.f32 %v11832_v2, %v11831_v53  ;;  %v11834_v54 = vpop.f32.mrb[250].mxu1 }
 0x717   :  { %v11835_v41 = vpop.f32.mrb[251].mxu1 }
 0x718   :  { %v16553_v10 = vadd.f32 %v11833_v1, %v16417_v0  ;;  %v11836_v24 = vadd.f32 %v11835_v41, %v11834_v54 }
 0x719   :  { %7849 = vmatmul.mubr.bf16.gmra.mrb[100].mxu1 %v18159_v7 }
 0x71a   :  { %v16557_v27 = vadd.f32 %v11836_v24, %v16421_v38  ;;  %7856 = vmatprep.mubr.bf16.mxu1 %v18160_v61  ;;  %v12286_v38 = vld [vmem:[%s17732_s9 + $0x120] ss:$16 sps:$4 sm:$0xff]  }
 0x71b   :  { %8377 = vmatpush1.bf16.msra.mxu1 %v12286_v38 }
 0x71c   :  { %v11837_v9 = vpop.f32.mrb[252].mxu1 }
 0x71d   :  { %v11838_v8 = vpop.f32.mrb[253].mxu1 }
 0x71e   :  { %v11839_v23 = vadd.f32 %v11838_v8, %v11837_v9  ;;  %v11840_v26 = vpop.f32.mrb[254].mxu1 }
 0x71f   :  { %v11841_v37 = vpop.f32.mrb[255].mxu1 }
 0x720   :  { %v16561_v18 = vadd.f32 %v11839_v23, %v16425_v50  ;;  %v11842_v22 = vadd.f32 %v11841_v37, %v11840_v26  ;;  %v12294_v26 = vld [vmem:[%s17732_s9 + $0x164] ss:$16 sps:$4 sm:$0xff]  }
 0x721   :  { %7857 = vmatmul.mubr.bf16.gmra.mrb[104].mxu1 %v18161_v36 }
 0x722   :  { %v16565_v0 = vadd.f32 %v11842_v22, %v16429_v60  ;;  %7864 = vmatprep.mubr.bf16.mxu1 %v18162_v44 }
 0x724   :  { %v11843_v59 = vpop.f32.mrb[0].mxu1 }
 0x725   :  { %v11844_v50 = vpop.f32.mrb[1].mxu1 }
 0x726   :  { %v11845_v3 = vadd.f32 %v11844_v50, %v11843_v59  ;;  %v11846_v4 = vpop.f32.mrb[2].mxu1 }
 0x727   :  { %v11847_v34 = vpop.f32.mrb[3].mxu1 }
 0x728   :  { %v16575_v60 = vadd.f32 %v11845_v3, %v16433_v20  ;;  %v11848_v52 = vadd.f32 %v11847_v34, %v11846_v4  ;;  %v12289_v20 = vld [vmem:[%s17732_s9 + $0x140] ss:$16 sps:$4 sm:$0xff]  }
 0x729   :  { %7865 = vmatmul.mubr.bf16.gmra.mrb[108].mxu1 %v18046_v56  ;;  %v12291_v56 = vld [vmem:[%s17732_s9 + $0x144] ss:$16 sps:$4 sm:$0xff]  }
 0x72a   :  { %v16579_v48 = vadd.f32 %v11848_v52, %v16437_v39  ;;  %7872 = vmatprep.mubr.bf16.mxu1 %v18047_v31  ;;  %8378 = vmatprep.subr.bf16.mxu1 %v12291_v56  ;;  %v18163_v34 = vld [vmem:[#allocation114_spill] sm:$0xff] }
 0x72b   :  { %8379 = vmatpush1.bf16.msra.mxu1 %v12289_v20 }
 0x72c   :  { %v11849_v53 = vpop.f32.mrb[4].mxu1  ;;  %8380 = vmatprep.subr.bf16.mxu1 %v12294_v26 }
 0x72d   :  { %v11850_v35 = vpop.f32.mrb[5].mxu1 }
 0x72e   :  { %v11851_v2 = vadd.f32 %v11850_v35, %v11849_v53  ;;  %v11852_v1 = vpop.f32.mrb[6].mxu1 }
 0x72f   :  { %v11853_v54 = vpop.f32.mrb[7].mxu1 }
 0x730   :  { %v16583_v41 = vadd.f32 %v11851_v2, %v16441_v45  ;;  %v11854_v24 = vadd.f32 %v11853_v54, %v11852_v1  ;;  %v18165_v54 = vld [vmem:[#allocation133_spill] sm:$0xff] }
 0x731   :  { %7873 = vmatmul.mubr.bf16.gmra.mrb[112].mxu1 %v18048_v29 }
 0x732   :  { %v16593_v31 = vadd.f32 %v11854_v24, %v16445_v28  ;;  %7880 = vmatprep.mubr.bf16.mxu1 %v15171_v43  ;;  %v12292_v43 = vld [vmem:[%s17732_s9 + $0x160] ss:$16 sps:$4 sm:$0xff]   ;;  %v12297_v24 = vld [vmem:[%s17732_s9 + $0x184] ss:$16 sps:$4 sm:$0xff]  }
 0x733   :  { %8381 = vmatpush1.bf16.msra.mxu1 %v12292_v43 }
 0x734   :  { %v11855_v39 = vpop.f32.mrb[8].mxu1  ;;  %8382 = vmatprep.subr.bf16.mxu1 %v12297_v24 }
 0x735   :  { %v11856_v45 = vpop.f32.mrb[9].mxu1 }
 0x736   :  { %v11857_v7 = vadd.f32 %v11856_v45, %v11855_v39  ;;  %v11858_v61 = vpop.f32.mrb[10].mxu1 }
 0x737   :  { %v11859_v9 = vpop.f32.mrb[11].mxu1 }
 0x738   :  { %v16597_v8 = vadd.f32 %v11857_v7, %v16457_v57  ;;  %v11860_v23 = vadd.f32 %v11859_v9, %v11858_v61 }
 0x739   :  { %7881 = vmatmul.mubr.bf16.gmra.mrb[116].mxu1 %v15166_v14 }
 0x73a   :  { %v16601_v29 = vadd.f32 %v11860_v23, %v16461_v6  ;;  %7888 = vmatprep.mubr.bf16.mxu1 %v15334_v19 }
 0x73c   :  { %v11861_v28 = vpop.f32.mrb[12].mxu1 }
 0x73d   :  { %v11862_v37 = vpop.f32.mrb[13].mxu1 }
 0x73e   :  { %v11863_v57 = vadd.f32 %v11862_v37, %v11861_v28  ;;  %v11864_v22 = vpop.f32.mrb[14].mxu1 }
 0x73f   :  { %v11865_v36 = vpop.f32.mrb[15].mxu1 }
 0x740   :  { %v16611_v14 = vadd.f32 %v11863_v57, %v16465_v30  ;;  %v11866_v6 = vadd.f32 %v11865_v36, %v11864_v22 }
 0x741   :  { %7889 = vmatmul.mubr.bf16.gmra.mrb[120].mxu1 %v15330_v33  ;;  %v18164_v33 = vld [vmem:[#allocation130_spill] sm:$0xff] }
 0x742   :  { %v16615_v19 = vadd.f32 %v11866_v6, %v16473_v12  ;;  %7896 = vmatprep.mubr.bf16.mxu1 %v15468_v32 }
 0x744   :  { %v11867_v44 = vpop.f32.mrb[16].mxu1 }
 0x745   :  { %v11868_v38 = vpop.f32.mrb[17].mxu1 }
 0x746   :  { %v11869_v13 = vadd.f32 %v11868_v38, %v11867_v44  ;;  %v11870_v59 = vpop.f32.mrb[18].mxu1 }
 0x747   :  { %v11871_v50 = vpop.f32.mrb[19].mxu1 }
 0x748   :  { %v16619_v3 = vadd.f32 %v11869_v13, %v16481_v42  ;;  %v11872_v4 = vadd.f32 %v11871_v50, %v11870_v59 }
 0x749   :  { %7897 = vmatmul.mubr.bf16.gmra.mrb[124].mxu1 %v18163_v34 }
 0x74a   :  { %v16623_v30 = vadd.f32 %v11872_v4, %v16487_v63  ;;  %7904 = vmatprep.mubr.bf16.mxu1 %v18164_v33  ;;  %v12295_v63 = vld [vmem:[%s17732_s9 + $0x180] ss:$16 sps:$4 sm:$0xff]  }
 0x74b   :  { %8383 = vmatpush1.bf16.msra.mxu1 %v12295_v63 }
 0x74c   :  { %v11873_v12 = vpop.f32.mrb[20].mxu1 }
 0x74d   :  { %v11874_v52 = vpop.f32.mrb[21].mxu1 }
 0x74e   :  { %v11875_v53 = vadd.f32 %v11874_v52, %v11873_v12  ;;  %v11876_v32 = vpop.f32.mrb[22].mxu1 }
 0x74f   :  { %v11877_v35 = vpop.f32.mrb[23].mxu1 }
 0x750   :  { %v16627_v2 = vadd.f32 %v11875_v53, %v16491_v47  ;;  %v11878_v1 = vadd.f32 %v11877_v35, %v11876_v32  ;;  %v12301_v32 = vld [vmem:[%s17732_s9 + $0x1c0] ss:$16 sps:$4 sm:$0xff]  }
 0x751   :  { %7905 = vmatmul.mubr.bf16.gmra.mrb[128].mxu1 %v18165_v54 }
 0x752   :  { %v16631_v42 = vadd.f32 %v11878_v1, %v16495_v46  ;;  %7912 = vmatprep.mubr.bf16.mxu1 %v16484_v15  ;;  %v18166_v15 = vld [vmem:[#allocation30_spill] sm:$0xff] }
 0x754   :  { %v11895_v20 = vpop.f32.mrb[24].mxu1 }
 0x755   :  { %v11896_v56 = vpop.f32.mrb[25].mxu1 }
 0x756   :  { %v11897_v47 = vadd.f32 %v11896_v56, %v11895_v20  ;;  %v11898_v39 = vpop.f32.mrb[26].mxu1 }
 0x757   :  { %v11899_v45 = vpop.f32.mrb[27].mxu1 }
 0x758   :  { %v16641_v46 = vadd.f32 %v11897_v47, %v16499_v25  ;;  %v11900_v7 = vadd.f32 %v11899_v45, %v11898_v39  ;;  %v12298_v25 = vld [vmem:[%s17732_s9 + $0x1a0] ss:$16 sps:$4 sm:$0xff]  }
 0x759   :  { %7913 = vmatmul.mubr.bf16.gmra.mrb[132].mxu1 %v18166_v15  ;;  %v12306_v15 = vld [vmem:[%s17732_s9 + $0x1e4] ss:$16 sps:$4 sm:$0xff]  }
 0x75a   :  { %v16645_v61 = vadd.f32 %v11900_v7, %v16503_v11  ;;  %v12300_v11 = vld [vmem:[%s17732_s9 + $0x1a4] ss:$16 sps:$4 sm:$0xff]  }
 0x75b   :  { %8384 = vmatprep.subr.bf16.mxu1 %v12300_v11 }
 0x75c   :  { %v11901_v9 = vpop.f32.mrb[28].mxu1  ;;  %8385 = vmatpush1.bf16.msra.mxu1 %v12298_v25 }
 0x75d   :  { %v11902_v23 = vpop.f32.mrb[29].mxu1 }
 0x75e   :  { %v11903_v28 = vadd.f32 %v11902_v23, %v11901_v9  ;;  %v11904_v43 = vpop.f32.mrb[30].mxu1 }
 0x75f   :  { %v11905_v26 = vpop.f32.mrb[31].mxu1 }
 0x760   :  { %v16648_v37 = vadd.f32 %v11903_v28, %v16507_v21  ;;  %v11906_v57 = vadd.f32 %v11905_v26, %v11904_v43  ;;  %v12309_v28 = vld [vmem:[%s17732_s9 + $0x10c] ss:$16 sps:$4 sm:$0xff]  }
 0x762   :  { %v16651_v22 = vadd.f32 %v11906_v57, %v16511_v17  ;;  %v12688_v57 = vmov 0  }
 0x763   :  { %8406 = vmatprep.mubr.bf16.mxu1 %v12688_v57 }
 0x764   :  { %v11907_v36 = vpop.f32.mrb[32].mxu1 }
 0x765   :  { %v11908_v6 = vpop.f32.mrb[33].mxu1 }
 0x766   :  { %v11909_v44 = vadd.f32 %v11908_v6, %v11907_v36  ;;  %v11910_v38 = vpop.f32.mrb[34].mxu1 }
 0x767   :  { %v11911_v21 = vpop.f32.mrb[35].mxu1 }
 0x768   :  { %v16660_v13 = vadd.f32 %v11909_v44, %v16515_v51  ;;  %v11912_v17 = vadd.f32 %v11911_v21, %v11910_v38  ;;  %v12303_v51 = vld [vmem:[%s17732_s9 + $0x1c4] ss:$16 sps:$4 sm:$0xff]  }
 0x769   :  { %8386 = vmatprep.subr.bf16.mxu1 %v12303_v51 }
 0x76a   :  { %v16663_v59 = vadd.f32 %v11912_v17, %v16519_v16  ;;  %8387 = vmatpush1.bf16.msra.mxu1 %v12301_v32 }
 0x76b   :  { %8388 = vmatprep.subr.bf16.mxu1 %v12306_v15 }
 0x76c   :  { %v11913_v50 = vpop.f32.mrb[36].mxu1 }
 0x76d   :  { %v11914_v4 = vpop.f32.mrb[37].mxu1 }
 0x76e   :  { %v11915_v34 = vadd.f32 %v11914_v4, %v11913_v50  ;;  %v11916_v33 = vpop.f32.mrb[38].mxu1 }
 0x76f   :  { %v11917_v12 = vpop.f32.mrb[39].mxu1 }
 0x770   :  { %v16666_v52 = vadd.f32 %v11915_v34, %v16523_v62  ;;  %v11918_v53 = vadd.f32 %v11917_v12, %v11916_v33 }
 0x772   :  { %v16675_v16 = vadd.f32 %v11918_v53, %v16527_v49 }
 0x774   :  { %v11919_v35 = vpop.f32.mrb[40].mxu1 }
 0x775   :  { %v11920_v1 = vpop.f32.mrb[41].mxu1 }
 0x776   :  { %v11921_v54 = vadd.f32 %v11920_v1, %v11919_v35  ;;  %v11922_v63 = vpop.f32.mrb[42].mxu1 }
 0x777   :  { %v11923_v62 = vpop.f32.mrb[43].mxu1 }
 0x778   :  { %v16678_v24 = vadd.f32 %v11921_v54, %v16531_v55  ;;  %v11924_v20 = vadd.f32 %v11923_v62, %v11922_v63  ;;  %v12304_v55 = vld [vmem:[%s17732_s9 + $0x1e0] ss:$16 sps:$4 sm:$0xff]  }
 0x779   :  { %8389 = vmatpush1.bf16.msra.mxu1 %v12304_v55 }
 0x77a   :  { %v16681_v56 = vadd.f32 %v11924_v20, %v16535_v58  ;;  %8417 = vmatprep.subr.bf16.mxu1 %v12309_v28 }
 0x77c   :  { %v11925_v47 = vpop.f32.mrb[44].mxu1 }
 0x77d   :  { %v11926_v39 = vpop.f32.mrb[45].mxu1 }
 0x77e   :  { %v11927_v45 = vadd.f32 %v11926_v39, %v11925_v47  ;;  %v11928_v7 = vpop.f32.mrb[46].mxu1 }
 0x77f   :  { %v11929_v49 = vpop.f32.mrb[47].mxu1 }
 0x780   :  { %v16687_v9 = vadd.f32 %v11927_v45, %v16539_v40  ;;  %v11930_v23 = vadd.f32 %v11929_v49, %v11928_v7 }
 0x782   :  { %v16693_v58 = vadd.f32 %v11930_v23, %v16543_v5 }
 0x784   :  { %v11931_v43 = vpop.f32.mrb[48].mxu1 }
 0x785   :  { %v11932_v26 = vpop.f32.mrb[49].mxu1 }
 0x786   :  { %v11933_v40 = vadd.f32 %v11932_v26, %v11931_v43  ;;  %v11934_v25 = vpop.f32.mrb[50].mxu1 }
 0x787   :  { %v11935_v11 = vpop.f32.mrb[51].mxu1 }
 0x788   :  { %v16700_v36 = vadd.f32 %v11933_v40, %v16553_v10  ;;  %v11936_v6 = vadd.f32 %v11935_v11, %v11934_v25 }
 0x78a   :  { %v16703_v5 = vadd.f32 %v11936_v6, %v16557_v27 }
 0x78c   :  { %v11937_v44 = vpop.f32.mrb[52].mxu1 }
 0x78d   :  { %v11938_v38 = vpop.f32.mrb[53].mxu1 }
 0x78e   :  { %v11939_v21 = vadd.f32 %v11938_v38, %v11937_v44  ;;  %v11940_v17 = vpop.f32.mrb[54].mxu1 }
 0x78f   :  { %v11941_v50 = vpop.f32.mrb[55].mxu1 }
 0x790   :  { %v16706_v4 = vadd.f32 %v11939_v21, %v16561_v18  ;;  %v11942_v34 = vadd.f32 %v11941_v50, %v11940_v17 }
 0x792   :  { %v16709_v33 = vadd.f32 %v11942_v34, %v16565_v0 }
 0x794   :  { %v11943_v12 = vpop.f32.mrb[56].mxu1 }
 0x795   :  { %v11944_v53 = vpop.f32.mrb[57].mxu1 }
 0x796   :  { %v11945_v10 = vadd.f32 %v11944_v53, %v11943_v12  ;;  %v11946_v32 = vpop.f32.mrb[58].mxu1 }
 0x797   :  { %v11947_v51 = vpop.f32.mrb[59].mxu1 }
 0x798   :  { %v16712_v27 = vadd.f32 %v11945_v10, %v16575_v60  ;;  %v11948_v35 = vadd.f32 %v11947_v51, %v11946_v32 }
 0x79a   :  { %v16715_v1 = vadd.f32 %v11948_v35, %v16579_v48 }
 0x79c   :  { %v11949_v54 = vpop.f32.mrb[60].mxu1 }
 0x79d   :  { %v11950_v63 = vpop.f32.mrb[61].mxu1 }
 0x79e   :  { %v11951_v18 = vadd.f32 %v11950_v63, %v11949_v54  ;;  %v11952_v62 = vpop.f32.mrb[62].mxu1 }
 0x79f   :  { %v11953_v20 = vpop.f32.mrb[63].mxu1 }
 0x7a0   :  { %v16718_v0 = vadd.f32 %v11951_v18, %v16583_v41  ;;  %v11954_v47 = vadd.f32 %v11953_v20, %v11952_v62 }
 0x7a2   :  { %v16721_v39 = vadd.f32 %v11954_v47, %v16593_v31 }
 0x7a4   :  { %v11955_v45 = vpop.f32.mrb[64].mxu1 }
 0x7a5   :  { %v11956_v7 = vpop.f32.mrb[65].mxu1 }
 0x7a6   :  { %v11957_v60 = vadd.f32 %v11956_v7, %v11955_v45  ;;  %v11958_v49 = vpop.f32.mrb[66].mxu1 }
 0x7a7   :  { %v11959_v15 = vpop.f32.mrb[67].mxu1 }
 0x7a8   :  { %v16724_v48 = vadd.f32 %v11957_v60, %v16597_v8  ;;  %v11960_v23 = vadd.f32 %v11959_v15, %v11958_v49 }
 0x7aa   :  { %v16727_v55 = vadd.f32 %v11960_v23, %v16601_v29 }
 0x7ac   :  { %v11961_v28 = vpop.f32.mrb[68].mxu1 }
 0x7ad   :  { %v11962_v43 = vpop.f32.mrb[69].mxu1 }
 0x7ae   :  { %v11963_v41 = vadd.f32 %v11962_v43, %v11961_v28  ;;  %v11964_v26 = vpop.f32.mrb[70].mxu1 }
 0x7af   :  { %v11965_v40 = vpop.f32.mrb[71].mxu1 }
 0x7b0   :  { %v16730_v31 = vadd.f32 %v11963_v41, %v16611_v14  ;;  %v11966_v25 = vadd.f32 %v11965_v40, %v11964_v26  ;;  %v16760_v26 = vld [vmem:[%s17734_s7] ss:$0 sm:$0xff] }
 0x7b2   :  { %v16733_v11 = vadd.f32 %v11966_v25, %v16615_v19 }
 0x7b4   :  { %v11967_v6 = vpop.f32.mrb[72].mxu1 }
 0x7b5   :  { %v11968_v44 = vpop.f32.mrb[73].mxu1 }
 0x7b6   :  { %v11969_v8 = vadd.f32 %v11968_v44, %v11967_v6  ;;  %v11970_v38 = vpop.f32.mrb[74].mxu1 }
 0x7b7   :  { %v11971_v21 = vpop.f32.mrb[75].mxu1 }
 0x7b8   :  { %v16736_v29 = vadd.f32 %v11969_v8, %v16619_v3  ;;  %v11972_v17 = vadd.f32 %v11971_v21, %v11970_v38  ;;  %v16769_v21 = vld [vmem:[%s17735_s8] ss:$0 sm:$0xff] }
 0x7ba   :  { %v16739_v50 = vadd.f32 %v11972_v17, %v16623_v30  ;;  %v16750_v30 = vld [vmem:[%s17733_s6] ss:$0 sm:$0xff] }
 0x7bc   :  { %v11973_v34 = vpop.f32.mrb[76].mxu1 }
 0x7bd   :  { %v11974_v12 = vpop.f32.mrb[77].mxu1 }
 0x7be   :  { %v11975_v14 = vadd.f32 %v11974_v12, %v11973_v34  ;;  %v11976_v53 = vpop.f32.mrb[78].mxu1 }
 0x7bf   :  { %v11977_v10 = vpop.f32.mrb[79].mxu1 }
 0x7c0   :  { %v16742_v19 = vadd.f32 %v11975_v14, %v16627_v2  ;;  %v11978_v32 = vadd.f32 %v11977_v10, %v11976_v53 }
 0x7c2   :  { %v16745_v51 = vadd.f32 %v11978_v32, %v16631_v42 }
 0x7c4   :  { %v11995_v35 = vpop.f32.mrb[80].mxu1 }
 0x7c5   :  { %v11996_v54 = vpop.f32.mrb[81].mxu1 }
 0x7c6   :  { %v11997_v3 = vadd.f32 %v11996_v54, %v11995_v35  ;;  %v11998_v63 = vpop.f32.mrb[82].mxu1 }
 0x7c7   :  { %v11999_v18 = vpop.f32.mrb[83].mxu1 }
 0x7c8   :  { %v7921_v62 = vadd.f32 %v11997_v3, %v16641_v46  ;;  %v12000_v20 = vadd.f32 %v11999_v18, %v11998_v63 }
 0x7ca   :  { %v7956_v2 = vadd.f32 %v16750_v30, %v7921_v62  ;;  %v7922_v47 = vadd.f32 %v12000_v20, %v16645_v61 }
 0x7cc   :  { %v7957_v42 = vadd.f32 %v16750_v30, %v7922_v47  ;;  %v12001_v45 = vpop.f32.mrb[84].mxu1  ;;  %v8012_v60 = vmul.f32 0.01, %v7956_v2  ;;  %vm7984_vm9 = vcmp.ge.f32.partialorder %v7956_v2, 0.0 }
 0x7cd   :  { %v12002_v7 = vpop.f32.mrb[85].mxu1 }
 0x7ce   :  { %v12003_v49 = vadd.f32 %v12002_v7, %v12001_v45  ;;  %v12004_v15 = vpop.f32.mrb[86].mxu1  ;;  %v8013_v28 = vmul.f32 0.01, %v7957_v42  ;;  %vm7985_vm10 = vcmp.ge.f32.partialorder %v7957_v42, 0.0  ;;  %v8040_v46 = vsel %vm7984_vm9, %v7956_v2, %v8012_v60 }
 0x7cf   :  { %v12005_v23 = vpop.f32.mrb[87].mxu1 }
 0x7d0   :  { %v7923_v43 = vadd.f32 %v12003_v49, %v16648_v37  ;;  %v12006_v41 = vadd.f32 %v12005_v23, %v12004_v15  ;;  %v8041_v25 = vsel %vm7985_vm10, %v7957_v42, %v8013_v28  ;;  %v8075_v37 = vmul.f32 %v16760_v26, %v8040_v46 }
 0x7d2   :  { %v7958_v61 = vadd.f32 %v16750_v30, %v7923_v43  ;;  %v7924_v40 = vadd.f32 %v12006_v41, %v16651_v22  ;;  %v8076_v22 = vmul.f32 %v16760_v26, %v8041_v25  ;;  %v8110_v3 = vadd.f32 %v16769_v21, %v8075_v37 }
 0x7d4   :  { %vm7986_vm11 = vcmp.ge.f32.partialorder %v7958_v61, 0.0  ;;  %v8014_v6 = vmul.f32 0.01, %v7958_v61  ;;  %v7959_v44 = vadd.f32 %v16750_v30, %v7924_v40  ;;  %v12007_v8 = vpop.f32.mrb[88].mxu1  ;;  %v8111_v2 = vadd.f32 %v16769_v21, %v8076_v22 }
 0x7d5   :  { %v12008_v38 = vpop.f32.mrb[89].mxu1 }
 0x7d6   :  { %v8042_v17 = vsel %vm7986_vm11, %v7958_v61, %v8014_v6  ;;  %vm7987_vm12 = vcmp.ge.f32.partialorder %v7959_v44, 0.0  ;;  %v8015_v34 = vmul.f32 0.01, %v7959_v44  ;;  %v12009_v12 = vadd.f32 %v12008_v38, %v12007_v8  ;;  %v12010_v14 = vpop.f32.mrb[90].mxu1 }
 0x7d7   :  { %v8077_v53 = vmul.f32 %v16760_v26, %v8042_v17  ;;  %v12011_v10 = vpop.f32.mrb[91].mxu1 }
 0x7d8   :  { %v8043_v32 = vsel %vm7987_vm12, %v7959_v44, %v8015_v34  ;;  %v7925_v35 = vadd.f32 %v12009_v12, %v16660_v13  ;;  %v12012_v54 = vadd.f32 %v12011_v10, %v12010_v14 }
 0x7d9   :  { %v8112_v63 = vadd.f32 %v16769_v21, %v8077_v53  ;;  %v8078_v18 = vmul.f32 %v16760_v26, %v8043_v32 }
 0x7da   :  { %v7960_v62 = vadd.f32 %v16750_v30, %v7925_v35  ;;  %v7926_v20 = vadd.f32 %v12012_v54, %v16663_v59 }
 0x7db   :  { %v8138_v47 = vmax.f32 %v8110_v3, %v8112_v63  ;;  %v8113_v42 = vadd.f32 %v16769_v21, %v8078_v18 }
 0x7dc   :  { %v7961_v45 = vadd.f32 %v16750_v30, %v7926_v20  ;;  %v12013_v7 = vpop.f32.mrb[92].mxu1  ;;  %v8016_v49 = vmul.f32 0.01, %v7960_v62  ;;  %vm7988_vm13 = vcmp.ge.f32.partialorder %v7960_v62, 0.0 }
 0x7dd   :  { %v8139_v13 = vmax.f32 %v8111_v2, %v8113_v42  ;;  %v12014_v60 = vpop.f32.mrb[93].mxu1 }
 0x7de   :  { %v12015_v15 = vadd.f32 %v12014_v60, %v12013_v7  ;;  %v12016_v23 = vpop.f32.mrb[94].mxu1  ;;  %v8017_v43 = vmul.f32 0.01, %v7961_v45  ;;  %vm7989_vm14 = vcmp.ge.f32.partialorder %v7961_v45, 0.0  ;;  %v8044_v59 = vsel %vm7988_vm13, %v7960_v62, %v8016_v49 }
 0x7df   :  { %v12017_v28 = vpop.f32.mrb[95].mxu1  ;;  %v8079_v37 = vmul.f32 %v16760_v26, %v8044_v59 }
 0x7e0   :  { %v7927_v41 = vadd.f32 %v12015_v15, %v16666_v52  ;;  %v12018_v46 = vadd.f32 %v12017_v28, %v12016_v23  ;;  %v8045_v25 = vsel %vm7989_vm14, %v7961_v45, %v8017_v43 }
 0x7e1   :  { %v8080_v14 = vmul.f32 %v16760_v26, %v8045_v25  ;;  %v8114_v35 = vadd.f32 %v16769_v21, %v8079_v37 }
 0x7e2   :  { %v7962_v61 = vadd.f32 %v16750_v30, %v7927_v41  ;;  %v7928_v40 = vadd.f32 %v12018_v46, %v16675_v16 }
 0x7e3   :  { %v8115_v62 = vadd.f32 %v16769_v21, %v8080_v14 }
 0x7e4   :  { %vm7990_vm0 = vcmp.ge.f32.partialorder %v7962_v61, 0.0  ;;  %v8018_v6 = vmul.f32 0.01, %v7962_v61  ;;  %v7963_v44 = vadd.f32 %v16750_v30, %v7928_v40  ;;  %v12019_v8 = vpop.f32.mrb[96].mxu1 }
 0x7e5   :  { %v12020_v38 = vpop.f32.mrb[97].mxu1 }
 0x7e6   :  { %v8046_v17 = vsel %vm7990_vm0, %v7962_v61, %v8018_v6  ;;  %vm7991_vm15 = vcmp.ge.f32.partialorder %v7963_v44, 0.0  ;;  %v8019_v34 = vmul.f32 0.01, %v7963_v44  ;;  %v12021_v52 = vadd.f32 %v12020_v38, %v12019_v8  ;;  %v12022_v12 = vpop.f32.mrb[98].mxu1 }
 0x7e7   :  { %v8081_v22 = vmul.f32 %v16760_v26, %v8046_v17  ;;  %v12023_v53 = vpop.f32.mrb[99].mxu1 }
 0x7e8   :  { %v8047_v16 = vsel %vm7991_vm15, %v7963_v44, %v8019_v34  ;;  %v7929_v10 = vadd.f32 %v12021_v52, %v16678_v24  ;;  %v12024_v32 = vadd.f32 %v12023_v53, %v12022_v12 }
 0x7e9   :  { %v8116_v54 = vadd.f32 %v16769_v21, %v8081_v22  ;;  %v8082_v3 = vmul.f32 %v16760_v26, %v8047_v16 }
 0x7ea   :  { %v7964_v63 = vadd.f32 %v16750_v30, %v7929_v10  ;;  %v7930_v18 = vadd.f32 %v12024_v32, %v16681_v56 }
 0x7eb   :  { %v16796_v20 = vmax.f32 %v8114_v35, %v8116_v54  ;;  %v8117_v2 = vadd.f32 %v16769_v21, %v8082_v3 }
 0x7ec   :  { %v7965_v42 = vadd.f32 %v16750_v30, %v7930_v18  ;;  %v12025_v24 = vpop.f32.mrb[100].mxu1  ;;  %v8020_v49 = vmul.f32 0.01, %v7964_v63  ;;  %vm7992_vm1 = vcmp.ge.f32.partialorder %v7964_v63, 0.0 }
 0x7ed   :  { %v8142_v45 = vmax.f32 %v8138_v47, %v16796_v20  ;;  %v8141_v7 = vmax.f32 %v8115_v62, %v8117_v2  ;;  %v12026_v60 = vpop.f32.mrb[101].mxu1 }
 0x7ee   :  { %v12027_v15 = vadd.f32 %v12026_v60, %v12025_v24  ;;  %v12028_v23 = vpop.f32.mrb[102].mxu1  ;;  %v8021_v56 = vmul.f32 0.01, %v7965_v42  ;;  %vm7993_vm2 = vcmp.ge.f32.partialorder %v7965_v42, 0.0  ;;  %v8048_v61 = vsel %vm7992_vm1, %v7964_v63, %v8020_v49 }
 0x7ef   :  { %v8143_v28 = vmax.f32 %v8139_v13, %v8141_v7  ;;  %v12029_v43 = vpop.f32.mrb[103].mxu1  ;;  %v8083_v8 = vmul.f32 %v16760_v26, %v8048_v61 }
 0x7f0   :  { %v7931_v41 = vadd.f32 %v12027_v15, %v16687_v9  ;;  %v12030_v46 = vadd.f32 %v12029_v43, %v12028_v23  ;;  %v8049_v25 = vsel %vm7993_vm2, %v7965_v42, %v8021_v56  ;;  %v12307_v56 = vld [vmem:[%s17732_s9 + $0x108] ss:$16 sps:$4 sm:$0xff]  }
 0x7f1   :  { %v16802_v59 = vpack.c.bf16 %v8143_v28, %v8142_v45  ;;  %v8084_v52 = vmul.f32 %v16760_v26, %v8049_v25  ;;  %v8118_v16 = vadd.f32 %v16769_v21, %v8083_v8 }
 0x7f2   :  { %v7966_v40 = vadd.f32 %v16750_v30, %v7931_v41  ;;  %v7932_v47 = vadd.f32 %v12030_v46, %v16693_v58 }
 0x7f3   :  { %v8119_v3 = vadd.f32 %v16769_v21, %v8084_v52 }
 0x7f4   :  { %vm7994_vm3 = vcmp.ge.f32.partialorder %v7966_v40, 0.0  ;;  %v8022_v6 = vmul.f32 0.01, %v7966_v40  ;;  %v7967_v44 = vadd.f32 %v16750_v30, %v7932_v47  ;;  %v12031_v13 = vpop.f32.mrb[104].mxu1 }
 0x7f5   :  { %v12032_v37 = vpop.f32.mrb[105].mxu1 }
 0x7f6   :  { %v8050_v38 = vsel %vm7994_vm3, %v7966_v40, %v8022_v6  ;;  %vm7995_vm4 = vcmp.ge.f32.partialorder %v7967_v44, 0.0  ;;  %v8023_v9 = vmul.f32 0.01, %v7967_v44  ;;  %v12033_v17 = vadd.f32 %v12032_v37, %v12031_v13  ;;  %v12034_v34 = vpop.f32.mrb[106].mxu1  ;;  %v12310_v6 = vld [vmem:[%s17732_s9 + $0x128] ss:$16 sps:$4 sm:$0xff]  }
 0x7f7   :  { %v8085_v12 = vmul.f32 %v16760_v26, %v8050_v38  ;;  %v12035_v14 = vpop.f32.mrb[107].mxu1 }
 0x7f8   :  { %v8051_v58 = vsel %vm7995_vm4, %v7967_v44, %v8023_v9  ;;  %v7933_v22 = vadd.f32 %v12033_v17, %v16700_v36  ;;  %v12036_v53 = vadd.f32 %v12035_v14, %v12034_v34 }
 0x7f9   :  { %v8120_v10 = vadd.f32 %v16769_v21, %v8085_v12  ;;  %v8086_v32 = vmul.f32 %v16760_v26, %v8051_v58 }
 0x7fa   :  { %v7968_v35 = vadd.f32 %v16750_v30, %v7933_v22  ;;  %v7934_v54 = vadd.f32 %v12036_v53, %v16703_v5  ;;  %v12313_v22 = vld [vmem:[%s17732_s9 + $0x148] ss:$16 sps:$4 sm:$0xff]  }
 0x7fb   :  { %v16817_v63 = vmax.f32 %v8118_v16, %v8120_v10  ;;  %v8121_v18 = vadd.f32 %v16769_v21, %v8086_v32  ;;  %v12318_v32 = vld [vmem:[%s17732_s9 + $0x16c] ss:$16 sps:$4 sm:$0xff]  }
 0x7fc   :  { %v7969_v62 = vadd.f32 %v16750_v30, %v7934_v54  ;;  %v12037_v36 = vpop.f32.mrb[108].mxu1  ;;  %v8024_v45 = vmul.f32 0.01, %v7968_v35  ;;  %vm7996_vm5 = vcmp.ge.f32.partialorder %v7968_v35, 0.0 }
 0x7fd   :  { %v8179_v2 = vmax.f32 %v16796_v20, %v16817_v63  ;;  %v16823_v42 = vmax.f32 %v8119_v3, %v8121_v18  ;;  %v12038_v24 = vpop.f32.mrb[109].mxu1  ;;  %v12312_v20 = vld [vmem:[%s17732_s9 + $0x12c] ss:$16 sps:$4 sm:$0xff]  }
 0x7fe   :  { %v12039_v60 = vadd.f32 %v12038_v24, %v12037_v36  ;;  %v12040_v49 = vpop.f32.mrb[110].mxu1  ;;  %v8025_v23 = vmul.f32 0.01, %v7969_v62  ;;  %vm7997_vm6 = vcmp.ge.f32.partialorder %v7969_v62, 0.0  ;;  %v8052_v46 = vsel %vm7996_vm5, %v7968_v35, %v8024_v45 }
 0x7ff   :  { %v8180_v5 = vmax.f32 %v8141_v7, %v16823_v42  ;;  %v12041_v15 = vpop.f32.mrb[111].mxu1  ;;  %v8087_v44 = vmul.f32 %v16760_v26, %v8052_v46 }
 0x800   :  { %v7935_v28 = vadd.f32 %v12039_v60, %v16706_v4  ;;  %v12042_v43 = vadd.f32 %v12041_v15, %v12040_v49  ;;  %v8053_v4 = vsel %vm7997_vm6, %v7969_v62, %v8025_v23  ;;  %v12321_v60 = vld [vmem:[%s17732_s9 + $0x18c] ss:$16 sps:$4 sm:$0xff]  }
 0x801   :  { %v16830_v41 = vpack.c.bf16 %v8180_v5, %v8179_v2  ;;  %v8088_v17 = vmul.f32 %v16760_v26, %v8053_v4  ;;  %v8122_v53 = vadd.f32 %v16769_v21, %v8087_v44  ;;  %v12316_v2 = vld [vmem:[%s17732_s9 + $0x168] ss:$16 sps:$4 sm:$0xff]  }
 0x802   :  { %v7970_v7 = vadd.f32 %v16750_v30, %v7935_v28  ;;  %v7936_v61 = vadd.f32 %v12042_v43, %v16709_v33  ;;  %v12315_v33 = vld [vmem:[%s17732_s9 + $0x14c] ss:$16 sps:$4 sm:$0xff]  }
 0x803   :  { %8407 = vmatmul.mubr.bf16.vlgmr.msra.gmra.mrb[136].mxu1 %v16830_v41  ;;  %v8123_v54 = vadd.f32 %v16769_v21, %v8088_v17 }
 0x804   :  { %vm7998_vm7 = vcmp.ge.f32.partialorder %v7970_v7, 0.0  ;;  %v8026_v40 = vmul.f32 0.01, %v7970_v7  ;;  %v7971_v47 = vadd.f32 %v16750_v30, %v7936_v61  ;;  %8418 = vmatpush1.bf16.msra.mxu1 %v12307_v56  ;;  %v12043_v25 = vpop.f32.mrb[112].mxu1  ;;  %8449 = vmatprep.mubr.bf16.mxu1 %v12688_v57 }
 0x805   :  { %v12044_v13 = vpop.f32.mrb[113].mxu1  ;;  %8419 = vmatprep.subr.bf16.mxu1 %v12312_v20  ;;  %v12319_v20 = vld [vmem:[%s17732_s9 + $0x188] ss:$16 sps:$4 sm:$0xff]  }
 0x806   :  { %v8054_v8 = vsel %vm7998_vm7, %v7970_v7, %v8026_v40  ;;  %vm7999_vm8 = vcmp.ge.f32.partialorder %v7971_v47, 0.0  ;;  %v8027_v37 = vmul.f32 0.01, %v7971_v47  ;;  %v12045_v38 = vadd.f32 %v12044_v13, %v12043_v25  ;;  %v12046_v9 = vpop.f32.mrb[114].mxu1  ;;  %v12324_v7 = vld [vmem:[%s17732_s9 + $0x1ac] ss:$16 sps:$4 sm:$0xff]  }
 0x807   :  { %v8089_v34 = vmul.f32 %v16760_v26, %v8054_v8  ;;  %v12047_v52 = vpop.f32.mrb[115].mxu1 }
 0x808   :  { %v8055_v12 = vsel %vm7999_vm8, %v7971_v47, %v8027_v37  ;;  %v7937_v14 = vadd.f32 %v12045_v38, %v16712_v27  ;;  %v12048_v58 = vadd.f32 %v12047_v52, %v12046_v9  ;;  %8420 = vmatpush1.bf16.msra.mxu1 %v12310_v6  ;;  %v12322_v6 = vld [vmem:[%s17732_s9 + $0x1a8] ss:$16 sps:$4 sm:$0xff]  }
 0x809   :  { %v8124_v16 = vadd.f32 %v16769_v21, %v8089_v34  ;;  %v8090_v10 = vmul.f32 %v16760_v26, %v8055_v12  ;;  %8421 = vmatprep.subr.bf16.mxu1 %v12315_v33  ;;  %v12327_v33 = vld [vmem:[%s17732_s9 + $0x1cc] ss:$16 sps:$4 sm:$0xff]  }
 0x80a   :  { %v7972_v35 = vadd.f32 %v16750_v30, %v7937_v14  ;;  %v7938_v27 = vadd.f32 %v12048_v58, %v16715_v1  ;;  %v12325_v58 = vld [vmem:[%s17732_s9 + $0x1c8] ss:$16 sps:$4 sm:$0xff]  }
 0x80b   :  { %v16862_v3 = vmax.f32 %v8122_v53, %v8124_v16  ;;  %v8125_v18 = vadd.f32 %v16769_v21, %v8090_v10  ;;  %v12330_v10 = vld [vmem:[%s17732_s9 + $0x1ec] ss:$16 sps:$4 sm:$0xff]  }
 0x80c   :  { %v7973_v62 = vadd.f32 %v16750_v30, %v7938_v27  ;;  %8422 = vmatpush1.bf16.msra.mxu1 %v12313_v22  ;;  %v12049_v36 = vpop.f32.mrb[116].mxu1  ;;  %v8028_v49 = vmul.f32 0.01, %v7972_v35  ;;  %vm8000_vm9 = vcmp.ge.f32.partialorder %v7972_v35, 0.0 }
 0x80d   :  { %v8708_v24 = vmax.f32 %v16817_v63, %v16862_v3  ;;  %v16871_v45 = vmax.f32 %v8123_v54, %v8125_v18  ;;  %v12050_v1 = vpop.f32.mrb[117].mxu1  ;;  %8423 = vmatprep.subr.bf16.mxu1 %v12318_v32 }
 0x80e   :  { %v12051_v5 = vadd.f32 %v12050_v1, %v12049_v36  ;;  %v12052_v15 = vpop.f32.mrb[118].mxu1  ;;  %v8029_v43 = vmul.f32 0.01, %v7973_v62  ;;  %vm8001_vm10 = vcmp.ge.f32.partialorder %v7973_v62, 0.0  ;;  %v12328_v36 = vld [vmem:[%s17732_s9 + $0x1e8] ss:$16 sps:$4 sm:$0xff]  }
 0x80f   :  { %v8709_v23 = vmax.f32 %v16823_v42, %v16871_v45  ;;  %v12053_v28 = vpop.f32.mrb[119].mxu1  ;;  %v8056_v42 = vsel %vm8000_vm9, %v7972_v35, %v8028_v49  ;;  %v12333_v1 = vld [vmem:[%s17732_s9 + $0x4] ss:$16 sps:$4 sm:$0xff]  }
 0x810   :  { %v7939_v56 = vadd.f32 %v12051_v5, %v16718_v0  ;;  %v12054_v63 = vadd.f32 %v12053_v28, %v12052_v15  ;;  %8424 = vmatpush1.bf16.msra.mxu1 %v12316_v2  ;;  %v8057_v0 = vsel %vm8001_vm10, %v7973_v62, %v8029_v43  ;;  %v8091_v44 = vmul.f32 %v16760_v26, %v8056_v42 }
 0x811   :  { %v16882_v46 = vpack.c.bf16 %v8709_v23, %v8708_v24  ;;  %8425 = vmatprep.subr.bf16.mxu1 %v12321_v60  ;;  %v8092_v9 = vmul.f32 %v16760_v26, %v8057_v0 }
 0x812   :  { %v7974_v61 = vadd.f32 %v16750_v30, %v7939_v56  ;;  %v7940_v4 = vadd.f32 %v12054_v63, %v16721_v39  ;;  %v8126_v22 = vadd.f32 %v16769_v21, %v8091_v44  ;;  %v12331_v56 = vld [vmem:[%s17732_s9] ss:$16 sps:$4 sm:$0xff]  }
 0x813   :  { %v8127_v35 = vadd.f32 %v16769_v21, %v8092_v9 }
 0x814   :  { %vm8002_vm11 = vcmp.ge.f32.partialorder %v7974_v61, 0.0  ;;  %v8030_v40 = vmul.f32 0.01, %v7974_v61  ;;  %v7975_v47 = vadd.f32 %v16750_v30, %v7940_v4  ;;  %8426 = vmatpush1.bf16.msra.mxu1 %v12319_v20  ;;  %v12055_v25 = vpop.f32.mrb[120].mxu1  ;;  %v12336_v20 = vld [vmem:[%s17732_s9 + $0x24] ss:$16 sps:$4 sm:$0xff]  }
 0x815   :  { %v12056_v13 = vpop.f32.mrb[121].mxu1  ;;  %8427 = vmatprep.subr.bf16.mxu1 %v12324_v7 }
 0x816   :  { %v8058_v39 = vsel %vm8002_vm11, %v7974_v61, %v8030_v40  ;;  %vm8003_vm12 = vcmp.ge.f32.partialorder %v7975_v47, 0.0  ;;  %v8031_v8 = vmul.f32 0.01, %v7975_v47  ;;  %v12057_v37 = vadd.f32 %v12056_v13, %v12055_v25  ;;  %v12058_v38 = vpop.f32.mrb[122].mxu1  ;;  %v12334_v40 = vld [vmem:[%s17732_s9 + $0x20] ss:$16 sps:$4 sm:$0xff]  }
 0x817   :  { %v8093_v17 = vmul.f32 %v16760_v26, %v8058_v39  ;;  %v12059_v34 = vpop.f32.mrb[123].mxu1 }
 0x818   :  { %v8059_v52 = vsel %vm8003_vm12, %v7975_v47, %v8031_v8  ;;  %v7941_v12 = vadd.f32 %v12057_v37, %v16724_v48  ;;  %v12060_v14 = vadd.f32 %v12059_v34, %v12058_v38  ;;  %8428 = vmatpush1.bf16.msra.mxu1 %v12322_v6 }
 0x819   :  { %v8128_v53 = vadd.f32 %v16769_v21, %v8093_v17  ;;  %v8094_v16 = vmul.f32 %v16760_v26, %v8059_v52  ;;  %8429 = vmatprep.subr.bf16.mxu1 %v12327_v33  ;;  %v12337_v17 = vld [vmem:[%s17732_s9 + $0x40] ss:$16 sps:$4 sm:$0xff]  }
 0x81a   :  { %v7976_v32 = vadd.f32 %v16750_v30, %v7941_v12  ;;  %v7942_v48 = vadd.f32 %v12060_v14, %v16727_v55  ;;  %v12342_v14 = vld [vmem:[%s17732_s9 + $0x64] ss:$16 sps:$4 sm:$0xff]  }
 0x81b   :  { %v16912_v27 = vmax.f32 %v8126_v22, %v8128_v53  ;;  %v8129_v54 = vadd.f32 %v16769_v21, %v8094_v16 }
 0x81c   :  { %v7977_v18 = vadd.f32 %v16750_v30, %v7942_v48  ;;  %8430 = vmatpush1.bf16.msra.mxu1 %v12325_v58  ;;  %v12061_v62 = vpop.f32.mrb[124].mxu1  ;;  %v8032_v60 = vmul.f32 0.01, %v7976_v32  ;;  %vm8004_vm13 = vcmp.ge.f32.partialorder %v7976_v32, 0.0  ;;  %v12340_v48 = vld [vmem:[%s17732_s9 + $0x60] ss:$16 sps:$4 sm:$0xff]  }
 0x81d   :  { %v8999_v2 = vmax.f32 %v16862_v3, %v16912_v27  ;;  %v16921_v24 = vmax.f32 %v8127_v35, %v8129_v54  ;;  %v12062_v55 = vpop.f32.mrb[125].mxu1  ;;  %8431 = vmatprep.subr.bf16.mxu1 %v12330_v10 }
 0x81e   :  { %v12063_v49 = vadd.f32 %v12062_v55, %v12061_v62  ;;  %v12064_v5 = vpop.f32.mrb[126].mxu1  ;;  %v8033_v28 = vmul.f32 0.01, %v7977_v18  ;;  %vm8005_vm14 = vcmp.ge.f32.partialorder %v7977_v18, 0.0 }
 0x81f   :  { %v9000_v15 = vmax.f32 %v16871_v45, %v16921_v24  ;;  %v12065_v23 = vpop.f32.mrb[127].mxu1  ;;  %v8060_v45 = vsel %vm8004_vm13, %v7976_v32, %v8032_v60 }
 0x820   :  { %v7943_v43 = vadd.f32 %v12063_v49, %v16730_v31  ;;  %v12066_v3 = vadd.f32 %v12065_v23, %v12064_v5  ;;  %8432 = vmatpush1.bf16.msra.mxu1 %v12328_v36  ;;  %v8061_v31 = vsel %vm8005_vm14, %v7977_v18, %v8033_v28  ;;  %v8095_v47 = vmul.f32 %v16760_v26, %v8060_v45  ;;  %v12348_v23 = vld [vmem:[%s17732_s9 + $0xa4] ss:$16 sps:$4 sm:$0xff]  }
 0x821   :  { %v16932_v63 = vpack.c.bf16 %v9000_v15, %v8999_v2  ;;  %8620 = vmatprep.subr.bf16.mxu1 %v12333_v1  ;;  %v8096_v33 = vmul.f32 %v16760_v26, %v8061_v31 }
 0x822   :  { %v7978_v7 = vadd.f32 %v16750_v30, %v7943_v43  ;;  %v7944_v42 = vadd.f32 %v12066_v3, %v16733_v11  ;;  %v12339_v11 = vld [vmem:[%s17732_s9 + $0x44] ss:$16 sps:$4 sm:$0xff]   ;;  %v8130_v34 = vadd.f32 %v16769_v21, %v8095_v47 }
 0x823   :  { %8450 = vmatmul.mubr.bf16.vlgmr.msra.gmra.mrb[140].mxu1 %v16830_v41  ;;  %v8131_v22 = vadd.f32 %v16769_v21, %v8096_v33 }
 0x824   :  { %vm8006_vm0 = vcmp.ge.f32.partialorder %v7978_v7, 0.0  ;;  %v8034_v61 = vmul.f32 0.01, %v7978_v7  ;;  %v7979_v4 = vadd.f32 %v16750_v30, %v7944_v42  ;;  %8621 = vmatpush1.bf16.msra.mxu1 %v12331_v56  ;;  %v12067_v0 = vpop.f32.mrb[128].mxu1  ;;  %8652 = vmatprep.mubr.bf16.mxu1 %v12688_v57 }
 0x825   :  { %v12068_v25 = vpop.f32.mrb[129].mxu1  ;;  %8622 = vmatprep.subr.bf16.mxu1 %v12336_v20  ;;  %v12346_v20 = vld [vmem:[%s17732_s9 + $0xa0] ss:$16 sps:$4 sm:$0xff]  }
 0x826   :  { %v8062_v41 = vsel %vm8006_vm0, %v7978_v7, %v8034_v61  ;;  %vm8007_vm15 = vcmp.ge.f32.partialorder %v7979_v4, 0.0  ;;  %v8035_v6 = vmul.f32 0.01, %v7979_v4  ;;  %v12069_v44 = vadd.f32 %v12068_v25, %v12067_v0  ;;  %v12070_v13 = vpop.f32.mrb[130].mxu1  ;;  %v12351_v7 = vld [vmem:[%s17732_s9 + $0xc4] ss:$16 sps:$4 sm:$0xff]  }
 0x827   :  { %v8097_v39 = vmul.f32 %v16760_v26, %v8062_v41  ;;  %v12071_v8 = vpop.f32.mrb[131].mxu1  ;;  %v12354_v25 = vld [vmem:[%s17732_s9 + $0xe4] ss:$16 sps:$4 sm:$0xff]  }
 0x828   :  { %v8063_v37 = vsel %vm8007_vm15, %v7979_v4, %v8035_v6  ;;  %v7945_v38 = vadd.f32 %v12069_v44, %v16736_v29  ;;  %v12072_v9 = vadd.f32 %v12071_v8, %v12070_v13  ;;  %8623 = vmatpush1.bf16.msra.mxu1 %v12334_v40  ;;  %v12349_v4 = vld [vmem:[%s17732_s9 + $0xc0] ss:$16 sps:$4 sm:$0xff]   ;;  %v12355_v8 = vld [vmem:[%s17732_s9 + $0x8] ss:$16 sps:$4 sm:$0xff]  }
 0x829   :  { %v8132_v52 = vadd.f32 %v16769_v21, %v8097_v39  ;;  %v8098_v12 = vmul.f32 %v16760_v26, %v8063_v37  ;;  %8624 = vmatprep.subr.bf16.mxu1 %v12339_v11  ;;  %v12352_v44 = vld [vmem:[%s17732_s9 + $0xe0] ss:$16 sps:$4 sm:$0xff]  }
 0x82a   :  { %v7980_v58 = vadd.f32 %v16750_v30, %v7945_v38  ;;  %v7946_v29 = vadd.f32 %v12072_v9, %v16739_v50  ;;  %v12345_v50 = vld [vmem:[%s17732_s9 + $0x84] ss:$16 sps:$4 sm:$0xff]   ;;  %v12358_v38 = vld [vmem:[%s17732_s9 + $0x28] ss:$16 sps:$4 sm:$0xff]   ;;  %v12363_v9 = vld [vmem:[%s17732_s9 + $0x4c] ss:$16 sps:$4 sm:$0xff]  }
 0x82b   :  { %v9288_v53 = vmax.f32 %v8130_v34, %v8132_v52  ;;  %v8133_v16 = vadd.f32 %v16769_v21, %v8098_v12  ;;  %v12366_v34 = vld [vmem:[%s17732_s9 + $0x6c] ss:$16 sps:$4 sm:$0xff]   ;;  %v12364_v52 = vld [vmem:[%s17732_s9 + $0x68] ss:$16 sps:$4 sm:$0xff]  }
 0x82c   :  { %v7981_v10 = vadd.f32 %v16750_v30, %v7946_v29  ;;  %8625 = vmatpush1.bf16.msra.mxu1 %v12337_v17  ;;  %v12073_v32 = vpop.f32.mrb[132].mxu1  ;;  %v8036_v62 = vmul.f32 0.01, %v7980_v58  ;;  %vm8008_vm1 = vcmp.ge.f32.partialorder %v7980_v58, 0.0  ;;  %v12361_v17 = vld [vmem:[%s17732_s9 + $0x48] ss:$16 sps:$4 sm:$0xff]  }
 0x82d   :  { %v9290_v35 = vmax.f32 %v16912_v27, %v9288_v53  ;;  %v9289_v54 = vmax.f32 %v8131_v22, %v8133_v16  ;;  %v12074_v18 = vpop.f32.mrb[133].mxu1  ;;  %8626 = vmatprep.subr.bf16.mxu1 %v12342_v14  ;;  %v12343_v27 = vld [vmem:[%s17732_s9 + $0x80] ss:$16 sps:$4 sm:$0xff]   ;;  %v12369_v12 = vld [vmem:[%s17732_s9 + $0x8c] ss:$16 sps:$4 sm:$0xff]  }
 0x82e   :  { %v12075_v36 = vadd.f32 %v12074_v18, %v12073_v32  ;;  %v12076_v2 = vpop.f32.mrb[134].mxu1  ;;  %v8037_v60 = vmul.f32 0.01, %v7981_v10  ;;  %vm8009_vm2 = vcmp.ge.f32.partialorder %v7981_v10, 0.0  ;;  %v12367_v14 = vld [vmem:[%s17732_s9 + $0x88] ss:$16 sps:$4 sm:$0xff]  }
 0x82f   :  { %v9291_v55 = vmax.f32 %v16921_v24, %v9289_v54  ;;  %v12077_v1 = vpop.f32.mrb[135].mxu1  ;;  %v8064_v24 = vsel %vm8008_vm1, %v7980_v58, %v8036_v62  ;;  %v12372_v58 = vld [vmem:[%s17732_s9 + $0xac] ss:$16 sps:$4 sm:$0xff]   ;;  %v12370_v29 = vld [vmem:[%s17732_s9 + $0xa8] ss:$16 sps:$4 sm:$0xff]   ;;  %vm10626_vm1 = vcmask 7168  }
 0x830   :  { %v7947_v49 = vadd.f32 %v12075_v36, %v16742_v19  ;;  %v12078_v5 = vadd.f32 %v12077_v1, %v12076_v2  ;;  %8627 = vmatpush1.bf16.msra.mxu1 %v12340_v48  ;;  %v8065_v19 = vsel %vm8009_vm2, %v7981_v10, %v8037_v60  ;;  %v8099_v45 = vmul.f32 %v16760_v26, %v8064_v24  ;;  %v12375_v22 = vld [vmem:[%s17732_s9 + $0xcc] ss:$16 sps:$4 sm:$0xff]   ;;  %v12376_v10 = vld [vmem:[%s17732_s9 + $0xe8] ss:$16 sps:$4 sm:$0xff]   ;;  %v12381_v32 = vld [vmem:[%s17732_s9 + $0x204] ss:$16 sps:$4 sm:$0xff]  }
 0x831   :  { %v16978_v15 = vpack.c.bf16 %v9291_v55, %v9290_v35  ;;  %8628 = vmatprep.subr.bf16.mxu1 %v12345_v50  ;;  %v8100_v31 = vmul.f32 %v16760_v26, %v8065_v19  ;;  %v12378_v16 = vld [vmem:[%s17732_s9 + $0xec] ss:$16 sps:$4 sm:$0xff]   ;;  %v12379_v48 = vld [vmem:[%s17732_s9 + $0x200] ss:$16 sps:$4 sm:$0xff]   ;;  %v12384_v35 = vld [vmem:[%s17732_s9 + $0x224] ss:$16 sps:$4 sm:$0xff]  }
 0x832   :  { %v7982_v28 = vadd.f32 %v16750_v30, %v7947_v49  ;;  %v7948_v43 = vadd.f32 %v12078_v5, %v16745_v51  ;;  %v8134_v0 = vadd.f32 %v16769_v21, %v8099_v45  ;;  %v12387_v18 = vld [vmem:[%s17732_s9 + $0x244] ss:$16 sps:$4 sm:$0xff]   ;;  %v12385_v50 = vld [vmem:[%s17732_s9 + $0x240] ss:$16 sps:$4 sm:$0xff]   ;;  %v12403_v24 = vld [vmem:[%s17732_s9 + $0x208] ss:$16 sps:$4 sm:$0xff]  }
 0x833   :  { %v8135_v11 = vadd.f32 %v16769_v21, %v8100_v31  ;;  %v12388_v62 = vld [vmem:[%s17732_s9 + $0x260] ss:$16 sps:$4 sm:$0xff]   ;;  %v12393_v36 = vld [vmem:[%s17732_s9 + $0x284] ss:$16 sps:$4 sm:$0xff]   ;;  %v12411_v19 = vld [vmem:[%s17732_s9 + $0x24c] ss:$16 sps:$4 sm:$0xff]  }
 0x834   :  { %vm8010_vm3 = vcmp.ge.f32.partialorder %v7982_v28, 0.0  ;;  %v8038_v3 = vmul.f32 0.01, %v7982_v28  ;;  %v7983_v56 = vadd.f32 %v16750_v30, %v7948_v43  ;;  %8629 = vmatpush1.bf16.msra.mxu1 %v12343_v27  ;;  %v12391_v2 = vld [vmem:[%s17732_s9 + $0x280] ss:$16 sps:$4 sm:$0xff]  }
 0x835   :  { %8630 = vmatprep.subr.bf16.mxu1 %v12348_v23  ;;  %v12396_v55 = vld [vmem:[%s17732_s9 + $0x2a4] ss:$16 sps:$4 sm:$0xff]   ;;  %v12394_v1 = vld [vmem:[%s17732_s9 + $0x2a0] ss:$16 sps:$4 sm:$0xff]   ;;  %v12405_v23 = vld [vmem:[%s17732_s9 + $0x20c] ss:$16 sps:$4 sm:$0xff]  }
 0x836   :  { %v8066_v42 = vsel %vm8010_vm3, %v7982_v28, %v8038_v3  ;;  %vm8011_vm4 = vcmp.ge.f32.partialorder %v7983_v56, 0.0  ;;  %v8039_v51 = vmul.f32 0.01, %v7983_v56  ;;  %v12399_v60 = vld [vmem:[%s17732_s9 + $0x2c4] ss:$16 sps:$4 sm:$0xff]  }
 0x837   :  { %v8101_v61 = vmul.f32 %v16760_v26, %v8066_v42  ;;  %v12397_v49 = vld [vmem:[%s17732_s9 + $0x2c0] ss:$16 sps:$4 sm:$0xff]   ;;  %v12402_v5 = vld [vmem:[%s17732_s9 + $0x2e4] ss:$16 sps:$4 sm:$0xff]   ;;  %v12408_v28 = vld [vmem:[%s17732_s9 + $0x22c] ss:$16 sps:$4 sm:$0xff]  }
 0x838   :  { %v8067_v30 = vsel %vm8011_vm4, %v7983_v56, %v8039_v51  ;;  %8631 = vmatpush1.bf16.msra.mxu1 %v12346_v20  ;;  %v12400_v27 = vld [vmem:[%s17732_s9 + $0x2e0] ss:$16 sps:$4 sm:$0xff]   ;;  %v12406_v43 = vld [vmem:[%s17732_s9 + $0x228] ss:$16 sps:$4 sm:$0xff]   ;;  %v12414_v56 = vld [vmem:[%s17732_s9 + $0x26c] ss:$16 sps:$4 sm:$0xff]  }
 0x839   :  { %v8136_v40 = vadd.f32 %v16769_v21, %v8101_v61  ;;  %v8102_v47 = vmul.f32 %v16760_v26, %v8067_v30  ;;  %8632 = vmatprep.subr.bf16.mxu1 %v12351_v7  ;;  %v12357_v26 = vld [vmem:[%s17732_s9 + $0xc] ss:$16 sps:$4 sm:$0xff]   ;;  %v12409_v3 = vld [vmem:[%s17732_s9 + $0x248] ss:$16 sps:$4 sm:$0xff]  }
 0x83a   :  { %v12412_v20 = vld [vmem:[%s17732_s9 + $0x268] ss:$16 sps:$4 sm:$0xff]   ;;  %v12417_v45 = vld [vmem:[%s17732_s9 + $0x28c] ss:$16 sps:$4 sm:$0xff]  }
 0x83b   :  { %v9579_v41 = vmax.f32 %v8134_v0, %v8136_v40  ;;  %v8137_v6 = vadd.f32 %v16769_v21, %v8102_v47  ;;  %v12360_v21 = vld [vmem:[%s17732_s9 + $0x2c] ss:$16 sps:$4 sm:$0xff]   ;;  %v12415_v7 = vld [vmem:[%s17732_s9 + $0x288] ss:$16 sps:$4 sm:$0xff]   ;;  %v12429_v0 = vld [vmem:[%s17732_s9 + $0x304] ss:$16 sps:$4 sm:$0xff]  }
 0x83c   :  { %8633 = vmatpush1.bf16.msra.mxu1 %v12349_v4  ;;  %v12420_v42 = vld [vmem:[%s17732_s9 + $0x2ac] ss:$16 sps:$4 sm:$0xff]   ;;  %v12418_v51 = vld [vmem:[%s17732_s9 + $0x2a8] ss:$16 sps:$4 sm:$0xff]   ;;  %v12427_v40 = vld [vmem:[%s17732_s9 + $0x300] ss:$16 sps:$4 sm:$0xff]  }
 0x83d   :  { %v9581_v13 = vmax.f32 %v9288_v53, %v9579_v41  ;;  %v9580_v33 = vmax.f32 %v8135_v11, %v8137_v6  ;;  %8634 = vmatprep.subr.bf16.mxu1 %v12354_v25  ;;  %v12373_v53 = vld [vmem:[%s17732_s9 + $0xc8] ss:$16 sps:$4 sm:$0xff]   ;;  %v12423_v31 = vld [vmem:[%s17732_s9 + $0x2cc] ss:$16 sps:$4 sm:$0xff]   ;;  %v12432_v47 = vld [vmem:[%s17732_s9 + $0x324] ss:$16 sps:$4 sm:$0xff]  }
 0x83e   :  { %v12421_v61 = vld [vmem:[%s17732_s9 + $0x2c8] ss:$16 sps:$4 sm:$0xff]   ;;  %v12426_v30 = vld [vmem:[%s17732_s9 + $0x2ec] ss:$16 sps:$4 sm:$0xff]   ;;  %v12430_v25 = vld [vmem:[%s17732_s9 + $0x320] ss:$16 sps:$4 sm:$0xff]  }
 0x83f   :  { %v9582_v39 = vmax.f32 %v9289_v54, %v9580_v33  ;;  %v12382_v54 = vld [vmem:[%s17732_s9 + $0x220] ss:$16 sps:$4 sm:$0xff]   ;;  %v12424_v4 = vld [vmem:[%s17732_s9 + $0x2e8] ss:$16 sps:$4 sm:$0xff]   ;;  %v12435_v11 = vld [vmem:[%s17732_s9 + $0x344] ss:$16 sps:$4 sm:$0xff]  }
 0x840   :  { %8635 = vmatpush1.bf16.msra.mxu1 %v12352_v44  ;;  %v12433_v41 = vld [vmem:[%s17732_s9 + $0x340] ss:$16 sps:$4 sm:$0xff]   ;;  %v12441_v44 = vld [vmem:[%s17732_s9 + $0x384] ss:$16 sps:$4 sm:$0xff]  }
 0x841   :  { %v17015_v37 = vpack.c.bf16 %v9582_v39, %v9581_v13  ;;  %8663 = vmatprep.subr.bf16.mxu1 %v12357_v26  ;;  %v12436_v6 = vld [vmem:[%s17732_s9 + $0x360] ss:$16 sps:$4 sm:$0xff]   ;;  %v12444_v33 = vld [vmem:[%s17732_s9 + $0x3a4] ss:$16 sps:$4 sm:$0xff]  }
 0x842   :  { %v12439_v13 = vld [vmem:[%s17732_s9 + $0x380] ss:$16 sps:$4 sm:$0xff]   ;;  %v12447_v39 = vld [vmem:[%s17732_s9 + $0x3c4] ss:$16 sps:$4 sm:$0xff]  }
 0x843   :  { %8653 = vmatmul.mubr.bf16.vlgmr.msra.gmra.mrb[136].mxu1 %v16802_v59  ;;  %v12442_v26 = vld [vmem:[%s17732_s9 + $0x3a0] ss:$16 sps:$4 sm:$0xff]  }
 0x844   :  { %8664 = vmatpush1.bf16.msra.mxu1 %v12355_v8  ;;  %8695 = vmatprep.mubr.bf16.mxu1 %v12688_v57  ;;  %v12445_v8 = vld [vmem:[%s17732_s9 + $0x3c0] ss:$16 sps:$4 sm:$0xff]  }
 0x845   :  { %8665 = vmatprep.subr.bf16.mxu1 %v12360_v21  ;;  %v12450_v21 = vld [vmem:[%s17732_s9 + $0x3e4] ss:$16 sps:$4 sm:$0xff]  }
 0x848   :  { %8666 = vmatpush1.bf16.msra.mxu1 %v12358_v38  ;;  %v12448_v38 = vld [vmem:[%s17732_s9 + $0x3e0] ss:$16 sps:$4 sm:$0xff]  }
 0x849   :  { %8667 = vmatprep.subr.bf16.mxu1 %v12363_v9  ;;  %v12453_v9 = vld [vmem:[%s17732_s9 + $0x30c] ss:$16 sps:$4 sm:$0xff]  }
 0x84c   :  { %8668 = vmatpush1.bf16.msra.mxu1 %v12361_v17  ;;  %v12451_v17 = vld [vmem:[%s17732_s9 + $0x308] ss:$16 sps:$4 sm:$0xff]  }
 0x84d   :  { %8669 = vmatprep.subr.bf16.mxu1 %v12366_v34  ;;  %v12456_v34 = vld [vmem:[%s17732_s9 + $0x32c] ss:$16 sps:$4 sm:$0xff]  }
 0x850   :  { %8670 = vmatpush1.bf16.msra.mxu1 %v12364_v52  ;;  %v12454_v52 = vld [vmem:[%s17732_s9 + $0x328] ss:$16 sps:$4 sm:$0xff]  }
 0x851   :  { %8671 = vmatprep.subr.bf16.mxu1 %v12369_v12  ;;  %v12459_v12 = vld [vmem:[%s17732_s9 + $0x34c] ss:$16 sps:$4 sm:$0xff]  }
 0x854   :  { %8672 = vmatpush1.bf16.msra.mxu1 %v12367_v14  ;;  %v12457_v14 = vld [vmem:[%s17732_s9 + $0x348] ss:$16 sps:$4 sm:$0xff]  }
 0x855   :  { %8673 = vmatprep.subr.bf16.mxu1 %v12372_v58  ;;  %v12462_v58 = vld [vmem:[%s17732_s9 + $0x36c] ss:$16 sps:$4 sm:$0xff]  }
 0x858   :  { %8674 = vmatpush1.bf16.msra.mxu1 %v12370_v29  ;;  %v12460_v29 = vld [vmem:[%s17732_s9 + $0x368] ss:$16 sps:$4 sm:$0xff]  }
 0x859   :  { %8675 = vmatprep.subr.bf16.mxu1 %v12375_v22  ;;  %v12465_v22 = vld [vmem:[%s17732_s9 + $0x38c] ss:$16 sps:$4 sm:$0xff]  }
 0x85c   :  { %8676 = vmatpush1.bf16.msra.mxu1 %v12373_v53  ;;  %v12463_v53 = vld [vmem:[%s17732_s9 + $0x388] ss:$16 sps:$4 sm:$0xff]  }
 0x85d   :  { %8677 = vmatprep.subr.bf16.mxu1 %v12378_v16  ;;  %v12468_v16 = vld [vmem:[%s17732_s9 + $0x3ac] ss:$16 sps:$4 sm:$0xff]  }
 0x860   :  { %8678 = vmatpush1.bf16.msra.mxu1 %v12376_v10  ;;  %v12466_v10 = vld [vmem:[%s17732_s9 + $0x3a8] ss:$16 sps:$4 sm:$0xff]  }
 0x861   :  { %8903 = vmatprep.subr.bf16.mxu1 %v12381_v32  ;;  %v12471_v32 = vld [vmem:[%s17732_s9 + $0x3cc] ss:$16 sps:$4 sm:$0xff]  }
 0x863   :  { %8696 = vmatmul.mubr.bf16.vlgmr.msra.gmra.mrb[140].mxu1 %v16802_v59  ;;  %v12390_v59 = vld [vmem:[%s17732_s9 + $0x264] ss:$16 sps:$4 sm:$0xff]  }
 0x864   :  { %8904 = vmatpush1.bf16.msra.mxu1 %v12379_v48  ;;  %8935 = vmatprep.mubr.bf16.mxu1 %v12688_v57  ;;  %v12469_v48 = vld [vmem:[%s17732_s9 + $0x3c8] ss:$16 sps:$4 sm:$0xff]  }
 0x865   :  { %8905 = vmatprep.subr.bf16.mxu1 %v12384_v35  ;;  %v12474_v35 = vld [vmem:[%s17732_s9 + $0x3ec] ss:$16 sps:$4 sm:$0xff]  }
 0x868   :  { %8906 = vmatpush1.bf16.msra.mxu1 %v12382_v54  ;;  %v12472_v54 = vld [vmem:[%s17732_s9 + $0x3e8] ss:$16 sps:$4 sm:$0xff]  }
 0x869   :  { %8907 = vmatprep.subr.bf16.mxu1 %v12387_v18  ;;  %v12477_v18 = vld [vmem:[%s17732_s9 + $0x404] ss:$16 sps:$4 sm:$0xff]  }
 0x86c   :  { %8908 = vmatpush1.bf16.msra.mxu1 %v12385_v50  ;;  %v12475_v50 = vld [vmem:[%s17732_s9 + $0x400] ss:$16 sps:$4 sm:$0xff]  }
 0x86d   :  { %8909 = vmatprep.subr.bf16.mxu1 %v12390_v59  ;;  %v12480_v59 = vld [vmem:[%s17732_s9 + $0x424] ss:$16 sps:$4 sm:$0xff]  }
 0x870   :  { %8910 = vmatpush1.bf16.msra.mxu1 %v12388_v62  ;;  %v12478_v62 = vld [vmem:[%s17732_s9 + $0x420] ss:$16 sps:$4 sm:$0xff]  }
 0x871   :  { %8911 = vmatprep.subr.bf16.mxu1 %v12393_v36  ;;  %v12483_v36 = vld [vmem:[%s17732_s9 + $0x444] ss:$16 sps:$4 sm:$0xff]  }
 0x874   :  { %8912 = vmatpush1.bf16.msra.mxu1 %v12391_v2  ;;  %v12571_v2 = vld [vmem:[%s17736_s11] ss:$8 sps:$4 sm:$0xff]  }
 0x875   :  { %8913 = vmatprep.subr.bf16.mxu1 %v12396_v55  ;;  %v12576_v55 = vld [vmem:[%s17736_s11 + $0x14] ss:$8 sps:$4 sm:$0xff]  }
 0x878   :  { %8914 = vmatpush1.bf16.msra.mxu1 %v12394_v1  ;;  %v12481_v1 = vld [vmem:[%s17732_s9 + $0x440] ss:$16 sps:$4 sm:$0xff]  }
 0x879   :  { %8915 = vmatprep.subr.bf16.mxu1 %v12399_v60  ;;  %v12486_v60 = vld [vmem:[%s17732_s9 + $0x464] ss:$16 sps:$4 sm:$0xff]  }
 0x87c   :  { %8916 = vmatpush1.bf16.msra.mxu1 %v12397_v49  ;;  %v12574_v49 = vld [vmem:[%s17736_s11 + $0x10] ss:$8 sps:$4 sm:$0xff]  }
 0x87d   :  { %8917 = vmatprep.subr.bf16.mxu1 %v12402_v5  ;;  %v12579_v5 = vld [vmem:[%s17736_s11 + $0x24] ss:$8 sps:$4 sm:$0xff]  }
 0x880   :  { %8918 = vmatpush1.bf16.msra.mxu1 %v12400_v27  ;;  %v12484_v27 = vld [vmem:[%s17732_s9 + $0x460] ss:$16 sps:$4 sm:$0xff]  }
 0x881   :  { %8946 = vmatprep.subr.bf16.mxu1 %v12405_v23  ;;  %v12489_v23 = vld [vmem:[%s17732_s9 + $0x484] ss:$16 sps:$4 sm:$0xff]  }
 0x883   :  { %8936 = vmatmul.mubr.bf16.vlgmr.msra.gmra.mrb[136].mxu1 %v16882_v46 }
 0x884   :  { %8947 = vmatpush1.bf16.msra.mxu1 %v12403_v24  ;;  %8978 = vmatprep.mubr.bf16.mxu1 %v12688_v57  ;;  %v12577_v24 = vld [vmem:[%s17736_s11 + $0x20] ss:$8 sps:$4 sm:$0xff]  }
 0x885   :  { %8948 = vmatprep.subr.bf16.mxu1 %v12408_v28  ;;  %v12582_v28 = vld [vmem:[%s17736_s11 + $0x34] ss:$8 sps:$4 sm:$0xff]  }
 0x888   :  { %8949 = vmatpush1.bf16.msra.mxu1 %v12406_v43  ;;  %v12487_v43 = vld [vmem:[%s17732_s9 + $0x480] ss:$16 sps:$4 sm:$0xff]  }
 0x889   :  { %8950 = vmatprep.subr.bf16.mxu1 %v12411_v19  ;;  %v12492_v19 = vld [vmem:[%s17732_s9 + $0x4a4] ss:$16 sps:$4 sm:$0xff]  }
 0x88c   :  { %8951 = vmatpush1.bf16.msra.mxu1 %v12409_v3  ;;  %v12580_v3 = vld [vmem:[%s17736_s11 + $0x30] ss:$8 sps:$4 sm:$0xff]  }
 0x88d   :  { %8952 = vmatprep.subr.bf16.mxu1 %v12414_v56  ;;  %v12585_v56 = vld [vmem:[%s17736_s11 + $0x44] ss:$8 sps:$4 sm:$0xff]  }
 0x890   :  { %8953 = vmatpush1.bf16.msra.mxu1 %v12412_v20  ;;  %v12490_v20 = vld [vmem:[%s17732_s9 + $0x4a0] ss:$16 sps:$4 sm:$0xff]  }
 0x891   :  { %8954 = vmatprep.subr.bf16.mxu1 %v12417_v45  ;;  %v12495_v45 = vld [vmem:[%s17732_s9 + $0x4c4] ss:$16 sps:$4 sm:$0xff]  }
 0x894   :  { %8955 = vmatpush1.bf16.msra.mxu1 %v12415_v7  ;;  %v12583_v7 = vld [vmem:[%s17736_s11 + $0x40] ss:$8 sps:$4 sm:$0xff]  }
 0x895   :  { %8956 = vmatprep.subr.bf16.mxu1 %v12420_v42  ;;  %v12588_v42 = vld [vmem:[%s17736_s11 + $0x54] ss:$8 sps:$4 sm:$0xff]  }
 0x898   :  { %8957 = vmatpush1.bf16.msra.mxu1 %v12418_v51  ;;  %v12493_v51 = vld [vmem:[%s17732_s9 + $0x4c0] ss:$16 sps:$4 sm:$0xff]  }
 0x899   :  { %8958 = vmatprep.subr.bf16.mxu1 %v12423_v31  ;;  %v12498_v31 = vld [vmem:[%s17732_s9 + $0x4e4] ss:$16 sps:$4 sm:$0xff]  }
 0x89c   :  { %8959 = vmatpush1.bf16.msra.mxu1 %v12421_v61  ;;  %v12586_v61 = vld [vmem:[%s17736_s11 + $0x50] ss:$8 sps:$4 sm:$0xff]  }
 0x89d   :  { %8960 = vmatprep.subr.bf16.mxu1 %v12426_v30  ;;  %v12591_v30 = vld [vmem:[%s17736_s11 + $0x64] ss:$8 sps:$4 sm:$0xff]  }
 0x8a0   :  { %8961 = vmatpush1.bf16.msra.mxu1 %v12424_v4  ;;  %v12496_v4 = vld [vmem:[%s17732_s9 + $0x4e0] ss:$16 sps:$4 sm:$0xff]  }
 0x8a1   :  { %9194 = vmatprep.subr.bf16.mxu1 %v12429_v0  ;;  %v12589_v0 = vld [vmem:[%s17736_s11 + $0x60] ss:$8 sps:$4 sm:$0xff]  }
 0x8a3   :  { %8979 = vmatmul.mubr.bf16.vlgmr.msra.gmra.mrb[140].mxu1 %v16882_v46  ;;  %v12438_v46 = vld [vmem:[%s17732_s9 + $0x364] ss:$16 sps:$4 sm:$0xff]  }
 0x8a4   :  { %9195 = vmatpush1.bf16.msra.mxu1 %v12427_v40  ;;  %9226 = vmatprep.mubr.bf16.mxu1 %v12688_v57  ;;  %v12501_v40 = vld [vmem:[%s17732_s9 + $0x40c] ss:$16 sps:$4 sm:$0xff]  }
 0x8a5   :  { %9196 = vmatprep.subr.bf16.mxu1 %v12432_v47  ;;  %v12594_v47 = vld [vmem:[%s17736_s11 + $0x74] ss:$8 sps:$4 sm:$0xff]  }
 0x8a8   :  { %9197 = vmatpush1.bf16.msra.mxu1 %v12430_v25  ;;  %v12499_v25 = vld [vmem:[%s17732_s9 + $0x408] ss:$16 sps:$4 sm:$0xff]  }
 0x8a9   :  { %9198 = vmatprep.subr.bf16.mxu1 %v12435_v11  ;;  %v12504_v11 = vld [vmem:[%s17732_s9 + $0x42c] ss:$16 sps:$4 sm:$0xff]  }
 0x8ac   :  { %9199 = vmatpush1.bf16.msra.mxu1 %v12433_v41  ;;  %v12592_v41 = vld [vmem:[%s17736_s11 + $0x70] ss:$8 sps:$4 sm:$0xff]  }
 0x8ad   :  { %9200 = vmatprep.subr.bf16.mxu1 %v12438_v46  ;;  %v12597_v46 = vld [vmem:[%s17736_s11 + $0x84] ss:$8 sps:$4 sm:$0xff]  }
 0x8b0   :  { %9201 = vmatpush1.bf16.msra.mxu1 %v12436_v6  ;;  %v12502_v6 = vld [vmem:[%s17732_s9 + $0x428] ss:$16 sps:$4 sm:$0xff]  }
 0x8b1   :  { %9202 = vmatprep.subr.bf16.mxu1 %v12441_v44  ;;  %v12507_v44 = vld [vmem:[%s17732_s9 + $0x44c] ss:$16 sps:$4 sm:$0xff]  }
 0x8b4   :  { %9203 = vmatpush1.bf16.msra.mxu1 %v12439_v13  ;;  %v12595_v13 = vld [vmem:[%s17736_s11 + $0x80] ss:$8 sps:$4 sm:$0xff]  }
 0x8b5   :  { %9204 = vmatprep.subr.bf16.mxu1 %v12444_v33  ;;  %v12600_v33 = vld [vmem:[%s17736_s11 + $0x94] ss:$8 sps:$4 sm:$0xff]  }
 0x8b8   :  { %9205 = vmatpush1.bf16.msra.mxu1 %v12442_v26  ;;  %v12505_v26 = vld [vmem:[%s17732_s9 + $0x448] ss:$16 sps:$4 sm:$0xff]  }
 0x8b9   :  { %9206 = vmatprep.subr.bf16.mxu1 %v12447_v39  ;;  %v12510_v39 = vld [vmem:[%s17732_s9 + $0x46c] ss:$16 sps:$4 sm:$0xff]  }
 0x8bc   :  { %9207 = vmatpush1.bf16.msra.mxu1 %v12445_v8  ;;  %v12598_v8 = vld [vmem:[%s17736_s11 + $0x90] ss:$8 sps:$4 sm:$0xff]  }
 0x8bd   :  { %9208 = vmatprep.subr.bf16.mxu1 %v12450_v21  ;;  %v12603_v21 = vld [vmem:[%s17736_s11 + $0xa4] ss:$8 sps:$4 sm:$0xff]  }
 0x8c0   :  { %9209 = vmatpush1.bf16.msra.mxu1 %v12448_v38  ;;  %v12508_v38 = vld [vmem:[%s17732_s9 + $0x468] ss:$16 sps:$4 sm:$0xff]  }
 0x8c1   :  { %9237 = vmatprep.subr.bf16.mxu1 %v12453_v9  ;;  %v12513_v9 = vld [vmem:[%s17732_s9 + $0x48c] ss:$16 sps:$4 sm:$0xff]  }
 0x8c3   :  { %9227 = vmatmul.mubr.bf16.vlgmr.msra.gmra.mrb[136].mxu1 %v16932_v63 }
 0x8c4   :  { %9238 = vmatpush1.bf16.msra.mxu1 %v12451_v17  ;;  %9269 = vmatprep.mubr.bf16.mxu1 %v12688_v57  ;;  %v12601_v17 = vld [vmem:[%s17736_s11 + $0xa0] ss:$8 sps:$4 sm:$0xff]  }
 0x8c5   :  { %9239 = vmatprep.subr.bf16.mxu1 %v12456_v34  ;;  %v12606_v34 = vld [vmem:[%s17736_s11 + $0xb4] ss:$8 sps:$4 sm:$0xff]  }
 0x8c8   :  { %9240 = vmatpush1.bf16.msra.mxu1 %v12454_v52  ;;  %v12511_v52 = vld [vmem:[%s17732_s9 + $0x488] ss:$16 sps:$4 sm:$0xff]  }
 0x8c9   :  { %9241 = vmatprep.subr.bf16.mxu1 %v12459_v12  ;;  %v12516_v12 = vld [vmem:[%s17732_s9 + $0x4ac] ss:$16 sps:$4 sm:$0xff]  }
 0x8cc   :  { %9242 = vmatpush1.bf16.msra.mxu1 %v12457_v14  ;;  %v12604_v14 = vld [vmem:[%s17736_s11 + $0xb0] ss:$8 sps:$4 sm:$0xff]  }
 0x8cd   :  { %9243 = vmatprep.subr.bf16.mxu1 %v12462_v58  ;;  %v12609_v58 = vld [vmem:[%s17736_s11 + $0xc4] ss:$8 sps:$4 sm:$0xff]  }
 0x8d0   :  { %9244 = vmatpush1.bf16.msra.mxu1 %v12460_v29  ;;  %v12514_v29 = vld [vmem:[%s17732_s9 + $0x4a8] ss:$16 sps:$4 sm:$0xff]  }
 0x8d1   :  { %9245 = vmatprep.subr.bf16.mxu1 %v12465_v22  ;;  %v12519_v22 = vld [vmem:[%s17732_s9 + $0x4cc] ss:$16 sps:$4 sm:$0xff]  }
 0x8d4   :  { %9246 = vmatpush1.bf16.msra.mxu1 %v12463_v53  ;;  %v12607_v53 = vld [vmem:[%s17736_s11 + $0xc0] ss:$8 sps:$4 sm:$0xff]  }
 0x8d5   :  { %9247 = vmatprep.subr.bf16.mxu1 %v12468_v16  ;;  %v12612_v16 = vld [vmem:[%s17736_s11 + $0xd4] ss:$8 sps:$4 sm:$0xff]  }
 0x8d8   :  { %9248 = vmatpush1.bf16.msra.mxu1 %v12466_v10  ;;  %v12517_v10 = vld [vmem:[%s17732_s9 + $0x4c8] ss:$16 sps:$4 sm:$0xff]  }
 0x8d9   :  { %9249 = vmatprep.subr.bf16.mxu1 %v12471_v32  ;;  %v12522_v32 = vld [vmem:[%s17732_s9 + $0x4ec] ss:$16 sps:$4 sm:$0xff]  }
 0x8dc   :  { %9250 = vmatpush1.bf16.msra.mxu1 %v12469_v48  ;;  %v12610_v48 = vld [vmem:[%s17736_s11 + $0xd0] ss:$8 sps:$4 sm:$0xff]  }
 0x8dd   :  { %9251 = vmatprep.subr.bf16.mxu1 %v12474_v35  ;;  %v12615_v35 = vld [vmem:[%s17736_s11 + $0xe4] ss:$8 sps:$4 sm:$0xff]  }
 0x8e0   :  { %9252 = vmatpush1.bf16.msra.mxu1 %v12472_v54  ;;  %v12520_v54 = vld [vmem:[%s17732_s9 + $0x4e8] ss:$16 sps:$4 sm:$0xff]  }
 0x8e1   :  { %9485 = vmatprep.subr.bf16.mxu1 %v12477_v18  ;;  %v12525_v18 = vld [vmem:[%s17732_s9 + $0x504] ss:$16 sps:$4 sm:$0xff]  }
 0x8e3   :  { %9270 = vmatmul.mubr.bf16.vlgmr.msra.gmra.mrb[140].mxu1 %v16932_v63  ;;  %v12573_v63 = vld [vmem:[%s17736_s11 + $0x4] ss:$8 sps:$4 sm:$0xff]  }
 0x8e4   :  { %9486 = vmatpush1.bf16.msra.mxu1 %v12475_v50  ;;  %9517 = vmatprep.mubr.bf16.mxu1 %v12688_v57  ;;  %v12613_v50 = vld [vmem:[%s17736_s11 + $0xe0] ss:$8 sps:$4 sm:$0xff]  }
 0x8e5   :  { %9487 = vmatprep.subr.bf16.mxu1 %v12480_v59  ;;  %10324 = vmatprep.subr.bf16.mxu0 %v12573_v63  ;;  %v12523_v59 = vld [vmem:[%s17732_s9 + $0x500] ss:$16 sps:$4 sm:$0xff]  }
 0x8e6   :  { %10325 = vmatpush1.bf16.msra.mxu0 %v12571_v2  ;;  %v12531_v2 = vld [vmem:[%s17732_s9 + $0x544] ss:$16 sps:$4 sm:$0xff]   ;;  %v12529_v63 = vld [vmem:[%s17732_s9 + $0x540] ss:$16 sps:$4 sm:$0xff]  }
 0x8e7   :  { %10326 = vmatprep.subr.bf16.mxu0 %v12576_v55  ;;  %v12532_v55 = vld [vmem:[%s17732_s9 + $0x560] ss:$16 sps:$4 sm:$0xff]  }
 0x8e8   :  { %9488 = vmatpush1.bf16.msra.mxu1 %v12478_v62  ;;  %v12528_v62 = vld [vmem:[%s17732_s9 + $0x524] ss:$16 sps:$4 sm:$0xff]  }
 0x8e9   :  { %9489 = vmatprep.subr.bf16.mxu1 %v12483_v36  ;;  %v12526_v36 = vld [vmem:[%s17732_s9 + $0x520] ss:$16 sps:$4 sm:$0xff]  }
 0x8ea   :  { %10327 = vmatpush1.bf16.msra.mxu0 %v12574_v49  ;;  %v12540_v49 = vld [vmem:[%s17732_s9 + $0x5a4] ss:$16 sps:$4 sm:$0xff]  }
 0x8eb   :  { %10328 = vmatprep.subr.bf16.mxu0 %v12579_v5  ;;  %v12538_v5 = vld [vmem:[%s17732_s9 + $0x5a0] ss:$16 sps:$4 sm:$0xff]  }
 0x8ec   :  { %9490 = vmatpush1.bf16.msra.mxu1 %v12481_v1  ;;  %v12537_v1 = vld [vmem:[%s17732_s9 + $0x584] ss:$16 sps:$4 sm:$0xff]  }
 0x8ed   :  { %9491 = vmatprep.subr.bf16.mxu1 %v12486_v60  ;;  %v12535_v60 = vld [vmem:[%s17732_s9 + $0x580] ss:$16 sps:$4 sm:$0xff]  }
 0x8ee   :  { %10329 = vmatpush1.bf16.msra.mxu0 %v12577_v24  ;;  %v12546_v24 = vld [vmem:[%s17732_s9 + $0x5e4] ss:$16 sps:$4 sm:$0xff]  }
 0x8ef   :  { %10330 = vmatprep.subr.bf16.mxu0 %v12582_v28  ;;  %v12544_v28 = vld [vmem:[%s17732_s9 + $0x5e0] ss:$16 sps:$4 sm:$0xff]  }
 0x8f0   :  { %9492 = vmatpush1.bf16.msra.mxu1 %v12484_v27  ;;  %v12543_v27 = vld [vmem:[%s17732_s9 + $0x5c4] ss:$16 sps:$4 sm:$0xff]  }
 0x8f1   :  { %9493 = vmatprep.subr.bf16.mxu1 %v12489_v23  ;;  %v12541_v23 = vld [vmem:[%s17732_s9 + $0x5c0] ss:$16 sps:$4 sm:$0xff]  }
 0x8f2   :  { %10331 = vmatpush1.bf16.msra.mxu0 %v12580_v3  ;;  %v12552_v3 = vld [vmem:[%s17732_s9 + $0x52c] ss:$16 sps:$4 sm:$0xff]  }
 0x8f3   :  { %10332 = vmatprep.subr.bf16.mxu0 %v12585_v56  ;;  %v12550_v56 = vld [vmem:[%s17732_s9 + $0x528] ss:$16 sps:$4 sm:$0xff]  }
 0x8f4   :  { %9494 = vmatpush1.bf16.msra.mxu1 %v12487_v43  ;;  %v12549_v43 = vld [vmem:[%s17732_s9 + $0x50c] ss:$16 sps:$4 sm:$0xff]  }
 0x8f5   :  { %9495 = vmatprep.subr.bf16.mxu1 %v12492_v19  ;;  %v12547_v19 = vld [vmem:[%s17732_s9 + $0x508] ss:$16 sps:$4 sm:$0xff]  }
 0x8f6   :  { %10333 = vmatpush1.bf16.msra.mxu0 %v12583_v7  ;;  %v12558_v7 = vld [vmem:[%s17732_s9 + $0x56c] ss:$16 sps:$4 sm:$0xff]  }
 0x8f7   :  { %10334 = vmatprep.subr.bf16.mxu0 %v12588_v42  ;;  %v12561_v42 = vld [vmem:[%s17732_s9 + $0x58c] ss:$16 sps:$4 sm:$0xff]  }
 0x8f8   :  { %9496 = vmatpush1.bf16.msra.mxu1 %v12490_v20  ;;  %v12555_v20 = vld [vmem:[%s17732_s9 + $0x54c] ss:$16 sps:$4 sm:$0xff]  }
 0x8f9   :  { %9497 = vmatprep.subr.bf16.mxu1 %v12495_v45  ;;  %v12553_v45 = vld [vmem:[%s17732_s9 + $0x548] ss:$16 sps:$4 sm:$0xff]  }
 0x8fa   :  { %10335 = vmatpush1.bf16.msra.mxu0 %v12586_v61  ;;  %v12562_v61 = vld [vmem:[%s17732_s9 + $0x5a8] ss:$16 sps:$4 sm:$0xff]  }
 0x8fb   :  { %10336 = vmatprep.subr.bf16.mxu0 %v12591_v30  ;;  %v12567_v30 = vld [vmem:[%s17732_s9 + $0x5cc] ss:$16 sps:$4 sm:$0xff]  }
 0x8fc   :  { %9498 = vmatpush1.bf16.msra.mxu1 %v12493_v51  ;;  %v12559_v51 = vld [vmem:[%s17732_s9 + $0x588] ss:$16 sps:$4 sm:$0xff]  }
 0x8fd   :  { %9499 = vmatprep.subr.bf16.mxu1 %v12498_v31  ;;  %v12564_v31 = vld [vmem:[%s17732_s9 + $0x5ac] ss:$16 sps:$4 sm:$0xff]  }
 0x8fe   :  { %10337 = vmatpush1.bf16.msra.mxu0 %v12589_v0  ;;  %v12570_v0 = vld [vmem:[%s17732_s9 + $0x5ec] ss:$16 sps:$4 sm:$0xff]  }
 0x8ff   :  { %10338 = vmatprep.subr.bf16.mxu0 %v12594_v47  ;;  %v12618_v47 = vld [vmem:[%s17736_s11 + $0xf4] ss:$8 sps:$4 sm:$0xff]  }
 0x900   :  { %9500 = vmatpush1.bf16.msra.mxu1 %v12496_v4  ;;  %v12565_v4 = vld [vmem:[%s17732_s9 + $0x5c8] ss:$16 sps:$4 sm:$0xff]  }
 0x901   :  { %9528 = vmatprep.subr.bf16.mxu1 %v12501_v40  ;;  %v12568_v40 = vld [vmem:[%s17732_s9 + $0x5e8] ss:$16 sps:$4 sm:$0xff]  }
 0x902   :  { %10339 = vmatpush1.bf16.msra.mxu0 %v12592_v41  ;;  %v9870_v41 = vld [vmem:[%s17738_s10] sm:$0xf] }
 0x903   :  { %9518 = vmatmul.mubr.bf16.vlgmr.msra.gmra.mrb[136].mxu1 %v16978_v15  ;;  %10340 = vmatprep.subr.bf16.mxu0 %v12597_v46 }
 0x904   :  { %9529 = vmatpush1.bf16.msra.mxu1 %v12499_v25  ;;  %9560 = vmatprep.mubr.bf16.mxu1 %v12688_v57  ;;  %v12616_v25 = vld [vmem:[%s17736_s11 + $0xf0] ss:$8 sps:$4 sm:$0xff]  }
 0x905   :  { %9530 = vmatprep.subr.bf16.mxu1 %v12504_v11  ;;  %v12621_v11 = vld [vmem:[%s17736_s11 + $0x104] ss:$8 sps:$4 sm:$0xff]  }
 0x906   :  { %10341 = vmatpush1.bf16.msra.mxu0 %v12595_v13 }
 0x907   :  { %10342 = vmatprep.subr.bf16.mxu0 %v12600_v33 }
 0x908   :  { %9531 = vmatpush1.bf16.msra.mxu1 %v12502_v6  ;;  %v18168_v6 = vld [vmem:[#allocation6_spill] sm:$0xff] }
 0x909   :  { %9532 = vmatprep.subr.bf16.mxu1 %v12507_v44  ;;  %v9879_v44 = vrot.slane %v9870_v41, %v18168_v6 }
 0x90a   :  { %10343 = vmatpush1.bf16.msra.mxu0 %v12598_v8 }
 0x90b   :  { %10344 = vmatprep.subr.bf16.mxu0 %v12603_v21 }
 0x90c   :  { %9533 = vmatpush1.bf16.msra.mxu1 %v12505_v26 }
 0x90d   :  { %9534 = vmatprep.subr.bf16.mxu1 %v12510_v39 }
 0x90e   :  { %10345 = vmatpush1.bf16.msra.mxu0 %v12601_v17 }
 0x90f   :  { %10346 = vmatprep.subr.bf16.mxu0 %v12606_v34 }
 0x910   :  { %9535 = vmatpush1.bf16.msra.mxu1 %v12508_v38 }
 0x911   :  { %9536 = vmatprep.subr.bf16.mxu1 %v12513_v9 }
 0x912   :  { %10347 = vmatpush1.bf16.msra.mxu0 %v12604_v14 }
 0x913   :  { %10348 = vmatprep.subr.bf16.mxu0 %v12609_v58 }
 0x914   :  { %9537 = vmatpush1.bf16.msra.mxu1 %v12511_v52 }
 0x915   :  { %9538 = vmatprep.subr.bf16.mxu1 %v12516_v12 }
 0x916   :  { %10349 = vmatpush1.bf16.msra.mxu0 %v12607_v53 }
 0x917   :  { %10350 = vmatprep.subr.bf16.mxu0 %v12612_v16 }
 0x918   :  { %9539 = vmatpush1.bf16.msra.mxu1 %v12514_v29 }
 0x919   :  { %9540 = vmatprep.subr.bf16.mxu1 %v12519_v22 }
 0x91a   :  { %10351 = vmatpush1.bf16.msra.mxu0 %v12610_v48  ;;  %v12622_v48 = vld [vmem:[%s17736_s11 + $0x110] ss:$8 sps:$4 sm:$0xff]  }
 0x91b   :  { %10352 = vmatprep.subr.bf16.mxu0 %v12615_v35  ;;  %v12627_v35 = vld [vmem:[%s17736_s11 + $0x124] ss:$8 sps:$4 sm:$0xff]  }
 0x91c   :  { %9541 = vmatpush1.bf16.msra.mxu1 %v12517_v10  ;;  %v12619_v10 = vld [vmem:[%s17736_s11 + $0x100] ss:$8 sps:$4 sm:$0xff]  }
 0x91d   :  { %9542 = vmatprep.subr.bf16.mxu1 %v12522_v32  ;;  %v12624_v32 = vld [vmem:[%s17736_s11 + $0x114] ss:$8 sps:$4 sm:$0xff]  }
 0x91e   :  { %10353 = vmatpush1.bf16.msra.mxu0 %v12613_v50  ;;  %v12628_v50 = vld [vmem:[%s17736_s11 + $0x130] ss:$8 sps:$4 sm:$0xff]  }
 0x91f   :  { %10354 = vmatprep.subr.bf16.mxu0 %v12618_v47  ;;  %v12643_v47 = vld [vmem:[%s17736_s11 + $0x180] ss:$8 sps:$4 sm:$0xff]  }
 0x920   :  { %9543 = vmatpush1.bf16.msra.mxu1 %v12520_v54  ;;  %v12625_v54 = vld [vmem:[%s17736_s11 + $0x120] ss:$8 sps:$4 sm:$0xff]  }
 0x921   :  { %9776 = vmatprep.subr.bf16.mxu1 %v12525_v18  ;;  %v12630_v18 = vld [vmem:[%s17736_s11 + $0x134] ss:$8 sps:$4 sm:$0xff]  }
 0x922   :  { %10355 = vmatpush1.bf16.msra.mxu0 %v12616_v25 }
 0x923   :  { %9561 = vmatmul.mubr.bf16.vlgmr.msra.gmra.mrb[140].mxu1 %v16978_v15  ;;  %v12534_v15 = vld [vmem:[%s17732_s9 + $0x564] ss:$16 sps:$4 sm:$0xff]   ;;  %10367 = vmatprep.subr.bf16.mxu0 %v12621_v11 }
 0x924   :  { %9777 = vmatpush1.bf16.msra.mxu1 %v12523_v59  ;;  %9808 = vmatprep.mubr.bf16.mxu1 %v12688_v57  ;;  %v12633_v59 = vld [vmem:[%s17736_s11 + $0x144] ss:$8 sps:$4 sm:$0xff]   ;;  %v12648_v11 = vld [vmem:[%s17736_s11 + $0x194] ss:$8 sps:$4 sm:$0xff]  }
 0x925   :  { %9778 = vmatprep.subr.bf16.mxu1 %v12528_v62  ;;  %v12631_v62 = vld [vmem:[%s17736_s11 + $0x140] ss:$8 sps:$4 sm:$0xff]  }
 0x928   :  { %9779 = vmatpush1.bf16.msra.mxu1 %v12526_v36  ;;  %v18169_v36 = vld [vmem:[#allocation4_spill] sm:$0xff] }
 0x929   :  { %9780 = vmatprep.subr.bf16.mxu1 %v12531_v2  ;;  %v9882_v2 = vsub.s32 2, %v18169_v36 }
 0x92c   :  { %9781 = vmatpush1.bf16.msra.mxu1 %v12529_v63  ;;  %v12636_v63 = vld [vmem:[%s17736_s11 + $0x154] ss:$8 sps:$4 sm:$0xff]  }
 0x92d   :  { %9782 = vmatprep.subr.bf16.mxu1 %v12534_v15  ;;  %v9886_v15 = vsub.s32 3, %v18169_v36 }
 0x930   :  { %9783 = vmatpush1.bf16.msra.mxu1 %v12532_v55  ;;  %v12634_v55 = vld [vmem:[%s17736_s11 + $0x150] ss:$8 sps:$4 sm:$0xff]  }
 0x931   :  { %9784 = vmatprep.subr.bf16.mxu1 %v12537_v1  ;;  %v9883_v1 = vrot.slane %v9870_v41, %v9882_v2 }
 0x934   :  { %9785 = vmatpush1.bf16.msra.mxu1 %v12535_v60  ;;  %v9887_v60 = vrot.slane %v9870_v41, %v9886_v15 }
 0x935   :  { %9786 = vmatprep.subr.bf16.mxu1 %v12540_v49  ;;  %v12639_v49 = vld [vmem:[%s17736_s11 + $0x164] ss:$8 sps:$4 sm:$0xff]  }
 0x938   :  { %9787 = vmatpush1.bf16.msra.mxu1 %v12538_v5 }
 0x939   :  { %9788 = vmatprep.subr.bf16.mxu1 %v12543_v27 }
 0x93c   :  { %9789 = vmatpush1.bf16.msra.mxu1 %v12541_v23 }
 0x93d   :  { %9790 = vmatprep.subr.bf16.mxu1 %v12546_v24  ;;  %v12637_v24 = vld [vmem:[%s17736_s11 + $0x160] ss:$8 sps:$4 sm:$0xff]  }
 0x940   :  { %9791 = vmatpush1.bf16.msra.mxu1 %v12544_v28 }
 0x941   :  { %9819 = vmatprep.subr.bf16.mxu1 %v12549_v43 }
 0x943   :  { %9809 = vmatmul.mubr.bf16.vlgmr.msra.gmra.mrb[136].mxu1 %v17015_v37 }
 0x944   :  { %9820 = vmatpush1.bf16.msra.mxu1 %v12547_v19  ;;  %9851 = vmatprep.mubr.bf16.mxu1 %v12688_v57  ;;  %v12556_v57 = vld [vmem:[%s17732_s9 + $0x568] ss:$16 sps:$4 sm:$0xff]   ;;  %v12642_v19 = vld [vmem:[%s17736_s11 + $0x174] ss:$8 sps:$4 sm:$0xff]  }
 0x945   :  { %9821 = vmatprep.subr.bf16.mxu1 %v12552_v3 }
 0x948   :  { %9822 = vmatpush1.bf16.msra.mxu1 %v12550_v56 }
 0x949   :  { %9823 = vmatprep.subr.bf16.mxu1 %v12555_v20 }
 0x94c   :  { %9824 = vmatpush1.bf16.msra.mxu1 %v12553_v45 }
 0x94d   :  { %9825 = vmatprep.subr.bf16.mxu1 %v12558_v7 }
 0x950   :  { %9826 = vmatpush1.bf16.msra.mxu1 %v12556_v57 }
 0x951   :  { %9827 = vmatprep.subr.bf16.mxu1 %v12561_v42  ;;  %v12640_v42 = vld [vmem:[%s17736_s11 + $0x170] ss:$8 sps:$4 sm:$0xff]  }
 0x954   :  { %9828 = vmatpush1.bf16.msra.mxu1 %v12559_v51 }
 0x955   :  { %9829 = vmatprep.subr.bf16.mxu1 %v12564_v31  ;;  %v12645_v31 = vld [vmem:[%s17736_s11 + $0x184] ss:$8 sps:$4 sm:$0xff]  }
 0x958   :  { %9830 = vmatpush1.bf16.msra.mxu1 %v12562_v61 }
 0x959   :  { %9831 = vmatprep.subr.bf16.mxu1 %v12567_v30 }
 0x95c   :  { %9832 = vmatpush1.bf16.msra.mxu1 %v12565_v4 }
 0x95d   :  { %9833 = vmatprep.subr.bf16.mxu1 %v12570_v0 }
 0x960   :  { %9834 = vmatpush1.bf16.msra.mxu1 %v12568_v40 }
 0x963   :  { %9852 = vmatmul.mubr.bf16.vlgmr.msra.gmra.mrb[140].mxu1 %v17015_v37  ;;  %v18167_v37 = vld [vmem:[#allocation5_spill] sm:$0xff] }
 0x964   :  { %v9875_v46 = vrot.slane %v9870_v41, %v18167_v37  ;;  %v12646_v41 = vld [vmem:[%s17736_s11 + $0x190] ss:$8 sps:$4 sm:$0xff]  }
 0xa16   :  { %v9810_v13 = vpop.f32.mrb[136].mxu1 }
 0xa17   :  { %v9892_v33 = vadd.f32 %v9875_v46, %v9810_v13  ;;  %v9812_v26 = vpop.f32.mrb[137].mxu1  ;;  %v12654_v13 = vld [vmem:[%s17736_s11 + $0x1b4] ss:$8 sps:$4 sm:$0xff]  }
 0xa18   :  { %v9893_v39 = vadd.f32 %v9879_v44, %v9812_v26  ;;  %v9814_v8 = vpop.f32.mrb[138].mxu1  ;;  %v12657_v26 = vld [vmem:[%s17736_s11 + $0x1c4] ss:$8 sps:$4 sm:$0xff]  }
 0xa19   :  { %v9908_v21 = vmul.f32 0.01, %v9892_v33  ;;  %v9896_v38 = vadd.f32 %v9875_v46, %v9814_v8  ;;  %v9816_v9 = vpop.f32.mrb[139].mxu1  ;;  %vm9900_vm5 = vcmp.ge.f32.partialorder %v9892_v33, 0.0  ;;  %v12651_v46 = vld [vmem:[%s17736_s11 + $0x1a4] ss:$8 sps:$4 sm:$0xff]  }
 0xa1a   :  { %v9909_v17 = vmul.f32 0.01, %v9893_v39  ;;  %v9897_v34 = vadd.f32 %v9879_v44, %v9816_v9  ;;  %vm9901_vm6 = vcmp.ge.f32.partialorder %v9893_v39, 0.0  ;;  %v12649_v44 = vld [vmem:[%s17736_s11 + $0x1a0] ss:$8 sps:$4 sm:$0xff]  }
 0xa1b   :  { %vm9904_vm7 = vcmp.ge.f32.partialorder %v9896_v38, 0.0  ;;  %v9912_v52 = vmul.f32 0.01, %v9896_v38  ;;  %v9916_v14 = vsel %vm9900_vm5, %v9892_v33, %v9908_v21  ;;  %v12652_v33 = vld [vmem:[%s17736_s11 + $0x1b0] ss:$8 sps:$4 sm:$0xff]  }
 0xa1c   :  { %vm9905_vm8 = vcmp.ge.f32.partialorder %v9897_v34, 0.0  ;;  %v9913_v12 = vmul.f32 0.01, %v9897_v34  ;;  %v9917_v22 = vsel %vm9901_vm6, %v9893_v39, %v9909_v17  ;;  %v12655_v39 = vld [vmem:[%s17736_s11 + $0x1c0] ss:$8 sps:$4 sm:$0xff]  }
 0xa1d   :  { %v9920_v58 = vsel %vm9904_vm7, %v9896_v38, %v9912_v52  ;;  %v12660_v8 = vld [vmem:[%s17736_s11 + $0x1d4] ss:$8 sps:$4 sm:$0xff]   ;;  %v12658_v21 = vld [vmem:[%s17736_s11 + $0x1d0] ss:$8 sps:$4 sm:$0xff]   ;;  %v12663_v38 = vld [vmem:[%s17736_s11 + $0x1e4] ss:$8 sps:$4 sm:$0xff]  }
 0xa1e   :  { %v9924_v29 = vpack.c.bf16 %v9920_v58, %v9916_v14  ;;  %v9921_v53 = vsel %vm9905_vm8, %v9897_v34, %v9913_v12  ;;  %v12661_v9 = vld [vmem:[%s17736_s11 + $0x1e0] ss:$8 sps:$4 sm:$0xff]   ;;  %v12666_v17 = vld [vmem:[%s17736_s11 + $0x1f4] ss:$8 sps:$4 sm:$0xff]   ;;  %v12664_v34 = vld [vmem:[%s17736_s11 + $0x1f0] ss:$8 sps:$4 sm:$0xff]  }
 0xa1f   :  { %v9925_v16 = vpack.c.bf16 %v9921_v53, %v9917_v22  ;;  %v12667_v52 = vld [vmem:[%s17737_s13 + $0x40] sm:$0xff]   ;;  %v12669_v14 = vld [vmem:[%s17737_s13 + $0x48] sm:$0xff]   ;;  %v12672_v22 = vld [vmem:[%s17737_s13 + $0x10] sm:$0xff]  }
 0xa20   :  { %v12668_v12 = vld [vmem:[%s17737_s13] sm:$0xff]   ;;  %v12670_v58 = vld [vmem:[%s17737_s13 + $0x8] sm:$0xff]   ;;  %v12673_v53 = vld [vmem:[%s17737_s13 + $0x58] sm:$0xff]  }
 0xa21   :  { %10356 = vmatprep.mubr.bf16.mxu0 %v9925_v16  ;;  %v12674_v16 = vld [vmem:[%s17737_s13 + $0x18] sm:$0xff]  }
 0xa22   :  { %10357 = vmatmul.mubr.bf16.vlgmr.msra.gmra.mrb[24].mxu0 %v9924_v29  ;;  %v12671_v29 = vld [vmem:[%s17737_s13 + $0x50] sm:$0xff]  }
 0xa23   :  { %10368 = vmatpush1.bf16.msra.mxu0 %v12619_v10  ;;  %v12675_v10 = vld [vmem:[%s17737_s13 + $0x60] sm:$0xff]  }
 0xa24   :  { %10369 = vmatprep.subr.bf16.mxu0 %v12624_v32  ;;  %v12676_v32 = vld [vmem:[%s17737_s13 + $0x20] sm:$0xff]  }
 0xa27   :  { %10370 = vmatpush1.bf16.msra.mxu0 %v12622_v48  ;;  %v12677_v48 = vld [vmem:[%s17737_s13 + $0x68] sm:$0xff]  }
 0xa28   :  { %10371 = vmatprep.subr.bf16.mxu0 %v12627_v35  ;;  %v12678_v35 = vld [vmem:[%s17737_s13 + $0x28] sm:$0xff]  }
 0xa2b   :  { %10372 = vmatpush1.bf16.msra.mxu0 %v12625_v54  ;;  %v12679_v54 = vld [vmem:[%s17737_s13 + $0x70] sm:$0xff]  }
 0xa2c   :  { %10373 = vmatprep.subr.bf16.mxu0 %v12630_v18  ;;  %v12680_v18 = vld [vmem:[%s17737_s13 + $0x30] sm:$0xff]  }
 0xa2f   :  { %10374 = vmatpush1.bf16.msra.mxu0 %v12628_v50  ;;  %v12681_v50 = vld [vmem:[%s17737_s13 + $0x78] sm:$0xff]  }
 0xa30   :  { %10375 = vmatprep.subr.bf16.mxu0 %v12633_v59  ;;  %v12682_v59 = vld [vmem:[%s17737_s13 + $0x38] sm:$0xff]  }
 0xa33   :  { %10376 = vmatpush1.bf16.msra.mxu0 %v12631_v62  ;;  %v9992_v62 = vld [vmem:[%s17739_s12] sm:$0x3] }
 0xa34   :  { %10377 = vmatprep.subr.bf16.mxu0 %v12636_v63  ;;  %v9997_v36 = vrot.slane %v9992_v62, %v18167_v37  ;;  %v10001_v2 = vrot.slane %v9992_v62, %v18168_v6 }
 0xa36   :  { %v9853_v5 = vpop.f32.mrb[140].mxu1 }
 0xa37   :  { %v9894_v27 = vadd.f32 %v9883_v1, %v9853_v5  ;;  %10378 = vmatpush1.bf16.msra.mxu0 %v12634_v55  ;;  %v9855_v23 = vpop.f32.mrb[141].mxu1 }
 0xa38   :  { %v9895_v28 = vadd.f32 %v9887_v60, %v9855_v23  ;;  %v9857_v43 = vpop.f32.mrb[142].mxu1  ;;  %10379 = vmatprep.subr.bf16.mxu0 %v12639_v49 }
 0xa39   :  { %v9910_v3 = vmul.f32 0.01, %v9894_v27  ;;  %v9898_v56 = vadd.f32 %v9883_v1, %v9857_v43  ;;  %v9859_v20 = vpop.f32.mrb[143].mxu1  ;;  %vm9902_vm9 = vcmp.ge.f32.partialorder %v9894_v27, 0.0 }
 0xa3a   :  { %v9911_v45 = vmul.f32 0.01, %v9895_v28  ;;  %v9899_v7 = vadd.f32 %v9887_v60, %v9859_v20  ;;  %vm9903_vm10 = vcmp.ge.f32.partialorder %v9895_v28, 0.0 }
 0xa3b   :  { %vm9906_vm11 = vcmp.ge.f32.partialorder %v9898_v56, 0.0  ;;  %v9914_v57 = vmul.f32 0.01, %v9898_v56  ;;  %10380 = vmatpush1.bf16.msra.mxu0 %v12637_v24  ;;  %v9918_v61 = vsel %vm9902_vm9, %v9894_v27, %v9910_v3 }
 0xa3c   :  { %vm9907_vm12 = vcmp.ge.f32.partialorder %v9899_v7, 0.0  ;;  %v9915_v51 = vmul.f32 0.01, %v9899_v7  ;;  %10381 = vmatprep.subr.bf16.mxu0 %v12642_v19  ;;  %v9919_v0 = vsel %vm9903_vm10, %v9895_v28, %v9911_v45  ;;  %v22_v45 = vstv %s17740_s15 }
 0xa3d   :  { %v9922_v30 = vsel %vm9906_vm11, %v9898_v56, %v9914_v57  ;;  %23 = vst [vmem:[#allocation2] sm:$0x1] %v22_v45 }
 0xa3e   :  { %v9926_v4 = vpack.c.bf16 %v9922_v30, %v9918_v61  ;;  %v9923_v40 = vsel %vm9907_vm12, %v9899_v7, %v9915_v51  ;;  %v24_v7 = vstv %s17741_s16  ;;  %v11259_v61 = vld [vmem:[%s17742_s14] ss:$0 sm:$0xff] }
 0xa3f   :  { %10382 = vmatpush1.bf16.msra.mxu0 %v12640_v42  ;;  %v9927_v25 = vpack.c.bf16 %v9923_v40, %v9919_v0  ;;  %25 = vst [vmem:[#allocation3] sm:$0x1] %v24_v7 }
 0xa40   :  { %10383 = vmatprep.subr.bf16.mxu0 %v12645_v31 }
 0xa41   :  { %10399 = vmatprep.mubr.bf16.mxu0 %v9927_v25 }
 0xa43   :  { %10384 = vmatpush1.bf16.msra.mxu0 %v12643_v47 }
 0xa44   :  { %10385 = vmatprep.subr.bf16.mxu0 %v12648_v11  ;;  %v11276_v11 = vld [vmem:[#allocation2] ss:$0 sm:$0xff] }
 0xa47   :  { %10386 = vmatpush1.bf16.msra.mxu0 %v12646_v41  ;;  %v11277_v41 = vld [vmem:[#allocation3] ss:$0 sm:$0xff] }
 0xa48   :  { %10387 = vmatprep.subr.bf16.mxu0 %v12651_v46 }
 0xa4b   :  { %10388 = vmatpush1.bf16.msra.mxu0 %v12649_v44 }
 0xa4c   :  { %10389 = vmatprep.subr.bf16.mxu0 %v12654_v13 }
 0xa4f   :  { %10390 = vmatpush1.bf16.msra.mxu0 %v12652_v33 }
 0xa50   :  { %10391 = vmatprep.subr.bf16.mxu0 %v12657_v26 }
 0xa53   :  { %10392 = vmatpush1.bf16.msra.mxu0 %v12655_v39 }
 0xa54   :  { %10393 = vmatprep.subr.bf16.mxu0 %v12660_v8 }
 0xa57   :  { %10394 = vmatpush1.bf16.msra.mxu0 %v12658_v21 }
 0xa58   :  { %10395 = vmatprep.subr.bf16.mxu0 %v12663_v38 }
 0xa5b   :  { %10396 = vmatpush1.bf16.msra.mxu0 %v12661_v9 }
 0xa5c   :  { %10397 = vmatprep.subr.bf16.mxu0 %v12666_v17 }
 0xa5f   :  { %10398 = vmatpush1.bf16.msra.mxu0 %v12664_v34 }
 0xa60   :  { %12079 = vmatprep.subr.bf16.mxu0 %v12667_v52 }
 0xa62   :  { %10400 = vmatmul.mubr.bf16.vlgmr.msra.gmra.mrb[24].mxu0 %v9926_v4 }
 0xa63   :  { %12080 = vmatpush3.bf16.msra.mxu0 %v12668_v12 }
 0xa64   :  { %12081 = vmatprep.subr.bf16.mxu0 %v12669_v14 }
 0xa67   :  { %12082 = vmatpush3.bf16.msra.mxu0 %v12670_v58 }
 0xa68   :  { %12083 = vmatprep.subr.bf16.mxu0 %v12671_v29 }
 0xa6b   :  { %12084 = vmatpush3.bf16.msra.mxu0 %v12672_v22 }
 0xa6c   :  { %12085 = vmatprep.subr.bf16.mxu0 %v12673_v53 }
 0xa6f   :  { %12086 = vmatpush3.bf16.msra.mxu0 %v12674_v16 }
 0xa70   :  { %12087 = vmatprep.subr.bf16.mxu0 %v12675_v10 }
 0xa73   :  { %12088 = vmatpush3.bf16.msra.mxu0 %v12676_v32 }
 0xa74   :  { %12089 = vmatprep.subr.bf16.mxu0 %v12677_v48 }
 0xa77   :  { %12090 = vmatpush3.bf16.msra.mxu0 %v12678_v35 }
 0xa78   :  { %12091 = vmatprep.subr.bf16.mxu0 %v12679_v54 }
 0xa7b   :  { %12092 = vmatpush3.bf16.msra.mxu0 %v12680_v18 }
 0xa7c   :  { %12093 = vmatprep.subr.bf16.mxu0 %v12681_v50 }
 0xa7f   :  { %12094 = vmatpush3.bf16.msra.mxu0 %v12682_v59 }
 0xb35   :  { %v10401_v63 = vpop.f32.mrb[24].mxu0 }
 0xb36   :  { %v12105_v15 = vadd.f32 %v10401_v63, %v9997_v36  ;;  %v10403_v55 = vpop.f32.mrb[25].mxu0 }
 0xb37   :  { %v12106_v1 = vadd.f32 %v10403_v55, %v10001_v2  ;;  %v10405_v60 = vpop.f32.mrb[26].mxu0 }
 0xb38   :  { %v10414_v49 = vmul.f32 0.01, %v12105_v15  ;;  %v12107_v5 = vadd.f32 %v10405_v60, %v9997_v36  ;;  %v10407_v27 = vpop.f32.mrb[27].mxu0  ;;  %vm10410_vm13 = vcmp.ge.f32.partialorder %v12105_v15, 0.0 }
 0xb39   :  { %v10415_v23 = vmul.f32 0.01, %v12106_v1  ;;  %v12108_v24 = vadd.f32 %v10407_v27, %v10001_v2  ;;  %vm10411_vm14 = vcmp.ge.f32.partialorder %v12106_v1, 0.0 }
 0xb3a   :  { %vm10412_vm0 = vcmp.ge.f32.partialorder %v12107_v5, 0.0  ;;  %v10416_v28 = vmul.f32 0.01, %v12107_v5  ;;  %v10418_v19 = vsel %vm10410_vm13, %v12105_v15, %v10414_v49 }
 0xb3b   :  { %vm10413_vm15 = vcmp.ge.f32.partialorder %v12108_v24, 0.0  ;;  %v10417_v43 = vmul.f32 0.01, %v12108_v24  ;;  %v10419_v6 = vsel %vm10411_vm14, %v12106_v1, %v10415_v23 }
 0xb3c   :  { %v10420_v37 = vsel %vm10412_vm0, %v12107_v5, %v10416_v28 }
 0xb3d   :  { %v10422_v3 = vpack.c.bf16 %v10420_v37, %v10418_v19  ;;  %v10421_v56 = vsel %vm10413_vm15, %v12108_v24, %v10417_v43 }
 0xb3e   :  { %v10423_v20 = vpack.c.bf16 %v10421_v56, %v10419_v6 }
 0xb40   :  { %10591 = vmatprep.mubr.bf16.mxu0 %v10423_v20 }
 0xb41   :  { %10592 = vmatmul.mubr.bf16.vlgmr.msra.gmra.mrb[28].mxu0 %v10422_v3 }
 0xc14   :  { %v12095_v57 = vpop.f32.mrb[28].mxu0 }
 0xc15   :  { %v12096_v42 = vpop.f32.mrb[29].mxu0 }
 0xc16   :  { %v12097_v51 = vadd.f32 %v12096_v42, %v12095_v57  ;;  %v12098_v31 = vpop.f32.mrb[30].mxu0 }
 0xc17   :  { %v12099_v30 = vpop.f32.mrb[31].mxu0 }
 0xc18   :  { %v12100_v4 = vadd.f32 %v12099_v30, %v12098_v31  ;;  %v10594_v0 = vadd.f32 %v12097_v51, %v11259_v61 }
 0xc1a   :  { %v10597_v40 = vadd.f32 %v12100_v4, %v11259_v61 }
 0xc1c   :  { %v10600_v47 = vsub.f32 %v10594_v0, %v10597_v40 }
 0xc1e   :  { %v10601_v25 = vand.u32 2147483647, %v10600_v47 }
 0xc20   :  { %10602 = vadd.xlane.f32.xlu1 %v10601_v25 }
 0xcad   :  { %v10603_v46 = vpop.xlane.xlu1 %10602 }
 0xcae   :  { %v10611_v44 = vmul.f32 %v11276_v11, %v10603_v46 }
 0xcb0   :  { %v10619_v13 = vadd.f32 %v11277_v41, %v10611_v44 }
 0xcb2   :  { %v11278_v33 = vmul.f32 -1.442695, %v10619_v13 }
 0xcb4   :  { %12683 = vpow2.f32 %v11278_v33 }
 0xcbe   :  { %v12684_v26 = vpop.eup %12683 }
 0xcbf   :  { %v10623_v39 = vadd.f32 1.0, %v12684_v26 }
 0xcc1   :  { %12685 = vrcp.f32 %v10623_v39 }
 0xccb   :  { %v12686_v8 = vpop.eup %12685 }
 0xccc   :  { %10627 = vst.msk [vmem:[%s17743_s17] sm:$0xff] %vm10626_vm1, %v12686_v8 }

</bundles_post_ra>
